<compile_context>
chip_gen: v7x
topology: tpu7x:2x2x1
jax: 0.10.0
libtpu: 0.0.40
codegen_flags: <defaults>
</compile_context>

<pallas_src>
import math

import numpy as np
import jax
import jax.numpy as jnp
from jax.experimental import pallas as pl
from jax.experimental.pallas import tpu as pltpu

NUM_CLASSES = 6
NEG_SLOPE = 0.2

# spatial geometry (16x16 images; stride-1 / pad-1 convs preserve H, W)
H = W = 16
HPAD = WPAD = 18             # conv zero-padding
NPIX = HPAD * WPAD           # 324 flattened padded pixels
LANES = 384                  # per-image lane pitch (NPIX padded to 3*128)
BBLK = 8                     # images per grid step, concatenated along lanes
NL = BBLK * LANES            # 3072 activation lanes per grid step
HALO = 128                   # zero halo on each side of the wide act scratch
WIDE = HALO + NL + HALO

# channel counts padded to multiples of 16 (bf16 sublane granule)
C0 = 16                      # conv0 out: 10 -> 16
C1 = 32                      # conv1 out: 20 -> 32
C2 = 48                      # conv2 out: 40 -> 48
K0 = 16                      # conv0 dense im2col K (9 real taps padded to 16)
ACT_ROWS = C1                # wide act scratch rows (conv2 reads 32)
PATCH_ROWS = 9 * C1          # 288 im2col rows (conv2)

# tap offsets in flattened padded coordinates: output pixel p reads p + off
OFFSETS = tuple((dy - 1) * WPAD + (dx - 1) for dy in range(3) for dx in range(3))

# packed linear-head array layout (row starts are multiples of 8; col 48 = bias)
HW_ROWS, HW_COLS = 128, 56
_R1, _R2, _R3, _R4, _R5 = 0, 40, 72, 96, 112
_BCOL = 48


def _leaky(v):
    return jnp.where(v >= 0, v, NEG_SLOPE * v)


def _im2col(act_ref, patch_ref, cin):
    """Copy the 9 shifted (cin, NL) bf16 windows out of the zero-haloed scratch."""
    for t, off in enumerate(OFFSETS):
        start = HALO + off
        patch_ref[t * cin:(t + 1) * cin, :] = act_ref[0:cin, start:start + NL]


def mnist_kernel(x_ref, g_ref, w0_ref, w1_ref, w2_ref, cb_ref,
                 mask_ref, pool_ref, hw_ref, out_ref, patch_ref, act_ref):
    mask = mask_ref[...]                                  # (1, NL) f32

    # Zero only the two 128-lane halos (4 aligned vector stores).  Done every
    # step because scratch is per-TensorCore under "parallel" grid sharding.
    act_ref[:, 0:HALO] = jnp.zeros((ACT_ROWS, HALO), jnp.bfloat16)
    act_ref[:, HALO + NL:WIDE] = jnp.zeros((ACT_ROWS, HALO), jnp.bfloat16)

    # conv0 (Cin=1): im2col rows were built by the wrapper -> one dense K=16
    # matmul on the MXU (9 real taps), no 144-row zero-padded patch.
    y0 = jnp.dot(w0_ref[...], x_ref[0], preferred_element_type=jnp.float32)
    a0 = _leaky(y0 + cb_ref[0:C0, 0:1]) * mask            # (C0, NL) f32
    act_ref[0:C0, HALO:HALO + NL] = a0.astype(jnp.bfloat16)

    # conv1: 9 bf16 window copies + one (C1, 144) @ (144, NL) matmul
    _im2col(act_ref, patch_ref, C0)
    y1 = jnp.dot(w1_ref[...], patch_ref[0:9 * C0, :],
                 preferred_element_type=jnp.float32)
    a1 = _leaky(y1 + cb_ref[0:C1, 1:2]) * mask            # (C1, NL) f32
    act_ref[0:C1, HALO:HALO + NL] = a1.astype(jnp.bfloat16)

    # conv2: (C2, 288) @ (288, NL); no mask multiply needed -- the pooling
    # matrix below already zeroes non-interior lanes.
    _im2col(act_ref, patch_ref, C1)
    y2 = jnp.dot(w2_ref[...], patch_ref[0:9 * C1, :],
                 preferred_element_type=jnp.float32)
    a2 = _leaky(y2 + cb_ref[0:C2, 2:3])                   # (C2, NL) f32

    # AdaptiveAvgPool2d((1,1)) for all BBLK images at once: one masked matmul
    # against the per-image 0 / (1/256) pooling matrix.
    pooled = jnp.dot(a2, pool_ref[...],
                     preferred_element_type=jnp.float32)  # (C2, BBLK), rows 40.. == 0

    # linear head in column-vector form, N = BBLK images.  All weights/biases
    # come from one packed resident array (static slices are free).  The 2-wide
    # goal part of linear1 runs as two VPU broadcast mul-adds (no K=2 MXU push).
    gv = g_ref[0]                                         # (2, BBLK)
    hw = hw_ref
    h = jnp.dot(hw[_R1:_R1 + 40, 0:C2], pooled, preferred_element_type=jnp.float32)
    h = h + hw[_R1:_R1 + 40, 40:41] * gv[0:1, :] + hw[_R1:_R1 + 40, 41:42] * gv[1:2, :]
    h = _leaky(h + hw[_R1:_R1 + 40, _BCOL:_BCOL + 1])
    h = _leaky(jnp.dot(hw[_R2:_R2 + 30, 0:40], h, preferred_element_type=jnp.float32)
               + hw[_R2:_R2 + 30, _BCOL:_BCOL + 1])
    h = _leaky(jnp.dot(hw[_R3:_R3 + 20, 0:30], h, preferred_element_type=jnp.float32)
               + hw[_R3:_R3 + 20, _BCOL:_BCOL + 1])
    h = _leaky(jnp.dot(hw[_R4:_R4 + 10, 0:20], h, preferred_element_type=jnp.float32)
               + hw[_R4:_R4 + 10, _BCOL:_BCOL + 1])
    logits = (jnp.dot(hw[_R5:_R5 + NUM_CLASSES, 0:10], h,
                      preferred_element_type=jnp.float32)
              + hw[_R5:_R5 + NUM_CLASSES, _BCOL:_BCOL + 1])
    out_ref[0] = logits                                   # (NUM_CLASSES, BBLK)


def _interior_mask_local():
    idx = np.arange(LANES)
    r, c = idx // WPAD, idx % WPAD
    m = (idx < NPIX) & (r >= 1) & (r <= H) & (c >= 1) & (c <= W)
    return m.astype(np.float32)                           # (LANES,)


def _conv0_im2col(x_nchw, pad_b):
    """Wrapper-side im2col for the single-channel first conv (layout plumbing):
    (B,1,16,16) -> (G, 16, NL) bf16; row t (t<9) is the (dy,dx) tap window,
    rows 9..15 are zero; the BBLK images of a step are concatenated on lanes."""
    x = jnp.pad(x_nchw[:, 0].astype(jnp.float32),
                ((0, pad_b), (2, 2), (2, 2)))             # (Bp, 20, 20)
    rows = []
    for dy in range(3):
        for dx in range(3):
            win = x[:, dy:dy + HPAD, dx:dx + WPAD].reshape(-1, NPIX)
            rows.append(jnp.pad(win, ((0, 0), (0, LANES - NPIX))))
    x9 = jnp.stack(rows, axis=1)                          # (Bp, 9, LANES)
    x16 = jnp.pad(x9, ((0, 0), (0, K0 - 9), (0, 0)))      # (Bp, 16, LANES)
    g = x16.shape[0] // BBLK
    return (x16.reshape(g, BBLK, K0, LANES).transpose(0, 2, 1, 3)
               .reshape(g, K0, NL).astype(jnp.bfloat16))


def mnist_forward(x_nchw, g_nc11, kp):
    """x_nchw: (B,1,16,16) f32, g_nc11: (B,2,1,1) f32 -> (B, NUM_CLASSES) logits."""
    B, cin, h, w = x_nchw.shape
    assert (cin, h, w) == (1, H, W)
    G = -(-B // BBLK)
    Bp = G * BBLK
    pad_b = Bp - B

    x_in = _conv0_im2col(x_nchw, pad_b)                            # (G, 16, NL) bf16
    gfull = jnp.pad(g_nc11.reshape(B, 2).astype(jnp.float32), ((0, pad_b), (0, 0)))
    g_in = gfull.reshape(G, BBLK, 2).transpose(0, 2, 1)            # (G, 2, BBLK)

    local = _interior_mask_local()
    mask = jnp.asarray(np.tile(local, BBLK)[None, :])              # (1, NL)
    pool = jnp.asarray(np.kron(np.eye(BBLK, dtype=np.float32),
                               local[:, None]) / float(H * W))     # (NL, BBLK)

    args = (x_in, g_in, kp["w0"], kp["w1"], kp["w2"], kp["cb"], mask, pool, kp["head"])

    def resident(a):
        nd = a.ndim
        return pl.BlockSpec(a.shape, lambda b: (0,) * nd)          # same block every step

    in_specs = [pl.BlockSpec((1, K0, NL), lambda b: (b, 0, 0)),
                pl.BlockSpec((1, 2, BBLK), lambda b: (b, 0, 0))]
    in_specs += [resident(a) for a in args[2:]]

    out = pl.pallas_call(
        mnist_kernel,
        out_shape=jax.ShapeDtypeStruct((G, NUM_CLASSES, BBLK), jnp.float32),
        grid_spec=pltpu.PrefetchScalarGridSpec(
            num_scalar_prefetch=0,
            grid=(G,),
            in_specs=in_specs,
            out_specs=pl.BlockSpec((1, NUM_CLASSES, BBLK), lambda b: (b, 0, 0)),
            scratch_shapes=[
                pltpu.VMEM((PATCH_ROWS, NL), jnp.bfloat16),   # im2col patches (bf16)
                pltpu.VMEM((ACT_ROWS, WIDE), jnp.bfloat16),   # zero-haloed activations
            ],
        ),
        compiler_params=pltpu.CompilerParams(
            dimension_semantics=("parallel",),
        ),
    )(*args)
    return out.transpose(0, 2, 1).reshape(Bp, NUM_CLASSES)[:B]


def init_torch_params(key):
    """Deterministic PyTorch-default-style init in PyTorch-native layouts
    (Conv2d: OIHW weight, (O,) bias; Linear: (out,in) weight, (out,) bias)."""
    def uni(k, shape, fan_in):
        bound = 1.0 / math.sqrt(fan_in)
        return jax.random.uniform(k, shape, jnp.float32, -bound, bound)

    ks = iter(jax.random.split(key, 16))
    p = {}
    p["conv0_w"] = uni(next(ks), (10, 1, 3, 3), 1 * 9)
    p["conv0_b"] = uni(next(ks), (10,), 1 * 9)
    p["conv1_w"] = uni(next(ks), (20, 10, 3, 3), 10 * 9)
    p["conv1_b"] = uni(next(ks), (20,), 10 * 9)
    p["conv2_w"] = uni(next(ks), (40, 20, 3, 3), 20 * 9)
    p["conv2_b"] = uni(next(ks), (40,), 20 * 9)
    p["lin1_w"] = uni(next(ks), (40, 42), 42)
    p["lin1_b"] = uni(next(ks), (40,), 42)
    p["lin2_w"] = uni(next(ks), (30, 40), 40)
    p["lin2_b"] = uni(next(ks), (30,), 40)
    p["lin3_w"] = uni(next(ks), (20, 30), 30)
    p["lin3_b"] = uni(next(ks), (20,), 30)
    p["lin4_w"] = uni(next(ks), (10, 20), 20)
    p["lin4_b"] = uni(next(ks), (10,), 20)
    p["lin5_w"] = uni(next(ks), (NUM_CLASSES, 10), 10)
    p["lin5_b"] = uni(next(ks), (NUM_CLASSES,), 10)
    return p


def pack_params(p):
    """Pack PyTorch-layout weights into the kernel's padded layouts:
    conv weights -> bf16 im2col tiles; conv biases -> one (48,8) array; the
    whole linear head (weights + biases) -> one (128,56) f32 array."""
    def pack_conv(w_oihw, cin_pad, cout_pad):
        cout, cin = w_oihw.shape[:2]
        wk = jnp.zeros((cout_pad, 9 * cin_pad), jnp.float32)
        for dy in range(3):
            for dx in range(3):
                t = dy * 3 + dx                      # must match OFFSETS / wrapper order
                wk = wk.at[:cout, t * cin_pad:t * cin_pad + cin].set(w_oihw[:, :, dy, dx])
        return wk.astype(jnp.bfloat16)

    w0 = jnp.pad(pack_conv(p["conv0_w"], 1, C0), ((0, 0), (0, K0 - 9)))  # (16, 16)
    w1 = pack_conv(p["conv1_w"], C0, C1)                                  # (32, 144)
    w2 = pack_conv(p["conv2_w"], C1, C2)                                  # (48, 288)

    cb = jnp.zeros((C2, 8), jnp.float32)
    cb = cb.at[:10, 0].set(p["conv0_b"])
    cb = cb.at[:20, 1].set(p["conv1_b"])
    cb = cb.at[:40, 2].set(p["conv2_b"])

    hw = jnp.zeros((HW_ROWS, HW_COLS), jnp.float32)
    hw = hw.at[_R1:_R1 + 40, 0:40].set(p["lin1_w"][:, :40])
    hw = hw.at[_R1:_R1 + 40, 40:42].set(p["lin1_w"][:, 40:42])   # goal-feature columns
    hw = hw.at[_R1:_R1 + 40, _BCOL].set(p["lin1_b"])
    hw = hw.at[_R2:_R2 + 30, 0:40].set(p["lin2_w"])
    hw = hw.at[_R2:_R2 + 30, _BCOL].set(p["lin2_b"])
    hw = hw.at[_R3:_R3 + 20, 0:30].set(p["lin3_w"])
    hw = hw.at[_R3:_R3 + 20, _BCOL].set(p["lin3_b"])
    hw = hw.at[_R4:_R4 + 10, 0:20].set(p["lin4_w"])
    hw = hw.at[_R4:_R4 + 10, _BCOL].set(p["lin4_b"])
    hw = hw.at[_R5:_R5 + NUM_CLASSES, 0:10].set(p["lin5_w"])
    hw = hw.at[_R5:_R5 + NUM_CLASSES, _BCOL].set(p["lin5_b"])

    return {"w0": w0, "w1": w1, "w2": w2, "cb": cb, "head": hw}


def reference_forward(x_nchw, g_nc11, p):
    """Pure-JAX/XLA reference of MnistModel.forward (conv weights rounded to
    bf16 like the kernel; activations kept f32, hence the loose tolerance)."""
    leaky = lambda v: jnp.where(v >= 0, v, NEG_SLOPE * v)
    bf = lambda wt: wt.astype(jnp.bfloat16).astype(jnp.float32)

    def conv(inp, wt, b):
        y = jax.lax.conv_general_dilated(
            inp, wt, window_strides=(1, 1), padding=((1, 1), (1, 1)),
            dimension_numbers=("NCHW", "OIHW", "NCHW"),
            precision=jax.lax.Precision.HIGHEST)
        return y + b[None, :, None, None]

    out = leaky(conv(x_nchw, bf(p["conv0_w"]), p["conv0_b"]))
    out = leaky(conv(out, bf(p["conv1_w"]), p["conv1_b"]))
    out = leaky(conv(out, bf(p["conv2_w"]), p["conv2_b"]))
    pooled = out.mean(axis=(2, 3))                               # (B, 40)
    feat = jnp.concatenate([pooled, g_nc11.reshape(-1, 2)], axis=1)
    h = leaky(feat @ p["lin1_w"].T + p["lin1_b"])
    h = leaky(h @ p["lin2_w"].T + p["lin2_b"])
    h = leaky(h @ p["lin3_w"].T + p["lin3_b"])
    h = leaky(h @ p["lin4_w"].T + p["lin4_b"])
    return h @ p["lin5_w"].T + p["lin5_b"]


if __name__ == "__main__":
    key = jax.random.PRNGKey(0)
    k_p, k_x, k_g = jax.random.split(key, 3)

    torch_params = init_torch_params(k_p)
    kparams = pack_params(torch_params)

    B = 16                                   # 2 grid steps of BBLK=8 images
    x = jax.random.normal(k_x, (B, 1, H, W), jnp.float32)   # NCHW like torch
    g = jax.random.normal(k_g, (B, 2, 1, 1), jnp.float32)   # goal, cat'd on C

    logits = jax.block_until_ready(mnist_forward(x, g, kparams))
    assert logits.shape == (B, NUM_CLASSES)
    assert bool(jnp.all(jnp.isfinite(logits)))

    # sanity check against a pure-JAX reference (bf16 conv operands => loose tol)
    ref = reference_forward(x, g, torch_params)
    err = float(jnp.max(jnp.abs(logits - ref)))
    tol = 3e-2 + 2e-2 * float(jnp.max(jnp.abs(ref)))
    assert err < tol, f"kernel vs reference mismatch: {err} (tol {tol})"
    print("KERNEL_OK")
</pallas_src>

<mosaic_0001>
module attributes {stable_mosaic.version = 11 : i64} {
  func.func @mnist_kernel(%arg0: i32, %arg1: memref<1x16x3072xbf16, #tpu.memory_space<vmem>>, %arg2: memref<1x2x8xf32, #tpu.memory_space<vmem>>, %arg3: memref<16x16xbf16, #tpu.memory_space<vmem>>, %arg4: memref<32x144xbf16, #tpu.memory_space<vmem>>, %arg5: memref<48x288xbf16, #tpu.memory_space<vmem>>, %arg6: memref<48x8xf32, #tpu.memory_space<vmem>>, %arg7: memref<1x3072xf32, #tpu.memory_space<vmem>>, %arg8: memref<3072x8xf32, #tpu.memory_space<vmem>>, %arg9: memref<128x56xf32, #tpu.memory_space<vmem>>, %arg10: memref<1x6x8xf32, #tpu.memory_space<vmem>>, %arg11: memref<288x3072xbf16, #tpu.memory_space<vmem>>, %arg12: memref<32x3328xbf16, #tpu.memory_space<vmem>>) attributes {dimension_semantics = [#tpu.dimension_semantics<parallel>], iteration_bounds = array<i64: 2>, scalar_prefetch = 0 : i64, scratch_operands = 2 : i64, tpu.core_type = #tpu.core_type<tc>, window_params = [{transform_indices = @transform_0, window_bounds = array<i64: 1, 16, 3072>}, {transform_indices = @transform_1, window_bounds = array<i64: 1, 2, 8>}, {pipeline_mode = #tpu.pipeline_mode<synchronous>, transform_indices = @transform_2, window_bounds = array<i64: 16, 16>}, {pipeline_mode = #tpu.pipeline_mode<synchronous>, transform_indices = @transform_3, window_bounds = array<i64: 32, 144>}, {pipeline_mode = #tpu.pipeline_mode<synchronous>, transform_indices = @transform_4, window_bounds = array<i64: 48, 288>}, {pipeline_mode = #tpu.pipeline_mode<synchronous>, transform_indices = @transform_5, window_bounds = array<i64: 48, 8>}, {pipeline_mode = #tpu.pipeline_mode<synchronous>, transform_indices = @transform_6, window_bounds = array<i64: 1, 3072>}, {pipeline_mode = #tpu.pipeline_mode<synchronous>, transform_indices = @transform_7, window_bounds = array<i64: 3072, 8>}, {pipeline_mode = #tpu.pipeline_mode<synchronous>, transform_indices = @transform_8, window_bounds = array<i64: 128, 56>}, {transform_indices = @transform_9, window_bounds = array<i64: 1, 6, 8>}]} {
    %c0 = arith.constant 0 : index
    %c0_0 = arith.constant 0 : index
    %0 = vector.load %arg7[%c0, %c0_0] : memref<1x3072xf32, #tpu.memory_space<vmem>>, vector<1x3072xf32>
    %cst = arith.constant 0.000000e+00 : bf16
    %1 = vector.broadcast %cst : bf16 to vector<32x128xbf16>
    %c0_1 = arith.constant 0 : index
    %c0_2 = arith.constant 0 : index
    %2 = vector.load %arg12[%c0_1, %c0_2] : memref<32x3328xbf16, #tpu.memory_space<vmem>>, vector<32x128xbf16>
    tpu.vector_store %arg12[%c0_1, %c0_2], %1 {strides = array<i32>} : memref<32x3328xbf16, #tpu.memory_space<vmem>>, vector<32x128xbf16>,
    %cst_3 = arith.constant 0.000000e+00 : bf16
    %3 = vector.broadcast %cst_3 : bf16 to vector<32x128xbf16>
    %c0_4 = arith.constant 0 : index
    %c3200 = arith.constant 3200 : index
    %4 = vector.load %arg12[%c0_4, %c3200] : memref<32x3328xbf16, #tpu.memory_space<vmem>>, vector<32x128xbf16>
    tpu.vector_store %arg12[%c0_4, %c3200], %3 {strides = array<i32>} : memref<32x3328xbf16, #tpu.memory_space<vmem>>, vector<32x128xbf16>,
    %c0_5 = arith.constant 0 : index
    %c0_6 = arith.constant 0 : index
    %5 = vector.load %arg3[%c0_5, %c0_6] : memref<16x16xbf16, #tpu.memory_space<vmem>>, vector<16x16xbf16>
    %c0_7 = arith.constant 0 : index
    %c0_8 = arith.constant 0 : index
    %c0_9 = arith.constant 0 : index
    %6 = vector.load %arg1[%c0_7, %c0_8, %c0_9] : memref<1x16x3072xbf16, #tpu.memory_space<vmem>>, vector<1x16x3072xbf16>
    %7 = vector.shape_cast %6 : vector<1x16x3072xbf16> to vector<16x3072xbf16>
    %cst_10 = arith.constant dense<0.000000e+00> : vector<16x3072xf32>
    %8 = tpu.matmul %5, %7, %cst_10 {dimension_numbers = #tpu.dot_dimension_numbers<[1], [0], [0], [1], [0, 0, 1, 1], [], []>} : vector<16x16xbf16>, vector<16x3072xbf16>, vector<16x3072xf32> -> vector<16x3072xf32>
    %c0_11 = arith.constant 0 : index
    %c0_12 = arith.constant 0 : index
    %9 = vector.load %arg6[%c0_11, %c0_12] : memref<48x8xf32, #tpu.memory_space<vmem>>, vector<16x1xf32>
    %10 = vector.broadcast %9 : vector<16x1xf32> to vector<16x3072xf32>
    %11 = arith.addf %8, %10 : vector<16x3072xf32>
    %cst_13 = arith.constant 0.000000e+00 : f32
    %12 = vector.broadcast %cst_13 : f32 to vector<16x3072xf32>
    %13 = arith.cmpf oge, %11, %12 : vector<16x3072xf32>
    %cst_14 = arith.constant 2.000000e-01 : f32
    %14 = vector.broadcast %cst_14 : f32 to vector<16x3072xf32>
    %15 = arith.mulf %14, %11 : vector<16x3072xf32>
    %16 = arith.select %13, %11, %15 : vector<16x3072xi1>, vector<16x3072xf32>
    %17 = vector.broadcast %0 : vector<1x3072xf32> to vector<16x3072xf32>
    %18 = arith.mulf %16, %17 : vector<16x3072xf32>
    %19 = arith.truncf %18 : vector<16x3072xf32> to vector<16x3072xbf16>
    %c0_15 = arith.constant 0 : index
    %c128 = arith.constant 128 : index
    %20 = vector.load %arg12[%c0_15, %c128] : memref<32x3328xbf16, #tpu.memory_space<vmem>>, vector<16x3072xbf16>
    tpu.vector_store %arg12[%c0_15, %c128], %19 {strides = array<i32>} : memref<32x3328xbf16, #tpu.memory_space<vmem>>, vector<16x3072xbf16>,
    %c0_16 = arith.constant 0 : index
    %c109 = arith.constant 109 : index
    %21 = vector.load %arg12[%c0_16, %c109] : memref<32x3328xbf16, #tpu.memory_space<vmem>>, vector<16x3072xbf16>
    %c0_17 = arith.constant 0 : index
    %c0_18 = arith.constant 0 : index
    %22 = vector.load %arg11[%c0_17, %c0_18] : memref<288x3072xbf16, #tpu.memory_space<vmem>>, vector<16x3072xbf16>
    tpu.vector_store %arg11[%c0_17, %c0_18], %21 {strides = array<i32>} : memref<288x3072xbf16, #tpu.memory_space<vmem>>, vector<16x3072xbf16>,
    %c0_19 = arith.constant 0 : index
    %c110 = arith.constant 110 : index
    %23 = vector.load %arg12[%c0_19, %c110] : memref<32x3328xbf16, #tpu.memory_space<vmem>>, vector<16x3072xbf16>
    %c16 = arith.constant 16 : index
    %c0_20 = arith.constant 0 : index
    %24 = vector.load %arg11[%c16, %c0_20] : memref<288x3072xbf16, #tpu.memory_space<vmem>>, vector<16x3072xbf16>
    tpu.vector_store %arg11[%c16, %c0_20], %23 {strides = array<i32>} : memref<288x3072xbf16, #tpu.memory_space<vmem>>, vector<16x3072xbf16>,
    %c0_21 = arith.constant 0 : index
    %c111 = arith.constant 111 : index
    %25 = vector.load %arg12[%c0_21, %c111] : memref<32x3328xbf16, #tpu.memory_space<vmem>>, vector<16x3072xbf16>
    %c32 = arith.constant 32 : index
    %c0_22 = arith.constant 0 : index
    %26 = vector.load %arg11[%c32, %c0_22] : memref<288x3072xbf16, #tpu.memory_space<vmem>>, vector<16x3072xbf16>
    tpu.vector_store %arg11[%c32, %c0_22], %25 {strides = array<i32>} : memref<288x3072xbf16, #tpu.memory_space<vmem>>, vector<16x3072xbf16>,
    %c0_23 = arith.constant 0 : index
    %c127 = arith.constant 127 : index
    %27 = vector.load %arg12[%c0_23, %c127] : memref<32x3328xbf16, #tpu.memory_space<vmem>>, vector<16x3072xbf16>
    %c48 = arith.constant 48 : index
    %c0_24 = arith.constant 0 : index
    %28 = vector.load %arg11[%c48, %c0_24] : memref<288x3072xbf16, #tpu.memory_space<vmem>>, vector<16x3072xbf16>
    tpu.vector_store %arg11[%c48, %c0_24], %27 {strides = array<i32>} : memref<288x3072xbf16, #tpu.memory_space<vmem>>, vector<16x3072xbf16>,
    %c0_25 = arith.constant 0 : index
    %c128_26 = arith.constant 128 : index
    %29 = vector.load %arg12[%c0_25, %c128_26] : memref<32x3328xbf16, #tpu.memory_space<vmem>>, vector<16x3072xbf16>
    %c64 = arith.constant 64 : index
    %c0_27 = arith.constant 0 : index
    %30 = vector.load %arg11[%c64, %c0_27] : memref<288x3072xbf16, #tpu.memory_space<vmem>>, vector<16x3072xbf16>
    tpu.vector_store %arg11[%c64, %c0_27], %29 {strides = array<i32>} : memref<288x3072xbf16, #tpu.memory_space<vmem>>, vector<16x3072xbf16>,
    %c0_28 = arith.constant 0 : index
    %c129 = arith.constant 129 : index
    %31 = vector.load %arg12[%c0_28, %c129] : memref<32x3328xbf16, #tpu.memory_space<vmem>>, vector<16x3072xbf16>
    %c80 = arith.constant 80 : index
    %c0_29 = arith.constant 0 : index
    %32 = vector.load %arg11[%c80, %c0_29] : memref<288x3072xbf16, #tpu.memory_space<vmem>>, vector<16x3072xbf16>
    tpu.vector_store %arg11[%c80, %c0_29], %31 {strides = array<i32>} : memref<288x3072xbf16, #tpu.memory_space<vmem>>, vector<16x3072xbf16>,
    %c0_30 = arith.constant 0 : index
    %c145 = arith.constant 145 : index
    %33 = vector.load %arg12[%c0_30, %c145] : memref<32x3328xbf16, #tpu.memory_space<vmem>>, vector<16x3072xbf16>
    %c96 = arith.constant 96 : index
    %c0_31 = arith.constant 0 : index
    %34 = vector.load %arg11[%c96, %c0_31] : memref<288x3072xbf16, #tpu.memory_space<vmem>>, vector<16x3072xbf16>
    tpu.vector_store %arg11[%c96, %c0_31], %33 {strides = array<i32>} : memref<288x3072xbf16, #tpu.memory_space<vmem>>, vector<16x3072xbf16>,
    %c0_32 = arith.constant 0 : index
    %c146 = arith.constant 146 : index
    %35 = vector.load %arg12[%c0_32, %c146] : memref<32x3328xbf16, #tpu.memory_space<vmem>>, vector<16x3072xbf16>
    %c112 = arith.constant 112 : index
    %c0_33 = arith.constant 0 : index
    %36 = vector.load %arg11[%c112, %c0_33] : memref<288x3072xbf16, #tpu.memory_space<vmem>>, vector<16x3072xbf16>
    tpu.vector_store %arg11[%c112, %c0_33], %35 {strides = array<i32>} : memref<288x3072xbf16, #tpu.memory_space<vmem>>, vector<16x3072xbf16>,
    %c0_34 = arith.constant 0 : index
    %c147 = arith.constant 147 : index
    %37 = vector.load %arg12[%c0_34, %c147] : memref<32x3328xbf16, #tpu.memory_space<vmem>>, vector<16x3072xbf16>
    %c128_35 = arith.constant 128 : index
    %c0_36 = arith.constant 0 : index
    %38 = vector.load %arg11[%c128_35, %c0_36] : memref<288x3072xbf16, #tpu.memory_space<vmem>>, vector<16x3072xbf16>
    tpu.vector_store %arg11[%c128_35, %c0_36], %37 {strides = array<i32>} : memref<288x3072xbf16, #tpu.memory_space<vmem>>, vector<16x3072xbf16>,
    %c0_37 = arith.constant 0 : index
    %c0_38 = arith.constant 0 : index
    %39 = vector.load %arg4[%c0_37, %c0_38] : memref<32x144xbf16, #tpu.memory_space<vmem>>, vector<32x144xbf16>
    %c0_39 = arith.constant 0 : index
    %c0_40 = arith.constant 0 : index
    %40 = vector.load %arg11[%c0_39, %c0_40] : memref<288x3072xbf16, #tpu.memory_space<vmem>>, vector<144x3072xbf16>
    %cst_41 = arith.constant dense<0.000000e+00> : vector<32x3072xf32>
    %41 = tpu.matmul %39, %40, %cst_41 {dimension_numbers = #tpu.dot_dimension_numbers<[1], [0], [0], [1], [0, 0, 1, 1], [], []>} : vector<32x144xbf16>, vector<144x3072xbf16>, vector<32x3072xf32> -> vector<32x3072xf32>
    %c0_42 = arith.constant 0 : index
    %c1 = arith.constant 1 : index
    %42 = vector.load %arg6[%c0_42, %c1] : memref<48x8xf32, #tpu.memory_space<vmem>>, vector<32x1xf32>
    %43 = vector.broadcast %42 : vector<32x1xf32> to vector<32x3072xf32>
    %44 = arith.addf %41, %43 : vector<32x3072xf32>
    %cst_43 = arith.constant 0.000000e+00 : f32
    %45 = vector.broadcast %cst_43 : f32 to vector<32x3072xf32>
    %46 = arith.cmpf oge, %44, %45 : vector<32x3072xf32>
    %cst_44 = arith.constant 2.000000e-01 : f32
    %47 = vector.broadcast %cst_44 : f32 to vector<32x3072xf32>
    %48 = arith.mulf %47, %44 : vector<32x3072xf32>
    %49 = arith.select %46, %44, %48 : vector<32x3072xi1>, vector<32x3072xf32>
    %50 = vector.broadcast %0 : vector<1x3072xf32> to vector<32x3072xf32>
    %51 = arith.mulf %49, %50 : vector<32x3072xf32>
    %52 = arith.truncf %51 : vector<32x3072xf32> to vector<32x3072xbf16>
    %c0_45 = arith.constant 0 : index
    %c128_46 = arith.constant 128 : index
    %53 = vector.load %arg12[%c0_45, %c128_46] : memref<32x3328xbf16, #tpu.memory_space<vmem>>, vector<32x3072xbf16>
    tpu.vector_store %arg12[%c0_45, %c128_46], %52 {strides = array<i32>} : memref<32x3328xbf16, #tpu.memory_space<vmem>>, vector<32x3072xbf16>,
    %c0_47 = arith.constant 0 : index
    %c109_48 = arith.constant 109 : index
    %54 = vector.load %arg12[%c0_47, %c109_48] : memref<32x3328xbf16, #tpu.memory_space<vmem>>, vector<32x3072xbf16>
    %c0_49 = arith.constant 0 : index
    %c0_50 = arith.constant 0 : index
    %55 = vector.load %arg11[%c0_49, %c0_50] : memref<288x3072xbf16, #tpu.memory_space<vmem>>, vector<32x3072xbf16>
    tpu.vector_store %arg11[%c0_49, %c0_50], %54 {strides = array<i32>} : memref<288x3072xbf16, #tpu.memory_space<vmem>>, vector<32x3072xbf16>,
    %c0_51 = arith.constant 0 : index
    %c110_52 = arith.constant 110 : index
    %56 = vector.load %arg12[%c0_51, %c110_52] : memref<32x3328xbf16, #tpu.memory_space<vmem>>, vector<32x3072xbf16>
    %c32_53 = arith.constant 32 : index
    %c0_54 = arith.constant 0 : index
    %57 = vector.load %arg11[%c32_53, %c0_54] : memref<288x3072xbf16, #tpu.memory_space<vmem>>, vector<32x3072xbf16>
    tpu.vector_store %arg11[%c32_53, %c0_54], %56 {strides = array<i32>} : memref<288x3072xbf16, #tpu.memory_space<vmem>>, vector<32x3072xbf16>,
    %c0_55 = arith.constant 0 : index
    %c111_56 = arith.constant 111 : index
    %58 = vector.load %arg12[%c0_55, %c111_56] : memref<32x3328xbf16, #tpu.memory_space<vmem>>, vector<32x3072xbf16>
    %c64_57 = arith.constant 64 : index
    %c0_58 = arith.constant 0 : index
    %59 = vector.load %arg11[%c64_57, %c0_58] : memref<288x3072xbf16, #tpu.memory_space<vmem>>, vector<32x3072xbf16>
    tpu.vector_store %arg11[%c64_57, %c0_58], %58 {strides = array<i32>} : memref<288x3072xbf16, #tpu.memory_space<vmem>>, vector<32x3072xbf16>,
    %c0_59 = arith.constant 0 : index
    %c127_60 = arith.constant 127 : index
    %60 = vector.load %arg12[%c0_59, %c127_60] : memref<32x3328xbf16, #tpu.memory_space<vmem>>, vector<32x3072xbf16>
    %c96_61 = arith.constant 96 : index
    %c0_62 = arith.constant 0 : index
    %61 = vector.load %arg11[%c96_61, %c0_62] : memref<288x3072xbf16, #tpu.memory_space<vmem>>, vector<32x3072xbf16>
    tpu.vector_store %arg11[%c96_61, %c0_62], %60 {strides = array<i32>} : memref<288x3072xbf16, #tpu.memory_space<vmem>>, vector<32x3072xbf16>,
    %c0_63 = arith.constant 0 : index
    %c128_64 = arith.constant 128 : index
    %62 = vector.load %arg12[%c0_63, %c128_64] : memref<32x3328xbf16, #tpu.memory_space<vmem>>, vector<32x3072xbf16>
    %c128_65 = arith.constant 128 : index
    %c0_66 = arith.constant 0 : index
    %63 = vector.load %arg11[%c128_65, %c0_66] : memref<288x3072xbf16, #tpu.memory_space<vmem>>, vector<32x3072xbf16>
    tpu.vector_store %arg11[%c128_65, %c0_66], %62 {strides = array<i32>} : memref<288x3072xbf16, #tpu.memory_space<vmem>>, vector<32x3072xbf16>,
    %c0_67 = arith.constant 0 : index
    %c129_68 = arith.constant 129 : index
    %64 = vector.load %arg12[%c0_67, %c129_68] : memref<32x3328xbf16, #tpu.memory_space<vmem>>, vector<32x3072xbf16>
    %c160 = arith.constant 160 : index
    %c0_69 = arith.constant 0 : index
    %65 = vector.load %arg11[%c160, %c0_69] : memref<288x3072xbf16, #tpu.memory_space<vmem>>, vector<32x3072xbf16>
    tpu.vector_store %arg11[%c160, %c0_69], %64 {strides = array<i32>} : memref<288x3072xbf16, #tpu.memory_space<vmem>>, vector<32x3072xbf16>,
    %c0_70 = arith.constant 0 : index
    %c145_71 = arith.constant 145 : index
    %66 = vector.load %arg12[%c0_70, %c145_71] : memref<32x3328xbf16, #tpu.memory_space<vmem>>, vector<32x3072xbf16>
    %c192 = arith.constant 192 : index
    %c0_72 = arith.constant 0 : index
    %67 = vector.load %arg11[%c192, %c0_72] : memref<288x3072xbf16, #tpu.memory_space<vmem>>, vector<32x3072xbf16>
    tpu.vector_store %arg11[%c192, %c0_72], %66 {strides = array<i32>} : memref<288x3072xbf16, #tpu.memory_space<vmem>>, vector<32x3072xbf16>,
    %c0_73 = arith.constant 0 : index
    %c146_74 = arith.constant 146 : index
    %68 = vector.load %arg12[%c0_73, %c146_74] : memref<32x3328xbf16, #tpu.memory_space<vmem>>, vector<32x3072xbf16>
    %c224 = arith.constant 224 : index
    %c0_75 = arith.constant 0 : index
    %69 = vector.load %arg11[%c224, %c0_75] : memref<288x3072xbf16, #tpu.memory_space<vmem>>, vector<32x3072xbf16>
    tpu.vector_store %arg11[%c224, %c0_75], %68 {strides = array<i32>} : memref<288x3072xbf16, #tpu.memory_space<vmem>>, vector<32x3072xbf16>,
    %c0_76 = arith.constant 0 : index
    %c147_77 = arith.constant 147 : index
    %70 = vector.load %arg12[%c0_76, %c147_77] : memref<32x3328xbf16, #tpu.memory_space<vmem>>, vector<32x3072xbf16>
    %c256 = arith.constant 256 : index
    %c0_78 = arith.constant 0 : index
    %71 = vector.load %arg11[%c256, %c0_78] : memref<288x3072xbf16, #tpu.memory_space<vmem>>, vector<32x3072xbf16>
    tpu.vector_store %arg11[%c256, %c0_78], %70 {strides = array<i32>} : memref<288x3072xbf16, #tpu.memory_space<vmem>>, vector<32x3072xbf16>,
    %c0_79 = arith.constant 0 : index
    %c0_80 = arith.constant 0 : index
    %72 = vector.load %arg5[%c0_79, %c0_80] : memref<48x288xbf16, #tpu.memory_space<vmem>>, vector<48x288xbf16>
    %c0_81 = arith.constant 0 : index
    %c0_82 = arith.constant 0 : index
    %73 = vector.load %arg11[%c0_81, %c0_82] : memref<288x3072xbf16, #tpu.memory_space<vmem>>, vector<288x3072xbf16>
    %cst_83 = arith.constant dense<0.000000e+00> : vector<48x3072xf32>
    %74 = tpu.matmul %72, %73, %cst_83 {dimension_numbers = #tpu.dot_dimension_numbers<[1], [0], [0], [1], [0, 0, 1, 1], [], []>} : vector<48x288xbf16>, vector<288x3072xbf16>, vector<48x3072xf32> -> vector<48x3072xf32>
    %c0_84 = arith.constant 0 : index
    %c2 = arith.constant 2 : index
    %75 = vector.load %arg6[%c0_84, %c2] : memref<48x8xf32, #tpu.memory_space<vmem>>, vector<48x1xf32>
    %76 = vector.broadcast %75 : vector<48x1xf32> to vector<48x3072xf32>
    %77 = arith.addf %74, %76 : vector<48x3072xf32>
    %cst_85 = arith.constant 0.000000e+00 : f32
    %78 = vector.broadcast %cst_85 : f32 to vector<48x3072xf32>
    %79 = arith.cmpf oge, %77, %78 : vector<48x3072xf32>
    %cst_86 = arith.constant 2.000000e-01 : f32
    %80 = vector.broadcast %cst_86 : f32 to vector<48x3072xf32>
    %81 = arith.mulf %80, %77 : vector<48x3072xf32>
    %82 = arith.select %79, %77, %81 : vector<48x3072xi1>, vector<48x3072xf32>
    %c0_87 = arith.constant 0 : index
    %c0_88 = arith.constant 0 : index
    %83 = vector.load %arg8[%c0_87, %c0_88] : memref<3072x8xf32, #tpu.memory_space<vmem>>, vector<3072x8xf32>
    %cst_89 = arith.constant dense<0.000000e+00> : vector<48x8xf32>
    %84 = tpu.matmul %82, %83, %cst_89 {dimension_numbers = #tpu.dot_dimension_numbers<[1], [0], [0], [1], [0, 0, 1, 1], [], []>} : vector<48x3072xf32>, vector<3072x8xf32>, vector<48x8xf32> -> vector<48x8xf32>
    %c0_90 = arith.constant 0 : index
    %c0_91 = arith.constant 0 : index
    %c0_92 = arith.constant 0 : index
    %85 = vector.load %arg2[%c0_90, %c0_91, %c0_92] : memref<1x2x8xf32, #tpu.memory_space<vmem>>, vector<1x2x8xf32>
    %86 = vector.shape_cast %85 : vector<1x2x8xf32> to vector<2x8xf32>
    %c0_93 = arith.constant 0 : index
    %c0_94 = arith.constant 0 : index
    %87 = vector.load %arg9[%c0_93, %c0_94] : memref<128x56xf32, #tpu.memory_space<vmem>>, vector<40x48xf32>
    %cst_95 = arith.constant dense<0.000000e+00> : vector<40x8xf32>
    %88 = tpu.matmul %87, %84, %cst_95 {dimension_numbers = #tpu.dot_dimension_numbers<[1], [0], [0], [1], [0, 0, 1, 1], [], []>} : vector<40x48xf32>, vector<48x8xf32>, vector<40x8xf32> -> vector<40x8xf32>
    %c0_96 = arith.constant 0 : index
    %c40 = arith.constant 40 : index
    %89 = vector.load %arg9[%c0_96, %c40] : memref<128x56xf32, #tpu.memory_space<vmem>>, vector<40x1xf32>
    %90 = vector.extract_strided_slice %86 {offsets = [0, 0], sizes = [1, 8], strides = [1, 1]} : vector<2x8xf32> to vector<1x8xf32>
    %91 = vector.broadcast %89 : vector<40x1xf32> to vector<40x8xf32>
    %92 = vector.broadcast %90 : vector<1x8xf32> to vector<40x8xf32>
    %93 = arith.mulf %91, %92 : vector<40x8xf32>
    %94 = arith.addf %88, %93 : vector<40x8xf32>
    %c0_97 = arith.constant 0 : index
    %c41 = arith.constant 41 : index
    %95 = vector.load %arg9[%c0_97, %c41] : memref<128x56xf32, #tpu.memory_space<vmem>>, vector<40x1xf32>
    %96 = vector.extract_strided_slice %86 {offsets = [1, 0], sizes = [1, 8], strides = [1, 1]} : vector<2x8xf32> to vector<1x8xf32>
    %97 = vector.broadcast %95 : vector<40x1xf32> to vector<40x8xf32>
    %98 = vector.broadcast %96 : vector<1x8xf32> to vector<40x8xf32>
    %99 = arith.mulf %97, %98 : vector<40x8xf32>
    %100 = arith.addf %94, %99 : vector<40x8xf32>
    %c0_98 = arith.constant 0 : index
    %c48_99 = arith.constant 48 : index
    %101 = vector.load %arg9[%c0_98, %c48_99] : memref<128x56xf32, #tpu.memory_space<vmem>>, vector<40x1xf32>
    %102 = vector.broadcast %101 : vector<40x1xf32> to vector<40x8xf32>
    %103 = arith.addf %100, %102 : vector<40x8xf32>
    %cst_100 = arith.constant 0.000000e+00 : f32
    %104 = vector.broadcast %cst_100 : f32 to vector<40x8xf32>
    %105 = arith.cmpf oge, %103, %104 : vector<40x8xf32>
    %cst_101 = arith.constant 2.000000e-01 : f32
    %106 = vector.broadcast %cst_101 : f32 to vector<40x8xf32>
    %107 = arith.mulf %106, %103 : vector<40x8xf32>
    %108 = arith.select %105, %103, %107 : vector<40x8xi1>, vector<40x8xf32>
    %c40_102 = arith.constant 40 : index
    %c0_103 = arith.constant 0 : index
    %109 = vector.load %arg9[%c40_102, %c0_103] : memref<128x56xf32, #tpu.memory_space<vmem>>, vector<30x40xf32>
    %cst_104 = arith.constant dense<0.000000e+00> : vector<30x8xf32>
    %110 = tpu.matmul %109, %108, %cst_104 {dimension_numbers = #tpu.dot_dimension_numbers<[1], [0], [0], [1], [0, 0, 1, 1], [], []>} : vector<30x40xf32>, vector<40x8xf32>, vector<30x8xf32> -> vector<30x8xf32>
    %c40_105 = arith.constant 40 : index
    %c48_106 = arith.constant 48 : index
    %111 = vector.load %arg9[%c40_105, %c48_106] : memref<128x56xf32, #tpu.memory_space<vmem>>, vector<30x1xf32>
    %112 = vector.broadcast %111 : vector<30x1xf32> to vector<30x8xf32>
    %113 = arith.addf %110, %112 : vector<30x8xf32>
    %cst_107 = arith.constant 0.000000e+00 : f32
    %114 = vector.broadcast %cst_107 : f32 to vector<30x8xf32>
    %115 = arith.cmpf oge, %113, %114 : vector<30x8xf32>
    %cst_108 = arith.constant 2.000000e-01 : f32
    %116 = vector.broadcast %cst_108 : f32 to vector<30x8xf32>
    %117 = arith.mulf %116, %113 : vector<30x8xf32>
    %118 = arith.select %115, %113, %117 : vector<30x8xi1>, vector<30x8xf32>
    %c72 = arith.constant 72 : index
    %c0_109 = arith.constant 0 : index
    %119 = vector.load %arg9[%c72, %c0_109] : memref<128x56xf32, #tpu.memory_space<vmem>>, vector<20x30xf32>
    %cst_110 = arith.constant dense<0.000000e+00> : vector<20x8xf32>
    %120 = tpu.matmul %119, %118, %cst_110 {dimension_numbers = #tpu.dot_dimension_numbers<[1], [0], [0], [1], [0, 0, 1, 1], [], []>} : vector<20x30xf32>, vector<30x8xf32>, vector<20x8xf32> -> vector<20x8xf32>
    %c72_111 = arith.constant 72 : index
    %c48_112 = arith.constant 48 : index
    %121 = vector.load %arg9[%c72_111, %c48_112] : memref<128x56xf32, #tpu.memory_space<vmem>>, vector<20x1xf32>
    %122 = vector.broadcast %121 : vector<20x1xf32> to vector<20x8xf32>
    %123 = arith.addf %120, %122 : vector<20x8xf32>
    %cst_113 = arith.constant 0.000000e+00 : f32
    %124 = vector.broadcast %cst_113 : f32 to vector<20x8xf32>
    %125 = arith.cmpf oge, %123, %124 : vector<20x8xf32>
    %cst_114 = arith.constant 2.000000e-01 : f32
    %126 = vector.broadcast %cst_114 : f32 to vector<20x8xf32>
    %127 = arith.mulf %126, %123 : vector<20x8xf32>
    %128 = arith.select %125, %123, %127 : vector<20x8xi1>, vector<20x8xf32>
    %c96_115 = arith.constant 96 : index
    %c0_116 = arith.constant 0 : index
    %129 = vector.load %arg9[%c96_115, %c0_116] : memref<128x56xf32, #tpu.memory_space<vmem>>, vector<10x20xf32>
    %cst_117 = arith.constant dense<0.000000e+00> : vector<10x8xf32>
    %130 = tpu.matmul %129, %128, %cst_117 {dimension_numbers = #tpu.dot_dimension_numbers<[1], [0], [0], [1], [0, 0, 1, 1], [], []>} : vector<10x20xf32>, vector<20x8xf32>, vector<10x8xf32> -> vector<10x8xf32>
    %c96_118 = arith.constant 96 : index
    %c48_119 = arith.constant 48 : index
    %131 = vector.load %arg9[%c96_118, %c48_119] : memref<128x56xf32, #tpu.memory_space<vmem>>, vector<10x1xf32>
    %132 = vector.broadcast %131 : vector<10x1xf32> to vector<10x8xf32>
    %133 = arith.addf %130, %132 : vector<10x8xf32>
    %cst_120 = arith.constant 0.000000e+00 : f32
    %134 = vector.broadcast %cst_120 : f32 to vector<10x8xf32>
    %135 = arith.cmpf oge, %133, %134 : vector<10x8xf32>
    %cst_121 = arith.constant 2.000000e-01 : f32
    %136 = vector.broadcast %cst_121 : f32 to vector<10x8xf32>
    %137 = arith.mulf %136, %133 : vector<10x8xf32>
    %138 = arith.select %135, %133, %137 : vector<10x8xi1>, vector<10x8xf32>
    %c112_122 = arith.constant 112 : index
    %c0_123 = arith.constant 0 : index
    %139 = vector.load %arg9[%c112_122, %c0_123] : memref<128x56xf32, #tpu.memory_space<vmem>>, vector<6x10xf32>
    %cst_124 = arith.constant dense<0.000000e+00> : vector<6x8xf32>
    %140 = tpu.matmul %139, %138, %cst_124 {dimension_numbers = #tpu.dot_dimension_numbers<[1], [0], [0], [1], [0, 0, 1, 1], [], []>} : vector<6x10xf32>, vector<10x8xf32>, vector<6x8xf32> -> vector<6x8xf32>
    %c112_125 = arith.constant 112 : index
    %c48_126 = arith.constant 48 : index
    %141 = vector.load %arg9[%c112_125, %c48_126] : memref<128x56xf32, #tpu.memory_space<vmem>>, vector<6x1xf32>
    %142 = vector.broadcast %141 : vector<6x1xf32> to vector<6x8xf32>
    %143 = arith.addf %140, %142 : vector<6x8xf32>
    %c0_127 = arith.constant 0 : index
    %c0_128 = arith.constant 0 : index
    %c0_129 = arith.constant 0 : index
    %144 = vector.load %arg10[%c0_127, %c0_128, %c0_129] : memref<1x6x8xf32, #tpu.memory_space<vmem>>, vector<1x6x8xf32>
    %145 = vector.shape_cast %144 : vector<1x6x8xf32> to vector<6x8xf32>
    %146 = vector.shape_cast %143 : vector<6x8xf32> to vector<1x6x8xf32>
    tpu.vector_store %arg10[%c0_127, %c0_128, %c0_129], %146 {strides = array<i32>} : memref<1x6x8xf32, #tpu.memory_space<vmem>>, vector<1x6x8xf32>,
    return
  }
  func.func @transform_0(%arg0: i32) -> (i32, i32, i32) {
    %c0_i32 = arith.constant 0 : i32
    %c0_i32_0 = arith.constant 0 : i32
    %c0_i32_1 = arith.constant 0 : i32
    return %arg0, %c0_i32, %c0_i32_0 : i32, i32, i32
  }
  func.func @transform_1(%arg0: i32) -> (i32, i32, i32) {
    %c0_i32 = arith.constant 0 : i32
    %c0_i32_0 = arith.constant 0 : i32
    %c0_i32_1 = arith.constant 0 : i32
    return %arg0, %c0_i32, %c0_i32_0 : i32, i32, i32
  }
  func.func @transform_2(%arg0: i32) -> (i32, i32) {
    %c0_i32 = arith.constant 0 : i32
    %c0_i32_0 = arith.constant 0 : i32
    %c0_i32_1 = arith.constant 0 : i32
    return %c0_i32, %c0_i32_0 : i32, i32
  }
  func.func @transform_3(%arg0: i32) -> (i32, i32) {
    %c0_i32 = arith.constant 0 : i32
    %c0_i32_0 = arith.constant 0 : i32
    %c0_i32_1 = arith.constant 0 : i32
    return %c0_i32, %c0_i32_0 : i32, i32
  }
  func.func @transform_4(%arg0: i32) -> (i32, i32) {
    %c0_i32 = arith.constant 0 : i32
    %c0_i32_0 = arith.constant 0 : i32
    %c0_i32_1 = arith.constant 0 : i32
    return %c0_i32, %c0_i32_0 : i32, i32
  }
  func.func @transform_5(%arg0: i32) -> (i32, i32) {
    %c0_i32 = arith.constant 0 : i32
    %c0_i32_0 = arith.constant 0 : i32
    %c0_i32_1 = arith.constant 0 : i32
    return %c0_i32, %c0_i32_0 : i32, i32
  }
  func.func @transform_6(%arg0: i32) -> (i32, i32) {
    %c0_i32 = arith.constant 0 : i32
    %c0_i32_0 = arith.constant 0 : i32
    %c0_i32_1 = arith.constant 0 : i32
    return %c0_i32, %c0_i32_0 : i32, i32
  }
  func.func @transform_7(%arg0: i32) -> (i32, i32) {
    %c0_i32 = arith.constant 0 : i32
    %c0_i32_0 = arith.constant 0 : i32
    %c0_i32_1 = arith.constant 0 : i32
    return %c0_i32, %c0_i32_0 : i32, i32
  }
  func.func @transform_8(%arg0: i32) -> (i32, i32) {
    %c0_i32 = arith.constant 0 : i32
    %c0_i32_0 = arith.constant 0 : i32
    %c0_i32_1 = arith.constant 0 : i32
    return %c0_i32, %c0_i32_0 : i32, i32
  }
  func.func @transform_9(%arg0: i32) -> (i32, i32, i32) {
    %c0_i32 = arith.constant 0 : i32
    %c0_i32_0 = arith.constant 0 : i32
    %c0_i32_1 = arith.constant 0 : i32
    return %arg0, %c0_i32, %c0_i32_0 : i32, i32, i32
  }
}

</mosaic_0001>

<bundles_post_ra>
// kernel: tpu_custom_call.1
= control target key start
LH: loop header
LB: loop body
LE: loop exit
PB: predicated region body
PF: predicated region fallthrough
CT: control target
= control target key end

     0   :  { %s13529_s30 = smov 0   ;;  %s20688_s0 = inlined_call_operand.vmem [shape: bf16[2,16,3072], index: 0, kind: input, shape index: {}]   ;;  %s20689_s1 = inlined_call_operand.vmem [shape: f32[2,2,8], index: 1, kind: input, shape index: {}]   ;;  %s20690_s2 = inlined_call_operand.vmem [shape: bf16[16,16], index: 2, kind: input, shape index: {}]   ;;  %s20691_s3 = inlined_call_operand.vmem [shape: bf16[32,144], index: 3, kind: input, shape index: {}]   ;;  %s20692_s4 = inlined_call_operand.vmem [shape: bf16[48,288], index: 4, kind: input, shape index: {}]   ;;  %s20693_s5 = inlined_call_operand.vmem [shape: f32[48,8], index: 5, kind: input, shape index: {}]   ;;  %s20694_s6 = inlined_call_operand.vmem [shape: f32[1,3072], index: 6, kind: input, shape index: {}]   ;;  %s20695_s7 = inlined_call_operand.vmem [shape: f32[3072,8], index: 7, kind: input, shape index: {}]   ;;  %s20696_s8 = inlined_call_operand.vmem [shape: f32[128,56], index: 8, kind: input, shape index: {}]   ;;  %s20697_s9 = inlined_call_operand.vmem [shape: f32[2,6,8], index: 9, kind: output, shape index: {}]  }
   0x1 LB: > { %s11784_s10 = sadd.s32 4294967295, %s13459_s30   ;;  %p11788_p0 = scmp.ge.s32.totalorder %s13459_s30, 1  ;;  %s13459_s30 = sphi %s13529_s30, %s19_s30  }
   0x2   : > { %p296_p1 = scmp.lt.s32.totalorder %s13459_s30, 3 }
   0x4   : > { %p297_p2 = pnand %p11788_p0, %p296_p1 }
   0x6   : > { %300 = sbr.rel (%p297_p2) target bundleno = 3177 (0xc69), region = 56 }
   0xd   : > { %p335_p3 = scmp.lt.s32.totalorder %s11784_s10, 1  ;;  %v20698_v0 = vmov 0   ;;  %v382_v1 = vld [vmem:[%s20693_s5] sm:$0xff]  ;;  %v383_v2 = vld [vmem:[%s20693_s5 + $0x8] sm:$0xff]  ;;  %vm519_vm0 = vcmask 130048   ;;  %v1186_v52 = vlaneseq  ;;  %s13462_s21 = smov 18  }
   0xe   : > { %555 = vmatprep.mubr.bf16.mxu0 %v20698_v0  ;;  %598 = vmatprep.mubr.bf16.mxu1 %v20698_v0  ;;  %v13565_v16 = vld [vmem:[%s20690_s2] sm:$0xff]   ;;  %s13463_s22 = smov 19   ;;  %s13464_s23 = smov 1   ;;  %v350_v62 = vld [vmem:[%s20694_s6 + $0x8] sm:$0xff] }
   0xf   : > { %s21282_s10 = smov (!%p335_p3, %s11784_s10), 1  ;;  %13364 = vset.pattern.permute.xlu0 %v20698_v0  ;;  %1625 = vrot.lane.b32.xlu1 %v20698_v0, %s13462_s21  ;;  %v1187_v53 = vshrl.u32 %v1186_v52, 7  ;;  %s13465_s24 = smov 17   ;;  %v349_v55 = vld [vmem:[%s20694_s6] sm:$0xff] }
  0x10   : > { %386 = vperm.xlu0 %13364, %v382_v1   ;;  %s13337_s15 = smul.u32 192, %s21282_s10  ;;  %s13466_s12 = smov 127  }
  0x11   : > { %v1212_v54 = vsub.s32 6, %v1187_v53  ;;  %v1208_v56 = vsub.s32 5, %v1187_v53  ;;  %v1216_v59 = vsub.s32 7, %v1187_v53  ;;  %v13634_v61 = vsub.s32 4, %v1187_v53  ;;  %s13467_s13 = smov 111   ;;  %s13468_s14 = smov 110  }
  0x12   : > { %s13552_s18 = scalar_lea.vmem %s20688_s0, %s13337_s15  ;;  %s13469_s15 = smov 109  }
  0x13   : > { %v358_v3 = vld [vmem:[%s13552_s18] sm:$0xff]  ;;  %v359_v5 = vld [vmem:[%s13552_s18 + $0x8] sm:$0xff]  ;;  %v360_v9 = vld [vmem:[%s13552_s18 + $0x10] sm:$0xff]  ;;  %1971 = vrot.lane.b32.xlu1 %v20698_v0, %s13464_s23  ;;  %v13628_v57 = vrot.slane %v349_v55, %v1212_v54  ;;  %v13630_v58 = vrot.slane %v349_v55, %v1208_v56  ;;  %v13632_v60 = vrot.slane %v349_v55, %v1216_v59  ;;  %v13640_v63 = vrot.slane %v350_v62, %v13634_v61  ;;  %s11790_s16 = sshll.u32 %s21282_s10, 1  ;;  %s11791_s20 = sshll.u32 %s21282_s10, 3 }
  0x14   : > { %v370_v4 = vld [vmem:[%s13552_s18 + $0x60] sm:$0xff]  ;;  %391 = vperm.xlu0 %13364, %v383_v2   ;;  %v371_v7 = vld [vmem:[%s13552_s18 + $0x68] sm:$0xff]  ;;  %v372_v10 = vld [vmem:[%s13552_s18 + $0x70] sm:$0xff]  ;;  %v13642_v1 = vrot.slane %v350_v62, %v1212_v54  ;;  %v13644_v2 = vrot.slane %v350_v62, %v1208_v56  ;;  %s343_s19 = scalar_lea.vmem %s20689_s1, %s11790_s16 }
  0x15   : > { %v11794_v6 = vcombine.high %v358_v3, %v370_v4  ;;  %v11793_v8 = vcombine.low %v358_v3, %v370_v4  ;;  %v11796_v11 = vcombine.high %v359_v5, %v371_v7  ;;  %v11795_v12 = vcombine.low %v359_v5, %v371_v7  ;;  %v361_v14 = vld [vmem:[%s13552_s18 + $0x18] sm:$0xff]  ;;  %v362_v18 = vld [vmem:[%s13552_s18 + $0x20] sm:$0xff]  ;;  %v363_v21 = vld [vmem:[%s13552_s18 + $0x28] sm:$0xff]  ;;  %20825 = vst [vmem:[#allocation4_spill] sm:$0xff] %v13628_v57 }
  0x16   : > { %v11798_v13 = vcombine.high %v360_v9, %v372_v10  ;;  %v373_v15 = vld [vmem:[%s13552_s18 + $0x78] sm:$0xff]  ;;  %v374_v19 = vld [vmem:[%s13552_s18 + $0x80] sm:$0xff]  ;;  %v11797_v20 = vcombine.low %v360_v9, %v372_v10  ;;  %v375_v22 = vld [vmem:[%s13552_s18 + $0x88] sm:$0xff]  ;;  %20826 = vst [vmem:[#allocation5_spill] sm:$0xff] %v13630_v58  ;;  %v13646_v3 = vrot.slane %v350_v62, %v1216_v59  ;;  %v13664_v9 = vsub.s32 0, %v1187_v53 }
  0x17   : > { %523 = vmatprep.subr.bf16.mxu0 %v11794_v6  ;;  %v11800_v17 = vcombine.high %v361_v14, %v373_v15  ;;  %566 = vmatprep.subr.bf16.mxu1 %v11796_v11  ;;  %v11799_v23 = vcombine.low %v361_v14, %v373_v15  ;;  %v11802_v24 = vcombine.high %v362_v18, %v374_v19  ;;  %v364_v26 = vld [vmem:[%s13552_s18 + $0x30] sm:$0xff]  ;;  %v365_v29 = vld [vmem:[%s13552_s18 + $0x38] sm:$0xff]  ;;  %v366_v34 = vld [vmem:[%s13552_s18 + $0x40] sm:$0xff]  ;;  %v1196_v10 = vsub.s32 2, %v1187_v53 }
  0x18   : > { %524 = vmatpush1.bf16.msra.mxu0 %v11793_v8  ;;  %567 = vmatpush1.bf16.msra.mxu1 %v11795_v12  ;;  %v11804_v25 = vcombine.high %v363_v21, %v375_v22  ;;  %v376_v27 = vld [vmem:[%s13552_s18 + $0x90] sm:$0xff]  ;;  %v11801_v28 = vcombine.low %v362_v18, %v374_v19  ;;  %v377_v30 = vld [vmem:[%s13552_s18 + $0x98] sm:$0xff]  ;;  %v11803_v31 = vcombine.low %v363_v21, %v375_v22  ;;  %v378_v35 = vld [vmem:[%s13552_s18 + $0xa0] sm:$0xff]  ;;  %v13666_v11 = vsub.s32 1, %v1187_v53 }
  0x19   : > { %609 = vmatprep.subr.bf16.mxu0 %v11798_v13  ;;  %652 = vmatprep.subr.bf16.mxu1 %v11800_v17  ;;  %v11806_v32 = vcombine.high %v364_v26, %v376_v27  ;;  %v11808_v33 = vcombine.high %v365_v29, %v377_v30  ;;  %v11805_v36 = vcombine.low %v364_v26, %v376_v27  ;;  %v367_v37 = vld [vmem:[%s13552_s18 + $0x48] sm:$0xff]  ;;  %v368_v42 = vld [vmem:[%s13552_s18 + $0x50] sm:$0xff]  ;;  %v369_v45 = vld [vmem:[%s13552_s18 + $0x58] sm:$0xff]  ;;  %v13668_v12 = vsub.s32 3, %v1187_v53 }
  0x1a   : > { %v379_v38 = vld [vmem:[%s13552_s18 + $0xa8] sm:$0xff]  ;;  %v11807_v39 = vcombine.low %v365_v29, %v377_v30  ;;  %v11810_v40 = vcombine.high %v366_v34, %v378_v35  ;;  %v380_v43 = vld [vmem:[%s13552_s18 + $0xb0] sm:$0xff]  ;;  %v11809_v44 = vcombine.low %v366_v34, %v378_v35  ;;  %v381_v46 = vld [vmem:[%s13552_s18 + $0xb8] sm:$0xff]  ;;  %1452 = vrot.lane.b32.xlu0 %v20698_v0, %s13463_s22  ;;  %20827 = vst [vmem:[#allocation6_spill] sm:$0xff] %v13632_v60 }
  0x1b   : > { %11817 = vmatmul.mubr.msk.bf16.vlgmr.msra.gmra.mrb[0].mxu0 %vm519_vm0, %v13565_v16  ;;  %11818 = vmatmul.mubr.msk.bf16.vlgmr.msra.gmra.mrb[0].mxu1 %vm519_vm0, %v13565_v16  ;;  %v11812_v41 = vcombine.high %v367_v37, %v379_v38  ;;  %v11811_v47 = vcombine.low %v367_v37, %v379_v38  ;;  %v11814_v48 = vcombine.high %v368_v42, %v380_v43  ;;  %v13651_v4 = vld [vmem:[%s20694_s6 + $0x10] sm:$0xff] }
  0x1c   : > { %610 = vmatpush1.bf16.msra.mxu0 %v11797_v20  ;;  %653 = vmatpush1.bf16.msra.mxu1 %v11799_v23  ;;  %v11816_v49 = vcombine.high %v369_v45, %v381_v46  ;;  %v11813_v50 = vcombine.low %v368_v42, %v380_v43  ;;  %v11815_v51 = vcombine.low %v369_v45, %v381_v46 }
  0x1d   : > { %641 = vmatprep.mubr.bf16.mxu0 %v20698_v0  ;;  %684 = vmatprep.mubr.bf16.mxu1 %v20698_v0  ;;  %20828 = vst [vmem:[#allocation7_spill] sm:$0xff] %v13640_v63  ;;  %20829 = vst [vmem:[#allocation8_spill] sm:$0xff] %v13642_v1  ;;  %v13654_v5 = vrot.slane %v13651_v4, %v1212_v54  ;;  %v13657_v6 = vrot.slane %v13651_v4, %v1208_v56 }
  0x1e   : > { %695 = vmatprep.subr.bf16.mxu0 %v11802_v24  ;;  %738 = vmatprep.subr.bf16.mxu1 %v11804_v25  ;;  %v13660_v7 = vrot.slane %v13651_v4, %v1216_v59  ;;  %20833 = vst [vmem:[#allocation12_spill] sm:$0xff] %v13664_v9  ;;  %20834 = vst [vmem:[#allocation13_spill] sm:$0xff] %v13666_v11  ;;  %v13671_v13 = vrot.slane %v349_v55, %v13664_v9 }
  0x1f   : > { %1798 = vrot.lane.b32.xlu0 %v20698_v0, %s13465_s24  ;;  %20830 = vst [vmem:[#allocation9_spill] sm:$0xff] %v13654_v5  ;;  %20831 = vst [vmem:[#allocation10_spill] sm:$0xff] %v13657_v6  ;;  %v13673_v14 = vrot.slane %v349_v55, %v1196_v10  ;;  %v13678_v17 = vrot.slane %v349_v55, %v13666_v11  ;;  %v13681_v18 = vrot.slane %v349_v55, %v13668_v12 }
  0x20   : > { %20832 = vst [vmem:[#allocation11_spill] sm:$0xff] %v13660_v7  ;;  %v13684_v19 = vrot.slane %v349_v55, %v13634_v61  ;;  %v13687_v20 = vrot.slane %v350_v62, %v13664_v9  ;;  %v13690_v24 = vrot.slane %v350_v62, %v1196_v10  ;;  %v13693_v25 = vrot.slane %v350_v62, %v13666_v11 }
  0x21   : > { %v13696_v26 = vrot.slane %v350_v62, %v13668_v12 }
  0x22   : > { %20835 = vst [vmem:[#allocation14_spill] sm:$0xff] %v13684_v19  ;;  %20836 = vst [vmem:[#allocation15_spill] sm:$0xff] %v13687_v20 }
  0x23   : > { %11819 = vmatmul.mubr.msk.bf16.vlgmr.msra.gmra.mrb[4].mxu0 %vm519_vm0, %v13565_v16  ;;  %11820 = vmatmul.mubr.msk.bf16.vlgmr.msra.gmra.mrb[4].mxu1 %vm519_vm0, %v13565_v16  ;;  %20837 = vst [vmem:[#allocation16_spill] sm:$0xff] %v13690_v24  ;;  %20838 = vst [vmem:[#allocation17_spill] sm:$0xff] %v13693_v25 }
  0x24   : > { %696 = vmatpush1.bf16.msra.mxu0 %v11801_v28  ;;  %739 = vmatpush1.bf16.msra.mxu1 %v11803_v31  ;;  %20839 = vst [vmem:[#allocation18_spill] sm:$0xff] %v13696_v26  ;;  %v13702_v31 = vrot.slane %v13651_v4, %v13664_v9 }
  0x25   : > { %727 = vmatprep.mubr.bf16.mxu0 %v20698_v0  ;;  %770 = vmatprep.mubr.bf16.mxu1 %v20698_v0 }
  0x26   : > { %781 = vmatprep.subr.bf16.mxu0 %v11806_v32  ;;  %824 = vmatprep.subr.bf16.mxu1 %v11808_v33  ;;  %20840 = vst [vmem:[#allocation19_spill] sm:$0xff] %v13702_v31  ;;  %v13705_v32 = vrot.slane %v13651_v4, %v1196_v10 }
  0x28   : > { %20841 = vst [vmem:[#allocation20_spill] sm:$0xff] %v13705_v32 }
  0x2b   : > { %11821 = vmatmul.mubr.msk.bf16.vlgmr.msra.gmra.mrb[8].mxu0 %vm519_vm0, %v13565_v16  ;;  %11822 = vmatmul.mubr.msk.bf16.vlgmr.msra.gmra.mrb[8].mxu1 %vm519_vm0, %v13565_v16 }
  0x2c   : > { %782 = vmatpush1.bf16.msra.mxu0 %v11805_v36  ;;  %825 = vmatpush1.bf16.msra.mxu1 %v11807_v39 }
  0x2d   : > { %813 = vmatprep.mubr.bf16.mxu0 %v20698_v0  ;;  %856 = vmatprep.mubr.bf16.mxu1 %v20698_v0 }
  0x2e   : > { %867 = vmatprep.subr.bf16.mxu0 %v11810_v40  ;;  %910 = vmatprep.subr.bf16.mxu1 %v11812_v41 }
  0x33   : > { %11823 = vmatmul.mubr.msk.bf16.vlgmr.msra.gmra.mrb[12].mxu0 %vm519_vm0, %v13565_v16  ;;  %11824 = vmatmul.mubr.msk.bf16.vlgmr.msra.gmra.mrb[12].mxu1 %vm519_vm0, %v13565_v16 }
  0x34   : > { %868 = vmatpush1.bf16.msra.mxu0 %v11809_v44  ;;  %911 = vmatpush1.bf16.msra.mxu1 %v11811_v47 }
  0x35   : > { %899 = vmatprep.mubr.bf16.mxu0 %v20698_v0  ;;  %942 = vmatprep.mubr.bf16.mxu1 %v20698_v0 }
  0x36   : > { %953 = vmatprep.subr.bf16.mxu0 %v11814_v48  ;;  %996 = vmatprep.subr.bf16.mxu1 %v11816_v49 }
  0x3b   : > { %11825 = vmatmul.mubr.msk.bf16.vlgmr.msra.gmra.mrb[16].mxu0 %vm519_vm0, %v13565_v16  ;;  %11826 = vmatmul.mubr.msk.bf16.vlgmr.msra.gmra.mrb[16].mxu1 %vm519_vm0, %v13565_v16 }
  0x3c   : > { %954 = vmatpush1.bf16.msra.mxu0 %v11813_v50  ;;  %997 = vmatpush1.bf16.msra.mxu1 %v11815_v51 }
  0x3d   : > { %985 = vmatprep.mubr.bf16.mxu0 %v20698_v0  ;;  %1028 = vmatprep.mubr.bf16.mxu1 %v20698_v0 }
  0x43   : > { %11827 = vmatmul.mubr.msk.bf16.vlgmr.msra.gmra.mrb[20].mxu0 %vm519_vm0, %v13565_v16  ;;  %11828 = vmatmul.mubr.msk.bf16.vlgmr.msra.gmra.mrb[20].mxu1 %vm519_vm0, %v13565_v16 }
  0x8f   : > { %v13662_v8 = vpop.permute.xlu0 %386 }
  0x93   : > { %v13675_v15 = vpop.permute.xlu0 %391 }
  0xee   : > { %v557_v16 = vpop.f32.mrb[0].mxu0  ;;  %v600_v22 = vpop.f32.mrb[0].mxu1 }
  0xef   : > { %v558_v21 = vadd.f32 %v557_v16, %v13662_v8  ;;  %v559_v23 = vpop.f32.mrb[1].mxu0  ;;  %v601_v27 = vadd.f32 %v600_v22, %v13662_v8  ;;  %v602_v29 = vpop.f32.mrb[1].mxu1 }
  0xf0   : > { %v560_v28 = vadd.f32 %v559_v23, %v13662_v8  ;;  %v561_v30 = vpop.f32.mrb[2].mxu0  ;;  %v603_v34 = vadd.f32 %v602_v29, %v13662_v8  ;;  %v604_v36 = vpop.f32.mrb[2].mxu1 }
  0xf1   : > { %vm1039_vm1 = vcmp.ge.f32.partialorder %v558_v21, 0.0  ;;  %v1087_v33 = vmul.f32 0.2, %v558_v21  ;;  %v562_v35 = vadd.f32 %v561_v30, %v13675_v15  ;;  %v563_v37 = vpop.f32.mrb[3].mxu0  ;;  %vm1041_vm2 = vcmp.ge.f32.partialorder %v601_v27, 0.0  ;;  %v606_v42 = vpop.f32.mrb[3].mxu1 }
  0xf2   : > { %v1089_v38 = vmul.f32 0.2, %v601_v27  ;;  %vm1040_vm3 = vcmp.ge.f32.partialorder %v560_v28, 0.0  ;;  %v1088_v39 = vmul.f32 0.2, %v560_v28  ;;  %vm1042_vm4 = vcmp.ge.f32.partialorder %v603_v34, 0.0 }
  0xf3   : > { %v1135_v40 = vsel %vm1039_vm1, %v558_v21, %v1087_v33  ;;  %v1090_v41 = vmul.f32 0.2, %v603_v34  ;;  %vm1063_vm5 = vcmp.ge.f32.partialorder %v562_v35, 0.0  ;;  %v1111_v46 = vmul.f32 0.2, %v562_v35 }
  0xf4   : > { %v1306_v43 = vmul.f32 %v13671_v13, %v1135_v40  ;;  %v1137_v44 = vsel %vm1041_vm2, %v601_v27, %v1089_v38  ;;  %v1136_v45 = vsel %vm1040_vm3, %v560_v28, %v1088_v39  ;;  %v605_v50 = vadd.f32 %v604_v36, %v13675_v15 }
  0xf5   : > { %v1308_v47 = vmul.f32 %v13673_v14, %v1137_v44  ;;  %v1307_v48 = vmul.f32 %v13678_v17, %v1136_v45  ;;  %v1138_v49 = vsel %vm1042_vm4, %v603_v34, %v1090_v41  ;;  %v1159_v52 = vsel %vm1063_vm5, %v562_v35, %v1111_v46 }
  0xf6   : > { %v1309_v51 = vmul.f32 %v13681_v18, %v1138_v49  ;;  %v564_v53 = vadd.f32 %v563_v37, %v13675_v15  ;;  %v607_v54 = vadd.f32 %v606_v42, %v13675_v15  ;;  %v643_v55 = vpop.f32.mrb[4].mxu0  ;;  %v1330_v56 = vmul.f32 %v13671_v13, %v1159_v52  ;;  %v686_v10 = vpop.f32.mrb[4].mxu1 }
  0xf7   : > { %vm1065_vm6 = vcmp.ge.f32.partialorder %v605_v50, 0.0  ;;  %v1113_v59 = vmul.f32 0.2, %v605_v50  ;;  %v644_v62 = vadd.f32 %v643_v55, %v13662_v8  ;;  %v645_v16 = vpop.f32.mrb[5].mxu0  ;;  %v688_v29 = vpop.f32.mrb[5].mxu1  ;;  %v687_v36 = vadd.f32 %v686_v10, %v13662_v8 }
  0xf8   : > { %vm1064_vm7 = vcmp.ge.f32.partialorder %v564_v53, 0.0  ;;  %v1112_v21 = vmul.f32 0.2, %v564_v53  ;;  %vm1066_vm8 = vcmp.ge.f32.partialorder %v607_v54, 0.0  ;;  %v1114_v22 = vmul.f32 0.2, %v607_v54 }
  0xf9   : > { %v13718_v23 = vpack.c.bf16 %v1330_v56, %v1306_v43  ;;  %v1161_v27 = vsel %vm1065_vm6, %v605_v50, %v1113_v59  ;;  %vm1043_vm9 = vcmp.ge.f32.partialorder %v644_v62, 0.0  ;;  %v1091_v28 = vmul.f32 0.2, %v644_v62  ;;  %v647_v30 = vpop.f32.mrb[6].mxu0  ;;  %v690_v37 = vpop.f32.mrb[6].mxu1 }
  0xfa   : > { %v1332_v33 = vmul.f32 %v13673_v14, %v1161_v27  ;;  %v1160_v34 = vsel %vm1064_vm7, %v564_v53, %v1112_v21  ;;  %v1162_v35 = vsel %vm1066_vm8, %v607_v54, %v1114_v22  ;;  %v649_v38 = vpop.f32.mrb[7].mxu0  ;;  %v646_v42 = vadd.f32 %v645_v16, %v13662_v8  ;;  %v692_v43 = vpop.f32.mrb[7].mxu1 }
  0xfb   : > { %v1331_v39 = vmul.f32 %v13678_v17, %v1160_v34  ;;  %v1333_v40 = vmul.f32 %v13681_v18, %v1162_v35  ;;  %v1139_v41 = vsel %vm1043_vm9, %v644_v62, %v1091_v28  ;;  %1454 = vrot.lane.b32.xlu1 %v13718_v23, %s13463_s22  ;;  %vm1045_vm10 = vcmp.ge.f32.partialorder %v687_v36, 0.0 }
  0xfc   : > { %v13727_v44 = vpack.c.bf16 %v1332_v33, %v1308_v47  ;;  %v1310_v45 = vmul.f32 %v13684_v19, %v1139_v41  ;;  %v1093_v46 = vmul.f32 0.2, %v687_v36  ;;  %vm1044_vm11 = vcmp.ge.f32.partialorder %v646_v42, 0.0 }
  0xfd   : > { %v13730_v49 = vpack.c.bf16 %v1331_v39, %v1307_v48  ;;  %v13732_v50 = vpack.c.bf16 %v1333_v40, %v1309_v51  ;;  %v1092_v52 = vmul.f32 0.2, %v646_v42  ;;  %v689_v54 = vadd.f32 %v688_v29, %v13662_v8 }
  0xfe   : > { %v1141_v53 = vsel %vm1045_vm10, %v687_v36, %v1093_v46  ;;  %v648_v55 = vadd.f32 %v647_v30, %v13675_v15  ;;  %v691_v56 = vadd.f32 %v690_v37, %v13675_v15  ;;  %1631 = vrot.lane.b32.xlu0 %v13727_v44, %s13462_s21  ;;  %v729_v47 = vpop.f32.mrb[8].mxu0  ;;  %v650_v48 = vadd.f32 %v649_v38, %v13675_v15  ;;  %v772_v10 = vpop.f32.mrb[8].mxu1 }
  0xff   : > { %v1312_v59 = vmul.f32 %v13628_v57, %v1141_v53  ;;  %v1140_v62 = vsel %vm1044_vm11, %v646_v42, %v1092_v52  ;;  %v693_v51 = vadd.f32 %v692_v43, %v13675_v15  ;;  %1458 = vrot.lane.b32.xlu1 %v13727_v44, %s13463_s22  ;;  %v731_v16 = vpop.f32.mrb[9].mxu0  ;;  %vm1046_vm12 = vcmp.ge.f32.partialorder %v689_v54, 0.0  ;;  %v774_v27 = vpop.f32.mrb[9].mxu1 }
 0x100   : > { %v1311_v21 = vmul.f32 %v13630_v58, %v1140_v62  ;;  %v1094_v22 = vmul.f32 0.2, %v689_v54  ;;  %vm1067_vm13 = vcmp.ge.f32.partialorder %v648_v55, 0.0  ;;  %v733_v28 = vpop.f32.mrb[10].mxu0  ;;  %v1115_v29 = vmul.f32 0.2, %v648_v55 }
 0x101   : > { %vm1069_vm14 = vcmp.ge.f32.partialorder %v691_v56, 0.0  ;;  %v1117_v30 = vmul.f32 0.2, %v691_v56  ;;  %vm1068_vm15 = vcmp.ge.f32.partialorder %v650_v48, 0.0  ;;  %v1116_v34 = vmul.f32 0.2, %v650_v48 }
 0x102   : > { %v1142_v33 = vsel %vm1046_vm12, %v689_v54, %v1094_v22  ;;  %vm1070_vm1 = vcmp.ge.f32.partialorder %v693_v51, 0.0  ;;  %v1118_v35 = vmul.f32 0.2, %v693_v51  ;;  %1800 = vrot.lane.b32.xlu0 %v13718_v23, %s13465_s24  ;;  %v776_v36 = vpop.f32.mrb[10].mxu1  ;;  %v1163_v38 = vsel %vm1067_vm13, %v648_v55, %v1115_v29  ;;  %v735_v41 = vpop.f32.mrb[11].mxu0 }
 0x103   : > { %v1313_v37 = vmul.f32 %v13632_v60, %v1142_v33  ;;  %v1165_v39 = vsel %vm1069_vm14, %v691_v56, %v1117_v30  ;;  %v730_v40 = vadd.f32 %v729_v47, %v13662_v8  ;;  %v778_v42 = vpop.f32.mrb[11].mxu1  ;;  %1627 = vrot.lane.b32.xlu1 %v13718_v23, %s13462_s21  ;;  %v1334_v43 = vmul.f32 %v13684_v19, %v1163_v38 }
 0x104   : > { %v1336_v46 = vmul.f32 %v13628_v57, %v1165_v39  ;;  %v1164_v52 = vsel %vm1068_vm15, %v650_v48, %v1116_v34  ;;  %v1166_v53 = vsel %vm1070_vm1, %v693_v51, %v1118_v35  ;;  %v773_v22 = vadd.f32 %v772_v10, %v13662_v8 }
 0x105   : > { %v1335_v54 = vmul.f32 %v13630_v58, %v1164_v52  ;;  %v1337_v62 = vmul.f32 %v13632_v60, %v1166_v53  ;;  %vm1047_vm2 = vcmp.ge.f32.partialorder %v730_v40, 0.0  ;;  %v1095_v55 = vmul.f32 0.2, %v730_v40 }
 0x106   : > { %v13756_v56 = vpack.c.bf16 %v1334_v43, %v1310_v45  ;;  %v13758_v47 = vpack.c.bf16 %v1336_v46, %v1312_v59  ;;  %v732_v29 = vadd.f32 %v731_v16, %v13662_v8  ;;  %1977 = vrot.lane.b32.xlu0 %v13727_v44, %s13464_s23  ;;  %v815_v30 = vpop.f32.mrb[12].mxu0  ;;  %v775_v34 = vadd.f32 %v774_v27, %v13662_v8  ;;  %v858_v35 = vpop.f32.mrb[12].mxu1 }
 0x107   : > { %v13764_v48 = vpack.c.bf16 %v1335_v54, %v1311_v21  ;;  %v13766_v51 = vpack.c.bf16 %v1337_v62, %v1313_v37  ;;  %v1143_v33 = vsel %vm1047_vm2, %v730_v40, %v1095_v55  ;;  %1804 = vrot.lane.b32.xlu1 %v13727_v44, %s13465_s24  ;;  %v817_v45 = vpop.f32.mrb[13].mxu0  ;;  %vm1049_vm3 = vcmp.ge.f32.partialorder %v773_v22, 0.0  ;;  %v13772_v16 = vpop.f32.mrb[13].mxu1 }
 0x108   : > { %v1314_v59 = vmul.f32 %v13687_v20, %v1143_v33  ;;  %v1097_v10 = vmul.f32 0.2, %v773_v22  ;;  %vm1048_vm4 = vcmp.ge.f32.partialorder %v732_v29, 0.0  ;;  %v13774_v38 = vpop.f32.mrb[14].mxu0  ;;  %v1096_v21 = vmul.f32 0.2, %v732_v29 }
 0x109   : > { %vm1050_vm5 = vcmp.ge.f32.partialorder %v775_v34, 0.0  ;;  %v1098_v37 = vmul.f32 0.2, %v775_v34  ;;  %v734_v39 = vadd.f32 %v733_v28, %v13675_v15  ;;  %v862_v27 = vpop.f32.mrb[14].mxu1  ;;  %v777_v43 = vadd.f32 %v776_v36, %v13675_v15  ;;  %v13782_v53 = vpop.f32.mrb[15].mxu0 }
 0x10a   : > { %v1145_v40 = vsel %vm1049_vm3, %v773_v22, %v1097_v10  ;;  %v736_v46 = vadd.f32 %v735_v41, %v13675_v15  ;;  %v779_v52 = vadd.f32 %v778_v42, %v13675_v15  ;;  %2192 = vrot.lane.b32.xlu0 %v13718_v23, %s13466_s12  ;;  %v13784_v54 = vpop.f32.mrb[15].mxu1  ;;  %v1144_v28 = vsel %vm1048_vm4, %v732_v29, %v1096_v21 }
 0x10b   : > { %v1316_v62 = vmul.f32 %v13690_v24, %v1145_v40  ;;  %v1146_v55 = vsel %vm1050_vm5, %v775_v34, %v1098_v37  ;;  %vm1071_vm6 = vcmp.ge.f32.partialorder %v734_v39, 0.0  ;;  %1973 = vrot.lane.b32.xlu1 %v13718_v23, %s13464_s23  ;;  %v1315_v36 = vmul.f32 %v13693_v25, %v1144_v28 }
 0x10c   : > { %v1317_v41 = vmul.f32 %v13696_v26, %v1146_v55  ;;  %v1119_v42 = vmul.f32 0.2, %v734_v39  ;;  %vm1073_vm7 = vcmp.ge.f32.partialorder %v777_v43, 0.0  ;;  %v1121_v22 = vmul.f32 0.2, %v777_v43 }
 0x10d   : > { %vm1072_vm8 = vcmp.ge.f32.partialorder %v736_v46, 0.0  ;;  %v1120_v33 = vmul.f32 0.2, %v736_v46  ;;  %vm1074_vm9 = vcmp.ge.f32.partialorder %v779_v52, 0.0  ;;  %v1122_v0 = vmul.f32 0.2, %v779_v52 }
 0x10e   : > { %v1167_v10 = vsel %vm1071_vm6, %v734_v39, %v1119_v42  ;;  %v816_v40 = vadd.f32 %v815_v30, %v13662_v8  ;;  %v859_v29 = vadd.f32 %v858_v35, %v13662_v8  ;;  %2369 = vrot.lane.b32.xlu0 %v13727_v44, %s13467_s13  ;;  %v901_v34 = vpop.f32.mrb[16].mxu0  ;;  %v1169_v37 = vsel %vm1073_vm7, %v777_v43, %v1121_v22  ;;  %v944_v9 = vpop.f32.mrb[16].mxu1 }
 0x10f   : > { %v1338_v21 = vmul.f32 %v13687_v20, %v1167_v10  ;;  %v1168_v28 = vsel %vm1072_vm8, %v736_v46, %v1120_v33  ;;  %v818_v55 = vadd.f32 %v817_v45, %v13662_v8  ;;  %2196 = vrot.lane.b32.xlu1 %v13727_v44, %s13466_s12  ;;  %v13800_v39 = vpop.f32.mrb[17].mxu0  ;;  %v1340_v30 = vmul.f32 %v13690_v24, %v1169_v37  ;;  %v13805_v60 = vpop.f32.mrb[17].mxu1 }
 0x110   : > { %v1339_v35 = vmul.f32 %v13693_v25, %v1168_v28  ;;  %v1170_v42 = vsel %vm1074_vm9, %v779_v52, %v1122_v0  ;;  %vm1051_vm10 = vcmp.ge.f32.partialorder %v816_v40, 0.0  ;;  %v13807_v10 = vpop.f32.mrb[18].mxu0  ;;  %v1099_v46 = vmul.f32 0.2, %v816_v40  ;;  %v13812_v22 = vpop.f32.mrb[18].mxu1 }
 0x111   : > { %v13809_v43 = vpack.c.bf16 %v1338_v21, %v1314_v59  ;;  %v1341_v45 = vmul.f32 %v13696_v26, %v1170_v42  ;;  %vm1053_vm11 = vcmp.ge.f32.partialorder %v859_v29, 0.0  ;;  %v13814_v33 = vpop.f32.mrb[19].mxu0  ;;  %v13816_v37 = vpack.c.bf16 %v1340_v30, %v1316_v62  ;;  %v13822_v59 = vpop.f32.mrb[19].mxu1 }
 0x112   : > { %v13818_v28 = vpack.c.bf16 %v1339_v35, %v1315_v36  ;;  %v1101_v0 = vmul.f32 0.2, %v859_v29  ;;  %vm1052_vm12 = vcmp.ge.f32.partialorder %v818_v55, 0.0  ;;  %2538 = vrot.lane.b32.xlu0 %v13718_v23, %s13468_s14  ;;  %v1147_v21 = vsel %vm1051_vm10, %v816_v40, %v1099_v46 }
 0x113   : > { %v13824_v52 = vpack.c.bf16 %v1341_v45, %v1317_v41  ;;  %v1100_v42 = vmul.f32 0.2, %v818_v55  ;;  %v861_v26 = vadd.f32 %v13772_v16, %v13662_v8  ;;  %2365 = vrot.lane.b32.xlu1 %v13718_v23, %s13467_s13  ;;  %v820_v36 = vadd.f32 %v13774_v38, %v13675_v15 }
 0x114   : > { %v1149_v62 = vsel %vm1053_vm11, %v859_v29, %v1101_v0  ;;  %v863_v30 = vadd.f32 %v862_v27, %v13675_v15  ;;  %v13836_v35 = vrot.slane %v13651_v4, %v13666_v11  ;;  %v1318_v41 = vmul.f32 %v13640_v63, %v1147_v21 }
 0x115   : > { %v1148_v40 = vsel %vm1052_vm12, %v818_v55, %v1100_v42  ;;  %vm1054_vm13 = vcmp.ge.f32.partialorder %v861_v26, 0.0  ;;  %v1102_v45 = vmul.f32 0.2, %v861_v26  ;;  %v1320_v16 = vmul.f32 %v13642_v1, %v1149_v62 }
 0x116   : > { %20842 = vst [vmem:[#allocation21_spill] sm:$0xff] %v13836_v35  ;;  %vm1075_vm14 = vcmp.ge.f32.partialorder %v820_v36, 0.0  ;;  %v1123_v46 = vmul.f32 0.2, %v820_v36  ;;  %vm1077_vm15 = vcmp.ge.f32.partialorder %v863_v30, 0.0  ;;  %2715 = vrot.lane.b32.xlu0 %v13727_v44, %s13469_s15  ;;  %v13842_v38 = vpop.f32.mrb[20].mxu0  ;;  %v1319_v27 = vmul.f32 %v13644_v2, %v1148_v40 }
 0x117   : > { %v1125_v29 = vmul.f32 0.2, %v863_v30  ;;  %v822_v0 = vadd.f32 %v13782_v53, %v13675_v15  ;;  %v865_v55 = vadd.f32 %v13784_v54, %v13675_v15  ;;  %v13849_v21 = vpop.f32.mrb[20].mxu1  ;;  %2542 = vrot.lane.b32.xlu1 %v13727_v44, %s13468_s14  ;;  %v13853_v42 = vpop.f32.mrb[21].mxu0  ;;  %v1150_v62 = vsel %vm1054_vm13, %v861_v26, %v1102_v45 }
 0x118   : > { %v1171_v11 = vsel %vm1075_vm14, %v820_v36, %v1123_v46  ;;  %v902_v24 = vadd.f32 %v901_v34, %v13662_v8  ;;  %v945_v40 = vadd.f32 %v944_v9, %v13662_v8  ;;  %v13858_v25 = vpop.f32.mrb[21].mxu1  ;;  %v13860_v53 = vpop.f32.mrb[22].mxu0 }
 0x119   : > { %v1342_v54 = vmul.f32 %v13640_v63, %v1171_v11  ;;  %v1173_v20 = vsel %vm1077_vm15, %v863_v30, %v1125_v29  ;;  %vm1076_vm1 = vcmp.ge.f32.partialorder %v822_v0, 0.0  ;;  %v1124_v57 = vmul.f32 0.2, %v822_v0  ;;  %v13864_v58 = vpop.f32.mrb[22].mxu1  ;;  %v13866_v19 = vpop.f32.mrb[23].mxu0 }
 0x11a   : > { %v1344_v26 = vmul.f32 %v13642_v1, %v1173_v20  ;;  %vm1078_vm2 = vcmp.ge.f32.partialorder %v865_v55, 0.0  ;;  %v1126_v34 = vmul.f32 0.2, %v865_v55  ;;  %vm1055_vm3 = vcmp.ge.f32.partialorder %v902_v24, 0.0  ;;  %1460 = vrot.lane.b32.xlu0 %v13732_v50, %s13463_s22  ;;  %v13871_v9 = vpop.f32.mrb[23].mxu1 }
 0x11b   : > { %v13873_v36 = vpack.c.bf16 %v1342_v54, %v1318_v41  ;;  %v1172_v11 = vsel %vm1076_vm1, %v822_v0, %v1124_v57  ;;  %v1103_v30 = vmul.f32 0.2, %v902_v24  ;;  %vm1057_vm4 = vcmp.ge.f32.partialorder %v945_v40, 0.0  ;;  %2711 = vrot.lane.b32.xlu1 %v13718_v23, %s13469_s15 }
 0x11c   : > { %v13877_v45 = vpack.c.bf16 %v1344_v26, %v1320_v16  ;;  %v1343_v20 = vmul.f32 %v13644_v2, %v1172_v11  ;;  %v1174_v46 = vsel %vm1078_vm2, %v865_v55, %v1126_v34  ;;  %v1105_v29 = vmul.f32 0.2, %v945_v40 }
 0x11d   : > { %v1321_v1 = vmul.f32 %v13646_v3, %v1150_v62  ;;  %v1345_v63 = vmul.f32 %v13646_v3, %v1174_v46  ;;  %v904_v41 = vadd.f32 %v13800_v39, %v13662_v8  ;;  %v947_v57 = vadd.f32 %v13805_v60, %v13662_v8 }
 0x11e   : > { %v13886_v0 = vpack.c.bf16 %v1343_v20, %v1319_v27  ;;  %v1151_v54 = vsel %vm1055_vm3, %v902_v24, %v1103_v30  ;;  %v13891_v16 = vrot.slane %v13651_v4, %v13668_v12  ;;  %v906_v55 = vadd.f32 %v13807_v10, %v13675_v15  ;;  %1629 = vrot.lane.b32.xlu0 %v13730_v49, %s13462_s21 }
 0x11f   : > { %v13897_v62 = vpack.c.bf16 %v1345_v63, %v1321_v1  ;;  %v1153_v39 = vsel %vm1057_vm4, %v945_v40, %v1105_v29  ;;  %vm1056_vm5 = vcmp.ge.f32.partialorder %v904_v41, 0.0  ;;  %v1104_v60 = vmul.f32 0.2, %v904_v41  ;;  %1456 = vrot.lane.b32.xlu1 %v13730_v49, %s13463_s22 }
 0x120   : > { %20843 = vst [vmem:[#allocation22_spill] sm:$0xff] %v13891_v16  ;;  %vm1058_vm6 = vcmp.ge.f32.partialorder %v947_v57, 0.0  ;;  %v1106_v24 = vmul.f32 0.2, %v947_v57  ;;  %vm1079_vm7 = vcmp.ge.f32.partialorder %v906_v55, 0.0  ;;  %v1322_v27 = vmul.f32 %v13702_v31, %v1151_v54 }
 0x121   : > { %v1127_v12 = vmul.f32 0.2, %v906_v55  ;;  %v949_v10 = vadd.f32 %v13812_v22, %v13675_v15  ;;  %v908_v63 = vadd.f32 %v13814_v33, %v13675_v15  ;;  %v951_v1 = vadd.f32 %v13822_v59, %v13675_v15 }
 0x122   : > { %v1324_v40 = vmul.f32 %v13705_v32, %v1153_v39  ;;  %v1152_v26 = vsel %vm1056_vm5, %v904_v41, %v1104_v60  ;;  %v1154_v34 = vsel %vm1058_vm6, %v947_v57, %v1106_v24  ;;  %1806 = vrot.lane.b32.xlu0 %v13732_v50, %s13465_s24  ;;  %v988_v22 = vadd.f32 %v13842_v38, %v13662_v8 }
 0x123   : > { %v1175_v11 = vsel %vm1079_vm7, %v906_v55, %v1127_v12  ;;  %vm1081_vm8 = vcmp.ge.f32.partialorder %v949_v10, 0.0  ;;  %v1129_v20 = vmul.f32 0.2, %v949_v10  ;;  %1633 = vrot.lane.b32.xlu1 %v13732_v50, %s13462_s21  ;;  %vm1080_vm9 = vcmp.ge.f32.partialorder %v908_v63, 0.0 }
 0x124   : > { %v1346_v30 = vmul.f32 %v13702_v31, %v1175_v11  ;;  %v1128_v33 = vmul.f32 0.2, %v908_v63  ;;  %vm1082_vm10 = vcmp.ge.f32.partialorder %v951_v1, 0.0  ;;  %v1130_v59 = vmul.f32 0.2, %v951_v1 }
 0x125   : > { %v1323_v46 = vmul.f32 %v13836_v35, %v1152_v26  ;;  %v1325_v29 = vmul.f32 %v13891_v16, %v1154_v34  ;;  %v1177_v57 = vsel %vm1081_vm8, %v949_v10, %v1129_v20  ;;  %v1031_v38 = vadd.f32 %v13849_v21, %v13662_v8 }
 0x126   : > { %v13919_v41 = vpack.c.bf16 %v1346_v30, %v1322_v27  ;;  %v1348_v54 = vmul.f32 %v13705_v32, %v1177_v57  ;;  %v1176_v55 = vsel %vm1080_vm9, %v908_v63, %v1128_v33  ;;  %v1178_v39 = vsel %vm1082_vm10, %v951_v1, %v1130_v59  ;;  %1975 = vrot.lane.b32.xlu0 %v13730_v49, %s13464_s23 }
 0x127   : > { %v1347_v60 = vmul.f32 %v13836_v35, %v1176_v55  ;;  %v1349_v24 = vmul.f32 %v13891_v16, %v1178_v39  ;;  %v1107_v12 = vmul.f32 0.2, %v988_v22  ;;  %v990_v27 = vadd.f32 %v13853_v42, %v13662_v8  ;;  %1802 = vrot.lane.b32.xlu1 %v13730_v49, %s13465_s24 }
 0x128   : > { %v13932_v10 = vpack.c.bf16 %v1348_v54, %v1324_v40  ;;  %vm1059_vm11 = vcmp.ge.f32.partialorder %v988_v22, 0.0  ;;  %vm1061_vm12 = vcmp.ge.f32.partialorder %v1031_v38, 0.0  ;;  %v1109_v63 = vmul.f32 0.2, %v1031_v38 }
 0x129   : > { %v13934_v21 = vpack.c.bf16 %v1347_v60, %v1323_v46  ;;  %v13936_v1 = vpack.c.bf16 %v1349_v24, %v1325_v29  ;;  %vm1060_vm13 = vcmp.ge.f32.partialorder %v990_v27, 0.0  ;;  %v1108_v26 = vmul.f32 0.2, %v990_v27 }
 0x12a   : > { %v13940_v34 = vrot.slane %v13651_v4, %v13634_v61  ;;  %v1033_v42 = vadd.f32 %v13858_v25, %v13662_v8  ;;  %v992_v40 = vadd.f32 %v13860_v53, %v13675_v15  ;;  %v1035_v11 = vadd.f32 %v13864_v58, %v13675_v15  ;;  %2194 = vrot.lane.b32.xlu0 %v13730_v49, %s13466_s12 }
 0x12b   : > { %v1155_v30 = vsel %vm1059_vm11, %v988_v22, %v1107_v12  ;;  %v1157_v20 = vsel %vm1061_vm12, %v1031_v38, %v1109_v63  ;;  %v994_v33 = vadd.f32 %v13866_v19, %v13675_v15  ;;  %v1037_v61 = vadd.f32 %v13871_v9, %v13675_v15  ;;  %1979 = vrot.lane.b32.xlu1 %v13732_v50, %s13464_s23 }
 0x12c   : > { %20844 = vst [vmem:[#allocation23_spill] sm:$0xff] %v13940_v34  ;;  %v1156_v4 = vsel %vm1060_vm13, %v990_v27, %v1108_v26  ;;  %vm1062_vm14 = vcmp.ge.f32.partialorder %v1033_v42, 0.0  ;;  %v1110_v8 = vmul.f32 0.2, %v1033_v42  ;;  %vm1083_vm15 = vcmp.ge.f32.partialorder %v992_v40, 0.0 }
 0x12d   : > { %v1131_v25 = vmul.f32 0.2, %v992_v40  ;;  %vm1085_vm1 = vcmp.ge.f32.partialorder %v1035_v11, 0.0  ;;  %v1133_v58 = vmul.f32 0.2, %v1035_v11  ;;  %vm1084_vm2 = vcmp.ge.f32.partialorder %v994_v33, 0.0 }
 0x12e   : > { %v1158_v53 = vsel %vm1062_vm14, %v1033_v42, %v1110_v8  ;;  %v1132_v22 = vmul.f32 0.2, %v994_v33  ;;  %vm1086_vm3 = vcmp.ge.f32.partialorder %v1037_v61, 0.0  ;;  %v1134_v59 = vmul.f32 0.2, %v1037_v61  ;;  %2371 = vrot.lane.b32.xlu0 %v13732_v50, %s13467_s13 }
 0x12f   : > { %v1326_v15 = vmul.f32 %v13940_v34, %v1155_v30  ;;  %v1328_v19 = vmul.f32 %v13654_v5, %v1157_v20  ;;  %v1179_v9 = vsel %vm1083_vm15, %v992_v40, %v1131_v25  ;;  %v1181_v46 = vsel %vm1085_vm1, %v1035_v11, %v1133_v58  ;;  %2198 = vrot.lane.b32.xlu1 %v13732_v50, %s13466_s12  ;;  %v13987_v42 = vld [vmem:[%s20691_s3 + $0x4] ss:$8 sps:$4 sm:$0xff]   ;;  %v14033_v40 = vpop.permute.xlu1 %1625  ;;  %v1453_v11 = vpop.permute.xlu0 %1452 }
 0x130   : > { %v1350_v29 = vmul.f32 %v13940_v34, %v1179_v9  ;;  %v1352_v57 = vmul.f32 %v13654_v5, %v1181_v46  ;;  %v1180_v54 = vsel %vm1084_vm2, %v994_v33, %v1132_v22  ;;  %v1182_v55 = vsel %vm1086_vm3, %v1037_v61, %v1134_v59  ;;  %11833 = vmatprep.mubr.msk.bf16.mxu0 %vm519_vm0, %v13987_v42 }
 0x131   : > { %v1327_v39 = vmul.f32 %v13657_v6, %v1156_v4  ;;  %v1329_v38 = vmul.f32 %v13660_v7, %v1158_v53  ;;  %v1351_v60 = vmul.f32 %v13657_v6, %v1180_v54  ;;  %v1353_v24 = vmul.f32 %v13660_v7, %v1182_v55  ;;  %11835 = vmatprep.mubr.msk.bf16.mxu1 %vm519_vm0, %v13987_v42 }
 0x132   : > { %v13968_v12 = vpack.c.bf16 %v1350_v29, %v1326_v15  ;;  %v13970_v27 = vpack.c.bf16 %v1352_v57, %v1328_v19  ;;  %2540 = vrot.lane.b32.xlu0 %v13730_v49, %s13468_s14  ;;  %v13470_v9 = vmov 1   ;;  %vm1502_vm4 = vcmask 154624  }
 0x133   : > { %v13974_v63 = vpack.c.bf16 %v1351_v60, %v1327_v39  ;;  %v13976_v26 = vpack.c.bf16 %v1353_v24, %v1329_v38  ;;  %2367 = vrot.lane.b32.xlu1 %v13730_v49, %s13467_s13  ;;  %v14043_v30 = vpop.permute.xlu1 %1971  ;;  %v14047_v20 = vpop.permute.xlu0 %1798  ;;  %13365 = vset.pattern.permute.xlu0 %v13470_v9  ;;  %vm1675_vm5 = vcmask 146432   ;;  %vm1848_vm6 = vcmask 138240  }
 0x134   : > { %13366 = vset.pattern.permute.xlu1 %v13470_v9  ;;  %vm2021_vm7 = vcmask 7168   ;;  %vm2242_vm8 = vcmask 1039360   ;;  %vm2415_vm9 = vcmask 908288   ;;  %vm2588_vm10 = vcmask 900096  }
 0x135   : > { %vm2761_vm11 = vcmask 891904  }
 0x136   : > { %2717 = vrot.lane.b32.xlu0 %v13732_v50, %s13469_s15 }
 0x137   : > { %2544 = vrot.lane.b32.xlu1 %v13732_v50, %s13468_s14 }
 0x13a   : > { %2200 = vrot.lane.b32.xlu0 %v13756_v56, %s13466_s12 }
 0x13b   : > { %2713 = vrot.lane.b32.xlu1 %v13730_v49, %s13469_s15 }
 0x13e   : > { %2546 = vrot.lane.b32.xlu0 %v13756_v56, %s13468_s14 }
 0x13f   : > { %2373 = vrot.lane.b32.xlu1 %v13756_v56, %s13467_s13 }
 0x142   : > { %1462 = vrot.lane.b32.xlu0 %v13756_v56, %s13463_s22 }
 0x143   : > { %2719 = vrot.lane.b32.xlu1 %v13756_v56, %s13469_s15 }
 0x146   : > { %1635 = vrot.lane.b32.xlu0 %v13756_v56, %s13462_s21 }
 0x147   : > { %2204 = vrot.lane.b32.xlu1 %v13758_v47, %s13466_s12 }
 0x14a   : > { %1808 = vrot.lane.b32.xlu0 %v13756_v56, %s13465_s24 }
 0x14b   : > { %2377 = vrot.lane.b32.xlu1 %v13758_v47, %s13467_s13 }
 0x14e   : > { %1981 = vrot.lane.b32.xlu0 %v13756_v56, %s13464_s23 }
 0x14f   : > { %2550 = vrot.lane.b32.xlu1 %v13758_v47, %s13468_s14 }
 0x152   : > { %1466 = vrot.lane.b32.xlu0 %v13758_v47, %s13463_s22 }
 0x153   : > { %2723 = vrot.lane.b32.xlu1 %v13758_v47, %s13469_s15 }
 0x156   : > { %1639 = vrot.lane.b32.xlu0 %v13758_v47, %s13462_s21 }
 0x157   : > { %1464 = vrot.lane.b32.xlu1 %v13764_v48, %s13463_s22 }
 0x15a   : > { %1812 = vrot.lane.b32.xlu0 %v13758_v47, %s13465_s24 }
 0x15b   : > { %1637 = vrot.lane.b32.xlu1 %v13764_v48, %s13462_s21 }
 0x15e   : > { %1985 = vrot.lane.b32.xlu0 %v13758_v47, %s13464_s23 }
 0x15f   : > { %1810 = vrot.lane.b32.xlu1 %v13764_v48, %s13465_s24 }
 0x162   : > { %2202 = vrot.lane.b32.xlu0 %v13764_v48, %s13466_s12 }
 0x163   : > { %1983 = vrot.lane.b32.xlu1 %v13764_v48, %s13464_s23 }
 0x166   : > { %2375 = vrot.lane.b32.xlu0 %v13764_v48, %s13467_s13 }
 0x167   : > { %1468 = vrot.lane.b32.xlu1 %v13766_v51, %s13463_s22 }
 0x16a   : > { %2548 = vrot.lane.b32.xlu0 %v13764_v48, %s13468_s14 }
 0x16b   : > { %1641 = vrot.lane.b32.xlu1 %v13766_v51, %s13462_s21 }
 0x16d   : > { %v1455_v33 = vpop.permute.xlu1 %1454 }
 0x16e   : > { %2721 = vrot.lane.b32.xlu0 %v13764_v48, %s13469_s15  ;;  %v1503_v5 = vsel %vm1502_vm4, %v1453_v11, %v1455_v33 }
 0x16f   : > { %1814 = vrot.lane.b32.xlu1 %v13766_v51, %s13465_s24 }
 0x170   : > { %v1632_v61 = vpop.permute.xlu0 %1631 }
 0x171   : > { %v1459_v4 = vpop.permute.xlu1 %1458 }
 0x172   : > { %2206 = vrot.lane.b32.xlu0 %v13766_v51, %s13466_s12 }
 0x173   : > { %1987 = vrot.lane.b32.xlu1 %v13766_v51, %s13464_s23 }
 0x174   : > { %v14059_v8 = vpop.permute.xlu0 %1800 }
 0x175   : > { %v1628_v25 = vpop.permute.xlu1 %1627 }
 0x176   : > { %2379 = vrot.lane.b32.xlu0 %v13766_v51, %s13467_s13  ;;  %v1676_v11 = vsel %vm1675_vm5, %v14033_v40, %v1628_v25  ;;  %v1849_v40 = vsel %vm1848_vm6, %v14047_v20, %v14059_v8 }
 0x177   : > { %2208 = vrot.lane.b32.xlu1 %v13809_v43, %s13466_s12 }
 0x178   : > { %v14065_v58 = vpop.permute.xlu0 %1977 }
 0x179   : > { %v1805_v53 = vpop.permute.xlu1 %1804 }
 0x17a   : > { %2552 = vrot.lane.b32.xlu0 %v13766_v51, %s13468_s14 }
 0x17b   : > { %2381 = vrot.lane.b32.xlu1 %v13809_v43, %s13467_s13 }
 0x17c   : > { %v14071_v22 = vpop.permute.xlu0 %2192 }
 0x17d   : > { %v14073_v59 = vpop.permute.xlu1 %1973 }
 0x17e   : > { %2725 = vrot.lane.b32.xlu0 %v13766_v51, %s13469_s15  ;;  %v2022_v20 = vsel %vm2021_vm7, %v14043_v30, %v14073_v59 }
 0x17f   : > { %2554 = vrot.lane.b32.xlu1 %v13809_v43, %s13468_s14 }
 0x180   : > { %v14079_v15 = vpop.permute.xlu0 %2369 }
 0x181   : > { %v14081_v19 = vpop.permute.xlu1 %2196 }
 0x182   : > { %1470 = vrot.lane.b32.xlu0 %v13809_v43, %s13463_s22 }
 0x183   : > { %2727 = vrot.lane.b32.xlu1 %v13809_v43, %s13469_s15 }
 0x184   : > { %v14087_v46 = vpop.permute.xlu0 %2538 }
 0x185   : > { %v14089_v29 = vpop.permute.xlu1 %2365 }
 0x186   : > { %1643 = vrot.lane.b32.xlu0 %v13809_v43, %s13462_s21 }
 0x187   : > { %2212 = vrot.lane.b32.xlu1 %v13816_v37, %s13466_s12 }
 0x188   : > { %v14095_v57 = vpop.permute.xlu0 %2715 }
 0x189   : > { %v14097_v54 = vpop.permute.xlu1 %2542 }
 0x18a   : > { %1816 = vrot.lane.b32.xlu0 %v13809_v43, %s13465_s24 }
 0x18b   : > { %2385 = vrot.lane.b32.xlu1 %v13816_v37, %s13467_s13 }
 0x18c   : > { %v14103_v55 = vpop.permute.xlu0 %1460 }
 0x18d   : > { %v1506_v39 = vsel %vm1502_vm4, %v1459_v4, %v14103_v55  ;;  %v14107_v38 = vpop.permute.xlu1 %2711 }
 0x18e   : > { %1989 = vrot.lane.b32.xlu0 %v13809_v43, %s13464_s23  ;;  %3155 = vmatprep.subr.bf16.mxu1 %v1506_v39 }
 0x18f   : > { %2558 = vrot.lane.b32.xlu1 %v13816_v37, %s13468_s14 }
 0x190   : > { %v1630_v60 = vpop.permute.xlu0 %1629 }
 0x191   : > { %v1457_v24 = vpop.permute.xlu1 %1456  ;;  %v1677_v6 = vsel %vm1675_vm5, %v1628_v25, %v1630_v60 }
 0x192   : > { %1474 = vrot.lane.b32.xlu0 %v13816_v37, %s13463_s22  ;;  %v1504_v9 = vsel %vm1502_vm4, %v1455_v33, %v1457_v24  ;;  %v1505_v7 = vsel %vm1502_vm4, %v1457_v24, %v1459_v4 }
 0x193   : > { %2731 = vrot.lane.b32.xlu1 %v13816_v37, %s13469_s15  ;;  %3102 = vmatprep.subr.bf16.mxu0 %v1504_v9 }
 0x194   : > { %v14120_v39 = vpop.permute.xlu0 %1806  ;;  %3156 = vmatpush1.bf16.msra.mxu1 %v1505_v7  ;;  %3103 = vmatpush1.bf16.msra.mxu0 %v1503_v5  ;;  %v1678_v5 = vsel %vm1675_vm5, %v1630_v60, %v1632_v61 }
 0x195   : > { %3104 = vmatprep.subr.bf16.mxu0 %v1677_v6  ;;  %v14123_v34 = vpop.permute.xlu1 %1633  ;;  %v1852_v6 = vsel %vm1848_vm6, %v1805_v53, %v14120_v39 }
 0x196   : > { %1647 = vrot.lane.b32.xlu0 %v13816_v37, %s13462_s21  ;;  %v1679_v4 = vsel %vm1675_vm5, %v1632_v61, %v14123_v34 }
 0x197   : > { %1472 = vrot.lane.b32.xlu1 %v13818_v28, %s13463_s22  ;;  %3157 = vmatprep.subr.bf16.mxu1 %v1679_v4 }
 0x198   : > { %v1976_v7 = vpop.permute.xlu0 %1975  ;;  %3105 = vmatpush1.bf16.msra.mxu0 %v1676_v11  ;;  %3158 = vmatpush1.bf16.msra.mxu1 %v1678_v5 }
 0x199   : > { %3159 = vmatprep.subr.bf16.mxu1 %v1852_v6  ;;  %v1803_v33 = vpop.permute.xlu1 %1802  ;;  %v2023_v25 = vsel %vm2021_vm7, %v14073_v59, %v1976_v7 }
 0x19a   : > { %1820 = vrot.lane.b32.xlu0 %v13816_v37, %s13465_s24  ;;  %v1850_v24 = vsel %vm1848_vm6, %v14059_v8, %v1803_v33  ;;  %v1851_v9 = vsel %vm1848_vm6, %v1803_v33, %v1805_v53  ;;  %v2024_v8 = vsel %vm2021_vm7, %v1976_v7, %v14065_v58 }
 0x19b   : > { %1645 = vrot.lane.b32.xlu1 %v13818_v28, %s13462_s21  ;;  %3106 = vmatprep.subr.bf16.mxu0 %v1850_v24 }
 0x19c   : > { %v2195_v61 = vpop.permute.xlu0 %2194  ;;  %3107 = vmatpush1.bf16.msra.mxu0 %v1849_v40  ;;  %3160 = vmatpush1.bf16.msra.mxu1 %v1851_v9 }
 0x19d   : > { %3108 = vmatprep.subr.bf16.mxu0 %v2023_v25  ;;  %v14148_v60 = vpop.permute.xlu1 %1979  ;;  %v2244_v30 = vsel %vm2242_vm8, %v2195_v61, %v14081_v19 }
 0x19e   : > { %1993 = vrot.lane.b32.xlu0 %v13816_v37, %s13464_s23  ;;  %v2025_v53 = vsel %vm2021_vm7, %v14065_v58, %v14148_v60 }
 0x19f   : > { %1818 = vrot.lane.b32.xlu1 %v13818_v28, %s13465_s24  ;;  %3161 = vmatprep.subr.bf16.mxu1 %v2025_v53  ;;  %v14219_v53 = vld [vmem:[%s20691_s3] ss:$8 sps:$4 sm:$0xff]  }
 0x1a0   : > { %v2372_v4 = vpop.permute.xlu0 %2371  ;;  %3109 = vmatpush1.bf16.msra.mxu0 %v2022_v20  ;;  %3162 = vmatpush1.bf16.msra.mxu1 %v2024_v8 }
 0x1a1   : > { %3110 = vmatprep.subr.bf16.mxu0 %v13730_v49  ;;  %3163 = vmatprep.subr.bf16.mxu1 %v13732_v50  ;;  %v2199_v11 = vpop.permute.xlu1 %2198  ;;  %v2243_v50 = vsel %vm2242_vm8, %v14071_v22, %v2195_v61  ;;  %v2418_v25 = vsel %vm2415_vm9, %v14079_v15, %v2372_v4 }
 0x1a2   : > { %2210 = vrot.lane.b32.xlu0 %v13818_v28, %s13466_s12  ;;  %v2245_v24 = vsel %vm2242_vm8, %v14081_v19, %v2199_v11 }
 0x1a3   : > { %1991 = vrot.lane.b32.xlu1 %v13818_v28, %s13464_s23 }
 0x1a4   : > { %v2541_v5 = vpop.permute.xlu0 %2540  ;;  %3111 = vmatpush1.bf16.msra.mxu0 %v13718_v23  ;;  %3164 = vmatpush1.bf16.msra.mxu1 %v13727_v44 }
 0x1a5   : > { %3112 = vmatprep.subr.bf16.mxu0 %v2244_v30  ;;  %v2368_v49 = vpop.permute.xlu1 %2367  ;;  %v2590_v22 = vsel %vm2588_vm10, %v2541_v5, %v14097_v54 }
 0x1a6   : > { %2383 = vrot.lane.b32.xlu0 %v13818_v28, %s13467_s13  ;;  %v2417_v23 = vsel %vm2415_vm9, %v2368_v49, %v14079_v15  ;;  %v2416_v59 = vsel %vm2415_vm9, %v14089_v29, %v2368_v49  ;;  %v2589_v29 = vsel %vm2588_vm10, %v14087_v46, %v2541_v5  ;;  %v14252_v49 = vld [vmem:[%s20691_s3 + $0x10] ss:$8 sps:$4 sm:$0xff]  }
 0x1a7   : > { %1476 = vrot.lane.b32.xlu1 %v13824_v52, %s13463_s22 }
 0x1a8   : > { %v2718_v58 = vpop.permute.xlu0 %2717  ;;  %3113 = vmatpush1.bf16.msra.mxu0 %v2243_v50 }
 0x1a9   : > { %3114 = vmatprep.subr.bf16.mxu0 %v2417_v23  ;;  %v2545_v44 = vpop.permute.xlu1 %2544 }
 0x1aa   : > { %2556 = vrot.lane.b32.xlu0 %v13818_v28, %s13468_s14  ;;  %v2591_v15 = vsel %vm2588_vm10, %v14097_v54, %v2545_v44  ;;  %v2764_v54 = vsel %vm2761_vm11, %v14095_v57, %v2718_v58 }
 0x1ab   : > { %1649 = vrot.lane.b32.xlu1 %v13824_v52, %s13462_s21 }
 0x1ac   : > { %v14186_v7 = vpop.permute.xlu0 %2200  ;;  %3115 = vmatpush1.bf16.msra.mxu0 %v2416_v59 }
 0x1ad   : > { %v2246_v6 = vsel %vm2242_vm8, %v2199_v11, %v14186_v7  ;;  %3116 = vmatprep.subr.bf16.mxu0 %v2590_v22  ;;  %v2714_v33 = vpop.permute.xlu1 %2713  ;;  %v14226_v11 = vld [vmem:[%s20691_s3 + $0x14] ss:$8 sps:$4 sm:$0xff]  }
 0x1ae   : > { %2729 = vrot.lane.b32.xlu0 %v13818_v28, %s13469_s15  ;;  %3165 = vmatprep.subr.bf16.mxu1 %v2246_v6  ;;  %v2763_v40 = vsel %vm2761_vm11, %v2714_v33, %v14095_v57  ;;  %v2762_v46 = vsel %vm2761_vm11, %v14107_v38, %v2714_v33 }
 0x1af   : > { %3166 = vmatpush1.bf16.msra.mxu1 %v2245_v24  ;;  %1822 = vrot.lane.b32.xlu1 %v13824_v52, %s13465_s24 }
 0x1b0   : > { %v14200_v9 = vpop.permute.xlu0 %2546  ;;  %3117 = vmatpush1.bf16.msra.mxu0 %v2589_v29 }
 0x1b1   : > { %3118 = vmatprep.subr.bf16.mxu0 %v2763_v40  ;;  %v14204_v61 = vpop.permute.xlu1 %2373  ;;  %v2592_v8 = vsel %vm2588_vm10, %v2545_v44, %v14200_v9 }
 0x1b2   : > { %2214 = vrot.lane.b32.xlu0 %v13824_v52, %s13466_s12  ;;  %v2419_v19 = vsel %vm2415_vm9, %v2372_v4, %v14204_v61 }
 0x1b3   : > { %1995 = vrot.lane.b32.xlu1 %v13824_v52, %s13464_s23  ;;  %3167 = vmatprep.subr.bf16.mxu1 %v2419_v19 }
 0x1b4   : > { %v1463_v20 = vpop.permute.xlu0 %1462  ;;  %3119 = vmatpush1.bf16.msra.mxu0 %v2762_v46  ;;  %3168 = vmatpush1.bf16.msra.mxu1 %v2418_v25 }
 0x1b5   : > { %3169 = vmatprep.subr.bf16.mxu1 %v2592_v8  ;;  %v14228_v38 = vpop.permute.xlu1 %2719  ;;  %v1507_v24 = vsel %vm1502_vm4, %v14103_v55, %v1463_v20 }
 0x1b6   : > { %2387 = vrot.lane.b32.xlu0 %v13824_v52, %s13467_s13  ;;  %v2765_v5 = vsel %vm2761_vm11, %v2718_v58, %v14228_v38 }
 0x1b7   : > { %2216 = vrot.lane.b32.xlu1 %v13873_v36, %s13466_s12  ;;  %3135 = vmatmul.mubr.bf16.vlgmr.msra.gmra.mrb[24].mxu0 %v14219_v53 }
 0x1b8   : > { %v1636_v4 = vpop.permute.xlu0 %1635  ;;  %3170 = vmatpush1.bf16.msra.mxu1 %v2591_v15  ;;  %11834 = vmatprep.mubr.msk.bf16.mxu0 %vm519_vm0, %v14226_v11 }
 0x1b9   : > { %3171 = vmatprep.subr.bf16.mxu1 %v2765_v5  ;;  %v14241_v30 = vpop.permute.xlu1 %2204  ;;  %v1680_v46 = vsel %vm1675_vm5, %v14123_v34, %v1636_v4 }
 0x1ba   : > { %2560 = vrot.lane.b32.xlu0 %v13824_v52, %s13468_s14 }
 0x1bb   : > { %2389 = vrot.lane.b32.xlu1 %v13873_v36, %s13467_s13 }
 0x1bc   : > { %v1809_v50 = vpop.permute.xlu0 %1808  ;;  %3172 = vmatpush1.bf16.msra.mxu1 %v2764_v54 }
 0x1bd   : > { %v14254_v23 = vpop.permute.xlu1 %2377 }
 0x1be   : > { %2733 = vrot.lane.b32.xlu0 %v13824_v52, %s13469_s15 }
 0x1bf   : > { %2562 = vrot.lane.b32.xlu1 %v13873_v36, %s13468_s14  ;;  %3145 = vmatmul.mubr.bf16.gmra.mrb[28].mxu0 %v14252_v49 }
 0x1c0   : > { %v1982_v44 = vpop.permute.xlu0 %1981  ;;  %3188 = vmatmul.mubr.bf16.vlgmr.msra.gmra.mrb[24].mxu1 %v14219_v53  ;;  %11837 = vmatprep.mubr.msk.bf16.mxu0 %vm519_vm0, %v13987_v42 }
 0x1c1   : > { %v14264_v57 = vpop.permute.xlu1 %2550  ;;  %11836 = vmatprep.mubr.msk.bf16.mxu1 %vm519_vm0, %v14226_v11 }
 0x1c2   : > { %1478 = vrot.lane.b32.xlu0 %v13873_v36, %s13463_s22 }
 0x1c3   : > { %2735 = vrot.lane.b32.xlu1 %v13873_v36, %s13469_s15 }
 0x1c4   : > { %v1467_v58 = vpop.permute.xlu0 %1466 }
 0x1c5   : > { %v14272_v59 = vpop.permute.xlu1 %2723 }
 0x1c6   : > { %1482 = vrot.lane.b32.xlu0 %v13877_v45, %s13463_s22 }
 0x1c7   : > { %2220 = vrot.lane.b32.xlu1 %v13877_v45, %s13466_s12 }
 0x1c8   : > { %v1640_v22 = vpop.permute.xlu0 %1639  ;;  %3198 = vmatmul.mubr.bf16.gmra.mrb[28].mxu1 %v14252_v49 }
 0x1c9   : > { %v1465_v6 = vpop.permute.xlu1 %1464  ;;  %11839 = vmatprep.mubr.msk.bf16.mxu1 %vm519_vm0, %v13987_v42 }
 0x1ca   : > { %1651 = vrot.lane.b32.xlu0 %v13873_v36, %s13462_s21  ;;  %v1508_v33 = vsel %vm1502_vm4, %v1463_v20, %v1465_v6  ;;  %v1853_v20 = vsel %vm1848_vm6, %v14120_v39, %v1809_v50 }
 0x1cb   : > { %2393 = vrot.lane.b32.xlu1 %v13877_v45, %s13467_s13  ;;  %3208 = vmatprep.subr.bf16.mxu0 %v1508_v33  ;;  %v1509_v33 = vsel %vm1502_vm4, %v1465_v6, %v1467_v58 }
 0x1cc   : > { %v1813_v29 = vpop.permute.xlu0 %1812  ;;  %3209 = vmatpush1.bf16.msra.mxu0 %v1507_v24 }
 0x1cd   : > { %v1638_v40 = vpop.permute.xlu1 %1637 }
 0x1ce   : > { %1655 = vrot.lane.b32.xlu0 %v13877_v45, %s13462_s21  ;;  %v1681_v19 = vsel %vm1675_vm5, %v1636_v4, %v1638_v40  ;;  %v2026_v4 = vsel %vm2021_vm7, %v14148_v60, %v1982_v44 }
 0x1cf   : > { %2566 = vrot.lane.b32.xlu1 %v13877_v45, %s13468_s14  ;;  %3210 = vmatprep.subr.bf16.mxu0 %v1681_v19 }
 0x1d0   : > { %v1986_v25 = vpop.permute.xlu0 %1985  ;;  %3211 = vmatpush1.bf16.msra.mxu0 %v1680_v46 }
 0x1d1   : > { %v1811_v8 = vpop.permute.xlu1 %1810 }
 0x1d2   : > { %1824 = vrot.lane.b32.xlu0 %v13873_v36, %s13465_s24  ;;  %v1854_v55 = vsel %vm1848_vm6, %v1809_v50, %v1811_v8 }
 0x1d3   : > { %1480 = vrot.lane.b32.xlu1 %v13886_v0, %s13463_s22  ;;  %3212 = vmatprep.subr.bf16.mxu0 %v1854_v55 }
 0x1d4   : > { %v2203_v15 = vpop.permute.xlu0 %2202  ;;  %3213 = vmatpush1.bf16.msra.mxu0 %v1853_v20 }
 0x1d5   : > { %v1984_v5 = vpop.permute.xlu1 %1983 }
 0x1d6   : > { %1828 = vrot.lane.b32.xlu0 %v13877_v45, %s13465_s24  ;;  %v2027_v34 = vsel %vm2021_vm7, %v1982_v44, %v1984_v5 }
 0x1d7   : > { %1484 = vrot.lane.b32.xlu1 %v13897_v62, %s13463_s22  ;;  %3214 = vmatprep.subr.bf16.mxu0 %v2027_v34 }
 0x1d8   : > { %v2376_v54 = vpop.permute.xlu0 %2375  ;;  %3215 = vmatpush1.bf16.msra.mxu0 %v2026_v4 }
 0x1d9   : > { %3216 = vmatprep.subr.bf16.mxu0 %v13764_v48  ;;  %v14310_v39 = vpop.permute.xlu1 %1468  ;;  %v2248_v48 = vsel %vm2242_vm8, %v2203_v15, %v14241_v30  ;;  %v2421_v19 = vsel %vm2415_vm9, %v2376_v54, %v14254_v23 }
 0x1da   : > { %1997 = vrot.lane.b32.xlu0 %v13873_v36, %s13464_s23  ;;  %v1510_v50 = vsel %vm1502_vm4, %v1467_v58, %v14310_v39  ;;  %v1682_v58 = vsel %vm1675_vm5, %v1638_v40, %v1640_v22 }
 0x1db   : > { %1653 = vrot.lane.b32.xlu1 %v13886_v0, %s13462_s21  ;;  %3261 = vmatprep.subr.bf16.mxu1 %v1510_v50 }
 0x1dc   : > { %v2549_v24 = vpop.permute.xlu0 %2548  ;;  %3217 = vmatpush1.bf16.msra.mxu0 %v13756_v56  ;;  %3262 = vmatpush1.bf16.msra.mxu1 %v1509_v33  ;;  %v2247_v56 = vsel %vm2242_vm8, %v14186_v7, %v2203_v15  ;;  %v2420_v7 = vsel %vm2415_vm9, %v14204_v61, %v2376_v54 }
 0x1dd   : > { %3218 = vmatprep.subr.bf16.mxu0 %v2248_v48  ;;  %v14322_v60 = vpop.permute.xlu1 %1641  ;;  %v2594_v20 = vsel %vm2588_vm10, %v2549_v24, %v14264_v57  ;;  %v2593_v61 = vsel %vm2588_vm10, %v14200_v9, %v2549_v24 }
 0x1de   : > { %2001 = vrot.lane.b32.xlu0 %v13877_v45, %s13464_s23  ;;  %v1683_v44 = vsel %vm1675_vm5, %v1640_v22, %v14322_v60  ;;  %v1855_v22 = vsel %vm1848_vm6, %v1811_v8, %v1813_v29 }
 0x1df   : > { %1657 = vrot.lane.b32.xlu1 %v13897_v62, %s13462_s21  ;;  %3263 = vmatprep.subr.bf16.mxu1 %v1683_v44 }
 0x1e0   : > { %v2722_v6 = vpop.permute.xlu0 %2721  ;;  %3219 = vmatpush1.bf16.msra.mxu0 %v2247_v56  ;;  %3264 = vmatpush1.bf16.msra.mxu1 %v1682_v58 }
 0x1e1   : > { %3220 = vmatprep.subr.bf16.mxu0 %v2421_v19  ;;  %v14335_v46 = vpop.permute.xlu1 %1814  ;;  %v2767_v4 = vsel %vm2761_vm11, %v2722_v6, %v14272_v59  ;;  %v2766_v9 = vsel %vm2761_vm11, %v14228_v38, %v2722_v6 }
 0x1e2   : > { %2218 = vrot.lane.b32.xlu0 %v13886_v0, %s13466_s12  ;;  %v1856_v55 = vsel %vm1848_vm6, %v1813_v29, %v14335_v46  ;;  %v2028_v29 = vsel %vm2021_vm7, %v1984_v5, %v1986_v25 }
 0x1e3   : > { %1826 = vrot.lane.b32.xlu1 %v13886_v0, %s13465_s24  ;;  %3265 = vmatprep.subr.bf16.mxu1 %v1856_v55 }
 0x1e4   : > { %v2207_v40 = vpop.permute.xlu0 %2206  ;;  %3221 = vmatpush1.bf16.msra.mxu0 %v2420_v7  ;;  %3266 = vmatpush1.bf16.msra.mxu1 %v1855_v22  ;;  %v3054_v7 = vld [vmem:[%s20693_s5] sm:$0xff] }
 0x1e5   : > { %3222 = vmatprep.subr.bf16.mxu0 %v2594_v20  ;;  %v14348_v15 = vpop.permute.xlu1 %1987  ;;  %v2249_v38 = vsel %vm2242_vm8, %v14241_v30, %v2207_v40  ;;  %v3055_v20 = vld [vmem:[%s20693_s5 + $0x8] sm:$0xff] }
 0x1e6   : > { %2222 = vrot.lane.b32.xlu0 %v13897_v62, %s13466_s12  ;;  %v2029_v34 = vsel %vm2021_vm7, %v1986_v25, %v14348_v15 }
 0x1e7   : > { %1830 = vrot.lane.b32.xlu1 %v13897_v62, %s13465_s24  ;;  %3267 = vmatprep.subr.bf16.mxu1 %v2029_v34 }
 0x1e8   : > { %v2380_v8 = vpop.permute.xlu0 %2379  ;;  %3223 = vmatpush1.bf16.msra.mxu0 %v2593_v61  ;;  %3268 = vmatpush1.bf16.msra.mxu1 %v2028_v29 }
 0x1e9   : > { %3224 = vmatprep.subr.bf16.mxu0 %v2767_v4  ;;  %3269 = vmatprep.subr.bf16.mxu1 %v13766_v51  ;;  %v14362_v54 = vpop.permute.xlu1 %2208  ;;  %v2422_v30 = vsel %vm2415_vm9, %v14254_v23, %v2380_v8  ;;  %v3057_v4 = vld [vmem:[%s20693_s5 + $0x18] sm:$0xff] }
 0x1ea   : > { %2391 = vrot.lane.b32.xlu0 %v13886_v0, %s13467_s13  ;;  %v2250_v5 = vsel %vm2242_vm8, %v2207_v40, %v14362_v54 }
 0x1eb   : > { %1999 = vrot.lane.b32.xlu1 %v13886_v0, %s13464_s23 }
 0x1ec   : > { %v2553_v25 = vpop.permute.xlu0 %2552  ;;  %3225 = vmatpush1.bf16.msra.mxu0 %v2766_v9  ;;  %3270 = vmatpush1.bf16.msra.mxu1 %v13758_v47 }
 0x1ed   : > { %3271 = vmatprep.subr.bf16.mxu1 %v2250_v5  ;;  %v14373_v51 = vpop.permute.xlu1 %2381  ;;  %v2595_v56 = vsel %vm2588_vm10, %v14264_v57, %v2553_v25 }
 0x1ee   : > { %2395 = vrot.lane.b32.xlu0 %v13897_v62, %s13467_s13  ;;  %v2423_v47 = vsel %vm2415_vm9, %v2380_v8, %v14373_v51 }
 0x1ef   : > { %2003 = vrot.lane.b32.xlu1 %v13897_v62, %s13464_s23  ;;  %3241 = vmatmul.mubr.bf16.vlgmr.msra.gmra.mrb[32].mxu0 %v14219_v53 }
 0x1f0   : > { %v2726_v50 = vpop.permute.xlu0 %2725  ;;  %3272 = vmatpush1.bf16.msra.mxu1 %v2249_v38  ;;  %11838 = vmatprep.mubr.msk.bf16.mxu0 %vm519_vm0, %v14226_v11 }
 0x1f1   : > { %3273 = vmatprep.subr.bf16.mxu1 %v2423_v47  ;;  %v14386_v33 = vpop.permute.xlu1 %2554  ;;  %v2768_v57 = vsel %vm2761_vm11, %v14272_v59, %v2726_v50 }
 0x1f2   : > { %2564 = vrot.lane.b32.xlu0 %v13886_v0, %s13468_s14  ;;  %v2596_v48 = vsel %vm2588_vm10, %v2553_v25, %v14386_v33 }
 0x1f3   : > { %2739 = vrot.lane.b32.xlu1 %v13877_v45, %s13469_s15 }
 0x1f4   : > { %v1471_v24 = vpop.permute.xlu0 %1470  ;;  %3274 = vmatpush1.bf16.msra.mxu1 %v2422_v30  ;;  %v3056_v30 = vld [vmem:[%s20693_s5 + $0x10] sm:$0xff] }
 0x1f5   : > { %3275 = vmatprep.subr.bf16.mxu1 %v2596_v48  ;;  %v14396_v44 = vpop.permute.xlu1 %2727  ;;  %v1511_v9 = vsel %vm1502_vm4, %v14310_v39, %v1471_v24 }
 0x1f6   : > { %2568 = vrot.lane.b32.xlu0 %v13897_v62, %s13468_s14  ;;  %v2769_v58 = vsel %vm2761_vm11, %v2726_v50, %v14396_v44 }
 0x1f7   : > { %2224 = vrot.lane.b32.xlu1 %v13919_v41, %s13466_s12  ;;  %3251 = vmatmul.mubr.bf16.gmra.mrb[36].mxu0 %v14252_v49 }
 0x1f8   : > { %v1644_v23 = vpop.permute.xlu0 %1643  ;;  %3276 = vmatpush1.bf16.msra.mxu1 %v2595_v56  ;;  %11841 = vmatprep.mubr.msk.bf16.mxu0 %vm519_vm0, %v13987_v42 }
 0x1f9   : > { %3277 = vmatprep.subr.bf16.mxu1 %v2769_v58  ;;  %v14409_v6 = vpop.permute.xlu1 %2212  ;;  %v1684_v50 = vsel %vm1675_vm5, %v14322_v60, %v1644_v23 }
 0x1fa   : > { %2737 = vrot.lane.b32.xlu0 %v13886_v0, %s13469_s15 }
 0x1fb   : > { %2397 = vrot.lane.b32.xlu1 %v13919_v41, %s13467_s13 }
 0x1fc   : > { %v1817_v19 = vpop.permute.xlu0 %1816  ;;  %3278 = vmatpush1.bf16.msra.mxu1 %v2768_v57 }
 0x1fd   : > { %v14417_v55 = vpop.permute.xlu1 %2385  ;;  %v1857_v48 = vsel %vm1848_vm6, %v14335_v46, %v1817_v19 }
 0x1fe   : > { %2741 = vrot.lane.b32.xlu0 %v13897_v62, %s13469_s15 }
 0x1ff   : > { %2570 = vrot.lane.b32.xlu1 %v13919_v41, %s13468_s14  ;;  %3294 = vmatmul.mubr.bf16.vlgmr.msra.gmra.mrb[32].mxu1 %v14219_v53 }
 0x200   : > { %v1990_v22 = vpop.permute.xlu0 %1989  ;;  %11840 = vmatprep.mubr.msk.bf16.mxu1 %vm519_vm0, %v14226_v11 }
 0x201   : > { %v14429_v59 = vpop.permute.xlu1 %2558  ;;  %v2030_v58 = vsel %vm2021_vm7, %v14348_v15, %v1990_v22 }
 0x202   : > { %3060 = vperm.xlu0 %13365, %v3054_v7  }
 0x203   : > { %2743 = vrot.lane.b32.xlu1 %v13919_v41, %s13469_s15 }
 0x204   : > { %v1475_v40 = vpop.permute.xlu0 %1474 }
 0x205   : > { %v14436_v34 = vpop.permute.xlu1 %2731 }
 0x206   : > { %1488 = vrot.lane.b32.xlu0 %v13934_v21, %s13463_s22 }
 0x207   : > { %3065 = vperm.xlu1 %13366, %v3055_v20   ;;  %3304 = vmatmul.mubr.bf16.gmra.mrb[36].mxu1 %v14252_v49 }
 0x208   : > { %v1648_v61 = vpop.permute.xlu0 %1647  ;;  %11843 = vmatprep.mubr.msk.bf16.mxu1 %vm519_vm0, %v13987_v42 }
 0x209   : > { %v1473_v29 = vpop.permute.xlu1 %1472 }
 0x20a   : > { %1492 = vrot.lane.b32.xlu0 %v13936_v1, %s13463_s22  ;;  %v1512_v8 = vsel %vm1502_vm4, %v1471_v24, %v1473_v29  ;;  %v1513_v7 = vsel %vm1502_vm4, %v1473_v29, %v1475_v40 }
 0x20b   : > { %1486 = vrot.lane.b32.xlu1 %v13919_v41, %s13463_s22  ;;  %3314 = vmatprep.subr.bf16.mxu0 %v1512_v8 }
 0x20c   : > { %v1821_v25 = vpop.permute.xlu0 %1820  ;;  %3315 = vmatpush1.bf16.msra.mxu0 %v1511_v9 }
 0x20d   : > { %v1646_v5 = vpop.permute.xlu1 %1645 }
 0x20e   : > { %3075 = vperm.xlu0 %13365, %v3057_v4   ;;  %v1685_v38 = vsel %vm1675_vm5, %v1644_v23, %v1646_v5 }
 0x20f   : > { %1490 = vrot.lane.b32.xlu1 %v13932_v10, %s13463_s22  ;;  %3316 = vmatprep.subr.bf16.mxu0 %v1685_v38 }
 0x210   : > { %v1994_v47 = vpop.permute.xlu0 %1993  ;;  %3317 = vmatpush1.bf16.msra.mxu0 %v1684_v50 }
 0x211   : > { %v1819_v39 = vpop.permute.xlu1 %1818 }
 0x212   : > { %1661 = vrot.lane.b32.xlu0 %v13934_v21, %s13462_s21  ;;  %v1858_v24 = vsel %vm1848_vm6, %v1817_v19, %v1819_v39 }
 0x213   : > { %3070 = vperm.xlu1 %13366, %v3056_v30   ;;  %3318 = vmatprep.subr.bf16.mxu0 %v1858_v24 }
 0x214   : > { %v2211_v56 = vpop.permute.xlu0 %2210  ;;  %3319 = vmatpush1.bf16.msra.mxu0 %v1857_v48 }
 0x215   : > { %v1992_v60 = vpop.permute.xlu1 %1991 }
 0x216   : > { %1665 = vrot.lane.b32.xlu0 %v13936_v1, %s13462_s21  ;;  %v2031_v23 = vsel %vm2021_vm7, %v1990_v22, %v1992_v60 }
 0x217   : > { %1659 = vrot.lane.b32.xlu1 %v13919_v41, %s13462_s21  ;;  %3320 = vmatprep.subr.bf16.mxu0 %v2031_v23 }
 0x218   : > { %v2384_v57 = vpop.permute.xlu0 %2383  ;;  %3321 = vmatpush1.bf16.msra.mxu0 %v2030_v58 }
 0x219   : > { %3322 = vmatprep.subr.bf16.mxu0 %v13818_v28  ;;  %v14474_v46 = vpop.permute.xlu1 %1476  ;;  %v2252_v28 = vsel %vm2242_vm8, %v2211_v56, %v14409_v6  ;;  %v2425_v8 = vsel %vm2415_vm9, %v2384_v57, %v14417_v55 }
 0x21a   : > { %1834 = vrot.lane.b32.xlu0 %v13934_v21, %s13465_s24  ;;  %v1514_v19 = vsel %vm1502_vm4, %v1475_v40, %v14474_v46  ;;  %v1686_v40 = vsel %vm1675_vm5, %v1646_v5, %v1648_v61 }
 0x21b   : > { %1663 = vrot.lane.b32.xlu1 %v13932_v10, %s13462_s21  ;;  %3367 = vmatprep.subr.bf16.mxu1 %v1514_v19 }
 0x21c   : > { %v2557_v20 = vpop.permute.xlu0 %2556  ;;  %3323 = vmatpush1.bf16.msra.mxu0 %v13809_v43  ;;  %3368 = vmatpush1.bf16.msra.mxu1 %v1513_v7  ;;  %v2251_v43 = vsel %vm2242_vm8, %v14362_v54, %v2211_v56  ;;  %v2424_v54 = vsel %vm2415_vm9, %v14373_v51, %v2384_v57 }
 0x21d   : > { %3324 = vmatprep.subr.bf16.mxu0 %v2252_v28  ;;  %v14486_v15 = vpop.permute.xlu1 %1649  ;;  %v2598_v38 = vsel %vm2588_vm10, %v2557_v20, %v14429_v59  ;;  %v2597_v51 = vsel %vm2588_vm10, %v14386_v33, %v2557_v20 }
 0x21e   : > { %1838 = vrot.lane.b32.xlu0 %v13936_v1, %s13465_s24  ;;  %v1687_v22 = vsel %vm1675_vm5, %v1648_v61, %v14486_v15  ;;  %v1859_v61 = vsel %vm1848_vm6, %v1819_v39, %v1821_v25 }
 0x21f   : > { %1832 = vrot.lane.b32.xlu1 %v13919_v41, %s13465_s24  ;;  %3369 = vmatprep.subr.bf16.mxu1 %v1687_v22 }
 0x220   : > { %v2730_v29 = vpop.permute.xlu0 %2729  ;;  %3325 = vmatpush1.bf16.msra.mxu0 %v2251_v43  ;;  %3370 = vmatpush1.bf16.msra.mxu1 %v1686_v40 }
 0x221   : > { %3326 = vmatprep.subr.bf16.mxu0 %v2425_v8  ;;  %v14499_v4 = vpop.permute.xlu1 %1822  ;;  %v2771_v24 = vsel %vm2761_vm11, %v2730_v29, %v14436_v34  ;;  %v2770_v33 = vsel %vm2761_vm11, %v14396_v44, %v2730_v29 }
 0x222   : > { %2007 = vrot.lane.b32.xlu0 %v13934_v21, %s13464_s23  ;;  %v1860_v9 = vsel %vm1848_vm6, %v1821_v25, %v14499_v4  ;;  %v2032_v25 = vsel %vm2021_vm7, %v1992_v60, %v1994_v47 }
 0x223   : > { %1836 = vrot.lane.b32.xlu1 %v13932_v10, %s13465_s24  ;;  %3371 = vmatprep.subr.bf16.mxu1 %v1860_v9 }
 0x224   : > { %v2215_v5 = vpop.permute.xlu0 %2214  ;;  %3327 = vmatpush1.bf16.msra.mxu0 %v2424_v54  ;;  %3372 = vmatpush1.bf16.msra.mxu1 %v1859_v61 }
 0x225   : > { %3328 = vmatprep.subr.bf16.mxu0 %v2598_v38  ;;  %v14512_v50 = vpop.permute.xlu1 %1995  ;;  %v2253_v44 = vsel %vm2242_vm8, %v14409_v6, %v2215_v5 }
 0x226   : > { %2011 = vrot.lane.b32.xlu0 %v13936_v1, %s13464_s23  ;;  %v2033_v30 = vsel %vm2021_vm7, %v1994_v47, %v14512_v50 }
 0x227   : > { %2005 = vrot.lane.b32.xlu1 %v13919_v41, %s13464_s23  ;;  %3373 = vmatprep.subr.bf16.mxu1 %v2033_v30 }
 0x228   : > { %v2388_v39 = vpop.permute.xlu0 %2387  ;;  %3329 = vmatpush1.bf16.msra.mxu0 %v2597_v51  ;;  %3374 = vmatpush1.bf16.msra.mxu1 %v2032_v25 }
 0x229   : > { %3330 = vmatprep.subr.bf16.mxu0 %v2771_v24  ;;  %3375 = vmatprep.subr.bf16.mxu1 %v13824_v52  ;;  %v14526_v48 = vpop.permute.xlu1 %2216  ;;  %v2426_v6 = vsel %vm2415_vm9, %v14417_v55, %v2388_v39 }
 0x22a   : > { %2228 = vrot.lane.b32.xlu0 %v13932_v10, %s13466_s12  ;;  %v2254_v56 = vsel %vm2242_vm8, %v2215_v5, %v14526_v48 }
 0x22b   : > { %2009 = vrot.lane.b32.xlu1 %v13932_v10, %s13464_s23 }
 0x22c   : > { %v2561_v47 = vpop.permute.xlu0 %2560  ;;  %3331 = vmatpush1.bf16.msra.mxu0 %v2770_v33  ;;  %3376 = vmatpush1.bf16.msra.mxu1 %v13816_v37 }
 0x22d   : > { %3377 = vmatprep.subr.bf16.mxu1 %v2254_v56  ;;  %v14537_v52 = vpop.permute.xlu1 %2389  ;;  %v2599_v7 = vsel %vm2588_vm10, %v14429_v59, %v2561_v47 }
 0x22e   : > { %2232 = vrot.lane.b32.xlu0 %v13968_v12, %s13466_s12  ;;  %v2427_v37 = vsel %vm2415_vm9, %v2388_v39, %v14537_v52 }
 0x22f   : > { %2226 = vrot.lane.b32.xlu1 %v13934_v21, %s13466_s12  ;;  %3347 = vmatmul.mubr.bf16.vlgmr.msra.gmra.mrb[40].mxu0 %v14219_v53 }
 0x230   : > { %v2734_v60 = vpop.permute.xlu0 %2733  ;;  %3378 = vmatpush1.bf16.msra.mxu1 %v2253_v44  ;;  %11842 = vmatprep.mubr.msk.bf16.mxu0 %vm519_vm0, %v14226_v11 }
 0x231   : > { %3379 = vmatprep.subr.bf16.mxu1 %v2427_v37  ;;  %v14550_v23 = vpop.permute.xlu1 %2562  ;;  %v2772_v59 = vsel %vm2761_vm11, %v14436_v34, %v2734_v60 }
 0x232   : > { %2401 = vrot.lane.b32.xlu0 %v13932_v10, %s13467_s13  ;;  %v2600_v57 = vsel %vm2588_vm10, %v2561_v47, %v14550_v23 }
 0x233   : > { %2230 = vrot.lane.b32.xlu1 %v13936_v1, %s13466_s12 }
 0x234   : > { %v1479_v58 = vpop.permute.xlu0 %1478  ;;  %3380 = vmatpush1.bf16.msra.mxu1 %v2426_v6 }
 0x235   : > { %3381 = vmatprep.subr.bf16.mxu1 %v2600_v57  ;;  %v14560_v19 = vpop.permute.xlu1 %2735  ;;  %v1515_v61 = vsel %vm1502_vm4, %v14474_v46, %v1479_v58 }
 0x236   : > { %2405 = vrot.lane.b32.xlu0 %v13968_v12, %s13467_s13  ;;  %v2773_v20 = vsel %vm2761_vm11, %v2734_v60, %v14560_v19 }
 0x237   : > { %2399 = vrot.lane.b32.xlu1 %v13934_v21, %s13467_s13  ;;  %3357 = vmatmul.mubr.bf16.gmra.mrb[44].mxu0 %v14252_v49 }
 0x238   : > { %v1483_v55 = vpop.permute.xlu0 %1482  ;;  %3382 = vmatpush1.bf16.msra.mxu1 %v2599_v7  ;;  %11845 = vmatprep.mubr.msk.bf16.mxu0 %vm519_vm0, %v13987_v42 }
 0x239   : > { %3383 = vmatprep.subr.bf16.mxu1 %v2773_v20  ;;  %v14573_v28 = vpop.permute.xlu1 %2220 }
 0x23a   : > { %2574 = vrot.lane.b32.xlu0 %v13932_v10, %s13468_s14 }
 0x23b   : > { %2403 = vrot.lane.b32.xlu1 %v13936_v1, %s13467_s13 }
 0x23c   : > { %v1652_v22 = vpop.permute.xlu0 %1651  ;;  %3384 = vmatpush1.bf16.msra.mxu1 %v2772_v59 }
 0x23d   : > { %v14581_v43 = vpop.permute.xlu1 %2393  ;;  %v1688_v25 = vsel %vm1675_vm5, %v14486_v15, %v1652_v22 }
 0x23e   : > { %2578 = vrot.lane.b32.xlu0 %v13968_v12, %s13468_s14 }
 0x23f   : > { %2572 = vrot.lane.b32.xlu1 %v13934_v21, %s13468_s14  ;;  %3400 = vmatmul.mubr.bf16.vlgmr.msra.gmra.mrb[40].mxu1 %v14219_v53 }
 0x240   : > { %v1656_v40 = vpop.permute.xlu0 %1655  ;;  %11844 = vmatprep.mubr.msk.bf16.mxu1 %vm519_vm0, %v14226_v11 }
 0x241   : > { %v14590_v29 = vpop.permute.xlu1 %2566 }
 0x242   : > { %2747 = vrot.lane.b32.xlu0 %v13932_v10, %s13469_s15 }
 0x243   : > { %2576 = vrot.lane.b32.xlu1 %v13936_v1, %s13468_s14 }
 0x244   : > { %v1825_v34 = vpop.permute.xlu0 %1824 }
 0x245   : > { %v1481_v8 = vpop.permute.xlu1 %1480  ;;  %v1861_v60 = vsel %vm1848_vm6, %v14499_v4, %v1825_v34 }
 0x246   : > { %2751 = vrot.lane.b32.xlu0 %v13968_v12, %s13469_s15  ;;  %v1516_v9 = vsel %vm1502_vm4, %v1479_v58, %v1481_v8  ;;  %v1517_v30 = vsel %vm1502_vm4, %v1481_v8, %v1483_v55 }
 0x247   : > { %2745 = vrot.lane.b32.xlu1 %v13934_v21, %s13469_s15  ;;  %3410 = vmatmul.mubr.bf16.gmra.mrb[44].mxu1 %v14252_v49 }
 0x248   : > { %v1829_v54 = vpop.permute.xlu0 %1828  ;;  %3420 = vmatprep.subr.bf16.mxu0 %v1516_v9  ;;  %11847 = vmatprep.mubr.msk.bf16.mxu1 %vm519_vm0, %v13987_v42 }
 0x249   : > { %3421 = vmatpush1.bf16.msra.mxu0 %v1515_v61  ;;  %v14606_v5 = vpop.permute.xlu1 %1484 }
 0x24a   : > { %1496 = vrot.lane.b32.xlu0 %v13974_v63, %s13463_s22  ;;  %v1518_v38 = vsel %vm1502_vm4, %v1483_v55, %v14606_v5 }
 0x24b   : > { %2749 = vrot.lane.b32.xlu1 %v13936_v1, %s13469_s15  ;;  %3473 = vmatprep.subr.bf16.mxu1 %v1518_v38 }
 0x24c   : > { %v1998_v51 = vpop.permute.xlu0 %1997  ;;  %3474 = vmatpush1.bf16.msra.mxu1 %v1517_v30 }
 0x24d   : > { %v1654_v46 = vpop.permute.xlu1 %1653  ;;  %v2034_v20 = vsel %vm2021_vm7, %v14512_v50, %v1998_v51 }
 0x24e   : > { %1500 = vrot.lane.b32.xlu0 %v13976_v26, %s13463_s22  ;;  %v1689_v42 = vsel %vm1675_vm5, %v1652_v22, %v1654_v46  ;;  %v1690_v47 = vsel %vm1675_vm5, %v1654_v46, %v1656_v40  ;;  %v20845_v46 = vmov 0  }
 0x24f   : > { %1494 = vrot.lane.b32.xlu1 %v13968_v12, %s13463_s22  ;;  %3422 = vmatprep.subr.bf16.mxu0 %v1689_v42 }
 0x250   : > { %v2002_v39 = vpop.permute.xlu0 %2001  ;;  %3423 = vmatpush1.bf16.msra.mxu0 %v1688_v25 }
 0x251   : > { %v14622_v24 = vpop.permute.xlu1 %1657 }
 0x252   : > { %1669 = vrot.lane.b32.xlu0 %v13974_v63, %s13462_s21  ;;  %v1691_v33 = vsel %vm1675_vm5, %v1656_v40, %v14622_v24 }
 0x253   : > { %1498 = vrot.lane.b32.xlu1 %v13970_v27, %s13463_s22  ;;  %3475 = vmatprep.subr.bf16.mxu1 %v1691_v33 }
 0x254   : > { %v2219_v56 = vpop.permute.xlu0 %2218  ;;  %3476 = vmatpush1.bf16.msra.mxu1 %v1690_v47 }
 0x255   : > { %v1827_v44 = vpop.permute.xlu1 %1826  ;;  %v2255_v9 = vsel %vm2242_vm8, %v14526_v48, %v2219_v56 }
 0x256   : > { %1673 = vrot.lane.b32.xlu0 %v13976_v26, %s13462_s21  ;;  %v1862_v15 = vsel %vm1848_vm6, %v1825_v34, %v1827_v44  ;;  %v1863_v57 = vsel %vm1848_vm6, %v1827_v44, %v1829_v54 }
 0x257   : > { %1667 = vrot.lane.b32.xlu1 %v13968_v12, %s13462_s21  ;;  %3424 = vmatprep.subr.bf16.mxu0 %v1862_v15 }
 0x258   : > { %v2223_v37 = vpop.permute.xlu0 %2222  ;;  %3425 = vmatpush1.bf16.msra.mxu0 %v1861_v60 }
 0x259   : > { %v14638_v6 = vpop.permute.xlu1 %1830 }
 0x25a   : > { %1842 = vrot.lane.b32.xlu0 %v13974_v63, %s13465_s24  ;;  %v1864_v58 = vsel %vm1848_vm6, %v1829_v54, %v14638_v6 }
 0x25b   : > { %1671 = vrot.lane.b32.xlu1 %v13970_v27, %s13462_s21  ;;  %3477 = vmatprep.subr.bf16.mxu1 %v1864_v58 }
 0x25c   : > { %v2392_v7 = vpop.permute.xlu0 %2391  ;;  %3478 = vmatpush1.bf16.msra.mxu1 %v1863_v57 }
 0x25d   : > { %v2000_v55 = vpop.permute.xlu1 %1999  ;;  %v2428_v48 = vsel %vm2415_vm9, %v14537_v52, %v2392_v7 }
 0x25e   : > { %1846 = vrot.lane.b32.xlu0 %v13976_v26, %s13465_s24  ;;  %v2035_v4 = vsel %vm2021_vm7, %v1998_v51, %v2000_v55  ;;  %v2036_v34 = vsel %vm2021_vm7, %v2000_v55, %v2002_v39 }
 0x25f   : > { %1840 = vrot.lane.b32.xlu1 %v13968_v12, %s13465_s24  ;;  %3426 = vmatprep.subr.bf16.mxu0 %v2035_v4 }
 0x260   : > { %v2396_v59 = vpop.permute.xlu0 %2395  ;;  %3427 = vmatpush1.bf16.msra.mxu0 %v2034_v20 }
 0x261   : > { %3428 = vmatprep.subr.bf16.mxu0 %v13886_v0  ;;  %v14655_v22 = vpop.permute.xlu1 %2003  ;;  %v2256_v0 = vsel %vm2242_vm8, %v2219_v56, %v14573_v28 }
 0x262   : > { %2015 = vrot.lane.b32.xlu0 %v13974_v63, %s13464_s23  ;;  %v2037_v40 = vsel %vm2021_vm7, %v2002_v39, %v14655_v22 }
 0x263   : > { %1844 = vrot.lane.b32.xlu1 %v13970_v27, %s13465_s24  ;;  %3479 = vmatprep.subr.bf16.mxu1 %v2037_v40 }
 0x264   : > { %v2565_v8 = vpop.permute.xlu0 %2564  ;;  %3429 = vmatpush1.bf16.msra.mxu0 %v13873_v36  ;;  %3480 = vmatpush1.bf16.msra.mxu1 %v2036_v34  ;;  %v2429_v36 = vsel %vm2415_vm9, %v2392_v7, %v14581_v43 }
 0x265   : > { %3430 = vmatprep.subr.bf16.mxu0 %v2256_v0  ;;  %3481 = vmatprep.subr.bf16.mxu1 %v13897_v62  ;;  %v2740_v50 = vpop.permute.xlu1 %2739  ;;  %v2602_v38 = vsel %vm2588_vm10, %v2565_v8, %v14590_v29  ;;  %v2601_v52 = vsel %vm2588_vm10, %v14550_v23, %v2565_v8 }
 0x266   : > { %2019 = vrot.lane.b32.xlu0 %v13976_v26, %s13464_s23 }
 0x267   : > { %2013 = vrot.lane.b32.xlu1 %v13968_v12, %s13464_s23 }
 0x268   : > { %v2569_v54 = vpop.permute.xlu0 %2568  ;;  %3431 = vmatpush1.bf16.msra.mxu0 %v2255_v9  ;;  %3482 = vmatpush1.bf16.msra.mxu1 %v13877_v45  ;;  %v2257_v45 = vsel %vm2242_vm8, %v14573_v28, %v2223_v37  ;;  %v2430_v28 = vsel %vm2415_vm9, %v14581_v43, %v2396_v59 }
 0x269   : > { %3432 = vmatprep.subr.bf16.mxu0 %v2429_v36  ;;  %v14677_v61 = vpop.permute.xlu1 %2224  ;;  %v2603_v43 = vsel %vm2588_vm10, %v14590_v29, %v2569_v54  ;;  %v14743_v29 = vld [vmem:[%s20691_s3 + $0x4] ss:$8 sps:$4 sm:$0xff]  }
 0x26a   : > { %2236 = vrot.lane.b32.xlu0 %v13970_v27, %s13466_s12  ;;  %v2258_v62 = vsel %vm2242_vm8, %v2223_v37, %v14677_v61 }
 0x26b   : > { %2017 = vrot.lane.b32.xlu1 %v13970_v27, %s13464_s23  ;;  %3483 = vmatprep.subr.bf16.mxu1 %v2258_v62 }
 0x26c   : > { %3433 = vmatpush1.bf16.msra.mxu0 %v2428_v48  ;;  %3484 = vmatpush1.bf16.msra.mxu1 %v2257_v45  ;;  %v2738_v30 = vpop.permute.xlu0 %2737 }
 0x26d   : > { %3434 = vmatprep.subr.bf16.mxu0 %v2602_v38  ;;  %v14691_v51 = vpop.permute.xlu1 %2397  ;;  %v2775_v25 = vsel %vm2761_vm11, %v2738_v30, %v2740_v50  ;;  %v2774_v23 = vsel %vm2761_vm11, %v14560_v19, %v2738_v30 }
 0x26e   : > { %2240 = vrot.lane.b32.xlu0 %v20845_v46, %s13466_s12  ;;  %v2431_v42 = vsel %vm2415_vm9, %v2396_v59, %v14691_v51 }
 0x26f   : > { %2234 = vrot.lane.b32.xlu1 %v13974_v63, %s13466_s12  ;;  %3485 = vmatprep.subr.bf16.mxu1 %v2431_v42 }
 0x270   : > { %3435 = vmatpush1.bf16.msra.mxu0 %v2601_v52  ;;  %3486 = vmatpush1.bf16.msra.mxu1 %v2430_v28  ;;  %v2742_v47 = vpop.permute.xlu0 %2741 }
 0x271   : > { %3436 = vmatprep.subr.bf16.mxu0 %v2775_v25  ;;  %v14704_v39 = vpop.permute.xlu1 %2570  ;;  %v2776_v19 = vsel %vm2761_vm11, %v2740_v50, %v2742_v47 }
 0x272   : > { %2409 = vrot.lane.b32.xlu0 %v13970_v27, %s13467_s13  ;;  %v2604_v33 = vsel %vm2588_vm10, %v2569_v54, %v14704_v39 }
 0x273   : > { %2238 = vrot.lane.b32.xlu1 %v13976_v26, %s13466_s12  ;;  %3487 = vmatprep.subr.bf16.mxu1 %v2604_v33 }
 0x274   : > { %3437 = vmatpush1.bf16.msra.mxu0 %v2774_v23  ;;  %3488 = vmatpush1.bf16.msra.mxu1 %v2603_v43 }
 0x275   : > { %v14716_v56 = vpop.permute.xlu1 %2743 }
 0x276   : > { %2413 = vrot.lane.b32.xlu0 %v20845_v46, %s13467_s13  ;;  %v2777_v44 = vsel %vm2761_vm11, %v2742_v47, %v14716_v56 }
 0x277   : > { %2407 = vrot.lane.b32.xlu1 %v13974_v63, %s13467_s13  ;;  %3453 = vmatmul.mubr.bf16.vlgmr.msra.gmra.mrb[48].mxu0 %v14219_v53 }
 0x278   : > { %3489 = vmatprep.subr.bf16.mxu1 %v2777_v44  ;;  %11846 = vmatprep.mubr.msk.bf16.mxu0 %vm519_vm0, %v14226_v11 }
 0x279   : > { %3490 = vmatpush1.bf16.msra.mxu1 %v2776_v19 }
 0x27a   : > { %2582 = vrot.lane.b32.xlu0 %v13970_v27, %s13468_s14 }
 0x27b   : > { %2411 = vrot.lane.b32.xlu1 %v13976_v26, %s13467_s13 }
 0x27c   : > { %3506 = vmatmul.mubr.bf16.vlgmr.msra.gmra.mrb[48].mxu1 %v14219_v53 }
 0x27d   : > { %11848 = vmatprep.mubr.msk.bf16.mxu1 %vm519_vm0, %v14226_v11 }
 0x27e   : > { %2586 = vrot.lane.b32.xlu0 %v20845_v46, %s13468_s14 }
 0x27f   : > { %2580 = vrot.lane.b32.xlu1 %v13974_v63, %s13468_s14  ;;  %3463 = vmatmul.mubr.bf16.gmra.mrb[52].mxu0 %v14252_v49 }
 0x280   : > { %11849 = vmatprep.mubr.msk.bf16.mxu0 %vm519_vm0, %v14743_v29 }
 0x281   : > { %v14747_v53 = vpop.permute.xlu0 %3060 }
 0x282   : > { %20846 = vst [vmem:[#allocation24_spill] sm:$0xff] %v14747_v53  ;;  %2755 = vrot.lane.b32.xlu0 %v13970_v27, %s13469_s15 }
 0x283   : > { %2584 = vrot.lane.b32.xlu1 %v13976_v26, %s13468_s14 }
 0x284   : > { %3516 = vmatmul.mubr.bf16.gmra.mrb[52].mxu1 %v14252_v49 }
 0x285   : > { %v1489_v11 = vpop.permute.xlu0 %1488  ;;  %11851 = vmatprep.mubr.msk.bf16.mxu1 %vm519_vm0, %v14743_v29 }
 0x286   : > { %v14756_v15 = vpop.permute.xlu1 %3065  ;;  %2759 = vrot.lane.b32.xlu0 %v20845_v46, %s13469_s15 }
 0x287   : > { %20847 = vst [vmem:[#allocation25_spill] sm:$0xff] %v14756_v15  ;;  %2753 = vrot.lane.b32.xlu1 %v13974_v63, %s13469_s15 }
 0x289   : > { %v14762_v60 = vpop.permute.xlu0 %1492 }
 0x28a   : > { %v3136_v37 = vpop.f32.mrb[24].mxu0  ;;  %v1487_v58 = vpop.permute.xlu1 %1486  ;;  %13373 = vrot.lane.b32.xlu0 %v20845_v46, %s13462_s21 }
 0x28b   : > { %v3137_v49 = vadd.f32 %v3136_v37, %v14747_v53  ;;  %v3138_v57 = vpop.f32.mrb[25].mxu0  ;;  %2757 = vrot.lane.b32.xlu1 %v13976_v26, %s13469_s15  ;;  %v1520_v7 = vsel %vm1502_vm4, %v1487_v58, %v1489_v11  ;;  %v1519_v55 = vsel %vm1502_vm4, %v14606_v5, %v1487_v58 }
 0x28c   : > { %v3139_v4 = vadd.f32 %v3138_v57, %v14747_v53  ;;  %v3140_v20 = vpop.f32.mrb[26].mxu0  ;;  %3526 = vmatprep.subr.bf16.mxu0 %v1520_v7 }
 0x28d   : > { %v14773_v59 = vpop.permute.xlu0 %3075  ;;  %vm3738_vm12 = vcmp.ge.f32.partialorder %v3137_v49, 0.0  ;;  %v3834_v40 = vmul.f32 0.2, %v3137_v49  ;;  %v3141_v34 = vadd.f32 %v3140_v20, %v14756_v15  ;;  %v3142_v8 = vpop.f32.mrb[27].mxu0  ;;  %3527 = vmatpush1.bf16.msra.mxu0 %v1519_v55 }
 0x28e   : > { %vm3739_vm13 = vcmp.ge.f32.partialorder %v3139_v4, 0.0  ;;  %v3835_v0 = vmul.f32 0.2, %v3139_v4  ;;  %v3143_v50 = vadd.f32 %v3142_v8, %v14756_v15  ;;  %v1491_v9 = vpop.permute.xlu1 %1490  ;;  %13383 = vrot.lane.b32.xlu0 %v20845_v46, %s13464_s23 }
 0x28f   : > { %v3930_v5 = vsel %vm3738_vm12, %v3137_v49, %v3834_v40  ;;  %vm3762_vm14 = vcmp.ge.f32.partialorder %v3141_v34, 0.0  ;;  %v3858_v54 = vmul.f32 0.2, %v3141_v34  ;;  %13368 = vrot.lane.b32.xlu1 %v20845_v46, %s13463_s22  ;;  %v1522_v36 = vsel %vm1502_vm4, %v1491_v9, %v14762_v60 }
 0x290   : > { %v3931_v62 = vsel %vm3739_vm13, %v3139_v4, %v3835_v0  ;;  %vm3763_vm15 = vcmp.ge.f32.partialorder %v3143_v50, 0.0  ;;  %v3859_v48 = vmul.f32 0.2, %v3143_v50  ;;  %3579 = vmatprep.subr.bf16.mxu1 %v1522_v36  ;;  %v1521_v30 = vsel %vm1502_vm4, %v1489_v11, %v1491_v9 }
 0x291   : > { %v3954_v45 = vsel %vm3762_vm14, %v3141_v34, %v3858_v54  ;;  %v14783_v38 = vpop.permute.xlu0 %1661  ;;  %v4026_v42 = vmul.f32 %v3930_v5, %v13671_v13  ;;  %3580 = vmatpush1.bf16.msra.mxu1 %v1521_v30  ;;  %v4027_v23 = vmul.f32 %v3931_v62, %v13678_v17 }
 0x292   : > { %v4050_v52 = vmul.f32 %v3954_v45, %v13671_v13  ;;  %v3955_v28 = vsel %vm3763_vm15, %v3143_v50, %v3859_v48  ;;  %v3146_v25 = vpop.f32.mrb[28].mxu0  ;;  %v14788_v33 = vpop.permute.xlu1 %3070 }
 0x293   : > { %v4051_v43 = vmul.f32 %v3955_v28, %v13678_v17  ;;  %v3189_v47 = vpop.f32.mrb[24].mxu1  ;;  %v3148_v44 = vpop.f32.mrb[29].mxu0  ;;  %13378 = vrot.lane.b32.xlu1 %v20845_v46, %s13465_s24  ;;  %v3147_v19 = vadd.f32 %v3146_v25, %v14788_v33 }
 0x294   : > { %v14795_v11 = vpack.c.bf16 %v4050_v52, %v4026_v42  ;;  %v3190_v37 = vadd.f32 %v3189_v47, %v14747_v53  ;;  %v3149_v58 = vadd.f32 %v3148_v44, %v14788_v33  ;;  %v3191_v49 = vpop.f32.mrb[25].mxu1  ;;  %v3150_v57 = vpop.f32.mrb[30].mxu0 }
 0x295   : > { %v14799_v7 = vpack.c.bf16 %v4051_v43, %v4027_v23  ;;  %v14801_v55 = vpop.permute.xlu0 %1665  ;;  %v3192_v4 = vadd.f32 %v3191_v49, %v14747_v53  ;;  %v3151_v20 = vadd.f32 %v3150_v57, %v14773_v59  ;;  %vm3786_vm1 = vcmp.ge.f32.partialorder %v3147_v19, 0.0  ;;  %v3193_v40 = vpop.f32.mrb[26].mxu1 }
 0x296   : > { %vm3740_vm2 = vcmp.ge.f32.partialorder %v3190_v37, 0.0  ;;  %v3836_v34 = vmul.f32 0.2, %v3190_v37  ;;  %vm3787_vm3 = vcmp.ge.f32.partialorder %v3149_v58, 0.0  ;;  %v3883_v8 = vmul.f32 0.2, %v3149_v58  ;;  %v1660_v0 = vpop.permute.xlu1 %1659 }
 0x297   : > { %vm3741_vm12 = vcmp.ge.f32.partialorder %v3192_v4, 0.0  ;;  %v3837_v50 = vmul.f32 0.2, %v3192_v4  ;;  %vm3810_vm13 = vcmp.ge.f32.partialorder %v3151_v20, 0.0  ;;  %v3882_v9 = vmul.f32 0.2, %v3147_v19  ;;  %4320 = vrot.lane.b32.xlu1 %v14795_v11, %s13463_s22 }
 0x298   : > { %v3932_v5 = vsel %vm3740_vm2, %v3190_v37, %v3836_v34  ;;  %v3979_v54 = vsel %vm3787_vm3, %v3149_v58, %v3883_v8  ;;  %v3906_v36 = vmul.f32 0.2, %v3151_v20  ;;  %v3194_v62 = vadd.f32 %v3193_v40, %v14756_v15  ;;  %v3152_v48 = vpop.f32.mrb[31].mxu0  ;;  %v3195_v45 = vpop.f32.mrb[27].mxu1 }
 0x299   : > { %v4028_v30 = vmul.f32 %v3932_v5, %v13673_v14  ;;  %v4075_v42 = vmul.f32 %v3979_v54, %v13678_v17  ;;  %v3933_v52 = vsel %vm3741_vm12, %v3192_v4, %v3837_v50  ;;  %v3978_v28 = vsel %vm3786_vm1, %v3147_v19, %v3882_v9  ;;  %v14811_v25 = vpop.permute.xlu0 %1834 }
 0x29a   : > { %v4029_v23 = vmul.f32 %v3933_v52, %v13681_v18  ;;  %v4002_v43 = vsel %vm3810_vm13, %v3151_v20, %v3906_v36  ;;  %v4074_v47 = vmul.f32 %v3978_v28, %v13671_v13  ;;  %vm3764_vm14 = vcmp.ge.f32.partialorder %v3194_v62, 0.0  ;;  %v1664_v44 = vpop.permute.xlu1 %1663 }
 0x29b   : > { %v4098_v37 = vmul.f32 %v4002_v43, %v13671_v13  ;;  %v3860_v58 = vmul.f32 0.2, %v3194_v62  ;;  %v3153_v49 = vadd.f32 %v3152_v48, %v14773_v59  ;;  %v3196_v57 = vadd.f32 %v3195_v45, %v14756_v15  ;;  %v3199_v40 = vpop.f32.mrb[28].mxu1 }
 0x29c   : > { %v1693_v19 = vsel %vm1675_vm5, %v1660_v0, %v14783_v38  ;;  %v1692_v4 = vsel %vm1675_vm5, %v14622_v24, %v1660_v0  ;;  %v3200_v20 = vadd.f32 %v3199_v40, %v14788_v33  ;;  %v3201_v34 = vpop.f32.mrb[29].mxu1  ;;  %v1695_v8 = vsel %vm1675_vm5, %v1664_v44, %v14801_v55 }
 0x29d   : > { %v14825_v50 = vpack.c.bf16 %v4098_v37, %v4074_v47  ;;  %v3956_v13 = vsel %vm3764_vm14, %v3194_v62, %v3860_v58  ;;  %vm3811_vm15 = vcmp.ge.f32.partialorder %v3153_v49, 0.0  ;;  %v3907_v9 = vmul.f32 0.2, %v3153_v49  ;;  %3528 = vmatprep.subr.bf16.mxu0 %v1693_v19  ;;  %v14827_v5 = vpop.permute.xlu0 %1838  ;;  %v3203_v54 = vpop.f32.mrb[30].mxu1  ;;  %3581 = vmatprep.subr.bf16.mxu1 %v1695_v8 }
 0x29e   : > { %v4052_v36 = vmul.f32 %v3956_v13, %v13673_v14  ;;  %vm3765_vm1 = vcmp.ge.f32.partialorder %v3196_v57, 0.0  ;;  %v3861_v24 = vmul.f32 0.2, %v3196_v57  ;;  %3529 = vmatpush1.bf16.msra.mxu0 %v1692_v4  ;;  %vm3788_vm2 = vcmp.ge.f32.partialorder %v3200_v20, 0.0  ;;  %v3205_v0 = vpop.f32.mrb[31].mxu1  ;;  %v1833_v48 = vpop.permute.xlu1 %1832 }
 0x29f   : > { %v4003_v45 = vsel %vm3811_vm15, %v3153_v49, %v3907_v9  ;;  %v3884_v52 = vmul.f32 0.2, %v3200_v20  ;;  %v3202_v28 = vadd.f32 %v3201_v34, %v14788_v33  ;;  %v3204_v62 = vadd.f32 %v3203_v54, %v14773_v59 }
 0x2a0   : > { %v14832_v43 = vpack.c.bf16 %v4052_v36, %v4028_v30  ;;  %v4099_v47 = vmul.f32 %v4003_v45, %v13678_v17  ;;  %v3957_v37 = vsel %vm3765_vm1, %v3196_v57, %v3861_v24  ;;  %v3206_v58 = vadd.f32 %v3205_v0, %v14773_v59 }
 0x2a1   : > { %v4053_v40 = vmul.f32 %v3957_v37, %v13681_v18  ;;  %v3980_v19 = vsel %vm3788_vm2, %v3200_v20, %v3884_v52  ;;  %vm3789_vm3 = vcmp.ge.f32.partialorder %v3202_v28, 0.0  ;;  %v3885_v4 = vmul.f32 0.2, %v3202_v28  ;;  %v2008_v8 = vpop.permute.xlu0 %2007 }
 0x2a2   : > { %v14837_v13 = vpack.c.bf16 %v4099_v47, %v4075_v42  ;;  %v4076_v49 = vmul.f32 %v3980_v19, %v13673_v14  ;;  %vm3812_vm12 = vcmp.ge.f32.partialorder %v3204_v62, 0.0  ;;  %v3908_v34 = vmul.f32 0.2, %v3204_v62  ;;  %4324 = vrot.lane.b32.xlu0 %v14832_v43, %s13463_s22  ;;  %4668 = vrot.lane.b32.xlu1 %v14832_v43, %s13462_s21  ;;  %v1837_v17 = vpop.permute.xlu1 %1836 }
 0x2a3   : > { %v14844_v30 = vpack.c.bf16 %v4053_v40, %v4029_v23  ;;  %v3981_v57 = vsel %vm3789_vm3, %v3202_v28, %v3885_v4  ;;  %vm3813_vm13 = vcmp.ge.f32.partialorder %v3206_v58, 0.0  ;;  %v3909_v20 = vmul.f32 0.2, %v3206_v58 }
 0x2a4   : > { %v4077_v9 = vmul.f32 %v3981_v57, %v13681_v18  ;;  %v4004_v42 = vsel %vm3812_vm12, %v3204_v62, %v3908_v34  ;;  %v1694_v54 = vsel %vm1675_vm5, %v14783_v38, %v1664_v44  ;;  %v1866_v36 = vsel %vm1848_vm6, %v1833_v48, %v14811_v25 }
 0x2a5   : > { %v4100_v24 = vmul.f32 %v4004_v42, %v13673_v14  ;;  %v4005_v0 = vsel %vm3813_vm13, %v3206_v58, %v3909_v20  ;;  %3582 = vmatpush1.bf16.msra.mxu1 %v1694_v54  ;;  %3530 = vmatprep.subr.bf16.mxu0 %v1866_v36  ;;  %v1865_v23 = vsel %vm1848_vm6, %v14638_v6, %v1833_v48  ;;  %v14854_v45 = vpop.permute.xlu0 %2011 }
 0x2a6   : > { %v4101_v52 = vmul.f32 %v4005_v0, %v13681_v18  ;;  %3531 = vmatpush1.bf16.msra.mxu0 %v1865_v23  ;;  %4664 = vrot.lane.b32.xlu0 %v14795_v11, %s13462_s21  ;;  %v1868_v38 = vsel %vm1848_vm6, %v1837_v17, %v14827_v5  ;;  %v1867_v14 = vsel %vm1848_vm6, %v14811_v25, %v1837_v17  ;;  %v2006_v44 = vpop.permute.xlu1 %2005 }
 0x2a7   : > { %v14863_v28 = vpack.c.bf16 %v4100_v24, %v4076_v49  ;;  %5008 = vrot.lane.b32.xlu1 %v14795_v11, %s13465_s24  ;;  %3583 = vmatprep.subr.bf16.mxu1 %v1868_v38  ;;  %v2039_v6 = vsel %vm2021_vm7, %v2006_v44, %v2008_v8  ;;  %v2038_v18 = vsel %vm2021_vm7, %v14655_v22, %v2006_v44 }
 0x2a8   : > { %v14870_v48 = vpack.c.bf16 %v4101_v52, %v4077_v9  ;;  %3532 = vmatprep.subr.bf16.mxu0 %v2039_v6 }
 0x2a9   : > { %20848 = vst [vmem:[#allocation26_spill] sm:$0xff] %v14863_v28  ;;  %3584 = vmatpush1.bf16.msra.mxu1 %v1867_v14  ;;  %v2229_v62 = vpop.permute.xlu0 %2228 }
 0x2aa   : > { %20849 = vst [vmem:[#allocation27_spill] sm:$0xff] %v14870_v48  ;;  %5012 = vrot.lane.b32.xlu0 %v14832_v43, %s13465_s24  ;;  %3533 = vmatpush1.bf16.msra.mxu0 %v2038_v18  ;;  %v2010_v25 = vpop.permute.xlu1 %2009 }
 0x2ab   : > { %5356 = vrot.lane.b32.xlu1 %v14832_v43, %s13464_s23  ;;  %3534 = vmatprep.subr.bf16.mxu0 %v13934_v21  ;;  %v2041_v47 = vsel %vm2021_vm7, %v2010_v25, %v14854_v45  ;;  %v2040_v22 = vsel %vm2021_vm7, %v2008_v8, %v2010_v25 }
 0x2ac   : > { %3585 = vmatprep.subr.bf16.mxu1 %v2041_v47 }
 0x2ad   : > { %v14880_v37 = vpop.permute.xlu0 %2232  ;;  %3586 = vmatpush1.bf16.msra.mxu1 %v2040_v22 }
 0x2ae   : > { %5352 = vrot.lane.b32.xlu0 %v14795_v11, %s13464_s23  ;;  %3535 = vmatpush1.bf16.msra.mxu0 %v13919_v41  ;;  %v2227_v58 = vpop.permute.xlu1 %2226 }
 0x2af   : > { %5790 = vrot.lane.b32.xlu1 %v14795_v11, %s13466_s12  ;;  %3587 = vmatprep.subr.bf16.mxu1 %v13936_v1  ;;  %v2260_v21 = vsel %vm2242_vm8, %v2227_v58, %v2229_v62  ;;  %v2259_v40 = vsel %vm2242_vm8, %v14677_v61, %v2227_v58 }
 0x2b0   : > { %3536 = vmatprep.subr.bf16.mxu0 %v2260_v21 }
 0x2b1   : > { %v2402_v19 = vpop.permute.xlu0 %2401  ;;  %3588 = vmatpush1.bf16.msra.mxu1 %v13932_v10 }
 0x2b2   : > { %5794 = vrot.lane.b32.xlu0 %v14832_v43, %s13466_s12  ;;  %3537 = vmatpush1.bf16.msra.mxu0 %v2259_v40  ;;  %v2231_v41 = vpop.permute.xlu1 %2230 }
 0x2b3   : > { %6134 = vrot.lane.b32.xlu1 %v14795_v11, %s13467_s13  ;;  %v2262_v1 = vsel %vm2242_vm8, %v2231_v41, %v14880_v37  ;;  %v2261_v4 = vsel %vm2242_vm8, %v2229_v62, %v2231_v41 }
 0x2b4   : > { %3589 = vmatprep.subr.bf16.mxu1 %v2262_v1 }
 0x2b5   : > { %v14899_v8 = vpop.permute.xlu0 %2405  ;;  %3590 = vmatpush1.bf16.msra.mxu1 %v2261_v4  ;;  %v20850_v4 = vld [vmem:[#allocation14_spill] sm:$0xff] }
 0x2b6   : > { %6138 = vrot.lane.b32.xlu0 %v14832_v43, %s13467_s13  ;;  %v2400_v10 = vpop.permute.xlu1 %2399 }
 0x2b7   : > { %6478 = vrot.lane.b32.xlu1 %v14795_v11, %s13468_s14  ;;  %v2433_v61 = vsel %vm2415_vm9, %v2400_v10, %v2402_v19  ;;  %v2432_v49 = vsel %vm2415_vm9, %v14691_v51, %v2400_v10 }
 0x2b8   : > { %3538 = vmatprep.subr.bf16.mxu0 %v2433_v61 }
 0x2b9   : > { %v2575_v34 = vpop.permute.xlu0 %2574  ;;  %3539 = vmatpush1.bf16.msra.mxu0 %v2432_v49 }
 0x2ba   : > { %6482 = vrot.lane.b32.xlu0 %v14832_v43, %s13468_s14  ;;  %v2404_v17 = vpop.permute.xlu1 %2403 }
 0x2bb   : > { %6822 = vrot.lane.b32.xlu1 %v14795_v11, %s13469_s15  ;;  %v2435_v57 = vsel %vm2415_vm9, %v2404_v17, %v14899_v8  ;;  %v2434_v20 = vsel %vm2415_vm9, %v2402_v19, %v2404_v17  ;;  %v20851_v17 = vld [vmem:[#allocation5_spill] sm:$0xff] }
 0x2bc   : > { %3591 = vmatprep.subr.bf16.mxu1 %v2435_v57 }
 0x2bd   : > { %v14915_v9 = vpop.permute.xlu0 %2578  ;;  %3592 = vmatpush1.bf16.msra.mxu1 %v2434_v20 }
 0x2be   : > { %6826 = vrot.lane.b32.xlu0 %v14832_v43, %s13469_s15  ;;  %v2573_v51 = vpop.permute.xlu1 %2572 }
 0x2bf   : > { %4326 = vrot.lane.b32.xlu1 %v14844_v30, %s13463_s22  ;;  %v2606_v42 = vsel %vm2588_vm10, %v2573_v51, %v2575_v34  ;;  %v2605_v54 = vsel %vm2588_vm10, %v14704_v39, %v2573_v51 }
 0x2c0   : > { %3540 = vmatprep.subr.bf16.mxu0 %v2606_v42 }
 0x2c1   : > { %v2748_v36 = vpop.permute.xlu0 %2747  ;;  %3541 = vmatpush1.bf16.msra.mxu0 %v2605_v54 }
 0x2c2   : > { %4322 = vrot.lane.b32.xlu0 %v14799_v7, %s13463_s22  ;;  %v3242_v24 = vpop.f32.mrb[32].mxu0  ;;  %v2577_v0 = vpop.permute.xlu1 %2576 }
 0x2c3   : > { %4666 = vrot.lane.b32.xlu1 %v14799_v7, %s13462_s21  ;;  %v3243_v23 = vadd.f32 %v3242_v24, %v14747_v53  ;;  %v3244_v52 = vpop.f32.mrb[33].mxu0  ;;  %v2608_v38 = vsel %vm2588_vm10, %v2577_v0, %v14915_v9  ;;  %v2607_v14 = vsel %vm2588_vm10, %v2575_v34, %v2577_v0 }
 0x2c4   : > { %v3245_v39 = vadd.f32 %v3244_v52, %v14747_v53  ;;  %v3246_v44 = vpop.f32.mrb[34].mxu0  ;;  %3593 = vmatprep.subr.bf16.mxu1 %v2608_v38 }
 0x2c5   : > { %v14933_v6 = vpop.permute.xlu0 %2751  ;;  %vm3742_vm14 = vcmp.ge.f32.partialorder %v3243_v23, 0.0  ;;  %v3838_v18 = vmul.f32 0.2, %v3243_v23  ;;  %v3247_v62 = vadd.f32 %v3246_v44, %v14756_v15  ;;  %v3248_v25 = vpop.f32.mrb[35].mxu0  ;;  %3594 = vmatpush1.bf16.msra.mxu1 %v2607_v14 }
 0x2c6   : > { %4670 = vrot.lane.b32.xlu0 %v14844_v30, %s13462_s21  ;;  %vm3743_vm15 = vcmp.ge.f32.partialorder %v3245_v39, 0.0  ;;  %v3839_v47 = vmul.f32 0.2, %v3245_v39  ;;  %v3249_v22 = vadd.f32 %v3248_v25, %v14756_v15  ;;  %v2746_v58 = vpop.permute.xlu1 %2745 }
 0x2c7   : > { %v3934_v21 = vsel %vm3742_vm14, %v3243_v23, %v3838_v18  ;;  %5014 = vrot.lane.b32.xlu1 %v14844_v30, %s13465_s24  ;;  %vm3766_vm1 = vcmp.ge.f32.partialorder %v3247_v62, 0.0  ;;  %v3862_v40 = vmul.f32 0.2, %v3247_v62  ;;  %v2779_v19 = vsel %vm2761_vm11, %v2746_v58, %v2748_v36 }
 0x2c8   : > { %v3935_v41 = vsel %vm3743_vm15, %v3245_v39, %v3839_v47  ;;  %vm3767_vm2 = vcmp.ge.f32.partialorder %v3249_v22, 0.0  ;;  %v3863_v1 = vmul.f32 0.2, %v3249_v22  ;;  %3542 = vmatprep.subr.bf16.mxu0 %v2779_v19  ;;  %v4030_v10 = vmul.f32 %v3934_v21, %v20850_v4  ;;  %v14967_v47 = vld [vmem:[%s20691_s3] ss:$8 sps:$4 sm:$0xff]  }
 0x2c9   : > { %v3958_v61 = vsel %vm3766_vm1, %v3247_v62, %v3862_v40  ;;  %v14943_v49 = vpop.permute.xlu0 %1496  ;;  %v2778_v34 = vsel %vm2761_vm11, %v14716_v56, %v2746_v58  ;;  %v4031_v57 = vmul.f32 %v3935_v41, %v20851_v17  ;;  %v14976_v40 = vld [vmem:[%s20691_s3 + $0x14] ss:$8 sps:$4 sm:$0xff]  }
 0x2ca   : > { %v4054_v20 = vmul.f32 %v3958_v61, %v20850_v4  ;;  %v3959_v51 = vsel %vm3767_vm2, %v3249_v22, %v3863_v1  ;;  %5010 = vrot.lane.b32.xlu0 %v14799_v7, %s13465_s24  ;;  %3543 = vmatpush1.bf16.msra.mxu0 %v2778_v34  ;;  %v3252_v42 = vpop.f32.mrb[36].mxu0  ;;  %v2750_v54 = vpop.permute.xlu1 %2749 }
 0x2cb   : > { %v4055_v24 = vmul.f32 %v3959_v51, %v20851_v17  ;;  %5354 = vrot.lane.b32.xlu1 %v14799_v7, %s13464_s23  ;;  %v3253_v0 = vadd.f32 %v3252_v42, %v14788_v33  ;;  %v3254_v23 = vpop.f32.mrb[37].mxu0  ;;  %v2781_v56 = vsel %vm2761_vm11, %v2750_v54, %v14933_v6  ;;  %v2780_v52 = vsel %vm2761_vm11, %v2748_v36, %v2750_v54 }
 0x2cc   : > { %v14958_v38 = vpack.c.bf16 %v4054_v20, %v4030_v10  ;;  %v3255_v14 = vadd.f32 %v3254_v23, %v14788_v33  ;;  %v3256_v39 = vpop.f32.mrb[38].mxu0  ;;  %3595 = vmatprep.subr.bf16.mxu1 %v2781_v56 }
 0x2cd   : > { %v14961_v44 = vpack.c.bf16 %v4055_v24, %v4031_v57  ;;  %v1501_v18 = vpop.permute.xlu0 %1500  ;;  %vm3790_vm3 = vcmp.ge.f32.partialorder %v3253_v0, 0.0  ;;  %v3886_v62 = vmul.f32 0.2, %v3253_v0  ;;  %v3257_v25 = vadd.f32 %v3256_v39, %v14773_v59  ;;  %3559 = vmatmul.mubr.bf16.vlgmr.msra.gmra.mrb[56].mxu0 %v14967_v47  ;;  %v3258_v36 = vpop.f32.mrb[39].mxu0  ;;  %3596 = vmatpush1.bf16.msra.mxu1 %v2780_v52 }
 0x2ce   : > { %20852 = vst [vmem:[#allocation14_spill] sm:$0xff] %v14958_v38  ;;  %5358 = vrot.lane.b32.xlu0 %v14844_v30, %s13464_s23  ;;  %vm3791_vm12 = vcmp.ge.f32.partialorder %v3255_v14, 0.0  ;;  %v3887_v22 = vmul.f32 0.2, %v3255_v14  ;;  %v3259_v58 = vadd.f32 %v3258_v36, %v14773_v59  ;;  %v1495_v21 = vpop.permute.xlu1 %1494  ;;  %11850 = vmatprep.mubr.msk.bf16.mxu0 %vm519_vm0, %v14976_v40 }
 0x2cf   : > { %20853 = vst [vmem:[#allocation5_spill] sm:$0xff] %v14961_v44  ;;  %v3982_v19 = vsel %vm3790_vm3, %v3253_v0, %v3886_v62  ;;  %5792 = vrot.lane.b32.xlu1 %v14799_v7, %s13466_s12  ;;  %vm3814_vm13 = vcmp.ge.f32.partialorder %v3257_v25, 0.0  ;;  %v3910_v41 = vmul.f32 0.2, %v3257_v25  ;;  %v1524_v1 = vsel %vm1502_vm4, %v1495_v21, %v14943_v49 }
 0x2d0   : > { %v3983_v10 = vsel %vm3791_vm12, %v3255_v14, %v3887_v22  ;;  %vm3815_vm14 = vcmp.ge.f32.partialorder %v3259_v58, 0.0  ;;  %v3911_v61 = vmul.f32 0.2, %v3259_v58  ;;  %3612 = vmatmul.mubr.bf16.vlgmr.msra.gmra.mrb[56].mxu1 %v14967_v47  ;;  %3632 = vmatprep.subr.bf16.mxu0 %v1524_v1  ;;  %v4078_v34 = vmul.f32 %v3982_v19, %v20850_v4 }
 0x2d1   : > { %v4006_v57 = vsel %vm3814_vm13, %v3257_v25, %v3910_v41  ;;  %v14986_v20 = vpop.permute.xlu0 %1669  ;;  %v1523_v51 = vsel %vm1502_vm4, %v14762_v60, %v1495_v21  ;;  %11852 = vmatprep.mubr.msk.bf16.mxu1 %vm519_vm0, %v14976_v40  ;;  %v4079_v42 = vmul.f32 %v3983_v10, %v20851_v17 }
 0x2d2   : > { %v4102_v54 = vmul.f32 %v4006_v57, %v20850_v4  ;;  %v4007_v24 = vsel %vm3815_vm14, %v3259_v58, %v3911_v61  ;;  %5796 = vrot.lane.b32.xlu0 %v14844_v30, %s13466_s12  ;;  %3633 = vmatpush1.bf16.msra.mxu0 %v1523_v51  ;;  %v3295_v0 = vpop.f32.mrb[32].mxu1  ;;  %v1499_v23 = vpop.permute.xlu1 %1498  ;;  %v20856_v51 = vld [vmem:[#allocation4_spill] sm:$0xff] }
 0x2d3   : > { %v4103_v56 = vmul.f32 %v4007_v24, %v20851_v17  ;;  %6136 = vrot.lane.b32.xlu1 %v14799_v7, %s13467_s13  ;;  %v3296_v60 = vadd.f32 %v3295_v0, %v14747_v53  ;;  %v3297_v52 = vpop.f32.mrb[33].mxu1  ;;  %v1526_v14 = vsel %vm1502_vm4, %v1499_v23, %v1501_v18  ;;  %v1525_v4 = vsel %vm1502_vm4, %v14943_v49, %v1499_v23  ;;  %v15012_v18 = vld [vmem:[%s20691_s3 + $0x10] ss:$8 sps:$4 sm:$0xff]  }
 0x2d4   : > { %v15003_v39 = vpack.c.bf16 %v4102_v54, %v4078_v34  ;;  %v3298_v62 = vadd.f32 %v3297_v52, %v14747_v53  ;;  %v3299_v25 = vpop.f32.mrb[34].mxu1  ;;  %3685 = vmatprep.subr.bf16.mxu1 %v1526_v14  ;;  %v20857_v23 = vld [vmem:[#allocation6_spill] sm:$0xff] }
 0x2d5   : > { %v15006_v36 = vpack.c.bf16 %v4103_v56, %v4079_v42  ;;  %v1674_v17 = vpop.permute.xlu0 %1673  ;;  %vm3744_vm15 = vcmp.ge.f32.partialorder %v3296_v60, 0.0  ;;  %v3840_v22 = vmul.f32 0.2, %v3296_v60  ;;  %v3300_v58 = vadd.f32 %v3299_v25, %v14756_v15  ;;  %3569 = vmatmul.mubr.bf16.gmra.mrb[60].mxu0 %v15012_v18  ;;  %v3301_v49 = vpop.f32.mrb[35].mxu1  ;;  %3686 = vmatpush1.bf16.msra.mxu1 %v1525_v4 }
 0x2d6   : > { %20854 = vst [vmem:[#allocation28_spill] sm:$0xff] %v15003_v39  ;;  %6140 = vrot.lane.b32.xlu0 %v14844_v30, %s13467_s13  ;;  %vm3745_vm1 = vcmp.ge.f32.partialorder %v3298_v62, 0.0  ;;  %v3841_v21 = vmul.f32 0.2, %v3298_v62  ;;  %v3302_v19 = vadd.f32 %v3301_v49, %v14756_v15  ;;  %v1668_v41 = vpop.permute.xlu1 %1667  ;;  %11853 = vmatprep.mubr.msk.bf16.mxu0 %vm519_vm0, %v14743_v29 }
 0x2d7   : > { %20855 = vst [vmem:[#allocation29_spill] sm:$0xff] %v15006_v36  ;;  %v3936_v1 = vsel %vm3744_vm15, %v3296_v60, %v3840_v22  ;;  %6480 = vrot.lane.b32.xlu1 %v14799_v7, %s13468_s14  ;;  %vm3768_vm2 = vcmp.ge.f32.partialorder %v3300_v58, 0.0  ;;  %v3864_v10 = vmul.f32 0.2, %v3300_v58  ;;  %v1697_v61 = vsel %vm1675_vm5, %v1668_v41, %v14986_v20 }
 0x2d8   : > { %v3937_v34 = vsel %vm3745_vm1, %v3298_v62, %v3841_v21  ;;  %vm3769_vm3 = vcmp.ge.f32.partialorder %v3302_v19, 0.0  ;;  %v3865_v57 = vmul.f32 0.2, %v3302_v19  ;;  %3622 = vmatmul.mubr.bf16.gmra.mrb[60].mxu1 %v15012_v18  ;;  %3634 = vmatprep.subr.bf16.mxu0 %v1697_v61  ;;  %v4032_v42 = vmul.f32 %v3936_v1, %v20856_v51 }
 0x2d9   : > { %v3960_v54 = vsel %vm3768_vm2, %v3300_v58, %v3864_v10  ;;  %v1843_v24 = vpop.permute.xlu0 %1842  ;;  %v1696_v0 = vsel %vm1675_vm5, %v14801_v55, %v1668_v41  ;;  %11855 = vmatprep.mubr.msk.bf16.mxu1 %vm519_vm0, %v14743_v29  ;;  %v4033_v56 = vmul.f32 %v3937_v34, %v20857_v23 }
 0x2da   : > { %v4056_v60 = vmul.f32 %v3960_v54, %v20856_v51  ;;  %v3961_v52 = vsel %vm3769_vm3, %v3302_v19, %v3865_v57  ;;  %6484 = vrot.lane.b32.xlu0 %v14844_v30, %s13468_s14  ;;  %3635 = vmatpush1.bf16.msra.mxu0 %v1696_v0  ;;  %v3305_v14 = vpop.f32.mrb[36].mxu1  ;;  %v1672_v4 = vpop.permute.xlu1 %1671 }
 0x2db   : > { %v4057_v62 = vmul.f32 %v3961_v52, %v20857_v23  ;;  %6824 = vrot.lane.b32.xlu1 %v14799_v7, %s13469_s15  ;;  %v3306_v55 = vadd.f32 %v3305_v14, %v14788_v33  ;;  %v3307_v25 = vpop.f32.mrb[37].mxu1  ;;  %v1699_v29 = vsel %vm1675_vm5, %v1672_v4, %v1674_v17  ;;  %v1698_v22 = vsel %vm1675_vm5, %v14986_v20, %v1672_v4 }
 0x2dc   : > { %v15041_v58 = vpack.c.bf16 %v4056_v60, %v4032_v42  ;;  %v3308_v49 = vadd.f32 %v3307_v25, %v14788_v33  ;;  %v3309_v21 = vpop.f32.mrb[38].mxu1  ;;  %3687 = vmatprep.subr.bf16.mxu1 %v1699_v29 }
 0x2dd   : > { %v15044_v19 = vpack.c.bf16 %v4057_v62, %v4033_v56  ;;  %v1847_v41 = vpop.permute.xlu0 %1846  ;;  %vm3792_vm12 = vcmp.ge.f32.partialorder %v3306_v55, 0.0  ;;  %v3888_v1 = vmul.f32 0.2, %v3306_v55  ;;  %v3310_v10 = vadd.f32 %v3309_v21, %v14773_v59  ;;  %v3311_v61 = vpop.f32.mrb[39].mxu1  ;;  %3688 = vmatpush1.bf16.msra.mxu1 %v1698_v22 }
 0x2de   : > { %20858 = vst [vmem:[#allocation4_spill] sm:$0xff] %v15041_v58  ;;  %6828 = vrot.lane.b32.xlu0 %v14844_v30, %s13469_s15  ;;  %vm3793_vm13 = vcmp.ge.f32.partialorder %v3308_v49, 0.0  ;;  %v3889_v20 = vmul.f32 0.2, %v3308_v49  ;;  %v3312_v17 = vadd.f32 %v3311_v61, %v14773_v59  ;;  %v1841_v34 = vpop.permute.xlu1 %1840 }
 0x2df   : > { %20859 = vst [vmem:[#allocation6_spill] sm:$0xff] %v15044_v19  ;;  %v3984_v57 = vsel %vm3792_vm12, %v3306_v55, %v3888_v1  ;;  %4714 = vrot.lane.b32.xlu1 %v14825_v50, %s13462_s21  ;;  %vm3816_vm14 = vcmp.ge.f32.partialorder %v3310_v10, 0.0  ;;  %v3912_v42 = vmul.f32 0.2, %v3310_v10  ;;  %v1870_v54 = vsel %vm1848_vm6, %v1841_v34, %v1843_v24 }
 0x2e0   : > { %v3985_v0 = vsel %vm3793_vm13, %v3308_v49, %v3889_v20  ;;  %vm3817_vm15 = vcmp.ge.f32.partialorder %v3312_v17, 0.0  ;;  %v3913_v56 = vmul.f32 0.2, %v3312_v17  ;;  %3636 = vmatprep.subr.bf16.mxu0 %v1870_v54  ;;  %v1869_v14 = vsel %vm1848_vm6, %v14827_v5, %v1841_v34 }
 0x2e1   : > { %v4008_v60 = vsel %vm3816_vm14, %v3310_v10, %v3912_v42  ;;  %v2016_v52 = vpop.permute.xlu0 %2015  ;;  %v4080_v4 = vmul.f32 %v3984_v57, %v20856_v51  ;;  %3637 = vmatpush1.bf16.msra.mxu0 %v1869_v14  ;;  %v4081_v29 = vmul.f32 %v3985_v0, %v20857_v23 }
 0x2e2   : > { %v4104_v62 = vmul.f32 %v4008_v60, %v20856_v51  ;;  %v4009_v55 = vsel %vm3817_vm15, %v3312_v17, %v3913_v56  ;;  %4370 = vrot.lane.b32.xlu0 %v14825_v50, %s13463_s22  ;;  %v1845_v25 = vpop.permute.xlu1 %1844 }
 0x2e3   : > { %v4105_v22 = vmul.f32 %v4009_v55, %v20857_v23  ;;  %4718 = vrot.lane.b32.xlu1 %v14863_v28, %s13462_s21  ;;  %v1872_v49 = vsel %vm1848_vm6, %v1845_v25, %v1847_v41  ;;  %v1871_v5 = vsel %vm1848_vm6, %v1843_v24, %v1845_v25 }
 0x2e4   : > { %v15065_v21 = vpack.c.bf16 %v4104_v62, %v4080_v4  ;;  %3689 = vmatprep.subr.bf16.mxu1 %v1872_v49 }
 0x2e5   : > { %v15067_v51 = vpack.c.bf16 %v4105_v22, %v4081_v29  ;;  %v2020_v1 = vpop.permute.xlu0 %2019  ;;  %3690 = vmatpush1.bf16.msra.mxu1 %v1871_v5 }
 0x2e6   : > { %20860 = vst [vmem:[#allocation30_spill] sm:$0xff] %v15065_v21  ;;  %4374 = vrot.lane.b32.xlu0 %v14863_v28, %s13463_s22  ;;  %v2014_v10 = vpop.permute.xlu1 %2013 }
 0x2e7   : > { %20861 = vst [vmem:[#allocation31_spill] sm:$0xff] %v15067_v51  ;;  %5402 = vrot.lane.b32.xlu1 %v14825_v50, %s13464_s23  ;;  %v2043_v23 = vsel %vm2021_vm7, %v2014_v10, %v2016_v52  ;;  %v2042_v41 = vsel %vm2021_vm7, %v14854_v45, %v2014_v10 }
 0x2e8   : > { %3638 = vmatprep.subr.bf16.mxu0 %v2043_v23 }
 0x2e9   : > { %v2237_v24 = vpop.permute.xlu0 %2236  ;;  %3639 = vmatpush1.bf16.msra.mxu0 %v2042_v41 }
 0x2ea   : > { %5058 = vrot.lane.b32.xlu0 %v14825_v50, %s13465_s24  ;;  %3640 = vmatprep.subr.bf16.mxu0 %v13974_v63  ;;  %v2018_v61 = vpop.permute.xlu1 %2017 }
 0x2eb   : > { %5406 = vrot.lane.b32.xlu1 %v14863_v28, %s13464_s23  ;;  %v2045_v20 = vsel %vm2021_vm7, %v2018_v61, %v2020_v1  ;;  %v2044_v17 = vsel %vm2021_vm7, %v2016_v52, %v2018_v61 }
 0x2ec   : > { %3691 = vmatprep.subr.bf16.mxu1 %v2045_v20 }
 0x2ed   : > { %v2241_v34 = vpop.permute.xlu0 %2240  ;;  %3641 = vmatpush1.bf16.msra.mxu0 %v13968_v12  ;;  %3692 = vmatpush1.bf16.msra.mxu1 %v2044_v17 }
 0x2ee   : > { %5062 = vrot.lane.b32.xlu0 %v14863_v28, %s13465_s24  ;;  %3693 = vmatprep.subr.bf16.mxu1 %v13976_v26  ;;  %v2235_v45 = vpop.permute.xlu1 %2234 }
 0x2ef   : > { %5844 = vrot.lane.b32.xlu1 %v14863_v28, %s13466_s12  ;;  %v2264_v63 = vsel %vm2242_vm8, %v2235_v45, %v2237_v24  ;;  %v2263_v57 = vsel %vm2242_vm8, %v14880_v37, %v2235_v45 }
 0x2f0   : > { %3642 = vmatprep.subr.bf16.mxu0 %v2264_v63 }
 0x2f1   : > { %v2410_v42 = vpop.permute.xlu0 %2409  ;;  %3643 = vmatpush1.bf16.msra.mxu0 %v2263_v57  ;;  %3694 = vmatpush1.bf16.msra.mxu1 %v13970_v27 }
 0x2f2   : > { %5840 = vrot.lane.b32.xlu0 %v14825_v50, %s13466_s12  ;;  %v2239_v12 = vpop.permute.xlu1 %2238 }
 0x2f3   : > { %6188 = vrot.lane.b32.xlu1 %v14863_v28, %s13467_s13  ;;  %v2266_v26 = vsel %vm2242_vm8, %v2239_v12, %v2241_v34  ;;  %v2265_v54 = vsel %vm2242_vm8, %v2237_v24, %v2239_v12 }
 0x2f4   : > { %3695 = vmatprep.subr.bf16.mxu1 %v2266_v26 }
 0x2f5   : > { %v2414_v0 = vpop.permute.xlu0 %2413  ;;  %3696 = vmatpush1.bf16.msra.mxu1 %v2265_v54 }
 0x2f6   : > { %6184 = vrot.lane.b32.xlu0 %v14825_v50, %s13467_s13  ;;  %v2408_v37 = vpop.permute.xlu1 %2407 }
 0x2f7   : > { %6532 = vrot.lane.b32.xlu1 %v14863_v28, %s13468_s14  ;;  %v2437_v27 = vsel %vm2415_vm9, %v2408_v37, %v2410_v42  ;;  %v2436_v56 = vsel %vm2415_vm9, %v14899_v8, %v2408_v37 }
 0x2f8   : > { %3644 = vmatprep.subr.bf16.mxu0 %v2437_v27 }
 0x2f9   : > { %v2583_v60 = vpop.permute.xlu0 %2582  ;;  %3645 = vmatpush1.bf16.msra.mxu0 %v2436_v56 }
 0x2fa   : > { %6528 = vrot.lane.b32.xlu0 %v14825_v50, %s13468_s14  ;;  %v2412_v52 = vpop.permute.xlu1 %2411 }
 0x2fb   : > { %6876 = vrot.lane.b32.xlu1 %v14863_v28, %s13469_s15  ;;  %v2439_v14 = vsel %vm2415_vm9, %v2412_v52, %v2414_v0  ;;  %v2438_v4 = vsel %vm2415_vm9, %v2410_v42, %v2412_v52  ;;  %v20862_v0 = vld [vmem:[#allocation15_spill] sm:$0xff]  ;;  %v20863_v52 = vld [vmem:[#allocation17_spill] sm:$0xff] }
 0x2fc   : > { %3697 = vmatprep.subr.bf16.mxu1 %v2439_v14 }
 0x2fd   : > { %v2587_v62 = vpop.permute.xlu0 %2586  ;;  %3698 = vmatpush1.bf16.msra.mxu1 %v2438_v4 }
 0x2fe   : > { %6872 = vrot.lane.b32.xlu0 %v14825_v50, %s13469_s15  ;;  %v2581_v8 = vpop.permute.xlu1 %2580 }
 0x2ff   : > { %4372 = vrot.lane.b32.xlu1 %v14837_v13, %s13463_s22  ;;  %v2610_v55 = vsel %vm2588_vm10, %v2581_v8, %v2583_v60  ;;  %v2609_v25 = vsel %vm2588_vm10, %v14915_v9, %v2581_v8 }
 0x300   : > { %3646 = vmatprep.subr.bf16.mxu0 %v2610_v55 }
 0x301   : > { %v2756_v29 = vpop.permute.xlu0 %2755  ;;  %3647 = vmatpush1.bf16.msra.mxu0 %v2609_v25 }
 0x302   : > { %4716 = vrot.lane.b32.xlu0 %v14837_v13, %s13462_s21  ;;  %v3348_v22 = vpop.f32.mrb[40].mxu0  ;;  %v2585_v49 = vpop.permute.xlu1 %2584 }
 0x303   : > { %4376 = vrot.lane.b32.xlu1 %v14870_v48, %s13463_s22  ;;  %v3349_v5 = vadd.f32 %v3348_v22, %v14747_v53  ;;  %v3350_v1 = vpop.f32.mrb[41].mxu0  ;;  %v2612_v10 = vsel %vm2588_vm10, %v2585_v49, %v2587_v62  ;;  %v2611_v23 = vsel %vm2588_vm10, %v2583_v60, %v2585_v49 }
 0x304   : > { %v3351_v9 = vadd.f32 %v3350_v1, %v14747_v53  ;;  %v3352_v41 = vpop.f32.mrb[42].mxu0  ;;  %3699 = vmatprep.subr.bf16.mxu1 %v2612_v10 }
 0x305   : > { %vm3746_vm1 = vcmp.ge.f32.partialorder %v3349_v5, 0.0  ;;  %v3842_v24 = vmul.f32 0.2, %v3349_v5  ;;  %v2760_v61 = vpop.permute.xlu0 %2759  ;;  %v3353_v20 = vadd.f32 %v3352_v41, %v14756_v15  ;;  %v3354_v17 = vpop.f32.mrb[43].mxu0  ;;  %3700 = vmatpush1.bf16.msra.mxu1 %v2611_v23 }
 0x306   : > { %4720 = vrot.lane.b32.xlu0 %v14870_v48, %s13462_s21  ;;  %vm3747_vm2 = vcmp.ge.f32.partialorder %v3351_v9, 0.0  ;;  %v3843_v34 = vmul.f32 0.2, %v3351_v9  ;;  %v3355_v45 = vadd.f32 %v3354_v17, %v14756_v15  ;;  %v2754_v63 = vpop.permute.xlu1 %2753 }
 0x307   : > { %v3938_v57 = vsel %vm3746_vm1, %v3349_v5, %v3842_v24  ;;  %5060 = vrot.lane.b32.xlu1 %v14837_v13, %s13465_s24  ;;  %vm3770_vm3 = vcmp.ge.f32.partialorder %v3353_v20, 0.0  ;;  %v3866_v42 = vmul.f32 0.2, %v3353_v20  ;;  %v2783_v12 = vsel %vm2761_vm11, %v2754_v63, %v2756_v29 }
 0x308   : > { %v3939_v26 = vsel %vm3747_vm2, %v3351_v9, %v3843_v34  ;;  %vm3771_vm12 = vcmp.ge.f32.partialorder %v3355_v45, 0.0  ;;  %v3867_v54 = vmul.f32 0.2, %v3355_v45  ;;  %3648 = vmatprep.subr.bf16.mxu0 %v2783_v12  ;;  %v4034_v37 = vmul.f32 %v3938_v57, %v20862_v0 }
 0x309   : > { %v3962_v27 = vsel %vm3770_vm3, %v3353_v20, %v3866_v42  ;;  %v15135_v56 = vpop.permute.xlu0 %13373  ;;  %v2782_v60 = vsel %vm2761_vm11, %v14933_v6, %v2754_v63  ;;  %v4035_v14 = vmul.f32 %v3939_v26, %v20863_v52 }
 0x30a   : > { %v4058_v4 = vmul.f32 %v3962_v27, %v20862_v0  ;;  %v3963_v62 = vsel %vm3771_vm12, %v3355_v45, %v3867_v54  ;;  %5404 = vrot.lane.b32.xlu0 %v14837_v13, %s13464_s23  ;;  %3649 = vmatpush1.bf16.msra.mxu0 %v2782_v60  ;;  %v3358_v8 = vpop.f32.mrb[44].mxu0  ;;  %v2758_v55 = vpop.permute.xlu1 %2757 }
 0x30b   : > { %v4059_v25 = vmul.f32 %v3963_v62, %v20863_v52  ;;  %5064 = vrot.lane.b32.xlu1 %v14870_v48, %s13465_s24  ;;  %v3359_v22 = vadd.f32 %v3358_v8, %v14788_v33  ;;  %v3360_v49 = vpop.f32.mrb[45].mxu0  ;;  %v2785_v6 = vsel %vm2761_vm11, %v2758_v55, %v2760_v61  ;;  %v2784_v5 = vsel %vm2761_vm11, %v2756_v29, %v2758_v55 }
 0x30c   : > { %v15149_v1 = vpack.c.bf16 %v4058_v4, %v4034_v37  ;;  %v3361_v10 = vadd.f32 %v3360_v49, %v14788_v33  ;;  %v3362_v23 = vpop.f32.mrb[46].mxu0  ;;  %3701 = vmatprep.subr.bf16.mxu1 %v2785_v6 }
 0x30d   : > { %v15152_v9 = vpack.c.bf16 %v4059_v25, %v4035_v14  ;;  %vm3794_vm13 = vcmp.ge.f32.partialorder %v3359_v22, 0.0  ;;  %v3890_v41 = vmul.f32 0.2, %v3359_v22  ;;  %v3363_v24 = vadd.f32 %v3362_v23, %v14773_v59  ;;  %3665 = vmatmul.mubr.bf16.vlgmr.msra.gmra.mrb[64].mxu0 %v14967_v47  ;;  %v3364_v20 = vpop.f32.mrb[47].mxu0  ;;  %3702 = vmatpush1.bf16.msra.mxu1 %v2784_v5  ;;  %v15158_v61 = vpop.permute.xlu0 %13383 }
 0x30e   : > { %20864 = vst [vmem:[#allocation15_spill] sm:$0xff] %v15149_v1  ;;  %5408 = vrot.lane.b32.xlu0 %v14870_v48, %s13464_s23  ;;  %vm3795_vm14 = vcmp.ge.f32.partialorder %v3361_v10, 0.0  ;;  %v3891_v29 = vmul.f32 0.2, %v3361_v10  ;;  %v15160_v17 = vpop.permute.xlu1 %13368  ;;  %11854 = vmatprep.mubr.msk.bf16.mxu0 %vm519_vm0, %v14976_v40  ;;  %v3365_v63 = vadd.f32 %v3364_v20, %v14773_v59 }
 0x30f   : > { %20865 = vst [vmem:[#allocation17_spill] sm:$0xff] %v15152_v9  ;;  %v3986_v34 = vsel %vm3794_vm13, %v3359_v22, %v3890_v41  ;;  %5846 = vrot.lane.b32.xlu1 %v14870_v48, %s13466_s12  ;;  %vm3818_vm15 = vcmp.ge.f32.partialorder %v3363_v24, 0.0  ;;  %v3914_v45 = vmul.f32 0.2, %v3363_v24 }
 0x310   : > { %3718 = vmatmul.mubr.bf16.vlgmr.msra.gmra.mrb[64].mxu1 %v14967_v47  ;;  %v3987_v57 = vsel %vm3795_vm14, %v3361_v10, %v3891_v29  ;;  %vm3819_vm1 = vcmp.ge.f32.partialorder %v3365_v63, 0.0  ;;  %v3915_v12 = vmul.f32 0.2, %v3365_v63  ;;  %v4082_v26 = vmul.f32 %v3986_v34, %v20862_v0 }
 0x311   : > { %v4010_v42 = vsel %vm3818_vm15, %v3363_v24, %v3914_v45  ;;  %11856 = vmatprep.mubr.msk.bf16.mxu1 %vm519_vm0, %v14976_v40  ;;  %v4083_v4 = vmul.f32 %v3987_v57, %v20863_v52  ;;  %v20868_v45 = vld [vmem:[#allocation16_spill] sm:$0xff] }
 0x312   : > { %v4106_v54 = vmul.f32 %v4010_v42, %v20862_v0  ;;  %5842 = vrot.lane.b32.xlu0 %v14837_v13, %s13466_s12  ;;  %v3401_v37 = vpop.f32.mrb[40].mxu1  ;;  %v15174_v27 = vpop.permute.xlu1 %13378  ;;  %v4011_v60 = vsel %vm3819_vm1, %v3365_v63, %v3915_v12 }
 0x313   : > { %6190 = vrot.lane.b32.xlu1 %v14870_v48, %s13467_s13  ;;  %v3402_v47 = vadd.f32 %v3401_v37, %v14747_v53  ;;  %v3403_v14 = vpop.f32.mrb[41].mxu1  ;;  %v4107_v62 = vmul.f32 %v4011_v60, %v20863_v52 }
 0x314   : > { %v15180_v40 = vpack.c.bf16 %v4106_v54, %v4082_v26  ;;  %v15183_v0 = vpop.permute.xlu0 %4324  ;;  %v3404_v8 = vadd.f32 %v3403_v14, %v14747_v53  ;;  %v3405_v55 = vpop.f32.mrb[42].mxu1  ;;  %v20869_v54 = vld [vmem:[#allocation18_spill] sm:$0xff] }
 0x315   : > { %vm3748_vm0 = vcmp.ge.f32.partialorder %v3402_v47, 0.0  ;;  %v3844_v25 = vmul.f32 0.2, %v3402_v47  ;;  %v3406_v22 = vadd.f32 %v3405_v55, %v14756_v15  ;;  %3675 = vmatmul.mubr.bf16.gmra.mrb[68].mxu0 %v15012_v18  ;;  %v3407_v49 = vpop.f32.mrb[43].mxu1  ;;  %v15188_v6 = vpack.c.bf16 %v4107_v62, %v4083_v4 }
 0x316   : > { %20866 = vst [vmem:[#allocation32_spill] sm:$0xff] %v15180_v40  ;;  %6186 = vrot.lane.b32.xlu0 %v14837_v13, %s13467_s13  ;;  %vm3749_vm2 = vcmp.ge.f32.partialorder %v3404_v8, 0.0  ;;  %v3845_v5 = vmul.f32 0.2, %v3404_v8  ;;  %v3408_v52 = vadd.f32 %v3407_v49, %v14756_v15  ;;  %v15193_v10 = vpop.permute.xlu1 %4320  ;;  %v20889_v40 = vld [vmem:[#allocation7_spill] sm:$0xff] }
 0x317   : > { %20867 = vst [vmem:[#allocation33_spill] sm:$0xff] %v15188_v6  ;;  %v3940_v23 = vsel %vm3748_vm0, %v3402_v47, %v3844_v25  ;;  %6534 = vrot.lane.b32.xlu1 %v14870_v48, %s13468_s14  ;;  %vm3772_vm3 = vcmp.ge.f32.partialorder %v3406_v22, 0.0  ;;  %v3868_v41 = vmul.f32 0.2, %v3406_v22 }
 0x318   : > { %v3941_v24 = vsel %vm3749_vm2, %v3404_v8, %v3845_v5  ;;  %v15197_v20 = vpop.permute.xlu0 %4664  ;;  %vm3773_vm12 = vcmp.ge.f32.partialorder %v3408_v52, 0.0  ;;  %v3869_v29 = vmul.f32 0.2, %v3408_v52  ;;  %3728 = vmatmul.mubr.bf16.gmra.mrb[68].mxu1 %v15012_v18  ;;  %v4036_v63 = vmul.f32 %v3940_v23, %v20868_v45 }
 0x319   : > { %v3964_v34 = vsel %vm3772_vm3, %v3406_v22, %v3868_v41  ;;  %v4037_v37 = vmul.f32 %v3941_v24, %v20869_v54 }
 0x31a   : > { %v4060_v57 = vmul.f32 %v3964_v34, %v20868_v45  ;;  %v3965_v42 = vsel %vm3773_vm12, %v3408_v52, %v3869_v29  ;;  %6530 = vrot.lane.b32.xlu0 %v14837_v13, %s13468_s14  ;;  %v3411_v12 = vpop.f32.mrb[44].mxu1  ;;  %v15204_v26 = vpop.permute.xlu1 %4668 }
 0x31b   : > { %v4061_v60 = vmul.f32 %v3965_v42, %v20869_v54  ;;  %6878 = vrot.lane.b32.xlu1 %v14870_v48, %s13469_s15  ;;  %v3412_v18 = vadd.f32 %v3411_v12, %v14788_v33  ;;  %v3413_v47 = vpop.f32.mrb[45].mxu1 }
 0x31c   : > { %v15211_v14 = vpack.c.bf16 %v4060_v57, %v4036_v63  ;;  %v15213_v4 = vpop.permute.xlu0 %5012  ;;  %v3414_v62 = vadd.f32 %v3413_v47, %v14788_v33  ;;  %v3415_v8 = vpop.f32.mrb[46].mxu1 }
 0x31d   : > { %v15216_v55 = vpack.c.bf16 %v4061_v60, %v4037_v37  ;;  %vm3796_vm13 = vcmp.ge.f32.partialorder %v3412_v18, 0.0  ;;  %v3892_v25 = vmul.f32 0.2, %v3412_v18  ;;  %v3416_v22 = vadd.f32 %v3415_v8, %v14773_v59  ;;  %v3417_v49 = vpop.f32.mrb[47].mxu1 }
 0x31e   : > { %20870 = vst [vmem:[#allocation16_spill] sm:$0xff] %v15211_v14  ;;  %6874 = vrot.lane.b32.xlu0 %v14837_v13, %s13469_s15  ;;  %vm3797_vm14 = vcmp.ge.f32.partialorder %v3414_v62, 0.0  ;;  %v3893_v5 = vmul.f32 0.2, %v3414_v62  ;;  %v3418_v52 = vadd.f32 %v3417_v49, %v14773_v59  ;;  %v15222_v23 = vpop.permute.xlu1 %5008 }
 0x31f   : > { %20871 = vst [vmem:[#allocation18_spill] sm:$0xff] %v15216_v55  ;;  %v3988_v41 = vsel %vm3796_vm13, %v3412_v18, %v3892_v25  ;;  %5798 = vrot.lane.b32.xlu1 %v14958_v38, %s13466_s12  ;;  %vm3820_vm15 = vcmp.ge.f32.partialorder %v3416_v22, 0.0  ;;  %v3916_v24 = vmul.f32 0.2, %v3416_v22 }
 0x320   : > { %v3989_v29 = vsel %vm3797_vm14, %v3414_v62, %v3893_v5  ;;  %v15226_v34 = vpop.permute.xlu0 %5352  ;;  %vm3821_vm1 = vcmp.ge.f32.partialorder %v3418_v52, 0.0  ;;  %v3917_v63 = vmul.f32 0.2, %v3418_v52  ;;  %v4084_v42 = vmul.f32 %v3988_v41, %v20868_v45 }
 0x321   : > { %v4012_v57 = vsel %vm3820_vm15, %v3416_v22, %v3916_v24  ;;  %v4085_v18 = vmul.f32 %v3989_v29, %v20869_v54  ;;  %v13370_v24 = vunpack.i.l.bf16 %v15160_v17 }
 0x322   : > { %v4108_v12 = vmul.f32 %v4012_v57, %v20868_v45  ;;  %v4013_v37 = vsel %vm3821_vm1, %v3418_v52, %v3917_v63  ;;  %5802 = vrot.lane.b32.xlu0 %v15041_v58, %s13466_s12  ;;  %v15232_v60 = vpop.permute.xlu1 %5356 }
 0x323   : > { %v4109_v47 = vmul.f32 %v4013_v37, %v20869_v54  ;;  %6142 = vrot.lane.b32.xlu1 %v14958_v38, %s13467_s13  ;;  %v4418_v57 = vsel %vm1502_vm4, %v13370_v24, %v15193_v10  ;;  %v13418_v24 = vld [vmem:[%s20692_s4 + $0x4] ss:$12 sps:$4 sm:$0xff]  }
 0x324   : > { %v15238_v62 = vpack.c.bf16 %v4108_v12, %v4084_v42  ;;  %v15240_v8 = vpop.permute.xlu0 %5794  ;;  %7633 = vmatprep.mubr.bf16.mxu0 %v13418_v24  ;;  %7759 = vmatprep.mubr.bf16.mxu1 %v13418_v24 }
 0x325   : > { %v15242_v25 = vpack.c.bf16 %v4109_v47, %v4085_v18 }
 0x326   : > { %20872 = vst [vmem:[#allocation34_spill] sm:$0xff] %v15238_v62  ;;  %6146 = vrot.lane.b32.xlu0 %v15041_v58, %s13467_s13  ;;  %v15246_v45 = vpop.permute.xlu1 %5790 }
 0x327   : > { %20873 = vst [vmem:[#allocation35_spill] sm:$0xff] %v15242_v25  ;;  %20874 = vst [vmem:[#allocation36_spill] sm:$0xff] %v15246_v45  ;;  %6486 = vrot.lane.b32.xlu1 %v14958_v38, %s13468_s14 }
 0x328   : > { %v15250_v22 = vpop.permute.xlu0 %6138 }
 0x329   : > { %20875 = vst [vmem:[#allocation37_spill] sm:$0xff] %v15250_v22 }
 0x32a   : > { %4330 = vrot.lane.b32.xlu0 %v14961_v44, %s13463_s22  ;;  %v15254_v54 = vpop.permute.xlu1 %6134 }
 0x32b   : > { %20876 = vst [vmem:[#allocation38_spill] sm:$0xff] %v15254_v54  ;;  %6830 = vrot.lane.b32.xlu1 %v14958_v38, %s13469_s15 }
 0x32c   : > { %v15258_v49 = vpop.permute.xlu0 %6482 }
 0x32d   : > { %20877 = vst [vmem:[#allocation39_spill] sm:$0xff] %v15258_v49 }
 0x32e   : > { %4334 = vrot.lane.b32.xlu0 %v15044_v19, %s13463_s22  ;;  %v15262_v5 = vpop.permute.xlu1 %6478 }
 0x32f   : > { %20878 = vst [vmem:[#allocation40_spill] sm:$0xff] %v15262_v5  ;;  %4328 = vrot.lane.b32.xlu1 %v14958_v38, %s13463_s22 }
 0x330   : > { %v15266_v52 = vpop.permute.xlu0 %6826 }
 0x331   : > { %20879 = vst [vmem:[#allocation41_spill] sm:$0xff] %v15266_v52 }
 0x332   : > { %4674 = vrot.lane.b32.xlu0 %v14961_v44, %s13462_s21  ;;  %v15270_v41 = vpop.permute.xlu1 %6822 }
 0x333   : > { %20880 = vst [vmem:[#allocation42_spill] sm:$0xff] %v15270_v41  ;;  %4332 = vrot.lane.b32.xlu1 %v15041_v58, %s13463_s22 }
 0x334   : > { %v4323_v29 = vpop.permute.xlu0 %4322 }
 0x335   : > { %v4419_v63 = vsel %vm1502_vm4, %v15193_v10, %v4323_v29  ;;  %v4420_v18 = vsel %vm1502_vm4, %v4323_v29, %v15183_v0 }
 0x336   : > { %4678 = vrot.lane.b32.xlu0 %v15044_v19, %s13462_s21  ;;  %7601 = vmatprep.subr.bf16.mxu0 %v4419_v63  ;;  %v15281_v42 = vpop.permute.xlu1 %4326 }
 0x337   : > { %20881 = vst [vmem:[#allocation43_spill] sm:$0xff] %v15281_v42  ;;  %4672 = vrot.lane.b32.xlu1 %v14958_v38, %s13462_s21  ;;  %7602 = vmatpush1.bf16.msra.mxu0 %v4418_v57  ;;  %v4421_v12 = vsel %vm1502_vm4, %v15183_v0, %v15281_v42 }
 0x338   : > { %v15288_v37 = vpop.permute.xlu0 %4670  ;;  %7727 = vmatprep.subr.bf16.mxu1 %v4421_v12 }
 0x339   : > { %7728 = vmatpush1.bf16.msra.mxu1 %v4420_v18 }
 0x33a   : > { %5018 = vrot.lane.b32.xlu0 %v14961_v44, %s13465_s24  ;;  %v15294_v10 = vpop.permute.xlu1 %4666 }
 0x33b   : > { %4676 = vrot.lane.b32.xlu1 %v15041_v58, %s13462_s21 }
 0x33c   : > { %v15298_v47 = vpop.permute.xlu0 %5010 }
 0x33e   : > { %5022 = vrot.lane.b32.xlu0 %v15044_v19, %s13465_s24  ;;  %v15305_v63 = vpop.permute.xlu1 %5014 }
 0x33f   : > { %5016 = vrot.lane.b32.xlu1 %v14958_v38, %s13465_s24 }
 0x340   : > { %v15309_v0 = vpop.permute.xlu0 %5358 }
 0x341   : > { %20882 = vst [vmem:[#allocation44_spill] sm:$0xff] %v15309_v0 }
 0x342   : > { %5362 = vrot.lane.b32.xlu0 %v14961_v44, %s13464_s23  ;;  %v15313_v29 = vpop.permute.xlu1 %5354 }
 0x343   : > { %5020 = vrot.lane.b32.xlu1 %v15041_v58, %s13465_s24 }
 0x344   : > { %v15317_v57 = vpop.permute.xlu0 %5796 }
 0x345   : > { %20883 = vst [vmem:[#allocation45_spill] sm:$0xff] %v15317_v57  ;;  %v20893_v57 = vld [vmem:[#allocation8_spill] sm:$0xff] }
 0x346   : > { %5366 = vrot.lane.b32.xlu0 %v15044_v19, %s13464_s23  ;;  %v15321_v12 = vpop.permute.xlu1 %5792 }
 0x347   : > { %5360 = vrot.lane.b32.xlu1 %v14958_v38, %s13464_s23 }
 0x348   : > { %v15325_v18 = vpop.permute.xlu0 %6140 }
 0x349   : > { %20884 = vst [vmem:[#allocation46_spill] sm:$0xff] %v15325_v18 }
 0x34a   : > { %5848 = vrot.lane.b32.xlu0 %v15003_v39, %s13466_s12  ;;  %v3454_v24 = vpop.f32.mrb[48].mxu0  ;;  %v15329_v42 = vpop.permute.xlu1 %6136 }
 0x34b   : > { %20885 = vst [vmem:[#allocation47_spill] sm:$0xff] %v15329_v42  ;;  %5364 = vrot.lane.b32.xlu1 %v15041_v58, %s13464_s23  ;;  %v3455_v46 = vadd.f32 %v3454_v24, %v14747_v53  ;;  %v3456_v25 = vpop.f32.mrb[49].mxu0 }
 0x34c   : > { %v15334_v62 = vpop.permute.xlu0 %6484  ;;  %v3457_v6 = vadd.f32 %v3456_v25, %v14747_v53  ;;  %v3458_v41 = vpop.f32.mrb[50].mxu0 }
 0x34d   : > { %20886 = vst [vmem:[#allocation48_spill] sm:$0xff] %v15334_v62  ;;  %vm3750_vm0 = vcmp.ge.f32.partialorder %v3455_v46, 0.0  ;;  %v3846_v38 = vmul.f32 0.2, %v3455_v46  ;;  %v3459_v18 = vadd.f32 %v3458_v41, %v14756_v15  ;;  %v3460_v55 = vpop.f32.mrb[51].mxu0 }
 0x34e   : > { %6192 = vrot.lane.b32.xlu0 %v15003_v39, %s13467_s13  ;;  %vm3751_vm2 = vcmp.ge.f32.partialorder %v3457_v6, 0.0  ;;  %v3847_v14 = vmul.f32 0.2, %v3457_v6  ;;  %v3461_v9 = vadd.f32 %v3460_v55, %v14756_v15  ;;  %v15341_v16 = vpop.permute.xlu1 %6480 }
 0x34f   : > { %20887 = vst [vmem:[#allocation49_spill] sm:$0xff] %v15341_v16  ;;  %v3942_v24 = vsel %vm3750_vm0, %v3455_v46, %v3846_v38  ;;  %5800 = vrot.lane.b32.xlu1 %v14961_v44, %s13466_s12  ;;  %vm3774_vm3 = vcmp.ge.f32.partialorder %v3459_v18, 0.0  ;;  %v3870_v25 = vmul.f32 0.2, %v3459_v18  ;;  %v3507_v62 = vpop.f32.mrb[48].mxu1 }
 0x350   : > { %v3943_v32 = vsel %vm3751_vm2, %v3457_v6, %v3847_v14  ;;  %v15345_v35 = vpop.permute.xlu0 %6828  ;;  %vm3775_vm12 = vcmp.ge.f32.partialorder %v3461_v9, 0.0  ;;  %v3871_v41 = vmul.f32 0.2, %v3461_v9  ;;  %v3509_v31 = vpop.f32.mrb[49].mxu1  ;;  %v4038_v52 = vmul.f32 %v3942_v24, %v20889_v40 }
 0x351   : > { %20888 = vst [vmem:[#allocation50_spill] sm:$0xff] %v15345_v35  ;;  %v3966_v5 = vsel %vm3774_vm3, %v3459_v18, %v3870_v25  ;;  %v3508_v55 = vadd.f32 %v3507_v62, %v14747_v53  ;;  %v3510_v16 = vadd.f32 %v3509_v31, %v14747_v53  ;;  %v3511_v46 = vpop.f32.mrb[50].mxu1  ;;  %v4039_v38 = vmul.f32 %v3943_v32, %v13644_v2 }
 0x352   : > { %v4062_v49 = vmul.f32 %v3966_v5, %v20889_v40  ;;  %v3967_v54 = vsel %vm3775_vm12, %v3461_v9, %v3871_v41  ;;  %6536 = vrot.lane.b32.xlu0 %v15003_v39, %s13468_s14  ;;  %v3512_v6 = vadd.f32 %v3511_v46, %v14756_v15  ;;  %v3513_v14 = vpop.f32.mrb[51].mxu1  ;;  %v3464_v35 = vpop.f32.mrb[52].mxu0 }
 0x353   : > { %v4063_v24 = vmul.f32 %v3967_v54, %v13644_v2  ;;  %vm3752_vm13 = vcmp.ge.f32.partialorder %v3508_v55, 0.0  ;;  %v3848_v18 = vmul.f32 0.2, %v3508_v55  ;;  %5804 = vrot.lane.b32.xlu1 %v15044_v19, %s13466_s12  ;;  %vm3753_vm14 = vcmp.ge.f32.partialorder %v3510_v16, 0.0  ;;  %v15358_v31 = vpop.permute.xlu1 %6824  ;;  %v3466_v32 = vpop.f32.mrb[53].mxu0 }
 0x354   : > { %20890 = vst [vmem:[#allocation7_spill] sm:$0xff] %v15358_v31  ;;  %v15360_v62 = vpack.c.bf16 %v4062_v49, %v4038_v52  ;;  %v3849_v9 = vmul.f32 0.2, %v3510_v16  ;;  %vm3776_vm15 = vcmp.ge.f32.partialorder %v3512_v6, 0.0  ;;  %v3872_v5 = vmul.f32 0.2, %v3512_v6  ;;  %v15362_v25 = vpop.permute.xlu0 %4370 }
 0x355   : > { %v3468_v41 = vpop.f32.mrb[54].mxu0  ;;  %v15364_v46 = vpack.c.bf16 %v4063_v24, %v4039_v38  ;;  %v3944_v54 = vsel %vm3752_vm13, %v3508_v55, %v3848_v18  ;;  %v3514_v53 = vadd.f32 %v3513_v14, %v14756_v15  ;;  %v3465_v42 = vadd.f32 %v3464_v35, %v14788_v33 }
 0x356   : > { %20891 = vst [vmem:[#allocation51_spill] sm:$0xff] %v15360_v62  ;;  %v3470_v22 = vpop.f32.mrb[55].mxu0  ;;  %v4040_v28 = vmul.f32 %v3944_v54, %v20893_v57  ;;  %v3968_v31 = vsel %vm3776_vm15, %v3512_v6, %v3872_v5  ;;  %6880 = vrot.lane.b32.xlu0 %v15003_v39, %s13469_s15  ;;  %v3467_v49 = vadd.f32 %v3466_v32, %v14788_v33 }
 0x357   : > { %20892 = vst [vmem:[#allocation52_spill] sm:$0xff] %v15364_v46  ;;  %v3945_v52 = vsel %vm3753_vm14, %v3510_v16, %v3849_v9  ;;  %v4064_v62 = vmul.f32 %v3968_v31, %v20893_v57  ;;  %vm3777_vm1 = vcmp.ge.f32.partialorder %v3514_v53, 0.0  ;;  %v3873_v38 = vmul.f32 0.2, %v3514_v53  ;;  %6144 = vrot.lane.b32.xlu1 %v14961_v44, %s13467_s13  ;;  %v3517_v55 = vpop.f32.mrb[52].mxu1  ;;  %v15376_v35 = vpop.permute.xlu1 %4714 }
 0x358   : > { %vm3798_vm0 = vcmp.ge.f32.partialorder %v3465_v42, 0.0  ;;  %v3894_v14 = vmul.f32 0.2, %v3465_v42  ;;  %vm3799_vm2 = vcmp.ge.f32.partialorder %v3467_v49, 0.0  ;;  %v3895_v6 = vmul.f32 0.2, %v3467_v49  ;;  %v15378_v24 = vpop.permute.xlu0 %4374 }
 0x359   : > { %v15380_v18 = vpack.c.bf16 %v4064_v62, %v4040_v28  ;;  %v3969_v32 = vsel %vm3777_vm1, %v3514_v53, %v3873_v38  ;;  %v3469_v16 = vadd.f32 %v3468_v41, %v14773_v59  ;;  %v3471_v31 = vadd.f32 %v3470_v22, %v14773_v59  ;;  %v3519_v9 = vpop.f32.mrb[53].mxu1 }
 0x35a   : > { %v4041_v5 = vmul.f32 %v3945_v52, %v13646_v3  ;;  %v4065_v54 = vmul.f32 %v3969_v32, %v13646_v3  ;;  %v3518_v46 = vadd.f32 %v3517_v55, %v14788_v33  ;;  %5852 = vrot.lane.b32.xlu0 %v15065_v21, %s13466_s12  ;;  %v3521_v15 = vpop.f32.mrb[54].mxu1  ;;  %v3990_v45 = vsel %vm3798_vm0, %v3465_v42, %v3894_v14 }
 0x35b   : > { %20894 = vst [vmem:[#allocation8_spill] sm:$0xff] %v15380_v18  ;;  %v3991_v48 = vsel %vm3799_vm2, %v3467_v49, %v3895_v6  ;;  %vm3822_vm3 = vcmp.ge.f32.partialorder %v3469_v16, 0.0  ;;  %v3918_v28 = vmul.f32 0.2, %v3469_v16  ;;  %6148 = vrot.lane.b32.xlu1 %v15044_v19, %s13467_s13  ;;  %v3523_v53 = vpop.f32.mrb[55].mxu1  ;;  %v15391_v22 = vpop.permute.xlu1 %4718  ;;  %vm3823_vm12 = vcmp.ge.f32.partialorder %v3471_v31, 0.0 }
 0x35c   : > { %v15393_v62 = vpack.c.bf16 %v4065_v54, %v4041_v5  ;;  %v3919_v41 = vmul.f32 0.2, %v3471_v31  ;;  %vm3800_vm13 = vcmp.ge.f32.partialorder %v3518_v46, 0.0  ;;  %v15395_v52 = vpop.permute.xlu0 %5058  ;;  %v3896_v55 = vmul.f32 0.2, %v3518_v46 }
 0x35d   : > { %v4014_v38 = vsel %vm3822_vm3, %v3469_v16, %v3918_v28  ;;  %v3520_v42 = vadd.f32 %v3519_v9, %v14788_v33  ;;  %v3522_v49 = vadd.f32 %v3521_v15, %v14773_v59  ;;  %v4086_v14 = vmul.f32 %v3990_v45, %v20889_v40 }
 0x35e   : > { %20895 = vst [vmem:[#allocation53_spill] sm:$0xff] %v15393_v62  ;;  %v4110_v6 = vmul.f32 %v4014_v38, %v20889_v40  ;;  %v4015_v32 = vsel %vm3823_vm12, %v3471_v31, %v3919_v41  ;;  %v3524_v18 = vadd.f32 %v3523_v53, %v14773_v59  ;;  %6196 = vrot.lane.b32.xlu0 %v15065_v21, %s13467_s13 }
 0x35f   : > { %v4087_v5 = vmul.f32 %v3991_v48, %v13644_v2  ;;  %v4111_v54 = vmul.f32 %v4015_v32, %v13644_v2  ;;  %vm3801_vm14 = vcmp.ge.f32.partialorder %v3520_v42, 0.0  ;;  %v3897_v16 = vmul.f32 0.2, %v3520_v42  ;;  %4378 = vrot.lane.b32.xlu1 %v15003_v39, %s13463_s22  ;;  %v15408_v15 = vpop.permute.xlu1 %5402 }
 0x360   : > { %v15410_v45 = vpack.c.bf16 %v4110_v6, %v4086_v14  ;;  %v3992_v40 = vsel %vm3800_vm13, %v3518_v46, %v3896_v55  ;;  %vm3824_vm15 = vcmp.ge.f32.partialorder %v3522_v49, 0.0  ;;  %v3920_v31 = vmul.f32 0.2, %v3522_v49  ;;  %v15413_v9 = vpop.permute.xlu0 %5062 }
 0x361   : > { %v15415_v28 = vpack.c.bf16 %v4111_v54, %v4087_v5  ;;  %v3993_v48 = vsel %vm3801_vm14, %v3520_v42, %v3897_v16  ;;  %vm3825_vm1 = vcmp.ge.f32.partialorder %v3524_v18, 0.0  ;;  %v3921_v2 = vmul.f32 0.2, %v3524_v18 }
 0x362   : > { %20896 = vst [vmem:[#allocation54_spill] sm:$0xff] %v15410_v45  ;;  %v4016_v53 = vsel %vm3824_vm15, %v3522_v49, %v3920_v31  ;;  %4380 = vrot.lane.b32.xlu0 %v15006_v36, %s13463_s22  ;;  %v4088_v41 = vmul.f32 %v3992_v40, %v20893_v57  ;;  %v4089_v55 = vmul.f32 %v3993_v48, %v13646_v3  ;;  %v13371_v48 = vunpack.i.h.bf16 %v15160_v17 }
 0x363   : > { %20897 = vst [vmem:[#allocation55_spill] sm:$0xff] %v15415_v28  ;;  %v4112_v38 = vmul.f32 %v4016_v53, %v20893_v57  ;;  %v4017_v14 = vsel %vm3825_vm1, %v3524_v18, %v3921_v2  ;;  %4382 = vrot.lane.b32.xlu1 %v15065_v21, %s13463_s22  ;;  %v15423_v46 = vpop.permute.xlu1 %5406  ;;  %v4763_v17 = vsel %vm1675_vm5, %v15197_v20, %v15294_v10 }
 0x364   : > { %v4113_v42 = vmul.f32 %v4017_v14, %v13646_v3  ;;  %v15427_v6 = vpop.permute.xlu0 %5840  ;;  %v13375_v14 = vunpack.i.l.bf16 %v15135_v56 }
 0x365   : > { %v15429_v49 = vpack.c.bf16 %v4112_v38, %v4088_v41  ;;  %v4442_v38 = vsel %vm1502_vm4, %v13371_v48, %v15362_v25 }
 0x366   : > { %v15431_v32 = vpack.c.bf16 %v4113_v42, %v4089_v55  ;;  %4384 = vrot.lane.b32.xlu0 %v15067_v51, %s13463_s22  ;;  %v4762_v48 = vsel %vm1675_vm5, %v13375_v14, %v15197_v20 }
 0x367   : > { %20898 = vst [vmem:[#allocation56_spill] sm:$0xff] %v15429_v49  ;;  %4722 = vrot.lane.b32.xlu1 %v15003_v39, %s13462_s21  ;;  %v15437_v57 = vpop.permute.xlu1 %5844 }
 0x368   : > { %20899 = vst [vmem:[#allocation57_spill] sm:$0xff] %v15431_v32  ;;  %v15439_v18 = vpop.permute.xlu0 %6184 }
 0x36a   : > { %4724 = vrot.lane.b32.xlu0 %v15006_v36, %s13462_s21 }
 0x36b   : > { %4726 = vrot.lane.b32.xlu1 %v15065_v21, %s13462_s21  ;;  %v15445_v3 = vpop.permute.xlu1 %6188 }
 0x36c   : > { %v15447_v5 = vpop.permute.xlu0 %6528 }
 0x36e   : > { %4728 = vrot.lane.b32.xlu0 %v15067_v51, %s13462_s21 }
 0x36f   : > { %5066 = vrot.lane.b32.xlu1 %v15003_v39, %s13465_s24  ;;  %v15453_v54 = vpop.permute.xlu1 %6532 }
 0x370   : > { %v15455_v16 = vpop.permute.xlu0 %6872 }
 0x372   : > { %5068 = vrot.lane.b32.xlu0 %v15006_v36, %s13465_s24 }
 0x373   : > { %5070 = vrot.lane.b32.xlu1 %v15065_v21, %s13465_s24  ;;  %v15461_v40 = vpop.permute.xlu1 %6876 }
 0x374   : > { %v4717_v31 = vpop.permute.xlu0 %4716 }
 0x375   : > { %v4787_v20 = vsel %vm1675_vm5, %v15376_v35, %v4717_v31 }
 0x376   : > { %5072 = vrot.lane.b32.xlu0 %v15067_v51, %s13465_s24 }
 0x377   : > { %5410 = vrot.lane.b32.xlu1 %v15003_v39, %s13464_s23  ;;  %v4373_v2 = vpop.permute.xlu1 %4372  ;;  %v20924_v39 = vld [vmem:[#allocation21_spill] sm:$0xff] }
 0x378   : > { %v15468_v53 = vpop.permute.xlu0 %4720  ;;  %v4443_v41 = vsel %vm1502_vm4, %v15362_v25, %v4373_v2 }
 0x379   : > { %7603 = vmatprep.subr.bf16.mxu0 %v4443_v41  ;;  %v4444_v41 = vsel %vm1502_vm4, %v4373_v2, %v15378_v24  ;;  %v13380_v2 = vunpack.i.l.bf16 %v15174_v27 }
 0x37a   : > { %5412 = vrot.lane.b32.xlu0 %v15006_v36, %s13464_s23  ;;  %7604 = vmatpush1.bf16.msra.mxu0 %v4442_v38  ;;  %v13376_v38 = vunpack.i.h.bf16 %v15135_v56  ;;  %v4764_v56 = vsel %vm1675_vm5, %v15294_v10, %v15204_v26  ;;  %v4788_v10 = vsel %vm1675_vm5, %v4717_v31, %v15391_v22  ;;  %v13385_v31 = vunpack.i.l.bf16 %v15158_v61 }
 0x37b   : > { %5414 = vrot.lane.b32.xlu1 %v15065_v21, %s13464_s23  ;;  %v15482_v55 = vpop.permute.xlu1 %4376  ;;  %7605 = vmatprep.subr.bf16.mxu0 %v4763_v17  ;;  %v4765_v17 = vsel %vm1675_vm5, %v15204_v26, %v15288_v37  ;;  %v5106_v26 = vsel %vm1848_vm6, %v13380_v2, %v15222_v23 }
 0x37c   : > { %v15484_v42 = vpop.permute.xlu0 %5404  ;;  %v4445_v25 = vsel %vm1502_vm4, %v15378_v24, %v15482_v55  ;;  %v4786_v24 = vsel %vm1675_vm5, %v13376_v38, %v15376_v35  ;;  %v5107_v35 = vsel %vm1848_vm6, %v15222_v23, %v15298_v47 }
 0x37d   : > { %7729 = vmatprep.subr.bf16.mxu1 %v4445_v25 }
 0x37e   : > { %5416 = vrot.lane.b32.xlu0 %v15067_v51, %s13464_s23  ;;  %7606 = vmatpush1.bf16.msra.mxu0 %v4762_v48  ;;  %v4789_v48 = vsel %vm1675_vm5, %v15391_v22, %v15468_v53  ;;  %v5108_v22 = vsel %vm1848_vm6, %v15298_v47, %v15213_v4 }
 0x37f   : > { %5850 = vrot.lane.b32.xlu1 %v15006_v36, %s13466_s12  ;;  %7730 = vmatpush1.bf16.msra.mxu1 %v4444_v41  ;;  %v5061_v25 = vpop.permute.xlu1 %5060 }
 0x380   : > { %v15503_v14 = vpop.permute.xlu0 %5408  ;;  %7731 = vmatprep.subr.bf16.mxu1 %v4765_v17  ;;  %7607 = vmatprep.subr.bf16.mxu0 %v4787_v20  ;;  %v13381_v17 = vunpack.i.h.bf16 %v15174_v27  ;;  %v5109_v20 = vsel %vm1848_vm6, %v15213_v4, %v15305_v63  ;;  %v5131_v23 = vsel %vm1848_vm6, %v15395_v52, %v5061_v25  ;;  %v5450_v4 = vsel %vm2021_vm7, %v13385_v31, %v15226_v34 }
 0x381   : > { %20900 = vst [vmem:[#allocation58_spill] sm:$0xff] %v15503_v14  ;;  %v5132_v47 = vsel %vm1848_vm6, %v5061_v25, %v15413_v9  ;;  %v5477_v25 = vsel %vm2021_vm7, %v15423_v46, %v15503_v14 }
 0x382   : > { %6490 = vrot.lane.b32.xlu0 %v15041_v58, %s13468_s14  ;;  %7608 = vmatpush1.bf16.msra.mxu0 %v4786_v24  ;;  %v5130_v27 = vsel %vm1848_vm6, %v13381_v17, %v15395_v52  ;;  %v5451_v52 = vsel %vm2021_vm7, %v15226_v34, %v15313_v29  ;;  %v5475_v34 = vsel %vm2021_vm7, %v15408_v15, %v15484_v42 }
 0x383   : > { %5854 = vrot.lane.b32.xlu1 %v15067_v51, %s13466_s12  ;;  %7732 = vmatpush1.bf16.msra.mxu1 %v4764_v56  ;;  %v15518_v41 = vpop.permute.xlu1 %5064 }
 0x384   : > { %20901 = vst [vmem:[#allocation59_spill] sm:$0xff] %v15518_v41  ;;  %v15523_v38 = vpop.permute.xlu0 %5842  ;;  %7733 = vmatprep.subr.bf16.mxu1 %v4789_v48  ;;  %7609 = vmatprep.subr.bf16.mxu0 %v5107_v35  ;;  %v5133_v2 = vsel %vm1848_vm6, %v15413_v9, %v15518_v41  ;;  %v5452_v9 = vsel %vm2021_vm7, %v15313_v29, %v15232_v60 }
 0x386   : > { %6540 = vrot.lane.b32.xlu0 %v15065_v21, %s13468_s14  ;;  %7610 = vmatpush1.bf16.msra.mxu0 %v5106_v26  ;;  %v13386_v26 = vunpack.i.h.bf16 %v15158_v61 }
 0x387   : > { %6194 = vrot.lane.b32.xlu1 %v15006_v36, %s13467_s13  ;;  %7734 = vmatpush1.bf16.msra.mxu1 %v4788_v10  ;;  %v15537_v24 = vpop.permute.xlu1 %5846  ;;  %v5453_v10 = vsel %vm2021_vm7, %v15232_v60, %v15309_v0  ;;  %v5476_v60 = vsel %vm2021_vm7, %v15484_v42, %v15423_v46  ;;  %v20908_v42 = vld [vmem:[#allocation45_spill] sm:$0xff] }
 0x388   : > { %v15541_v56 = vpop.permute.xlu0 %6186  ;;  %7735 = vmatprep.subr.bf16.mxu1 %v5109_v20  ;;  %7611 = vmatprep.subr.bf16.mxu0 %v5131_v23  ;;  %v5474_v61 = vsel %vm2021_vm7, %v13386_v26, %v15408_v15  ;;  %v20912_v26 = vld [vmem:[#allocation47_spill] sm:$0xff] }
 0x38a   : > { %6834 = vrot.lane.b32.xlu0 %v15041_v58, %s13469_s15  ;;  %7612 = vmatpush1.bf16.msra.mxu0 %v5130_v27 }
 0x38b   : > { %6198 = vrot.lane.b32.xlu1 %v15067_v51, %s13467_s13  ;;  %7736 = vmatpush1.bf16.msra.mxu1 %v5108_v22  ;;  %v15556_v48 = vpop.permute.xlu1 %6190 }
 0x38c   : > { %v15561_v35 = vpop.permute.xlu0 %6530  ;;  %7737 = vmatprep.subr.bf16.mxu1 %v5133_v2  ;;  %7613 = vmatprep.subr.bf16.mxu0 %v5451_v52  ;;  %v5915_v2 = vsel %vm2242_vm8, %v15523_v38, %v15437_v57 }
 0x38e   : > { %6884 = vrot.lane.b32.xlu0 %v15065_v21, %s13469_s15  ;;  %7614 = vmatpush1.bf16.msra.mxu0 %v5450_v4 }
 0x38f   : > { %6488 = vrot.lane.b32.xlu1 %v14961_v44, %s13468_s14  ;;  %7738 = vmatpush1.bf16.msra.mxu1 %v5132_v47  ;;  %v15575_v17 = vpop.permute.xlu1 %6534  ;;  %v20911_v47 = vld [vmem:[#allocation37_spill] sm:$0xff] }
 0x390   : > { %v15580_v20 = vpop.permute.xlu0 %6874  ;;  %7739 = vmatprep.subr.bf16.mxu1 %v5453_v10  ;;  %7615 = vmatprep.subr.bf16.mxu0 %v5475_v34  ;;  %v6235_v10 = vsel %vm2415_vm9, %v20912_v26, %v20911_v47  ;;  %v20913_v34 = vld [vmem:[#allocation38_spill] sm:$0xff] }
 0x392   : > { %5806 = vrot.lane.b32.xlu0 %v15149_v1, %s13466_s12  ;;  %7616 = vmatpush1.bf16.msra.mxu0 %v5474_v61  ;;  %v6234_v61 = vsel %vm2415_vm9, %v20913_v34, %v20912_v26  ;;  %v20920_v26 = vld [vmem:[#allocation32_spill] sm:$0xff] }
 0x393   : > { %6492 = vrot.lane.b32.xlu1 %v15044_v19, %s13468_s14  ;;  %7740 = vmatpush1.bf16.msra.mxu1 %v5452_v9  ;;  %v15594_v23 = vpop.permute.xlu1 %6878  ;;  %v20914_v9 = vld [vmem:[#allocation39_spill] sm:$0xff] }
 0x394   : > { %v15596_v27 = vpop.permute.xlu0 %5802  ;;  %7741 = vmatprep.subr.bf16.mxu1 %v5477_v25  ;;  %7617 = vmatprep.subr.bf16.mxu0 %v14799_v7  ;;  %v5891_v7 = vsel %vm2242_vm8, %v15321_v12, %v15240_v8  ;;  %v20915_v25 = vld [vmem:[#allocation49_spill] sm:$0xff] }
 0x395   : > { %20902 = vst [vmem:[#allocation60_spill] sm:$0xff] %v15596_v27 }
 0x396   : > { %6150 = vrot.lane.b32.xlu0 %v15149_v1, %s13467_s13  ;;  %7618 = vmatpush1.bf16.msra.mxu0 %v14795_v11 }
 0x397   : > { %6538 = vrot.lane.b32.xlu1 %v15006_v36, %s13468_s14  ;;  %7742 = vmatpush1.bf16.msra.mxu1 %v5476_v60  ;;  %v15607_v29 = vpop.permute.xlu1 %5798  ;;  %v15657_v60 = vsel %vm2588_vm10, %v20915_v25, %v20914_v9 }
 0x398   : > { %20903 = vst [vmem:[#allocation61_spill] sm:$0xff] %v15607_v29  ;;  %v15609_v15 = vpop.permute.xlu0 %6146  ;;  %7743 = vmatprep.subr.bf16.mxu1 %v14844_v30  ;;  %7619 = vmatprep.subr.bf16.mxu0 %v14837_v13  ;;  %v20905_v30 = vld [vmem:[#allocation27_spill] sm:$0xff]  ;;  %v20906_v13 = vld [vmem:[#allocation36_spill] sm:$0xff]  ;;  %v5893_v22 = vsel %vm2242_vm8, %v20908_v42, %v15607_v29 }
 0x399   : > { %20904 = vst [vmem:[#allocation62_spill] sm:$0xff] %v15609_v15  ;;  %v20923_v15 = vld [vmem:[#allocation19_spill] sm:$0xff] }
 0x39a   : > { %6494 = vrot.lane.b32.xlu0 %v15149_v1, %s13468_s14  ;;  %7620 = vmatpush1.bf16.msra.mxu0 %v14825_v50  ;;  %v5890_v50 = vsel %vm2242_vm8, %v20906_v13, %v15321_v12  ;;  %v5892_v12 = vsel %vm2242_vm8, %v15240_v8, %v20908_v42  ;;  %v5914_v13 = vsel %vm2242_vm8, %v15427_v6, %v15523_v38  ;;  %v20918_v42 = vld [vmem:[#allocation41_spill] sm:$0xff] }
 0x39b   : > { %6542 = vrot.lane.b32.xlu1 %v15067_v51, %s13468_s14  ;;  %7744 = vmatpush1.bf16.msra.mxu1 %v14832_v43  ;;  %v15619_v11 = vpop.permute.xlu1 %6142  ;;  %v20907_v43 = vld [vmem:[#allocation26_spill] sm:$0xff]  ;;  %v6259_v6 = vsel %vm2415_vm9, %v15541_v56, %v15445_v3  ;;  %v6258_v38 = vsel %vm2415_vm9, %v15439_v18, %v15541_v56 }
 0x39c   : > { %v15624_v46 = vpop.permute.xlu0 %4330  ;;  %7745 = vmatprep.subr.bf16.mxu1 %v20905_v30  ;;  %7621 = vmatprep.subr.bf16.mxu0 %v5891_v7  ;;  %v20916_v7 = vld [vmem:[#allocation24_spill] sm:$0xff] }
 0x39e   : > { %6838 = vrot.lane.b32.xlu0 %v15149_v1, %s13469_s15  ;;  %7622 = vmatpush1.bf16.msra.mxu0 %v5890_v50  ;;  %v20917_v50 = vld [vmem:[#allocation40_spill] sm:$0xff] }
 0x39f   : > { %6832 = vrot.lane.b32.xlu1 %v14961_v44, %s13469_s15  ;;  %7746 = vmatpush1.bf16.msra.mxu1 %v20907_v43  ;;  %v15638_v31 = vpop.permute.xlu1 %6486  ;;  %v15666_v43 = vsel %vm2588_vm10, %v20917_v50, %v20915_v25  ;;  %v20921_v50 = vld [vmem:[#allocation25_spill] sm:$0xff] }
 0x3a0   : > { %20909 = vst [vmem:[#allocation27_spill] sm:$0xff] %v15638_v31  ;;  %v15646_v52 = vpop.permute.xlu0 %4334  ;;  %7747 = vmatprep.subr.bf16.mxu1 %v5893_v22  ;;  %7623 = vmatprep.subr.bf16.mxu0 %v5915_v2  ;;  %v3560_v4 = vpop.f32.mrb[56].mxu0  ;;  %v20919_v22 = vld [vmem:[#allocation7_spill] sm:$0xff] }
 0x3a1   : > { %20910 = vst [vmem:[#allocation36_spill] sm:$0xff] %v15646_v52  ;;  %v3561_v8 = vadd.f32 %v3560_v4, %v20916_v7  ;;  %v3562_v30 = vpop.f32.mrb[57].mxu0  ;;  %v15671_v2 = vsel %vm2761_vm11, %v20919_v22, %v20918_v42 }
 0x3a2   : > { %5856 = vrot.lane.b32.xlu0 %v20920_v26, %s13466_s12  ;;  %v3563_v4 = vadd.f32 %v3562_v30, %v20916_v7  ;;  %v3564_v34 = vpop.f32.mrb[58].mxu0  ;;  %7624 = vmatpush1.bf16.msra.mxu0 %v5914_v13  ;;  %v15690_v13 = vsel %vm2588_vm10, %v15561_v35, %v15453_v54 }
 0x3a3   : > { %6836 = vrot.lane.b32.xlu1 %v15044_v19, %s13469_s15  ;;  %vm3754_vm0 = vcmp.ge.f32.partialorder %v3561_v8, 0.0  ;;  %v3850_v25 = vmul.f32 0.2, %v3561_v8  ;;  %v3565_v32 = vadd.f32 %v3564_v34, %v20921_v50  ;;  %7748 = vmatpush1.bf16.msra.mxu1 %v5892_v12  ;;  %v3566_v49 = vpop.f32.mrb[59].mxu0  ;;  %v15685_v30 = vpop.permute.xlu1 %6830  ;;  %v15698_v12 = vsel %vm2588_vm10, %v15447_v5, %v15561_v35 }
 0x3a4   : > { %20922 = vst [vmem:[#allocation26_spill] sm:$0xff] %v15685_v30  ;;  %v15692_v28 = vpop.permute.xlu0 %4674  ;;  %vm3755_vm2 = vcmp.ge.f32.partialorder %v3563_v4, 0.0  ;;  %v3851_v18 = vmul.f32 0.2, %v3563_v4  ;;  %v3567_v56 = vadd.f32 %v3566_v49, %v20921_v50  ;;  %7625 = vmatprep.subr.bf16.mxu0 %v6235_v10  ;;  %v3613_v62 = vpop.f32.mrb[56].mxu1 }
 0x3a5   : > { %v3946_v34 = vsel %vm3754_vm0, %v3561_v8, %v3850_v25  ;;  %vm3778_vm3 = vcmp.ge.f32.partialorder %v3565_v32, 0.0  ;;  %v3874_v21 = vmul.f32 0.2, %v3565_v32  ;;  %v3614_v58 = vadd.f32 %v3613_v62, %v20916_v7  ;;  %v3615_v19 = vpop.f32.mrb[57].mxu1 }
 0x3a6   : > { %v4042_v29 = vmul.f32 %v3946_v34, %v20923_v15  ;;  %v3947_v27 = vsel %vm3755_vm2, %v3563_v4, %v3851_v18  ;;  %6200 = vrot.lane.b32.xlu0 %v20920_v26, %s13467_s13  ;;  %vm3779_vm12 = vcmp.ge.f32.partialorder %v3567_v56, 0.0  ;;  %v3875_v49 = vmul.f32 0.2, %v3567_v56  ;;  %v3617_v10 = vpop.f32.mrb[58].mxu1  ;;  %7626 = vmatpush1.bf16.msra.mxu0 %v6234_v61 }
 0x3a7   : > { %v4043_v45 = vmul.f32 %v3947_v27, %v20924_v39  ;;  %v3970_v5 = vsel %vm3778_vm3, %v3565_v32, %v3874_v21  ;;  %6882 = vrot.lane.b32.xlu1 %v15006_v36, %s13469_s15  ;;  %vm3756_vm13 = vcmp.ge.f32.partialorder %v3614_v58, 0.0  ;;  %v3852_v35 = vmul.f32 0.2, %v3614_v58  ;;  %v3619_v62 = vpop.f32.mrb[59].mxu1  ;;  %v15707_v8 = vpop.permute.xlu1 %4328  ;;  %7627 = vmatprep.subr.bf16.mxu0 %v6259_v6  ;;  %v20927_v6 = vld [vmem:[#allocation20_spill] sm:$0xff] }
 0x3a8   : > { %v4066_v4 = vmul.f32 %v3970_v5, %v20923_v15  ;;  %v3971_v25 = vsel %vm3779_vm12, %v3567_v56, %v3875_v49  ;;  %v15710_v18 = vpop.permute.xlu0 %4678  ;;  %v3616_v34 = vadd.f32 %v3615_v19, %v20916_v7  ;;  %v3618_v61 = vadd.f32 %v3617_v10, %v20921_v50  ;;  %v3570_v27 = vpop.f32.mrb[60].mxu0 }
 0x3a9   : > { %20925 = vst [vmem:[#allocation45_spill] sm:$0xff] %v15710_v18  ;;  %v4067_v21 = vmul.f32 %v3971_v25, %v20924_v39  ;;  %v3948_v32 = vsel %vm3756_vm13, %v3614_v58, %v3852_v35  ;;  %v3620_v36 = vadd.f32 %v3619_v62, %v20921_v50  ;;  %v3571_v44 = vadd.f32 %v3570_v27, %v14788_v33  ;;  %v3572_v14 = vpop.f32.mrb[61].mxu0 }
 0x3aa   : > { %v15717_v41 = vpack.c.bf16 %v4066_v4, %v4042_v29  ;;  %v4044_v5 = vmul.f32 %v3948_v32, %v20927_v6  ;;  %vm3757_vm14 = vcmp.ge.f32.partialorder %v3616_v34, 0.0  ;;  %v3853_v56 = vmul.f32 0.2, %v3616_v34  ;;  %6544 = vrot.lane.b32.xlu0 %v20920_v26, %s13468_s14  ;;  %v3574_v19 = vpop.f32.mrb[62].mxu0  ;;  %7628 = vmatpush1.bf16.msra.mxu0 %v6258_v38 }
 0x3ab   : > { %v15722_v49 = vpack.c.bf16 %v4067_v21, %v4043_v45  ;;  %vm3780_vm15 = vcmp.ge.f32.partialorder %v3618_v61, 0.0  ;;  %v3876_v58 = vmul.f32 0.2, %v3618_v61  ;;  %vm3781_vm1 = vcmp.ge.f32.partialorder %v3620_v36, 0.0  ;;  %6886 = vrot.lane.b32.xlu1 %v15067_v51, %s13469_s15  ;;  %v3576_v10 = vpop.f32.mrb[63].mxu0  ;;  %v15726_v29 = vpop.permute.xlu1 %4332  ;;  %7629 = vmatprep.subr.bf16.mxu0 %v15657_v60  ;;  %v20929_v45 = vld [vmem:[#allocation22_spill] sm:$0xff] }
 0x3ac   : > { %20926 = vst [vmem:[#allocation37_spill] sm:$0xff] %v15717_v41  ;;  %v3949_v35 = vsel %vm3757_vm14, %v3616_v34, %v3853_v56  ;;  %v3877_v62 = vmul.f32 0.2, %v3620_v36  ;;  %vm3802_vm0 = vcmp.ge.f32.partialorder %v3571_v44, 0.0  ;;  %v3898_v4 = vmul.f32 0.2, %v3571_v44  ;;  %v15729_v25 = vpop.permute.xlu0 %5018 }
 0x3ad   : > { %20928 = vst [vmem:[#allocation47_spill] sm:$0xff] %v15722_v49  ;;  %v3623_v38 = vpop.f32.mrb[60].mxu1  ;;  %v4045_v27 = vmul.f32 %v3949_v35, %v20929_v45  ;;  %v3972_v21 = vsel %vm3780_vm15, %v3618_v61, %v3876_v58  ;;  %v3573_v32 = vadd.f32 %v3572_v14, %v14788_v33  ;;  %v3575_v49 = vadd.f32 %v3574_v19, %v14773_v59 }
 0x3ae   : > { %v3625_v41 = vpop.f32.mrb[61].mxu1  ;;  %v4068_v51 = vmul.f32 %v3972_v21, %v20927_v6  ;;  %v3973_v50 = vsel %vm3781_vm1, %v3620_v36, %v3877_v62  ;;  %v3994_v60 = vsel %vm3802_vm0, %v3571_v44, %v3898_v4  ;;  %6888 = vrot.lane.b32.xlu0 %v20920_v26, %s13469_s15  ;;  %v3577_v34 = vadd.f32 %v3576_v10, %v14773_v59 }
 0x3af   : > { %v3627_v56 = vpop.f32.mrb[62].mxu1  ;;  %v4069_v0 = vmul.f32 %v3973_v50, %v20929_v45  ;;  %v4090_v61 = vmul.f32 %v3994_v60, %v20923_v15  ;;  %vm3803_vm2 = vcmp.ge.f32.partialorder %v3573_v32, 0.0  ;;  %v3899_v14 = vmul.f32 0.2, %v3573_v32  ;;  %4336 = vrot.lane.b32.xlu1 %v15149_v1, %s13463_s22  ;;  %7630 = vmatpush1.bf16.msra.mxu0 %v15666_v43  ;;  %v15744_v36 = vpop.permute.xlu1 %4672 }
 0x3b0   : > { %v3629_v19 = vpop.f32.mrb[63].mxu1  ;;  %v15746_v44 = vpack.c.bf16 %v4068_v51, %v4044_v5  ;;  %vm3826_vm3 = vcmp.ge.f32.partialorder %v3575_v49, 0.0  ;;  %v3922_v58 = vmul.f32 0.2, %v3575_v49  ;;  %vm3827_vm12 = vcmp.ge.f32.partialorder %v3577_v34, 0.0  ;;  %v15748_v10 = vpop.permute.xlu0 %5022  ;;  %7631 = vmatprep.subr.bf16.mxu0 %v15690_v13  ;;  %v20932_v5 = vld [vmem:[#allocation17_spill] sm:$0xff] }
 0x3b1   : > { %v15751_v50 = vpack.c.bf16 %v4069_v0, %v4045_v27  ;;  %v3995_v35 = vsel %vm3803_vm2, %v3573_v32, %v3899_v14  ;;  %v3923_v62 = vmul.f32 0.2, %v3577_v34  ;;  %v3624_v4 = vadd.f32 %v3623_v38, %v14788_v33  ;;  %v15762_v13 = vld [vmem:[%s20692_s4] ss:$12 sps:$4 sm:$0xff]  }
 0x3b2   : > { %20930 = vst [vmem:[#allocation38_spill] sm:$0xff] %v15746_v44  ;;  %v4091_v43 = vmul.f32 %v3995_v35, %v20924_v39  ;;  %v4018_v21 = vsel %vm3826_vm3, %v3575_v49, %v3922_v58  ;;  %v3626_v60 = vadd.f32 %v3625_v41, %v14788_v33  ;;  %v3628_v51 = vadd.f32 %v3627_v56, %v14773_v59  ;;  %v20934_v32 = vld [vmem:[#allocation16_spill] sm:$0xff] }
 0x3b3   : > { %20931 = vst [vmem:[#allocation39_spill] sm:$0xff] %v15751_v50  ;;  %4338 = vrot.lane.b32.xlu0 %v20932_v5, %s13463_s22  ;;  %20933 = vst [vmem:[#allocation49_spill] sm:$0xff] %v15762_v13  ;;  %v4114_v0 = vmul.f32 %v4018_v21, %v20923_v15  ;;  %v4019_v27 = vsel %vm3827_vm12, %v3577_v34, %v3923_v62  ;;  %vm3804_vm13 = vcmp.ge.f32.partialorder %v3624_v4, 0.0  ;;  %v3900_v38 = vmul.f32 0.2, %v3624_v4  ;;  %v15768_v41 = vpop.permute.xlu1 %4676 }
 0x3b4   : > { %4340 = vrot.lane.b32.xlu1 %v20934_v32, %s13463_s22  ;;  %7632 = vmatpush1.bf16.msra.mxu0 %v15698_v12  ;;  %v4115_v49 = vmul.f32 %v4019_v27, %v20924_v39  ;;  %vm3805_vm14 = vcmp.ge.f32.partialorder %v3626_v60, 0.0  ;;  %v3901_v56 = vmul.f32 0.2, %v3626_v60  ;;  %vm3828_vm15 = vcmp.ge.f32.partialorder %v3628_v51, 0.0  ;;  %v15771_v14 = vpop.permute.xlu0 %5362  ;;  %v15777_v15 = vld [vmem:[%s20692_s4 + $0x1c] ss:$12 sps:$4 sm:$0xff]  }
 0x3b5   : > { %7664 = vmatprep.subr.bf16.mxu0 %v15671_v2  ;;  %20935 = vst [vmem:[#allocation24_spill] sm:$0xff] %v15777_v15  ;;  %v15779_v34 = vpack.c.bf16 %v4114_v0, %v4090_v61  ;;  %v3996_v58 = vsel %vm3804_vm13, %v3624_v4, %v3900_v38  ;;  %v3924_v12 = vmul.f32 0.2, %v3628_v51  ;;  %v3630_v35 = vadd.f32 %v3629_v19, %v14773_v59  ;;  %v20938_v39 = vld [vmem:[#allocation18_spill] sm:$0xff] }
 0x3b6   : > { %v15782_v62 = vpack.c.bf16 %v4115_v49, %v4091_v43  ;;  %v20939_v2 = vld [vmem:[#allocation42_spill] sm:$0xff]  ;;  %v6947_v61 = vsel %vm2761_vm11, %v15580_v20, %v15461_v40  ;;  %v3997_v0 = vsel %vm3805_vm14, %v3626_v60, %v3901_v56  ;;  %v4092_v43 = vmul.f32 %v3996_v58, %v20927_v6 }
 0x3b7   : > { %20936 = vst [vmem:[#allocation40_spill] sm:$0xff] %v15779_v34  ;;  %4342 = vrot.lane.b32.xlu0 %v20938_v39, %s13463_s22  ;;  %7634 = vmatmul.mubr.bf16.vlgmr.msra.gmra.mrb[72].mxu0 %v15762_v13  ;;  %v6922_v21 = vsel %vm2761_vm11, %v20939_v2, %v20919_v22  ;;  %v4020_v4 = vsel %vm3828_vm15, %v3628_v51, %v3924_v12  ;;  %vm3829_vm1 = vcmp.ge.f32.partialorder %v3630_v35, 0.0  ;;  %v3925_v27 = vmul.f32 0.2, %v3630_v35  ;;  %v15795_v19 = vpop.permute.xlu1 %5016  ;;  %v20941_v12 = vld [vmem:[#allocation33_spill] sm:$0xff] }
 0x3b8   : > { %20937 = vst [vmem:[#allocation41_spill] sm:$0xff] %v15782_v62  ;;  %4386 = vrot.lane.b32.xlu1 %v20920_v26, %s13463_s22  ;;  %7665 = vmatpush1.bf16.msra.mxu0 %v6922_v21  ;;  %v4116_v38 = vmul.f32 %v4020_v4, %v20927_v6  ;;  %v15799_v49 = vpop.permute.xlu0 %5366  ;;  %v4093_v60 = vmul.f32 %v3997_v0, %v20929_v45  ;;  %v20942_v6 = vld [vmem:[#allocation34_spill] sm:$0xff]  ;;  %v20946_v0 = vld [vmem:[#allocation35_spill] sm:$0xff]  ;;  %vm7591_vm0 = vcmask 261120  }
 0x3b9   : > { %7666 = vmatprep.subr.bf16.mxu0 %v6947_v61  ;;  %7643 = vmatprep.mubr.bf16.mxu0 %v15777_v15  ;;  %v4021_v22 = vsel %vm3829_vm1, %v3630_v35, %v3925_v27  ;;  %v6946_v58 = vsel %vm2761_vm11, %v15455_v16, %v15580_v20  ;;  %v4423_v35 = vsel %vm1502_vm4, %v15707_v8, %v15624_v46  ;;  %v15825_v61 = vld [vmem:[%s20692_s4 + $0x18] ss:$12 sps:$4 sm:$0xff]   ;;  %v15833_v20 = vld [vmem:[%s20692_s4 + $0x34] ss:$12 sps:$4 sm:$0xff]  }
 0x3ba   : > { %v15803_v51 = vpack.c.bf16 %v4116_v38, %v4092_v43  ;;  %v4117_v56 = vmul.f32 %v4021_v22, %v20929_v45  ;;  %20944 = vst [vmem:[#allocation21_spill] sm:$0xff] %v15825_v61  ;;  %20945 = vst [vmem:[#allocation20_spill] sm:$0xff] %v15833_v20  ;;  %v5916_v4 = vsel %vm2242_vm8, %v15437_v57, %v15537_v24  ;;  %v20947_v27 = vld [vmem:[#allocation46_spill] sm:$0xff] }
 0x3bb   : > { %4388 = vrot.lane.b32.xlu0 %v20941_v12, %s13463_s22  ;;  %v15813_v2 = vpop.permute.xlu1 %5020  ;;  %v6237_v43 = vsel %vm2415_vm9, %v20947_v27, %v15619_v11  ;;  %v6236_v57 = vsel %vm2415_vm9, %v20911_v47, %v20947_v27  ;;  %v6260_v47 = vsel %vm2415_vm9, %v15445_v3, %v15556_v48 }
 0x3bc   : > { %20940 = vst [vmem:[#allocation7_spill] sm:$0xff] %v15803_v51  ;;  %4390 = vrot.lane.b32.xlu1 %v20942_v6, %s13463_s22  ;;  %7667 = vmatpush1.bf16.msra.mxu0 %v6946_v58  ;;  %v15818_v21 = vpack.c.bf16 %v4117_v56, %v4093_v60  ;;  %v15820_v45 = vpop.permute.xlu0 %5848  ;;  %v15868_v58 = vld [vmem:[%s20692_s4 + $0x30] ss:$12 sps:$4 sm:$0xff]  }
 0x3bd   : > { %7853 = vmatprep.subr.bf16.mxu0 %v4423_v35  ;;  %v5917_v16 = vsel %vm2242_vm8, %v15537_v24, %v15820_v45  ;;  %20950 = vst [vmem:[#allocation16_spill] sm:$0xff] %v15868_v58  ;;  %v20951_v35 = vld [vmem:[#allocation48_spill] sm:$0xff] }
 0x3be   : > { %20943 = vst [vmem:[#allocation19_spill] sm:$0xff] %v15818_v21  ;;  %7749 = vmatprep.subr.bf16.mxu1 %v5917_v16  ;;  %v6581_v16 = vsel %vm2588_vm10, %v20951_v35, %v15638_v31  ;;  %v6580_v3 = vsel %vm2588_vm10, %v20914_v9, %v20951_v35  ;;  %v6604_v9 = vsel %vm2588_vm10, %v15453_v54, %v15575_v17  ;;  %v20956_v35 = vld [vmem:[#allocation50_spill] sm:$0xff]  ;;  %v20957_v21 = vld [vmem:[#allocation43_spill] sm:$0xff] }
 0x3bf   : > { %4392 = vrot.lane.b32.xlu0 %v20946_v0, %s13463_s22  ;;  %7750 = vmatpush1.bf16.msra.mxu1 %v5916_v4  ;;  %v15845_v38 = vpop.permute.xlu1 %5360  ;;  %v4422_v54 = vsel %vm1502_vm4, %v20957_v21, %v15707_v8 }
 0x3c0   : > { %4680 = vrot.lane.b32.xlu1 %v15149_v1, %s13462_s21  ;;  %v15847_v22 = vpop.permute.xlu0 %6192  ;;  %7644 = vmatmul.mubr.bf16.gmra.mrb[76].mxu0 %v15825_v61 }
 0x3c1   : > { %20948 = vst [vmem:[#allocation22_spill] sm:$0xff] %v15847_v22  ;;  %7751 = vmatprep.subr.bf16.mxu1 %v6237_v43  ;;  %7653 = vmatprep.mubr.bf16.mxu0 %v15833_v20  ;;  %v6261_v24 = vsel %vm2415_vm9, %v15556_v48, %v15847_v22  ;;  %v20953_v43 = vmov 0  }
 0x3c3   : > { %4682 = vrot.lane.b32.xlu0 %v20932_v5, %s13462_s21  ;;  %7752 = vmatpush1.bf16.msra.mxu1 %v6236_v57  ;;  %v15861_v60 = vpop.permute.xlu1 %5364 }
 0x3c4   : > { %4684 = vrot.lane.b32.xlu1 %v20934_v32, %s13462_s21  ;;  %v15863_v56 = vpop.permute.xlu0 %6536  ;;  %7753 = vmatprep.subr.bf16.mxu1 %v6261_v24 }
 0x3c5   : > { %20949 = vst [vmem:[#allocation17_spill] sm:$0xff] %v15863_v56  ;;  %v6605_v48 = vsel %vm2588_vm10, %v15575_v17, %v15863_v56  ;;  %v6924_v17 = vsel %vm2761_vm11, %v20918_v42, %v20956_v35  ;;  %v6948_v42 = vsel %vm2761_vm11, %v15461_v40, %v15594_v23 }
 0x3c7   : > { %4686 = vrot.lane.b32.xlu0 %v20938_v39, %s13462_s21  ;;  %7754 = vmatpush1.bf16.msra.mxu1 %v6260_v47  ;;  %v15880_v4 = vpop.permute.xlu1 %5800  ;;  %v15903_v47 = vld [vmem:[%s20692_s4 + $0x8] ss:$12 sps:$4 sm:$0xff]  }
 0x3c8   : > { %4730 = vrot.lane.b32.xlu1 %v20920_v26, %s13462_s21  ;;  %v15882_v27 = vpop.permute.xlu0 %6880  ;;  %7654 = vmatmul.mubr.bf16.gmra.mrb[80].mxu0 %v15868_v58  ;;  %20955 = vst [vmem:[#allocation33_spill] sm:$0xff] %v15903_v47 }
 0x3c9   : > { %20952 = vst [vmem:[#allocation18_spill] sm:$0xff] %v15882_v27  ;;  %7755 = vmatprep.subr.bf16.mxu1 %v6581_v16  ;;  %7696 = vmatprep.mubr.bf16.mxu0 %v20953_v43  ;;  %v6925_v16 = vsel %vm2761_vm11, %v20956_v35, %v15685_v30  ;;  %v6949_v8 = vsel %vm2761_vm11, %v15594_v23, %v15882_v27 }
 0x3ca   : > { %v4425_v35 = vsel %vm1502_vm4, %v15726_v29, %v15646_v52 }
 0x3cb   : > { %4732 = vrot.lane.b32.xlu0 %v20941_v12, %s13462_s21  ;;  %7756 = vmatpush1.bf16.msra.mxu1 %v6580_v3  ;;  %v15896_v57 = vpop.permute.xlu1 %5804 }
 0x3cc   : > { %4734 = vrot.lane.b32.xlu1 %v20942_v6, %s13462_s21  ;;  %20954 = vst [vmem:[#allocation42_spill] sm:$0xff] %v15896_v57  ;;  %v15898_v24 = vpop.permute.xlu0 %5852  ;;  %7757 = vmatprep.subr.bf16.mxu1 %v6605_v48 }
 0x3cf   : > { %4736 = vrot.lane.b32.xlu0 %v20946_v0, %s13462_s21  ;;  %7758 = vmatpush1.bf16.msra.mxu1 %v6604_v9  ;;  %v15915_v3 = vpop.permute.xlu1 %6144 }
 0x3d0   : > { %5024 = vrot.lane.b32.xlu1 %v15149_v1, %s13465_s24  ;;  %v15917_v48 = vpop.permute.xlu0 %6196  ;;  %11866 = vmatmul.mubr.msk.bf16.vlgmr.msra.gmra.mrb[72].mxu0 %vm7591_vm0, %v15903_v47 }
 0x3d1   : > { %7790 = vmatprep.subr.bf16.mxu1 %v6925_v16  ;;  %7854 = vmatpush1.bf16.msra.mxu0 %v4422_v54  ;;  %v15944_v16 = vld [vmem:[%s20692_s4 + $0x20] ss:$12 sps:$4 sm:$0xff]  }
 0x3d2   : > { %7706 = vmatprep.mubr.bf16.mxu0 %v20953_v43  ;;  %7760 = vmatmul.mubr.bf16.vlgmr.msra.gmra.mrb[72].mxu1 %v15762_v13 }
 0x3d3   : > { %5026 = vrot.lane.b32.xlu0 %v20932_v5, %s13465_s24  ;;  %7791 = vmatpush1.bf16.msra.mxu1 %v6924_v17  ;;  %v15936_v21 = vpop.permute.xlu1 %6148 }
 0x3d4   : > { %5028 = vrot.lane.b32.xlu1 %v20934_v32, %s13465_s24  ;;  %20958 = vst [vmem:[#allocation34_spill] sm:$0xff] %v15936_v21  ;;  %v15938_v9 = vpop.permute.xlu0 %4380  ;;  %7792 = vmatprep.subr.bf16.mxu1 %v6949_v8 }
 0x3d5   : > { %7769 = vmatprep.mubr.bf16.mxu1 %v15777_v15 }
 0x3d7   : > { %5030 = vrot.lane.b32.xlu0 %v20938_v39, %s13465_s24  ;;  %7793 = vmatpush1.bf16.msra.mxu1 %v6948_v42  ;;  %v4379_v54 = vpop.permute.xlu1 %4378  ;;  %v15979_v42 = vld [vmem:[%s20692_s4 + $0x38] ss:$12 sps:$4 sm:$0xff]  }
 0x3d8   : > { %5074 = vrot.lane.b32.xlu1 %v20920_v26, %s13465_s24  ;;  %v15956_v17 = vpop.permute.xlu0 %4384  ;;  %7979 = vmatprep.subr.bf16.mxu1 %v4425_v35  ;;  %v4447_v8 = vsel %vm1502_vm4, %v4379_v54, %v15938_v9  ;;  %v4446_v51 = vsel %vm1502_vm4, %v15482_v55, %v4379_v54  ;;  %v4767_v55 = vsel %vm1675_vm5, %v15744_v36, %v15692_v28 }
 0x3d9   : > { %20959 = vst [vmem:[#allocation35_spill] sm:$0xff] %v15956_v17  ;;  %11867 = vmatmul.mubr.msk.bf16.gmra.mrb[76].mxu0 %vm7591_vm0, %v15944_v16  ;;  %7855 = vmatprep.subr.bf16.mxu0 %v4447_v8  ;;  %v5111_v54 = vsel %vm1848_vm6, %v15795_v19, %v15729_v25 }
 0x3da   : > { %7716 = vmatprep.mubr.bf16.mxu0 %v20953_v43  ;;  %7770 = vmatmul.mubr.bf16.gmra.mrb[76].mxu1 %v15825_v61 }
 0x3db   : > { %5076 = vrot.lane.b32.xlu0 %v20941_v12, %s13465_s24  ;;  %7856 = vmatpush1.bf16.msra.mxu0 %v4446_v51  ;;  %v4383_v40 = vpop.permute.xlu1 %4382  ;;  %v4766_v51 = vsel %vm1675_vm5, %v15288_v37, %v15744_v36  ;;  %v5110_v37 = vsel %vm1848_vm6, %v15305_v63, %v15795_v19  ;;  %v16003_v36 = vsel %vm1502_vm4, %v15624_v46, %v15726_v29  ;;  %v16021_v46 = vld [vmem:[%s20692_s4 + $0x4] ss:$12 sps:$4 sm:$0xff]  }
 0x3dc   : > { %5078 = vrot.lane.b32.xlu1 %v20942_v6, %s13465_s24  ;;  %v15973_v23 = vpop.permute.xlu0 %4724  ;;  %7857 = vmatprep.subr.bf16.mxu0 %v4767_v55  ;;  %v16016_v63 = vsel %vm1675_vm5, %v15692_v28, %v15768_v41  ;;  %v16031_v28 = vsel %vm2021_vm7, %v15845_v38, %v15771_v14 }
 0x3dd   : > { %7779 = vmatprep.mubr.bf16.mxu1 %v15833_v20 }
 0x3df   : > { %5080 = vrot.lane.b32.xlu0 %v20946_v0, %s13465_s24  ;;  %7858 = vmatpush1.bf16.msra.mxu0 %v4766_v51  ;;  %v4723_v35 = vpop.permute.xlu1 %4722 }
 0x3e0   : > { %5368 = vrot.lane.b32.xlu1 %v15149_v1, %s13464_s23  ;;  %v15991_v8 = vpop.permute.xlu0 %4728  ;;  %v3666_v55 = vpop.f32.mrb[64].mxu0  ;;  %v4791_v62 = vsel %vm1675_vm5, %v4723_v35, %v15973_v23  ;;  %v4790_v50 = vsel %vm1675_vm5, %v15468_v53, %v4723_v35  ;;  %v16011_v53 = vsel %vm1675_vm5, %v15768_v41, %v15710_v18  ;;  %v20961_v41 = vld [vmem:[#allocation44_spill] sm:$0xff]  ;;  %v4449_v18 = vsel %vm1502_vm4, %v4383_v40, %v15956_v17 }
 0x3e1   : > { %20960 = vst [vmem:[#allocation46_spill] sm:$0xff] %v15991_v8  ;;  %11868 = vmatmul.mubr.msk.bf16.gmra.mrb[80].mxu0 %vm7591_vm0, %v15979_v42  ;;  %v3667_v51 = vadd.f32 %v3666_v55, %v20916_v7  ;;  %v3668_v44 = vpop.f32.mrb[65].mxu0  ;;  %7859 = vmatprep.subr.bf16.mxu0 %v4791_v62  ;;  %v16036_v19 = vsel %vm2021_vm7, %v20961_v41, %v15845_v38  ;;  %v20962_v55 = vld [vmem:[#allocation25_spill] sm:$0xff] }
 0x3e2   : > { %7885 = vmatprep.mubr.bf16.mxu0 %v16021_v46  ;;  %7780 = vmatmul.mubr.bf16.gmra.mrb[80].mxu1 %v15868_v58  ;;  %v3669_v29 = vadd.f32 %v3668_v44, %v20916_v7  ;;  %v3670_v62 = vpop.f32.mrb[66].mxu0 }
 0x3e3   : > { %5370 = vrot.lane.b32.xlu0 %v20932_v5, %s13464_s23  ;;  %vm3758_vm2 = vcmp.ge.f32.partialorder %v3667_v51, 0.0  ;;  %v3854_v35 = vmul.f32 0.2, %v3667_v51  ;;  %v3671_v34 = vadd.f32 %v3670_v62, %v20962_v55  ;;  %7860 = vmatpush1.bf16.msra.mxu0 %v4790_v50  ;;  %v3672_v44 = vpop.f32.mrb[67].mxu0  ;;  %v16041_v1 = vpop.permute.xlu1 %4726  ;;  %v16051_v62 = vsel %vm1502_vm4, %v15938_v9, %v4383_v40  ;;  %v20963_v9 = vld [vmem:[#allocation23_spill] sm:$0xff] }
 0x3e4   : > { %5372 = vrot.lane.b32.xlu1 %v20934_v32, %s13464_s23  ;;  %v16045_v52 = vpop.permute.xlu0 %5068  ;;  %vm3759_vm3 = vcmp.ge.f32.partialorder %v3669_v29, 0.0  ;;  %v3855_v58 = vmul.f32 0.2, %v3669_v29  ;;  %v3673_v38 = vadd.f32 %v3672_v44, %v20962_v55  ;;  %7861 = vmatprep.subr.bf16.mxu0 %v5111_v54  ;;  %v3719_v41 = vpop.f32.mrb[64].mxu1  ;;  %v16059_v15 = vsel %vm1675_vm5, %v16041_v1, %v15991_v8 }
 0x3e5   : > { %7822 = vmatprep.mubr.bf16.mxu1 %v20953_v43  ;;  %v3950_v50 = vsel %vm3758_vm2, %v3667_v51, %v3854_v35  ;;  %vm3782_vm12 = vcmp.ge.f32.partialorder %v3671_v34, 0.0  ;;  %v3878_v20 = vmul.f32 0.2, %v3671_v34  ;;  %v3720_v61 = vadd.f32 %v3719_v41, %v20916_v7  ;;  %v3721_v17 = vpop.f32.mrb[65].mxu1 }
 0x3e6   : > { %v3951_v27 = vsel %vm3759_vm3, %v3669_v29, %v3855_v58  ;;  %vm3783_vm13 = vcmp.ge.f32.partialorder %v3673_v38, 0.0  ;;  %v3879_v44 = vmul.f32 0.2, %v3673_v38  ;;  %v3723_v54 = vpop.f32.mrb[66].mxu1  ;;  %v4046_v40 = vmul.f32 %v3950_v50, %v20963_v9  ;;  %v20964_v50 = vld [vmem:[#allocation10_spill] sm:$0xff] }
 0x3e7   : > { %5374 = vrot.lane.b32.xlu0 %v20938_v39, %s13464_s23  ;;  %v3974_v51 = vsel %vm3782_vm12, %v3671_v34, %v3878_v20  ;;  %vm3760_vm14 = vcmp.ge.f32.partialorder %v3720_v61, 0.0  ;;  %v3856_v35 = vmul.f32 0.2, %v3720_v61  ;;  %7862 = vmatpush1.bf16.msra.mxu0 %v5110_v37  ;;  %v3725_v58 = vpop.f32.mrb[67].mxu1  ;;  %v5067_v29 = vpop.permute.xlu1 %5066  ;;  %v3722_v21 = vadd.f32 %v3721_v17, %v20916_v7 }
 0x3e8   : > { %5418 = vrot.lane.b32.xlu1 %v20920_v26, %s13464_s23  ;;  %v4070_v41 = vmul.f32 %v3974_v51, %v20963_v9  ;;  %v3975_v13 = vsel %vm3783_vm13, %v3673_v38, %v3879_v44  ;;  %v16065_v30 = vpop.permute.xlu0 %5072  ;;  %v3724_v8 = vadd.f32 %v3723_v54, %v20962_v55  ;;  %v3676_v56 = vpop.f32.mrb[68].mxu0  ;;  %v4047_v34 = vmul.f32 %v3951_v27, %v20964_v50 }
 0x3e9   : > { %v4071_v20 = vmul.f32 %v3975_v13, %v20964_v50  ;;  %v3726_v26 = vadd.f32 %v3725_v58, %v20962_v55  ;;  %v3677_v37 = vadd.f32 %v3676_v56, %v14788_v33  ;;  %v3678_v31 = vpop.f32.mrb[69].mxu0  ;;  %v3952_v38 = vsel %vm3760_vm14, %v3720_v61, %v3856_v35  ;;  %v20967_v35 = vld [vmem:[#allocation9_spill] sm:$0xff] }
 0x3ea   : > { %v16073_v57 = vpack.c.bf16 %v4070_v41, %v4046_v40  ;;  %vm3761_vm15 = vcmp.ge.f32.partialorder %v3722_v21, 0.0  ;;  %v3857_v44 = vmul.f32 0.2, %v3722_v21  ;;  %11869 = vmatmul.mubr.msk.bf16.vlgmr.msra.gmra.mrb[72].mxu1 %vm7591_vm0, %v15903_v47  ;;  %v3680_v7 = vpop.f32.mrb[70].mxu0  ;;  %vm3784_vm1 = vcmp.ge.f32.partialorder %v3724_v8, 0.0  ;;  %v20968_v47 = vld [vmem:[#allocation11_spill] sm:$0xff] }
 0x3eb   : > { %5420 = vrot.lane.b32.xlu0 %v20941_v12, %s13464_s23  ;;  %v16080_v27 = vpack.c.bf16 %v4071_v20, %v4047_v34  ;;  %v3880_v13 = vmul.f32 0.2, %v3724_v8  ;;  %vm3785_vm2 = vcmp.ge.f32.partialorder %v3726_v26, 0.0  ;;  %7980 = vmatpush1.bf16.msra.mxu1 %v16003_v36  ;;  %v3682_v61 = vpop.f32.mrb[71].mxu0  ;;  %v16085_v56 = vpop.permute.xlu1 %5070  ;;  %v3881_v55 = vmul.f32 0.2, %v3726_v26 }
 0x3ec   : > { %20965 = vst [vmem:[#allocation48_spill] sm:$0xff] %v16073_v57  ;;  %5422 = vrot.lane.b32.xlu1 %v20942_v6, %s13464_s23  ;;  %v3953_v17 = vsel %vm3761_vm15, %v3722_v21, %v3857_v44  ;;  %vm3806_vm3 = vcmp.ge.f32.partialorder %v3677_v37, 0.0  ;;  %v3902_v54 = vmul.f32 0.2, %v3677_v37  ;;  %7981 = vmatprep.subr.bf16.mxu1 %v4449_v18  ;;  %v16087_v40 = vpop.permute.xlu0 %5412  ;;  %v3729_v51 = vpop.f32.mrb[68].mxu1  ;;  %v4048_v58 = vmul.f32 %v3952_v38, %v20967_v35 }
 0x3ed   : > { %20966 = vst [vmem:[#allocation50_spill] sm:$0xff] %v16080_v27  ;;  %7832 = vmatprep.mubr.bf16.mxu1 %v20953_v43  ;;  %v3976_v41 = vsel %vm3784_vm1, %v3724_v8, %v3880_v13  ;;  %v3679_v34 = vadd.f32 %v3678_v31, %v14788_v33  ;;  %v5135_v36 = vsel %vm1848_vm6, %v5067_v29, %v16045_v52  ;;  %v3731_v20 = vpop.f32.mrb[69].mxu1 }
 0x3ee   : > { %v4072_v21 = vmul.f32 %v3976_v41, %v20967_v35  ;;  %v3977_v44 = vsel %vm3785_vm2, %v3726_v26, %v3881_v55  ;;  %v3998_v18 = vsel %vm3806_vm3, %v3677_v37, %v3902_v54  ;;  %7863 = vmatprep.subr.bf16.mxu0 %v5135_v36  ;;  %v3681_v27 = vadd.f32 %v3680_v7, %v14773_v59  ;;  %v3733_v57 = vpop.f32.mrb[70].mxu1  ;;  %v20969_v7 = vld [vmem:[#allocation59_spill] sm:$0xff] }
 0x3ef   : > { %v4049_v22 = vmul.f32 %v3953_v17, %v20968_v47  ;;  %v4073_v38 = vmul.f32 %v3977_v44, %v20968_v47  ;;  %vm3807_vm12 = vcmp.ge.f32.partialorder %v3679_v34, 0.0  ;;  %v3903_v8 = vmul.f32 0.2, %v3679_v34  ;;  %5424 = vrot.lane.b32.xlu0 %v20946_v0, %s13464_s23  ;;  %v3735_v31 = vpop.f32.mrb[71].mxu1  ;;  %v5411_v13 = vpop.permute.xlu1 %5410  ;;  %7982 = vmatpush1.bf16.msra.mxu1 %v16051_v62 }
 0x3f0   : > { %5808 = vrot.lane.b32.xlu1 %v20932_v5, %s13466_s12  ;;  %v16104_v26 = vpack.c.bf16 %v4072_v21, %v4048_v58  ;;  %vm3830_vm13 = vcmp.ge.f32.partialorder %v3681_v27, 0.0  ;;  %v3926_v37 = vmul.f32 0.2, %v3681_v27  ;;  %v5134_v55 = vsel %vm1848_vm6, %v20969_v7, %v5067_v29  ;;  %v16109_v17 = vpop.permute.xlu0 %5416  ;;  %7983 = vmatprep.subr.bf16.mxu1 %v16011_v53 }
 0x3f1   : > { %v16111_v54 = vpack.c.bf16 %v4073_v38, %v4049_v22  ;;  %v4094_v41 = vmul.f32 %v3998_v18, %v20963_v9  ;;  %7864 = vmatpush1.bf16.msra.mxu0 %v5134_v55  ;;  %v3683_v36 = vadd.f32 %v3682_v61, %v14773_v59  ;;  %v3730_v44 = vadd.f32 %v3729_v51, %v14788_v33 }
 0x3f2   : > { %v3999_v58 = vsel %vm3807_vm12, %v3679_v34, %v3903_v8  ;;  %v4022_v21 = vsel %vm3830_vm13, %v3681_v27, %v3926_v37  ;;  %7865 = vmatprep.subr.bf16.mxu0 %v16031_v28  ;;  %v3732_v62 = vadd.f32 %v3731_v20, %v14788_v33  ;;  %v3734_v53 = vadd.f32 %v3733_v57, %v14773_v59  ;;  %v20970_v8 = vld [vmem:[#allocation51_spill] sm:$0xff] }
 0x3f3   : > { %v4118_v29 = vmul.f32 %v4022_v21, %v20963_v9  ;;  %vm3831_vm14 = vcmp.ge.f32.partialorder %v3683_v36, 0.0  ;;  %v3927_v22 = vmul.f32 0.2, %v3683_v36  ;;  %vm3808_vm15 = vcmp.ge.f32.partialorder %v3730_v44, 0.0  ;;  %5810 = vrot.lane.b32.xlu0 %v20934_v32, %s13466_s12  ;;  %v16125_v61 = vpop.permute.xlu1 %5414  ;;  %7984 = vmatpush1.bf16.msra.mxu1 %v16016_v63 }
 0x3f4   : > { %5812 = vrot.lane.b32.xlu1 %v20938_v39, %s13466_s12  ;;  %v3904_v27 = vmul.f32 0.2, %v3730_v44  ;;  %vm3809_vm1 = vcmp.ge.f32.partialorder %v3732_v62, 0.0  ;;  %v3905_v28 = vmul.f32 0.2, %v3732_v62  ;;  %v16129_v33 = vpop.permute.xlu0 %6490  ;;  %v3736_v34 = vadd.f32 %v3735_v31, %v14773_v59  ;;  %7985 = vmatprep.subr.bf16.mxu1 %v16059_v15  ;;  %v20971_v31 = vld [vmem:[#allocation58_spill] sm:$0xff] }
 0x3f5   : > { %v16131_v9 = vpack.c.bf16 %v4118_v29, %v4094_v41  ;;  %v4023_v51 = vsel %vm3831_vm14, %v3683_v36, %v3927_v22  ;;  %7866 = vmatpush1.bf16.msra.mxu0 %v16036_v19  ;;  %v4095_v20 = vmul.f32 %v3999_v58, %v20964_v50  ;;  %vm3832_vm2 = vcmp.ge.f32.partialorder %v3734_v53, 0.0  ;;  %11870 = vmatmul.mubr.msk.bf16.gmra.mrb[76].mxu1 %vm7591_vm0, %v15944_v16  ;;  %v20972_v29 = vld [vmem:[#allocation5_spill] sm:$0xff] }
 0x3f6   : > { %v4119_v18 = vmul.f32 %v4023_v51, %v20964_v50  ;;  %v4000_v57 = vsel %vm3808_vm15, %v3730_v44, %v3904_v27  ;;  %v4001_v63 = vsel %vm3809_vm1, %v3732_v62, %v3905_v28  ;;  %v3928_v38 = vmul.f32 0.2, %v3734_v53  ;;  %7842 = vmatprep.mubr.bf16.mxu1 %v20953_v43  ;;  %v20973_v27 = vld [vmem:[#allocation14_spill] sm:$0xff] }
 0x3f7   : > { %vm3833_vm3 = vcmp.ge.f32.partialorder %v3736_v34, 0.0  ;;  %5814 = vrot.lane.b32.xlu0 %v20970_v8, %s13466_s12  ;;  %v5851_v59 = vpop.permute.xlu1 %5850  ;;  %v3929_v19 = vmul.f32 0.2, %v3736_v34  ;;  %v5479_v50 = vsel %vm2021_vm7, %v5411_v13, %v16087_v40  ;;  %v5478_v37 = vsel %vm2021_vm7, %v20971_v31, %v5411_v13 }
 0x3f8   : > { %5858 = vrot.lane.b32.xlu1 %v20941_v12, %s13466_s12  ;;  %v16145_v15 = vpack.c.bf16 %v4119_v18, %v4095_v20  ;;  %v16151_v7 = vpop.permute.xlu0 %6540  ;;  %v4024_v55 = vsel %vm3832_vm2, %v3734_v53, %v3928_v38  ;;  %7867 = vmatprep.subr.bf16.mxu0 %v5479_v50  ;;  %v4792_v41 = vsel %vm1675_vm5, %v15973_v23, %v16041_v1  ;;  %v20974_v53 = vld [vmem:[#allocation29_spill] sm:$0xff]  ;;  %v20977_v18 = vld [vmem:[#allocation60_spill] sm:$0xff] }
 0x3f9   : > { %v5113_v36 = vsel %vm1848_vm6, %v15813_v2, %v15748_v10  ;;  %v4096_v44 = vmul.f32 %v4000_v57, %v20967_v35  ;;  %v4120_v58 = vmul.f32 %v4024_v55, %v20967_v35  ;;  %v4025_v13 = vsel %vm3833_vm3, %v3736_v34, %v3929_v19  ;;  %7868 = vmatpush1.bf16.msra.mxu0 %v5478_v37  ;;  %v20975_v34 = vld [vmem:[#allocation54_spill] sm:$0xff] }
 0x3fa   : > { %7986 = vmatpush1.bf16.msra.mxu1 %v4792_v41  ;;  %v4097_v21 = vmul.f32 %v4001_v63, %v20968_v47  ;;  %v4121_v62 = vmul.f32 %v4025_v13, %v20968_v47  ;;  %7869 = vmatprep.subr.bf16.mxu0 %v20972_v29  ;;  %v5112_v47 = vsel %vm1848_vm6, %v15729_v25, %v15813_v2  ;;  %v20976_v2 = vld [vmem:[#allocation28_spill] sm:$0xff]  ;;  %v20979_v41 = vld [vmem:[#allocation62_spill] sm:$0xff]  ;;  %v20982_v13 = vld [vmem:[#allocation31_spill] sm:$0xff] }
 0x3fb   : > { %7987 = vmatprep.subr.bf16.mxu1 %v5113_v36  ;;  %v16166_v1 = vpop.permute.xlu1 %5854  ;;  %v16168_v23 = vpack.c.bf16 %v4120_v58, %v4096_v44  ;;  %5860 = vrot.lane.b32.xlu0 %v20942_v6, %s13466_s12  ;;  %v5137_v28 = vsel %vm1848_vm6, %v16085_v56, %v16065_v30  ;;  %v5136_v25 = vsel %vm1848_vm6, %v16045_v52, %v16085_v56  ;;  %v20978_v56 = vld [vmem:[#allocation61_spill] sm:$0xff]  ;;  %v20980_v44 = vld [vmem:[#allocation6_spill] sm:$0xff] }
 0x3fc   : > { %5862 = vrot.lane.b32.xlu1 %v20946_v0, %s13466_s12  ;;  %v16174_v35 = vpop.permute.xlu0 %6834  ;;  %v16176_v22 = vpack.c.bf16 %v4121_v62, %v4097_v21  ;;  %v5895_v57 = vsel %vm2242_vm8, %v15880_v4, %v20977_v18  ;;  %v5457_v63 = vsel %vm2021_vm7, %v15861_v60, %v15799_v49  ;;  %v5894_v19 = vsel %vm2242_vm8, %v20978_v56, %v15880_v4  ;;  %v20983_v29 = vld [vmem:[#allocation22_spill] sm:$0xff] }
 0x3fd   : > { %7870 = vmatpush1.bf16.msra.mxu0 %v20973_v27  ;;  %11871 = vmatmul.mubr.msk.bf16.gmra.mrb[80].mxu1 %vm7591_vm0, %v15979_v42  ;;  %v5456_v50 = vsel %vm2021_vm7, %v15771_v14, %v15861_v60  ;;  %v5919_v31 = vsel %vm2242_vm8, %v5851_v59, %v15898_v24  ;;  %v5481_v37 = vsel %vm2021_vm7, %v16125_v61, %v16109_v17  ;;  %v20985_v27 = vld [vmem:[#allocation42_spill] sm:$0xff] }
 0x3fe   : > { %7988 = vmatpush1.bf16.msra.mxu1 %v5112_v47  ;;  %7871 = vmatprep.subr.bf16.mxu0 %v20974_v53  ;;  %v5918_v60 = vsel %vm2242_vm8, %v15820_v45, %v5851_v59  ;;  %v5480_v4 = vsel %vm2021_vm7, %v16087_v40, %v16125_v61  ;;  %v6239_v36 = vsel %vm2415_vm9, %v15915_v3, %v20979_v41  ;;  %v20981_v61 = vld [vmem:[#allocation4_spill] sm:$0xff] }
 0x3ff   : > { %7989 = vmatprep.subr.bf16.mxu1 %v5137_v28  ;;  %v6195_v51 = vpop.permute.xlu1 %6194  ;;  %5864 = vrot.lane.b32.xlu0 %v20975_v34, %s13466_s12  ;;  %v6238_v40 = vsel %vm2415_vm9, %v15619_v11, %v15915_v3  ;;  %v20984_v3 = vld [vmem:[#allocation30_spill] sm:$0xff] }
 0x400   : > { %6152 = vrot.lane.b32.xlu1 %v20932_v5, %s13467_s13  ;;  %v16190_v20 = vpop.permute.xlu0 %6884  ;;  %8011 = vmatprep.mubr.bf16.mxu1 %v16021_v46  ;;  %v6263_v59 = vsel %vm2415_vm9, %v6195_v51, %v15917_v48  ;;  %v6262_v11 = vsel %vm2415_vm9, %v20983_v29, %v6195_v51 }
 0x401   : > { %7872 = vmatpush1.bf16.msra.mxu0 %v20976_v2  ;;  %v20986_v2 = vld [vmem:[#allocation27_spill] sm:$0xff] }
 0x402   : > { %7990 = vmatpush1.bf16.msra.mxu1 %v5136_v25  ;;  %7873 = vmatprep.subr.bf16.mxu0 %v5895_v57 }
 0x403   : > { %7991 = vmatprep.subr.bf16.mxu1 %v5457_v63  ;;  %v16204_v38 = vpop.permute.xlu1 %6198  ;;  %6154 = vrot.lane.b32.xlu0 %v20934_v32, %s13467_s13  ;;  %v5896_v63 = vsel %vm2242_vm8, %v20977_v18, %v20985_v27 }
 0x404   : > { %6156 = vrot.lane.b32.xlu1 %v20938_v39, %s13467_s13  ;;  %v16210_v52 = vpop.permute.xlu0 %5806 }
 0x405   : > { %7874 = vmatpush1.bf16.msra.mxu0 %v5894_v19  ;;  %v5897_v28 = vsel %vm2242_vm8, %v20985_v27, %v16210_v52  ;;  %v20987_v19 = vld [vmem:[#allocation17_spill] sm:$0xff] }
 0x406   : > { %7992 = vmatpush1.bf16.msra.mxu1 %v5456_v50  ;;  %7875 = vmatprep.subr.bf16.mxu0 %v5919_v31 }
 0x407   : > { %7993 = vmatprep.subr.bf16.mxu1 %v5481_v37  ;;  %v6489_v55 = vpop.permute.xlu1 %6488  ;;  %6158 = vrot.lane.b32.xlu0 %v20970_v8, %s13467_s13 }
 0x408   : > { %6202 = vrot.lane.b32.xlu1 %v20941_v12, %s13467_s13  ;;  %v16228_v14 = vpop.permute.xlu0 %6150  ;;  %v6583_v47 = vsel %vm2588_vm10, %v6489_v55, %v16129_v33  ;;  %v6582_v57 = vsel %vm2588_vm10, %v20986_v2, %v6489_v55  ;;  %v5920_v55 = vsel %vm2242_vm8, %v15898_v24, %v16166_v1  ;;  %v20990_v24 = vld [vmem:[#allocation49_spill] sm:$0xff] }
 0x409   : > { %7876 = vmatpush1.bf16.msra.mxu0 %v5918_v60  ;;  %v20988_v60 = vld [vmem:[#allocation34_spill] sm:$0xff]  ;;  %v20993_v2 = vld [vmem:[#allocation21_spill] sm:$0xff] }
 0x40a   : > { %7994 = vmatpush1.bf16.msra.mxu1 %v5480_v4  ;;  %7877 = vmatprep.subr.bf16.mxu0 %v6239_v36  ;;  %v6241_v4 = vsel %vm2415_vm9, %v20988_v60, %v16228_v14  ;;  %v20989_v36 = vld [vmem:[#allocation26_spill] sm:$0xff] }
 0x40b   : > { %7995 = vmatprep.subr.bf16.mxu1 %v20980_v44  ;;  %v16239_v58 = vpop.permute.xlu1 %6492  ;;  %6204 = vrot.lane.b32.xlu0 %v20942_v6, %s13467_s13 }
 0x40c   : > { %6206 = vrot.lane.b32.xlu1 %v20946_v0, %s13467_s13  ;;  %v16245_v45 = vpop.permute.xlu0 %6494 }
 0x40d   : > { %7878 = vmatpush1.bf16.msra.mxu0 %v6238_v40  ;;  %v6585_v27 = vsel %vm2588_vm10, %v16239_v58, %v16245_v45 }
 0x40e   : > { %7996 = vmatpush1.bf16.msra.mxu1 %v20981_v61  ;;  %7879 = vmatprep.subr.bf16.mxu0 %v6263_v59 }
 0x40f   : > { %7997 = vmatprep.subr.bf16.mxu1 %v20982_v13  ;;  %v6539_v21 = vpop.permute.xlu1 %6538  ;;  %6208 = vrot.lane.b32.xlu0 %v20975_v34, %s13467_s13  ;;  %v20991_v13 = vld [vmem:[#allocation24_spill] sm:$0xff] }
 0x410   : > { %6496 = vrot.lane.b32.xlu1 %v20932_v5, %s13468_s14  ;;  %v16258_v62 = vpop.permute.xlu0 %6838  ;;  %v6607_v25 = vsel %vm2588_vm10, %v6539_v21, %v16151_v7  ;;  %v6606_v50 = vsel %vm2588_vm10, %v20987_v19, %v6539_v21 }
 0x411   : > { %7880 = vmatpush1.bf16.msra.mxu0 %v6262_v11  ;;  %v20992_v11 = vld [vmem:[#allocation18_spill] sm:$0xff] }
 0x412   : > { %7998 = vmatpush1.bf16.msra.mxu1 %v20984_v3  ;;  %7881 = vmatprep.subr.bf16.mxu0 %v6583_v47  ;;  %v6264_v47 = vsel %vm2415_vm9, %v15917_v48, %v16204_v38  ;;  %v6584_v48 = vsel %vm2588_vm10, %v16129_v33, %v16239_v58 }
 0x413   : > { %7999 = vmatprep.subr.bf16.mxu1 %v5897_v28  ;;  %v16268_v53 = vpop.permute.xlu1 %6542  ;;  %6498 = vrot.lane.b32.xlu0 %v20934_v32, %s13468_s14 }
 0x414   : > { %6500 = vrot.lane.b32.xlu1 %v20938_v39, %s13468_s14  ;;  %v16274_v51 = vpop.permute.xlu0 %5856  ;;  %v6608_v58 = vsel %vm2588_vm10, %v16151_v7, %v16268_v53 }
 0x415   : > { %v5921_v56 = vsel %vm2242_vm8, %v16166_v1, %v16274_v51  ;;  %7882 = vmatpush1.bf16.msra.mxu0 %v6582_v57  ;;  %v6240_v1 = vsel %vm2415_vm9, %v20979_v41, %v20988_v60  ;;  %v20994_v57 = vld [vmem:[#allocation20_spill] sm:$0xff] }
 0x416   : > { %8000 = vmatpush1.bf16.msra.mxu1 %v5896_v63  ;;  %7883 = vmatprep.subr.bf16.mxu0 %v6607_v25 }
 0x417   : > { %8001 = vmatprep.subr.bf16.mxu1 %v5921_v56  ;;  %v6833_v31 = vpop.permute.xlu1 %6832  ;;  %6502 = vrot.lane.b32.xlu0 %v20970_v8, %s13468_s14 }
 0x418   : > { %6546 = vrot.lane.b32.xlu1 %v20941_v12, %s13468_s14  ;;  %v16292_v37 = vpop.permute.xlu0 %6200  ;;  %v6927_v18 = vsel %vm2761_vm11, %v6833_v31, %v16174_v35  ;;  %v6926_v44 = vsel %vm2761_vm11, %v20989_v36, %v6833_v31 }
 0x419   : > { %7884 = vmatpush1.bf16.msra.mxu0 %v6606_v50  ;;  %v6265_v59 = vsel %vm2415_vm9, %v16204_v38, %v16292_v37 }
 0x41a   : > { %8002 = vmatpush1.bf16.msra.mxu1 %v5920_v55  ;;  %7916 = vmatprep.subr.bf16.mxu0 %v6927_v18  ;;  %v20995_v18 = vld [vmem:[#allocation16_spill] sm:$0xff] }
 0x41b   : > { %8003 = vmatprep.subr.bf16.mxu1 %v6241_v4  ;;  %v6837_v40 = vpop.permute.xlu1 %6836  ;;  %6548 = vrot.lane.b32.xlu0 %v20942_v6, %s13468_s14 }
 0x41c   : > { %6550 = vrot.lane.b32.xlu1 %v20946_v0, %s13468_s14  ;;  %v16308_v61 = vpop.permute.xlu0 %6544  ;;  %7886 = vmatmul.mubr.bf16.vlgmr.msra.gmra.mrb[84].mxu0 %v20990_v24  ;;  %v6929_v19 = vsel %vm2761_vm11, %v6837_v40, %v16258_v62  ;;  %v6928_v7 = vsel %vm2761_vm11, %v16174_v35, %v6837_v40  ;;  %v20997_v40 = vld [vmem:[#allocation8_spill] sm:$0xff] }
 0x41d   : > { %7917 = vmatpush1.bf16.msra.mxu0 %v6926_v44  ;;  %7895 = vmatprep.mubr.bf16.mxu0 %v20991_v13  ;;  %v6609_v38 = vsel %vm2588_vm10, %v16268_v53, %v16308_v61  ;;  %v20996_v44 = vld [vmem:[#allocation52_spill] sm:$0xff] }
 0x41e   : > { %8004 = vmatpush1.bf16.msra.mxu1 %v6240_v1 }
 0x41f   : > { %8005 = vmatprep.subr.bf16.mxu1 %v6265_v59  ;;  %v6883_v21 = vpop.permute.xlu1 %6882  ;;  %6552 = vrot.lane.b32.xlu0 %v20975_v34, %s13468_s14  ;;  %v20998_v59 = vld [vmem:[#allocation33_spill] sm:$0xff] }
 0x420   : > { %6840 = vrot.lane.b32.xlu1 %v20932_v5, %s13469_s15  ;;  %v16322_v29 = vpop.permute.xlu0 %6888  ;;  %v6951_v41 = vsel %vm2761_vm11, %v6883_v21, %v16190_v20  ;;  %v6950_v3 = vsel %vm2761_vm11, %v20992_v11, %v6883_v21  ;;  %v21000_v21 = vld [vmem:[#allocation35_spill] sm:$0xff] }
 0x421   : > { %7918 = vmatprep.subr.bf16.mxu0 %v6951_v41 }
 0x422   : > { %8006 = vmatpush1.bf16.msra.mxu1 %v6264_v47  ;;  %7919 = vmatpush1.bf16.msra.mxu0 %v6950_v3  ;;  %v21001_v3 = vld [vmem:[#allocation53_spill] sm:$0xff] }
 0x423   : > { %8007 = vmatprep.subr.bf16.mxu1 %v6585_v27  ;;  %v6887_v28 = vpop.permute.xlu1 %6886  ;;  %6842 = vrot.lane.b32.xlu0 %v20934_v32, %s13469_s15 }
 0x424   : > { %6844 = vrot.lane.b32.xlu1 %v20938_v39, %s13469_s15  ;;  %7896 = vmatmul.mubr.bf16.gmra.mrb[88].mxu0 %v20993_v2  ;;  %v6953_v53 = vsel %vm2761_vm11, %v6887_v28, %v16322_v29  ;;  %v6952_v4 = vsel %vm2761_vm11, %v16190_v20, %v6887_v28  ;;  %v21002_v28 = vld [vmem:[#allocation45_spill] sm:$0xff] }
 0x425   : > { %v16338_v25 = vpop.permute.xlu0 %4338  ;;  %7905 = vmatprep.mubr.bf16.mxu0 %v20994_v57 }
 0x426   : > { %8008 = vmatpush1.bf16.msra.mxu1 %v6584_v48 }
 0x427   : > { %8009 = vmatprep.subr.bf16.mxu1 %v6609_v38  ;;  %v4337_v63 = vpop.permute.xlu1 %4336  ;;  %6846 = vrot.lane.b32.xlu0 %v20970_v8, %s13469_s15  ;;  %v21003_v38 = vld [vmem:[#allocation55_spill] sm:$0xff] }
 0x428   : > { %6890 = vrot.lane.b32.xlu1 %v20941_v12, %s13469_s15  ;;  %v4427_v33 = vsel %vm1502_vm4, %v4337_v63, %v16338_v25 }
 0x429   : > { %v16352_v56 = vpop.permute.xlu0 %4342  ;;  %8105 = vmatprep.subr.bf16.mxu0 %v4427_v33 }
 0x42a   : > { %8010 = vmatpush1.bf16.msra.mxu1 %v6608_v58  ;;  %v21005_v58 = vld [vmem:[#allocation57_spill] sm:$0xff] }
 0x42b   : > { %8042 = vmatprep.subr.bf16.mxu1 %v6929_v19  ;;  %v16361_v50 = vpop.permute.xlu1 %4340  ;;  %6892 = vrot.lane.b32.xlu0 %v20942_v6, %s13469_s15 }
 0x42c   : > { %6894 = vrot.lane.b32.xlu1 %v20946_v0, %s13469_s15  ;;  %7906 = vmatmul.mubr.bf16.gmra.mrb[92].mxu0 %v20995_v18  ;;  %v4429_v35 = vsel %vm1502_vm4, %v16361_v50, %v16352_v56 }
 0x42d   : > { %v16367_v31 = vpop.permute.xlu0 %4388  ;;  %8012 = vmatmul.mubr.bf16.vlgmr.msra.gmra.mrb[84].mxu1 %v20990_v24  ;;  %7948 = vmatprep.mubr.bf16.mxu0 %v20953_v43 }
 0x42e   : > { %8043 = vmatpush1.bf16.msra.mxu1 %v6928_v7  ;;  %8021 = vmatprep.mubr.bf16.mxu1 %v20991_v13  ;;  %v20999_v13 = vld [vmem:[#allocation36_spill] sm:$0xff] }
 0x42f   : > { %8044 = vmatprep.subr.bf16.mxu1 %v6953_v53  ;;  %v4387_v55 = vpop.permute.xlu1 %4386  ;;  %6896 = vrot.lane.b32.xlu0 %v20975_v34, %s13469_s15  ;;  %v4426_v20 = vsel %vm1502_vm4, %v20999_v13, %v4337_v63 }
 0x430   : > { %4344 = vrot.lane.b32.xlu1 %v20970_v8, %s13463_s22  ;;  %v4451_v1 = vsel %vm1502_vm4, %v4387_v55, %v16367_v31  ;;  %v4450_v41 = vsel %vm1502_vm4, %v21000_v21, %v4387_v55 }
 0x431   : > { %v16381_v60 = vpop.permute.xlu0 %4392 }
 0x432   : > { %8045 = vmatpush1.bf16.msra.mxu1 %v6952_v4  ;;  %v4428_v4 = vsel %vm1502_vm4, %v16338_v25, %v16361_v50 }
 0x433   : > { %8231 = vmatprep.subr.bf16.mxu1 %v4429_v35  ;;  %v4391_v36 = vpop.permute.xlu1 %4390  ;;  %4346 = vrot.lane.b32.xlu0 %v20996_v44, %s13463_s22 }
 0x434   : > { %4348 = vrot.lane.b32.xlu1 %v20997_v40, %s13463_s22  ;;  %11872 = vmatmul.mubr.msk.bf16.vlgmr.msra.gmra.mrb[84].mxu0 %vm7591_vm0, %v20998_v59 }
 0x435   : > { %v16392_v24 = vpop.permute.xlu0 %4682  ;;  %8022 = vmatmul.mubr.bf16.gmra.mrb[88].mxu1 %v20993_v2  ;;  %8106 = vmatpush1.bf16.msra.mxu0 %v4426_v20  ;;  %v4452_v20 = vsel %vm1502_vm4, %v16367_v31, %v4391_v36 }
 0x436   : > { %8031 = vmatprep.mubr.bf16.mxu1 %v20994_v57  ;;  %8107 = vmatprep.subr.bf16.mxu0 %v4451_v1  ;;  %v21004_v57 = vld [vmem:[#allocation56_spill] sm:$0xff]  ;;  %v4453_v1 = vsel %vm1502_vm4, %v4391_v36, %v16381_v60 }
 0x437   : > { %v4681_v11 = vpop.permute.xlu1 %4680  ;;  %7958 = vmatprep.mubr.bf16.mxu0 %v20953_v43  ;;  %4350 = vrot.lane.b32.xlu0 %v21001_v3, %s13463_s22 }
 0x438   : > { %4394 = vrot.lane.b32.xlu1 %v20975_v34, %s13463_s22  ;;  %v4771_v27 = vsel %vm1675_vm5, %v4681_v11, %v16392_v24  ;;  %v4770_v2 = vsel %vm1675_vm5, %v21002_v28, %v4681_v11 }
 0x439   : > { %v16409_v47 = vpop.permute.xlu0 %4686  ;;  %8108 = vmatpush1.bf16.msra.mxu0 %v4450_v41 }
 0x43a   : > { %8109 = vmatprep.subr.bf16.mxu0 %v4771_v27 }
 0x43b   : > { %v4685_v48 = vpop.permute.xlu1 %4684  ;;  %4396 = vrot.lane.b32.xlu0 %v21003_v38, %s13463_s22 }
 0x43c   : > { %4398 = vrot.lane.b32.xlu1 %v21004_v57, %s13463_s22  ;;  %11873 = vmatmul.mubr.msk.bf16.gmra.mrb[88].mxu0 %vm7591_vm0, %v15944_v16  ;;  %v4773_v21 = vsel %vm1675_vm5, %v4685_v48, %v16409_v47 }
 0x43d   : > { %v4733_v63 = vpop.permute.xlu0 %4732  ;;  %8032 = vmatmul.mubr.bf16.gmra.mrb[92].mxu1 %v20995_v18  ;;  %8110 = vmatpush1.bf16.msra.mxu0 %v4770_v2  ;;  %v21006_v18 = vld [vmem:[#allocation46_spill] sm:$0xff] }
 0x43e   : > { %8074 = vmatprep.mubr.bf16.mxu1 %v20953_v43  ;;  %7968 = vmatprep.mubr.bf16.mxu0 %v20953_v43 }
 0x43f   : > { %v4731_v33 = vpop.permute.xlu1 %4730  ;;  %4400 = vrot.lane.b32.xlu0 %v21005_v58, %s13463_s22 }
 0x440   : > { %4688 = vrot.lane.b32.xlu1 %v20970_v8, %s13462_s21  ;;  %v4795_v7 = vsel %vm1675_vm5, %v4731_v33, %v4733_v63  ;;  %v4794_v53 = vsel %vm1675_vm5, %v21006_v18, %v4731_v33 }
 0x441   : > { %v16428_v19 = vpop.permute.xlu0 %4736  ;;  %8111 = vmatprep.subr.bf16.mxu0 %v4795_v7 }
 0x442   : > { %8112 = vmatpush1.bf16.msra.mxu0 %v4794_v53 }
 0x443   : > { %v4735_v55 = vpop.permute.xlu1 %4734  ;;  %4690 = vrot.lane.b32.xlu0 %v20996_v44, %s13462_s21 }
 0x444   : > { %4692 = vrot.lane.b32.xlu1 %v20997_v40, %s13462_s21  ;;  %11874 = vmatmul.mubr.msk.bf16.gmra.mrb[92].mxu0 %vm7591_vm0, %v15979_v42  ;;  %v4797_v31 = vsel %vm1675_vm5, %v4735_v55, %v16428_v19  ;;  %v4796_v2 = vsel %vm1675_vm5, %v4733_v63, %v4735_v55 }
 0x445   : > { %v5027_v35 = vpop.permute.xlu0 %5026  ;;  %11875 = vmatmul.mubr.msk.bf16.vlgmr.msra.gmra.mrb[84].mxu1 %vm7591_vm0, %v20998_v59  ;;  %8137 = vmatprep.mubr.bf16.mxu0 %v16021_v46 }
 0x446   : > { %8232 = vmatpush1.bf16.msra.mxu1 %v4428_v4  ;;  %8084 = vmatprep.mubr.bf16.mxu1 %v20953_v43 }
 0x447   : > { %8233 = vmatprep.subr.bf16.mxu1 %v4453_v1  ;;  %v5025_v13 = vpop.permute.xlu1 %5024  ;;  %4694 = vrot.lane.b32.xlu0 %v21001_v3, %s13462_s21 }
 0x448   : > { %4738 = vrot.lane.b32.xlu1 %v20975_v34, %s13462_s21  ;;  %v5115_v50 = vsel %vm1848_vm6, %v5025_v13, %v5027_v35  ;;  %v5114_v59 = vsel %vm1848_vm6, %v15748_v10, %v5025_v13  ;;  %v4772_v10 = vsel %vm1675_vm5, %v16392_v24, %v4685_v48 }
 0x449   : > { %v16452_v25 = vpop.permute.xlu0 %5030  ;;  %8113 = vmatprep.subr.bf16.mxu0 %v5115_v50 }
 0x44a   : > { %8234 = vmatpush1.bf16.msra.mxu1 %v4452_v20  ;;  %8114 = vmatpush1.bf16.msra.mxu0 %v5114_v59 }
 0x44b   : > { %8235 = vmatprep.subr.bf16.mxu1 %v4773_v21  ;;  %v5029_v41 = vpop.permute.xlu1 %5028  ;;  %4740 = vrot.lane.b32.xlu0 %v21003_v38, %s13462_s21 }
 0x44c   : > { %4742 = vrot.lane.b32.xlu1 %v21004_v57, %s13462_s21  ;;  %v5117_v24 = vsel %vm1848_vm6, %v5029_v41, %v16452_v25  ;;  %v5116_v18 = vsel %vm1848_vm6, %v5027_v35, %v5029_v41 }
 0x44d   : > { %v5077_v11 = vpop.permute.xlu0 %5076  ;;  %11876 = vmatmul.mubr.msk.bf16.gmra.mrb[88].mxu1 %vm7591_vm0, %v15944_v16 }
 0x44e   : > { %8236 = vmatpush1.bf16.msra.mxu1 %v4772_v10  ;;  %8094 = vmatprep.mubr.bf16.mxu1 %v20953_v43 }
 0x44f   : > { %8237 = vmatprep.subr.bf16.mxu1 %v4797_v31  ;;  %v5075_v36 = vpop.permute.xlu1 %5074  ;;  %4744 = vrot.lane.b32.xlu0 %v21005_v58, %s13462_s21  ;;  %v21008_v31 = vld [vmem:[#allocation32_spill] sm:$0xff] }
 0x450   : > { %5032 = vrot.lane.b32.xlu1 %v20970_v8, %s13465_s24  ;;  %v5139_v16 = vsel %vm1848_vm6, %v5075_v36, %v5077_v11  ;;  %v5138_v28 = vsel %vm1848_vm6, %v16065_v30, %v5075_v36 }
 0x451   : > { %v16476_v27 = vpop.permute.xlu0 %5080  ;;  %8115 = vmatprep.subr.bf16.mxu0 %v5139_v16 }
 0x452   : > { %8238 = vmatpush1.bf16.msra.mxu1 %v4796_v2  ;;  %8116 = vmatpush1.bf16.msra.mxu0 %v5138_v28 }
 0x453   : > { %8239 = vmatprep.subr.bf16.mxu1 %v5117_v24  ;;  %v5079_v48 = vpop.permute.xlu1 %5078  ;;  %5034 = vrot.lane.b32.xlu0 %v20996_v44, %s13465_s24 }
 0x454   : > { %5036 = vrot.lane.b32.xlu1 %v20997_v40, %s13465_s24  ;;  %v5141_v7 = vsel %vm1848_vm6, %v5079_v48, %v16476_v27  ;;  %v5140_v30 = vsel %vm1848_vm6, %v5077_v11, %v5079_v48 }
 0x455   : > { %v5371_v33 = vpop.permute.xlu0 %5370  ;;  %11877 = vmatmul.mubr.msk.bf16.gmra.mrb[92].mxu1 %vm7591_vm0, %v15979_v42 }
 0x456   : > { %8240 = vmatpush1.bf16.msra.mxu1 %v5116_v18  ;;  %8263 = vmatprep.mubr.bf16.mxu1 %v16021_v46  ;;  %v21009_v18 = vld [vmem:[#allocation37_spill] sm:$0xff] }
 0x457   : > { %8241 = vmatprep.subr.bf16.mxu1 %v5141_v7  ;;  %v5369_v63 = vpop.permute.xlu1 %5368  ;;  %5038 = vrot.lane.b32.xlu0 %v21001_v3, %s13465_s24 }
 0x458   : > { %5082 = vrot.lane.b32.xlu1 %v20975_v34, %s13465_s24  ;;  %v5459_v55 = vsel %vm2021_vm7, %v5369_v63, %v5371_v33  ;;  %v5458_v42 = vsel %vm2021_vm7, %v15799_v49, %v5369_v63 }
 0x459   : > { %v16499_v53 = vpop.permute.xlu0 %5374  ;;  %8117 = vmatprep.subr.bf16.mxu0 %v5459_v55 }
 0x45a   : > { %8242 = vmatpush1.bf16.msra.mxu1 %v5140_v30  ;;  %8118 = vmatpush1.bf16.msra.mxu0 %v5458_v42 }
 0x45b   : > { %v5373_v46 = vpop.permute.xlu1 %5372  ;;  %5084 = vrot.lane.b32.xlu0 %v21003_v38, %s13465_s24 }
 0x45c   : > { %5086 = vrot.lane.b32.xlu1 %v21004_v57, %s13465_s24  ;;  %v5461_v4 = vsel %vm2021_vm7, %v5373_v46, %v16499_v53  ;;  %v5460_v1 = vsel %vm2021_vm7, %v5371_v33, %v5373_v46 }
 0x45d   : > { %v5421_v35 = vpop.permute.xlu0 %5420  ;;  %8243 = vmatprep.subr.bf16.mxu1 %v5461_v4 }
 0x45e   : > { %8244 = vmatpush1.bf16.msra.mxu1 %v5460_v1  ;;  %v21010_v1 = vld [vmem:[#allocation40_spill] sm:$0xff] }
 0x45f   : > { %v5419_v13 = vpop.permute.xlu1 %5418  ;;  %5088 = vrot.lane.b32.xlu0 %v21005_v58, %s13465_s24 }
 0x460   : > { %5376 = vrot.lane.b32.xlu1 %v20970_v8, %s13464_s23  ;;  %v5483_v49 = vsel %vm2021_vm7, %v5419_v13, %v5421_v35  ;;  %v5482_v50 = vsel %vm2021_vm7, %v16109_v17, %v5419_v13  ;;  %v21007_v17 = vld [vmem:[#allocation15_spill] sm:$0xff] }
 0x461   : > { %v16518_v59 = vpop.permute.xlu0 %5424  ;;  %8119 = vmatprep.subr.bf16.mxu0 %v5483_v49 }
 0x462   : > { %8120 = vmatpush1.bf16.msra.mxu0 %v5482_v50 }
 0x463   : > { %v5423_v20 = vpop.permute.xlu1 %5422  ;;  %8121 = vmatprep.subr.bf16.mxu0 %v20932_v5  ;;  %5378 = vrot.lane.b32.xlu0 %v20996_v44, %s13464_s23 }
 0x464   : > { %5380 = vrot.lane.b32.xlu1 %v20997_v40, %s13464_s23  ;;  %v5485_v21 = vsel %vm2021_vm7, %v5423_v20, %v16518_v59  ;;  %v5484_v41 = vsel %vm2021_vm7, %v5421_v35, %v5423_v20 }
 0x465   : > { %v5811_v11 = vpop.permute.xlu0 %5810  ;;  %8245 = vmatprep.subr.bf16.mxu1 %v5485_v21 }
 0x466   : > { %8122 = vmatpush1.bf16.msra.mxu0 %v21007_v17  ;;  %8246 = vmatpush1.bf16.msra.mxu1 %v5484_v41 }
 0x467   : > { %8247 = vmatprep.subr.bf16.mxu1 %v20938_v39  ;;  %v5809_v10 = vpop.permute.xlu1 %5808  ;;  %8123 = vmatprep.subr.bf16.mxu0 %v20941_v12 }
 0x468   : > { %5382 = vrot.lane.b32.xlu0 %v21001_v3, %s13464_s23  ;;  %5426 = vrot.lane.b32.xlu1 %v20975_v34, %s13464_s23  ;;  %v5899_v36 = vsel %vm2242_vm8, %v5809_v10, %v5811_v11  ;;  %v5898_v12 = vsel %vm2242_vm8, %v16210_v52, %v5809_v10 }
 0x469   : > { %v16535_v5 = vpop.permute.xlu0 %5814 }
 0x46a   : > { %8124 = vmatpush1.bf16.msra.mxu0 %v21008_v31  ;;  %8248 = vmatpush1.bf16.msra.mxu1 %v20934_v32 }
 0x46b   : > { %8249 = vmatprep.subr.bf16.mxu1 %v20946_v0  ;;  %v5813_v39 = vpop.permute.xlu1 %5812  ;;  %8125 = vmatprep.subr.bf16.mxu0 %v5899_v36 }
 0x46c   : > { %5428 = vrot.lane.b32.xlu0 %v21003_v38, %s13464_s23  ;;  %5430 = vrot.lane.b32.xlu1 %v21004_v57, %s13464_s23  ;;  %v5901_v32 = vsel %vm2242_vm8, %v5813_v39, %v16535_v5  ;;  %v5900_v28 = vsel %vm2242_vm8, %v5811_v11, %v5813_v39 }
 0x46d   : > { %v5861_v24 = vpop.permute.xlu0 %5860 }
 0x46e   : > { %8126 = vmatpush1.bf16.msra.mxu0 %v5898_v12  ;;  %8250 = vmatpush1.bf16.msra.mxu1 %v20942_v6 }
 0x46f   : > { %8251 = vmatprep.subr.bf16.mxu1 %v5901_v32  ;;  %v5859_v0 = vpop.permute.xlu1 %5858 }
 0x470   : > { %5432 = vrot.lane.b32.xlu0 %v21005_v58, %s13464_s23  ;;  %5816 = vrot.lane.b32.xlu1 %v20996_v44, %s13466_s12  ;;  %v5923_v16 = vsel %vm2242_vm8, %v5859_v0, %v5861_v24  ;;  %v5922_v52 = vsel %vm2242_vm8, %v16274_v51, %v5859_v0 }
 0x471   : > { %8127 = vmatprep.subr.bf16.mxu0 %v5923_v16  ;;  %v16558_v6 = vpop.permute.xlu0 %5864 }
 0x472   : > { %8128 = vmatpush1.bf16.msra.mxu0 %v5922_v52  ;;  %8252 = vmatpush1.bf16.msra.mxu1 %v5900_v28 }
 0x473   : > { %v5863_v2 = vpop.permute.xlu1 %5862 }
 0x474   : > { %5818 = vrot.lane.b32.xlu0 %v20997_v40, %s13466_s12  ;;  %5820 = vrot.lane.b32.xlu1 %v21001_v3, %s13466_s12  ;;  %v5925_v48 = vsel %vm2242_vm8, %v5863_v2, %v16558_v6  ;;  %v5924_v33 = vsel %vm2242_vm8, %v5861_v24, %v5863_v2 }
 0x475   : > { %8253 = vmatprep.subr.bf16.mxu1 %v5925_v48  ;;  %v6155_v51 = vpop.permute.xlu0 %6154 }
 0x476   : > { %8254 = vmatpush1.bf16.msra.mxu1 %v5924_v33  ;;  %v16640_v33 = vld [vmem:[%s20692_s4 + $0x1c] ss:$12 sps:$4 sm:$0xff]  }
 0x477   : > { %v6153_v7 = vpop.permute.xlu1 %6152 }
 0x478   : > { %5822 = vrot.lane.b32.xlu0 %v21009_v18, %s13466_s12  ;;  %5866 = vrot.lane.b32.xlu1 %v21003_v38, %s13466_s12  ;;  %v6243_v30 = vsel %vm2415_vm9, %v6153_v7, %v6155_v51  ;;  %v6242_v63 = vsel %vm2415_vm9, %v16228_v14, %v6153_v7 }
 0x479   : > { %8129 = vmatprep.subr.bf16.mxu0 %v6243_v30  ;;  %v16574_v55 = vpop.permute.xlu0 %6158 }
 0x47a   : > { %8130 = vmatpush1.bf16.msra.mxu0 %v6242_v63 }
 0x47b   : > { %v6157_v42 = vpop.permute.xlu1 %6156 }
 0x47c   : > { %5868 = vrot.lane.b32.xlu0 %v21004_v57, %s13466_s12  ;;  %5870 = vrot.lane.b32.xlu1 %v21005_v58, %s13466_s12  ;;  %v6245_v46 = vsel %vm2415_vm9, %v6157_v42, %v16574_v55  ;;  %v6244_v35 = vsel %vm2415_vm9, %v6155_v51, %v6157_v42 }
 0x47d   : > { %8255 = vmatprep.subr.bf16.mxu1 %v6245_v46  ;;  %v6205_v4 = vpop.permute.xlu0 %6204 }
 0x47e   : > { %8256 = vmatpush1.bf16.msra.mxu1 %v6244_v35  ;;  %v16664_v35 = vld [vmem:[%s20692_s4 + $0x18] ss:$12 sps:$4 sm:$0xff]  }
 0x47f   : > { %v6203_v14 = vpop.permute.xlu1 %6202 }
 0x480   : > { %5872 = vrot.lane.b32.xlu0 %v21010_v1, %s13466_s12  ;;  %6160 = vrot.lane.b32.xlu1 %v20996_v44, %s13467_s13  ;;  %v6267_v13 = vsel %vm2415_vm9, %v6203_v14, %v6205_v4  ;;  %v6266_v49 = vsel %vm2415_vm9, %v16292_v37, %v6203_v14  ;;  %v16670_v14 = vld [vmem:[%s20692_s4 + $0x34] ss:$12 sps:$4 sm:$0xff]  }
 0x481   : > { %8131 = vmatprep.subr.bf16.mxu0 %v6267_v13  ;;  %v16590_v50 = vpop.permute.xlu0 %6208 }
 0x482   : > { %8132 = vmatpush1.bf16.msra.mxu0 %v6266_v49 }
 0x483   : > { %v6207_v20 = vpop.permute.xlu1 %6206 }
 0x484   : > { %6162 = vrot.lane.b32.xlu0 %v20997_v40, %s13467_s13  ;;  %6164 = vrot.lane.b32.xlu1 %v21001_v3, %s13467_s13  ;;  %v6269_v21 = vsel %vm2415_vm9, %v6207_v20, %v16590_v50  ;;  %v6268_v41 = vsel %vm2415_vm9, %v6205_v4, %v6207_v20 }
 0x485   : > { %8257 = vmatprep.subr.bf16.mxu1 %v6269_v21  ;;  %v6499_v11 = vpop.permute.xlu0 %6498 }
 0x486   : > { %8258 = vmatpush1.bf16.msra.mxu1 %v6268_v41 }
 0x487   : > { %v6497_v37 = vpop.permute.xlu1 %6496 }
 0x488   : > { %6166 = vrot.lane.b32.xlu0 %v21009_v18, %s13467_s13  ;;  %6210 = vrot.lane.b32.xlu1 %v21003_v38, %s13467_s13  ;;  %v6587_v17 = vsel %vm2588_vm10, %v6497_v37, %v6499_v11  ;;  %v6586_v10 = vsel %vm2588_vm10, %v16245_v45, %v6497_v37  ;;  %v16694_v37 = vld [vmem:[%s20692_s4 + $0x30] ss:$12 sps:$4 sm:$0xff]  }
 0x489   : > { %8133 = vmatprep.subr.bf16.mxu0 %v6587_v17  ;;  %v16606_v31 = vpop.permute.xlu0 %6502 }
 0x48a   : > { %8134 = vmatpush1.bf16.msra.mxu0 %v6586_v10 }
 0x48b   : > { %v6501_v36 = vpop.permute.xlu1 %6500 }
 0x48c   : > { %6212 = vrot.lane.b32.xlu0 %v21004_v57, %s13467_s13  ;;  %6214 = vrot.lane.b32.xlu1 %v21005_v58, %s13467_s13  ;;  %v6589_v39 = vsel %vm2588_vm10, %v6501_v36, %v16606_v31  ;;  %v6588_v12 = vsel %vm2588_vm10, %v6499_v11, %v6501_v36 }
 0x48d   : > { %8259 = vmatprep.subr.bf16.mxu1 %v6589_v39  ;;  %v6549_v24 = vpop.permute.xlu0 %6548 }
 0x48e   : > { %8260 = vmatpush1.bf16.msra.mxu1 %v6588_v12 }
 0x48f   : > { %v6547_v45 = vpop.permute.xlu1 %6546 }
 0x490   : > { %6216 = vrot.lane.b32.xlu0 %v21010_v1, %s13467_s13  ;;  %6504 = vrot.lane.b32.xlu1 %v20996_v44, %s13468_s14  ;;  %v6611_v32 = vsel %vm2588_vm10, %v6547_v45, %v6549_v24  ;;  %v6610_v0 = vsel %vm2588_vm10, %v16308_v61, %v6547_v45  ;;  %v16634_v61 = vld [vmem:[%s20692_s4] ss:$12 sps:$4 sm:$0xff]   ;;  %v16716_v45 = vld [vmem:[%s20692_s4 + $0x8] ss:$12 sps:$4 sm:$0xff]  }
 0x491   : > { %8135 = vmatprep.subr.bf16.mxu0 %v6611_v32  ;;  %v16622_v16 = vpop.permute.xlu0 %6552 }
 0x492   : > { %8136 = vmatpush1.bf16.msra.mxu0 %v6610_v0 }
 0x493   : > { %v6551_v52 = vpop.permute.xlu1 %6550 }
 0x494   : > { %6506 = vrot.lane.b32.xlu0 %v20997_v40, %s13468_s14  ;;  %6508 = vrot.lane.b32.xlu1 %v21001_v3, %s13468_s14  ;;  %v6613_v28 = vsel %vm2588_vm10, %v6551_v52, %v16622_v16  ;;  %v6612_v2 = vsel %vm2588_vm10, %v6549_v24, %v6551_v52 }
 0x495   : > { %8138 = vmatmul.mubr.bf16.vlgmr.msra.gmra.mrb[96].mxu0 %v16634_v61  ;;  %8261 = vmatprep.subr.bf16.mxu1 %v6613_v28  ;;  %v6843_v48 = vpop.permute.xlu0 %6842 }
 0x496   : > { %8262 = vmatpush1.bf16.msra.mxu1 %v6612_v2  ;;  %8147 = vmatprep.mubr.bf16.mxu0 %v16640_v33 }
 0x497   : > { %v6841_v51 = vpop.permute.xlu1 %6840 }
 0x498   : > { %6510 = vrot.lane.b32.xlu0 %v21009_v18, %s13468_s14  ;;  %6554 = vrot.lane.b32.xlu1 %v21003_v38, %s13468_s14  ;;  %v6931_v7 = vsel %vm2761_vm11, %v6841_v51, %v6843_v48  ;;  %v6930_v30 = vsel %vm2761_vm11, %v16258_v62, %v6841_v51 }
 0x499   : > { %8168 = vmatprep.subr.bf16.mxu0 %v6931_v7  ;;  %8264 = vmatmul.mubr.bf16.vlgmr.msra.gmra.mrb[96].mxu1 %v16634_v61  ;;  %v16651_v63 = vpop.permute.xlu0 %6846  ;;  %v21011_v7 = vld [vmem:[#allocation47_spill] sm:$0xff] }
 0x49a   : > { %8169 = vmatpush1.bf16.msra.mxu0 %v6930_v30  ;;  %8273 = vmatprep.mubr.bf16.mxu1 %v16640_v33  ;;  %v21012_v30 = vld [vmem:[#allocation38_spill] sm:$0xff] }
 0x49b   : > { %v6845_v42 = vpop.permute.xlu1 %6844 }
 0x49c   : > { %6556 = vrot.lane.b32.xlu0 %v21004_v57, %s13468_s14  ;;  %6558 = vrot.lane.b32.xlu1 %v21005_v58, %s13468_s14  ;;  %v6933_v46 = vsel %vm2761_vm11, %v6845_v42, %v16651_v63  ;;  %v6932_v62 = vsel %vm2761_vm11, %v6843_v48, %v6845_v42 }
 0x49d   : > { %8148 = vmatmul.mubr.bf16.gmra.mrb[100].mxu0 %v16664_v35  ;;  %8294 = vmatprep.subr.bf16.mxu1 %v6933_v46  ;;  %v6893_v4 = vpop.permute.xlu0 %6892 }
 0x49e   : > { %8295 = vmatpush1.bf16.msra.mxu1 %v6932_v62  ;;  %8157 = vmatprep.mubr.bf16.mxu0 %v16670_v14  ;;  %v16748_v62 = vld [vmem:[%s20692_s4 + $0x20] ss:$12 sps:$4 sm:$0xff]  }
 0x49f   : > { %v6891_v13 = vpop.permute.xlu1 %6890 }
 0x4a0   : > { %6560 = vrot.lane.b32.xlu0 %v21010_v1, %s13468_s14  ;;  %6848 = vrot.lane.b32.xlu1 %v20996_v44, %s13469_s15  ;;  %v6955_v49 = vsel %vm2761_vm11, %v6891_v13, %v6893_v4  ;;  %v6954_v20 = vsel %vm2761_vm11, %v16322_v29, %v6891_v13 }
 0x4a1   : > { %8170 = vmatprep.subr.bf16.mxu0 %v6955_v49  ;;  %8274 = vmatmul.mubr.bf16.gmra.mrb[100].mxu1 %v16664_v35  ;;  %v16681_v21 = vpop.permute.xlu0 %6896 }
 0x4a2   : > { %8171 = vmatpush1.bf16.msra.mxu0 %v6954_v20  ;;  %8283 = vmatprep.mubr.bf16.mxu1 %v16670_v14 }
 0x4a3   : > { %v6895_v41 = vpop.permute.xlu1 %6894  ;;  %v16743_v46 = vpop.f32.mrb[72].mxu0 }
 0x4a4   : > { %6850 = vrot.lane.b32.xlu0 %v20997_v40, %s13469_s15  ;;  %6852 = vrot.lane.b32.xlu1 %v21001_v3, %s13469_s15  ;;  %v6957_v11 = vsel %vm2761_vm11, %v6895_v41, %v16681_v21  ;;  %v6956_v29 = vsel %vm2761_vm11, %v6893_v4, %v6895_v41  ;;  %v16753_v13 = vpop.f32.mrb[73].mxu0  ;;  %v21013_v41 = vld [vmem:[#allocation39_spill] sm:$0xff] }
 0x4a5   : > { %8158 = vmatmul.mubr.bf16.gmra.mrb[104].mxu0 %v16694_v37  ;;  %8296 = vmatprep.subr.bf16.mxu1 %v6957_v11  ;;  %v4347_v17 = vpop.permute.xlu0 %4346  ;;  %v16755_v20 = vpop.f32.mrb[74].mxu0 }
 0x4a6   : > { %8297 = vmatpush1.bf16.msra.mxu1 %v6956_v29  ;;  %8200 = vmatprep.mubr.bf16.mxu0 %v20953_v43 }
 0x4a7   : > { %v4345_v10 = vpop.permute.xlu1 %4344 }
 0x4a8   : > { %6854 = vrot.lane.b32.xlu0 %v21009_v18, %s13469_s15  ;;  %6898 = vrot.lane.b32.xlu1 %v21003_v38, %s13469_s15  ;;  %v4431_v36 = vsel %vm1502_vm4, %v4345_v10, %v4347_v17  ;;  %v4430_v32 = vsel %vm1502_vm4, %v16352_v56, %v4345_v10 }
 0x4a9   : > { %8284 = vmatmul.mubr.bf16.gmra.mrb[104].mxu1 %v16694_v37  ;;  %8357 = vmatprep.subr.bf16.mxu0 %v4431_v36  ;;  %v16704_v39 = vpop.permute.xlu0 %4350 }
 0x4aa   : > { %8326 = vmatprep.mubr.bf16.mxu1 %v20953_v43 }
 0x4ab   : > { %v4349_v12 = vpop.permute.xlu1 %4348 }
 0x4ac   : > { %6900 = vrot.lane.b32.xlu0 %v21004_v57, %s13469_s15  ;;  %6902 = vrot.lane.b32.xlu1 %v21005_v58, %s13469_s15  ;;  %v4433_v24 = vsel %vm1502_vm4, %v4349_v12, %v16704_v39  ;;  %v4432_v56 = vsel %vm1502_vm4, %v4347_v17, %v4349_v12  ;;  %v16764_v17 = vpop.f32.mrb[75].mxu0  ;;  %v21014_v12 = vld [vmem:[#allocation41_spill] sm:$0xff] }
 0x4ad   : > { %11878 = vmatmul.mubr.msk.bf16.vlgmr.msra.gmra.mrb[96].mxu0 %vm7591_vm0, %v16716_v45  ;;  %8483 = vmatprep.subr.bf16.mxu1 %v4433_v24  ;;  %v4397_v0 = vpop.permute.xlu0 %4396  ;;  %v21015_v24 = vld [vmem:[#allocation7_spill] sm:$0xff] }
 0x4ae   : > { %8358 = vmatpush1.bf16.msra.mxu0 %v4430_v32  ;;  %8210 = vmatprep.mubr.bf16.mxu0 %v20953_v43 }
 0x4af   : > { %v4395_v52 = vpop.permute.xlu1 %4394 }
 0x4b0   : > { %6904 = vrot.lane.b32.xlu0 %v21010_v1, %s13469_s15  ;;  %4352 = vrot.lane.b32.xlu1 %v21009_v18, %s13463_s22  ;;  %v4455_v28 = vsel %vm1502_vm4, %v4395_v52, %v4397_v0  ;;  %v4454_v2 = vsel %vm1502_vm4, %v16381_v60, %v4395_v52  ;;  %v16783_v52 = vld [vmem:[%s20692_s4 + $0x38] ss:$12 sps:$4 sm:$0xff]  }
 0x4b1   : > { %11881 = vmatmul.mubr.msk.bf16.vlgmr.msra.gmra.mrb[96].mxu1 %vm7591_vm0, %v16716_v45  ;;  %8359 = vmatprep.subr.bf16.mxu0 %v4455_v28  ;;  %v16733_v48 = vpop.permute.xlu0 %4400 }
 0x4b2   : > { %8484 = vmatpush1.bf16.msra.mxu1 %v4432_v56  ;;  %8360 = vmatpush1.bf16.msra.mxu0 %v4454_v2  ;;  %v16792_v56 = vld [vmem:[%s20692_s4 + $0x4] ss:$12 sps:$4 sm:$0xff]  }
 0x4b3   : > { %v4399_v51 = vpop.permute.xlu1 %4398  ;;  %8336 = vmatprep.mubr.bf16.mxu1 %v20953_v43 }
 0x4b4   : > { %4354 = vrot.lane.b32.xlu0 %v21011_v7, %s13463_s22  ;;  %4356 = vrot.lane.b32.xlu1 %v21012_v30, %s13463_s22  ;;  %v4457_v60 = vsel %vm1502_vm4, %v4399_v51, %v16733_v48  ;;  %v4456_v42 = vsel %vm1502_vm4, %v4397_v0, %v4399_v51  ;;  %v16778_v0 = vpop.f32.mrb[76].mxu0 }
 0x4b5   : > { %8485 = vmatprep.subr.bf16.mxu1 %v4457_v60  ;;  %11879 = vmatmul.mubr.msk.bf16.gmra.mrb[100].mxu0 %vm7591_vm0, %v16748_v62  ;;  %v4691_v4 = vpop.permute.xlu0 %4690  ;;  %21016 = vst [vmem:[#allocation43_spill] sm:$0xff] %v16778_v0 }
 0x4b6   : > { %8486 = vmatpush1.bf16.msra.mxu1 %v4456_v42  ;;  %8220 = vmatprep.mubr.bf16.mxu0 %v20953_v43 }
 0x4b7   : > { %v4689_v49 = vpop.permute.xlu1 %4688 }
 0x4b8   : > { %4358 = vrot.lane.b32.xlu0 %v21013_v41, %s13463_s22  ;;  %4402 = vrot.lane.b32.xlu1 %v21010_v1, %s13463_s22  ;;  %v4775_v11 = vsel %vm1675_vm5, %v4689_v49, %v4691_v4  ;;  %v4774_v29 = vsel %vm1675_vm5, %v16409_v47, %v4689_v49 }
 0x4b9   : > { %8361 = vmatprep.subr.bf16.mxu0 %v4775_v11  ;;  %11882 = vmatmul.mubr.msk.bf16.gmra.mrb[100].mxu1 %vm7591_vm0, %v16748_v62  ;;  %v16768_v10 = vpop.permute.xlu0 %4694 }
 0x4ba   : > { %8362 = vmatpush1.bf16.msra.mxu0 %v4774_v29  ;;  %8346 = vmatprep.mubr.bf16.mxu1 %v20953_v43 }
 0x4bb   : > { %v4693_v36 = vpop.permute.xlu1 %4692 }
 0x4bc   : > { %4404 = vrot.lane.b32.xlu0 %v21014_v12, %s13463_s22  ;;  %4406 = vrot.lane.b32.xlu1 %v21015_v24, %s13463_s22  ;;  %v4777_v47 = vsel %vm1675_vm5, %v4693_v36, %v16768_v10  ;;  %v4776_v32 = vsel %vm1675_vm5, %v4691_v4, %v4693_v36  ;;  %v21018_v4 = vld [vmem:[#allocation19_spill] sm:$0xff]  ;;  %v16808_v36 = vpop.f32.mrb[77].mxu0 }
 0x4bd   : > { %8487 = vmatprep.subr.bf16.mxu1 %v4777_v47  ;;  %11880 = vmatmul.mubr.msk.bf16.gmra.mrb[104].mxu0 %vm7591_vm0, %v16783_v52  ;;  %v16787_v28 = vpop.f32.mrb[72].mxu1  ;;  %v4741_v2 = vpop.permute.xlu0 %4740  ;;  %21020 = vst [vmem:[#allocation23_spill] sm:$0xff] %v16808_v36 }
 0x4be   : > { %8488 = vmatpush1.bf16.msra.mxu1 %v4776_v32  ;;  %8389 = vmatprep.mubr.bf16.mxu0 %v16792_v56  ;;  %v16795_v51 = vpop.f32.mrb[73].mxu1  ;;  %v16812_v47 = vpop.f32.mrb[78].mxu0 }
 0x4bf   : > { %v4739_v60 = vpop.permute.xlu1 %4738  ;;  %v16797_v42 = vpop.f32.mrb[74].mxu1  ;;  %21021 = vst [vmem:[#allocation10_spill] sm:$0xff] %v16812_v47 }
 0x4c0   : > { %21017 = vst [vmem:[#allocation44_spill] sm:$0xff] %v16797_v42  ;;  %4408 = vrot.lane.b32.xlu0 %v21018_v4, %s13463_s22  ;;  %4696 = vrot.lane.b32.xlu1 %v21009_v18, %s13462_s21  ;;  %v4799_v49 = vsel %vm1675_vm5, %v4739_v60, %v4741_v2  ;;  %v4798_v11 = vsel %vm1675_vm5, %v16428_v19, %v4739_v60  ;;  %v16806_v29 = vpop.f32.mrb[75].mxu1  ;;  %v16817_v42 = vpop.f32.mrb[79].mxu0 }
 0x4c1   : > { %21019 = vst [vmem:[#allocation25_spill] sm:$0xff] %v16806_v29  ;;  %8363 = vmatprep.subr.bf16.mxu0 %v4799_v49  ;;  %11883 = vmatmul.mubr.msk.bf16.gmra.mrb[104].mxu1 %vm7591_vm0, %v16783_v52  ;;  %v16814_v32 = vpop.permute.xlu0 %4744  ;;  %21022 = vst [vmem:[#allocation9_spill] sm:$0xff] %v16817_v42  ;;  %v16826_v49 = vpop.f32.mrb[80].mxu0 }
 0x4c2   : > { %8364 = vmatpush1.bf16.msra.mxu0 %v4798_v11  ;;  %8515 = vmatprep.mubr.bf16.mxu1 %v16792_v56  ;;  %21023 = vst [vmem:[#allocation11_spill] sm:$0xff] %v16826_v49  ;;  %v16828_v47 = vpop.f32.mrb[81].mxu0 }
 0x4c3   : > { %v4743_v0 = vpop.permute.xlu1 %4742  ;;  %21024 = vst [vmem:[#allocation59_spill] sm:$0xff] %v16828_v47  ;;  %v16830_v29 = vpop.f32.mrb[82].mxu0 }
 0x4c4   : > { %4698 = vrot.lane.b32.xlu0 %v21011_v7, %s13462_s21  ;;  %4700 = vrot.lane.b32.xlu1 %v21012_v30, %s13462_s21  ;;  %v4801_v19 = vsel %vm1675_vm5, %v4743_v0, %v16814_v32  ;;  %v4800_v60 = vsel %vm1675_vm5, %v4741_v2, %v4743_v0  ;;  %21025 = vst [vmem:[#allocation51_spill] sm:$0xff] %v16830_v29  ;;  %v16839_v2 = vpop.f32.mrb[83].mxu0 }
 0x4c5   : > { %8489 = vmatprep.subr.bf16.mxu1 %v4801_v19  ;;  %v5035_v11 = vpop.permute.xlu0 %5034  ;;  %21026 = vst [vmem:[#allocation58_spill] sm:$0xff] %v16839_v2 }
 0x4c6   : > { %8490 = vmatpush1.bf16.msra.mxu1 %v4800_v60 }
 0x4c7   : > { %v5033_v42 = vpop.permute.xlu1 %5032 }
 0x4c8   : > { %4702 = vrot.lane.b32.xlu0 %v21013_v41, %s13462_s21  ;;  %4746 = vrot.lane.b32.xlu1 %v21010_v1, %s13462_s21  ;;  %v5119_v36 = vsel %vm1848_vm6, %v5033_v42, %v5035_v11  ;;  %v5118_v0 = vsel %vm1848_vm6, %v16452_v25, %v5033_v42  ;;  %v16841_v19 = vpop.f32.mrb[76].mxu1 }
 0x4c9   : > { %8365 = vmatprep.subr.bf16.mxu0 %v5119_v36  ;;  %21027 = vst [vmem:[#allocation5_spill] sm:$0xff] %v16841_v19  ;;  %v16843_v60 = vpop.permute.xlu0 %5038  ;;  %v16845_v29 = vpop.f32.mrb[77].mxu1 }
 0x4ca   : > { %8366 = vmatpush1.bf16.msra.mxu0 %v5118_v0  ;;  %21028 = vst [vmem:[#allocation14_spill] sm:$0xff] %v16845_v29  ;;  %v16847_v47 = vpop.f32.mrb[78].mxu1 }
 0x4cb   : > { %v5037_v49 = vpop.permute.xlu1 %5036  ;;  %21029 = vst [vmem:[#allocation29_spill] sm:$0xff] %v16847_v47  ;;  %v16856_v36 = vpop.f32.mrb[79].mxu1 }
 0x4cc   : > { %4748 = vrot.lane.b32.xlu0 %v21014_v12, %s13462_s21  ;;  %4750 = vrot.lane.b32.xlu1 %v21015_v24, %s13462_s21  ;;  %v5121_v25 = vsel %vm1848_vm6, %v5037_v49, %v16843_v60  ;;  %v5120_v42 = vsel %vm1848_vm6, %v5035_v11, %v5037_v49  ;;  %21030 = vst [vmem:[#allocation54_spill] sm:$0xff] %v16856_v36 }
 0x4cd   : > { %8491 = vmatprep.subr.bf16.mxu1 %v5121_v25  ;;  %v5085_v0 = vpop.permute.xlu0 %5084 }
 0x4ce   : > { %8492 = vmatpush1.bf16.msra.mxu1 %v5120_v42 }
 0x4cf   : > { %v5083_v2 = vpop.permute.xlu1 %5082 }
 0x4d0   : > { %4752 = vrot.lane.b32.xlu0 %v21018_v4, %s13462_s21  ;;  %5040 = vrot.lane.b32.xlu1 %v21009_v18, %s13465_s24  ;;  %v5143_v47 = vsel %vm1848_vm6, %v5083_v2, %v5085_v0  ;;  %v5142_v19 = vsel %vm1848_vm6, %v16476_v27, %v5083_v2  ;;  %v16874_v42 = vpop.f32.mrb[80].mxu1 }
 0x4d1   : > { %8367 = vmatprep.subr.bf16.mxu0 %v5143_v47  ;;  %v16865_v29 = vpop.permute.xlu0 %5088  ;;  %21031 = vst [vmem:[#allocation28_spill] sm:$0xff] %v16874_v42  ;;  %v16876_v27 = vpop.f32.mrb[81].mxu1 }
 0x4d2   : > { %8368 = vmatpush1.bf16.msra.mxu0 %v5142_v19  ;;  %v16878_v2 = vpop.f32.mrb[82].mxu1 }
 0x4d3   : > { %v5087_v49 = vpop.permute.xlu1 %5086  ;;  %21032 = vst [vmem:[#allocation60_spill] sm:$0xff] %v16878_v2  ;;  %v16880_v36 = vpop.f32.mrb[83].mxu1 }
 0x4d4   : > { %5042 = vrot.lane.b32.xlu0 %v21011_v7, %s13465_s24  ;;  %5044 = vrot.lane.b32.xlu1 %v21012_v30, %s13465_s24  ;;  %v5145_v11 = vsel %vm1848_vm6, %v5087_v49, %v16865_v29  ;;  %v5144_v25 = vsel %vm1848_vm6, %v5085_v0, %v5087_v49  ;;  %21033 = vst [vmem:[#allocation61_spill] sm:$0xff] %v16880_v36 }
 0x4d5   : > { %8493 = vmatprep.subr.bf16.mxu1 %v5145_v11  ;;  %v5379_v47 = vpop.permute.xlu0 %5378 }
 0x4d6   : > { %8494 = vmatpush1.bf16.msra.mxu1 %v5144_v25 }
 0x4d7   : > { %v5377_v19 = vpop.permute.xlu1 %5376 }
 0x4d8   : > { %5046 = vrot.lane.b32.xlu0 %v21013_v41, %s13465_s24  ;;  %5090 = vrot.lane.b32.xlu1 %v21010_v1, %s13465_s24  ;;  %v5463_v0 = vsel %vm2021_vm7, %v5377_v19, %v5379_v47  ;;  %v5462_v49 = vsel %vm2021_vm7, %v16499_v53, %v5377_v19 }
 0x4d9   : > { %8369 = vmatprep.subr.bf16.mxu0 %v5463_v0 }
 0x4da   : > { %v16889_v11 = vpop.permute.xlu0 %5382  ;;  %8370 = vmatpush1.bf16.msra.mxu0 %v5462_v49 }
 0x4db   : > { %v5381_v25 = vpop.permute.xlu1 %5380 }
 0x4dc   : > { %5092 = vrot.lane.b32.xlu0 %v21014_v12, %s13465_s24  ;;  %5094 = vrot.lane.b32.xlu1 %v21015_v24, %s13465_s24  ;;  %v5465_v2 = vsel %vm2021_vm7, %v5381_v25, %v16889_v11  ;;  %v5464_v36 = vsel %vm2021_vm7, %v5379_v47, %v5381_v25 }
 0x4dd   : > { %8495 = vmatprep.subr.bf16.mxu1 %v5465_v2 }
 0x4de   : > { %v5429_v42 = vpop.permute.xlu0 %5428  ;;  %8496 = vmatpush1.bf16.msra.mxu1 %v5464_v36 }
 0x4df   : > { %v5427_v53 = vpop.permute.xlu1 %5426 }
 0x4e0   : > { %5096 = vrot.lane.b32.xlu0 %v21018_v4, %s13465_s24  ;;  %5384 = vrot.lane.b32.xlu1 %v21009_v18, %s13464_s23  ;;  %v5487_v19 = vsel %vm2021_vm7, %v5427_v53, %v5429_v42  ;;  %v5486_v0 = vsel %vm2021_vm7, %v16518_v59, %v5427_v53 }
 0x4e1   : > { %8371 = vmatprep.subr.bf16.mxu0 %v5487_v19 }
 0x4e2   : > { %v16905_v49 = vpop.permute.xlu0 %5432  ;;  %8372 = vmatpush1.bf16.msra.mxu0 %v5486_v0 }
 0x4e3   : > { %v5431_v47 = vpop.permute.xlu1 %5430  ;;  %8373 = vmatprep.subr.bf16.mxu0 %v20996_v44 }
 0x4e4   : > { %5386 = vrot.lane.b32.xlu0 %v21011_v7, %s13464_s23  ;;  %5388 = vrot.lane.b32.xlu1 %v21012_v30, %s13464_s23  ;;  %v5489_v36 = vsel %vm2021_vm7, %v5431_v47, %v16905_v49  ;;  %v5488_v2 = vsel %vm2021_vm7, %v5429_v42, %v5431_v47 }
 0x4e5   : > { %8497 = vmatprep.subr.bf16.mxu1 %v5489_v36 }
 0x4e6   : > { %v5819_v59 = vpop.permute.xlu0 %5818  ;;  %8374 = vmatpush1.bf16.msra.mxu0 %v20970_v8  ;;  %8498 = vmatpush1.bf16.msra.mxu1 %v5488_v2  ;;  %v21034_v2 = vld [vmem:[#allocation48_spill] sm:$0xff] }
 0x4e7   : > { %8499 = vmatprep.subr.bf16.mxu1 %v21001_v3  ;;  %v5817_v25 = vpop.permute.xlu1 %5816  ;;  %8375 = vmatprep.subr.bf16.mxu0 %v21003_v38 }
 0x4e8   : > { %5390 = vrot.lane.b32.xlu0 %v21013_v41, %s13464_s23  ;;  %5434 = vrot.lane.b32.xlu1 %v21010_v1, %s13464_s23  ;;  %v5903_v8 = vsel %vm2242_vm8, %v5817_v25, %v5819_v59  ;;  %v5902_v38 = vsel %vm2242_vm8, %v16535_v5, %v5817_v25 }
 0x4ea   : > { %v16922_v44 = vpop.permute.xlu0 %5822  ;;  %8376 = vmatpush1.bf16.msra.mxu0 %v20975_v34  ;;  %8500 = vmatpush1.bf16.msra.mxu1 %v20997_v40 }
 0x4eb   : > { %8501 = vmatprep.subr.bf16.mxu1 %v21005_v58  ;;  %v5821_v3 = vpop.permute.xlu1 %5820  ;;  %8377 = vmatprep.subr.bf16.mxu0 %v5903_v8 }
 0x4ec   : > { %5436 = vrot.lane.b32.xlu0 %v21014_v12, %s13464_s23  ;;  %5438 = vrot.lane.b32.xlu1 %v21015_v24, %s13464_s23  ;;  %v5905_v34 = vsel %vm2242_vm8, %v5821_v3, %v16922_v44  ;;  %v5904_v53 = vsel %vm2242_vm8, %v5819_v59, %v5821_v3 }
 0x4ee   : > { %v5869_v42 = vpop.permute.xlu0 %5868  ;;  %8378 = vmatpush1.bf16.msra.mxu0 %v5902_v38  ;;  %8502 = vmatpush1.bf16.msra.mxu1 %v21004_v57 }
 0x4ef   : > { %8503 = vmatprep.subr.bf16.mxu1 %v5905_v34  ;;  %v5867_v40 = vpop.permute.xlu1 %5866 }
 0x4f0   : > { %5440 = vrot.lane.b32.xlu0 %v21018_v4, %s13464_s23  ;;  %5824 = vrot.lane.b32.xlu1 %v21011_v7, %s13466_s12  ;;  %v5927_v58 = vsel %vm2242_vm8, %v5867_v40, %v5869_v42  ;;  %v5926_v5 = vsel %vm2242_vm8, %v16558_v6, %v5867_v40 }
 0x4f1   : > { %8379 = vmatprep.subr.bf16.mxu0 %v5927_v58 }
 0x4f2   : > { %v16945_v57 = vpop.permute.xlu0 %5872  ;;  %8380 = vmatpush1.bf16.msra.mxu0 %v5926_v5  ;;  %8504 = vmatpush1.bf16.msra.mxu1 %v5904_v53 }
 0x4f3   : > { %v5871_v19 = vpop.permute.xlu1 %5870 }
 0x4f4   : > { %5826 = vrot.lane.b32.xlu0 %v21012_v30, %s13466_s12  ;;  %5828 = vrot.lane.b32.xlu1 %v21013_v41, %s13466_s12  ;;  %v5929_v0 = vsel %vm2242_vm8, %v5871_v19, %v16945_v57  ;;  %v5928_v47 = vsel %vm2242_vm8, %v5869_v42, %v5871_v19 }
 0x4f5   : > { %8505 = vmatprep.subr.bf16.mxu1 %v5929_v0 }
 0x4f6   : > { %v6163_v6 = vpop.permute.xlu0 %6162  ;;  %8506 = vmatpush1.bf16.msra.mxu1 %v5928_v47 }
 0x4f7   : > { %v6161_v36 = vpop.permute.xlu1 %6160 }
 0x4f8   : > { %5830 = vrot.lane.b32.xlu0 %v21034_v2, %s13466_s12  ;;  %5874 = vrot.lane.b32.xlu1 %v21014_v12, %s13466_s12  ;;  %v6247_v59 = vsel %vm2415_vm9, %v6161_v36, %v6163_v6  ;;  %v6246_v25 = vsel %vm2415_vm9, %v16574_v55, %v6161_v36 }
 0x4f9   : > { %8381 = vmatprep.subr.bf16.mxu0 %v6247_v59 }
 0x4fa   : > { %v16961_v8 = vpop.permute.xlu0 %6166  ;;  %8382 = vmatpush1.bf16.msra.mxu0 %v6246_v25 }
 0x4fb   : > { %v6165_v3 = vpop.permute.xlu1 %6164 }
 0x4fc   : > { %5876 = vrot.lane.b32.xlu0 %v21015_v24, %s13466_s12  ;;  %5878 = vrot.lane.b32.xlu1 %v21018_v4, %s13466_s12  ;;  %v6249_v38 = vsel %vm2415_vm9, %v6165_v3, %v16961_v8  ;;  %v6248_v42 = vsel %vm2415_vm9, %v6163_v6, %v6165_v3 }
 0x4fd   : > { %8507 = vmatprep.subr.bf16.mxu1 %v6249_v38 }
 0x4fe   : > { %v6213_v34 = vpop.permute.xlu0 %6212  ;;  %8508 = vmatpush1.bf16.msra.mxu1 %v6248_v42 }
 0x4ff   : > { %v6211_v55 = vpop.permute.xlu1 %6210 }
 0x500   : > { %5880 = vrot.lane.b32.xlu0 %v16131_v9, %s13466_s12  ;;  %6168 = vrot.lane.b32.xlu1 %v21011_v7, %s13467_s13  ;;  %v6271_v40 = vsel %vm2415_vm9, %v6211_v55, %v6213_v34  ;;  %v6270_v58 = vsel %vm2415_vm9, %v16590_v50, %v6211_v55 }
 0x501   : > { %8383 = vmatprep.subr.bf16.mxu0 %v6271_v40 }
 0x502   : > { %v16977_v5 = vpop.permute.xlu0 %6216  ;;  %8384 = vmatpush1.bf16.msra.mxu0 %v6270_v58 }
 0x503   : > { %v6215_v53 = vpop.permute.xlu1 %6214 }
 0x504   : > { %6170 = vrot.lane.b32.xlu0 %v21012_v30, %s13467_s13  ;;  %6172 = vrot.lane.b32.xlu1 %v21013_v41, %s13467_s13  ;;  %v6273_v19 = vsel %vm2415_vm9, %v6215_v53, %v16977_v5  ;;  %v6272_v0 = vsel %vm2415_vm9, %v6213_v34, %v6215_v53 }
 0x505   : > { %8509 = vmatprep.subr.bf16.mxu1 %v6273_v19 }
 0x506   : > { %v6507_v47 = vpop.permute.xlu0 %6506  ;;  %8510 = vmatpush1.bf16.msra.mxu1 %v6272_v0 }
 0x507   : > { %v6505_v50 = vpop.permute.xlu1 %6504  ;;  %v17002_v42 = vpop.f32.mrb[84].mxu0 }
 0x508   : > { %6174 = vrot.lane.b32.xlu0 %v21034_v2, %s13467_s13  ;;  %6218 = vrot.lane.b32.xlu1 %v21014_v12, %s13467_s13  ;;  %v6591_v6 = vsel %vm2588_vm10, %v6505_v50, %v6507_v47  ;;  %v6590_v36 = vsel %vm2588_vm10, %v16606_v31, %v6505_v50  ;;  %21035 = vst [vmem:[#allocation62_spill] sm:$0xff] %v17002_v42  ;;  %v17004_v31 = vpop.f32.mrb[85].mxu0 }
 0x509   : > { %8385 = vmatprep.subr.bf16.mxu0 %v6591_v6  ;;  %v17006_v55 = vpop.f32.mrb[86].mxu0 }
 0x50a   : > { %v16993_v59 = vpop.permute.xlu0 %6510  ;;  %8386 = vmatpush1.bf16.msra.mxu0 %v6590_v36  ;;  %21036 = vst [vmem:[#allocation6_spill] sm:$0xff] %v17006_v55  ;;  %v17008_v58 = vpop.f32.mrb[87].mxu0  ;;  %v18210_v55 = vld [vmem:[%s20695_s7 + $0x338] sm:$0xff] }
 0x50b   : > { %v6509_v25 = vpop.permute.xlu1 %6508  ;;  %21037 = vst [vmem:[#allocation4_spill] sm:$0xff] %v17008_v58 }
 0x50c   : > { %6220 = vrot.lane.b32.xlu0 %v21015_v24, %s13467_s13  ;;  %6222 = vrot.lane.b32.xlu1 %v21018_v4, %s13467_s13  ;;  %v6593_v3 = vsel %vm2588_vm10, %v6509_v25, %v16993_v59  ;;  %v6592_v38 = vsel %vm2588_vm10, %v6507_v47, %v6509_v25 }
 0x50d   : > { %8511 = vmatprep.subr.bf16.mxu1 %v6593_v3 }
 0x50e   : > { %v6557_v34 = vpop.permute.xlu0 %6556  ;;  %8512 = vmatpush1.bf16.msra.mxu1 %v6592_v38 }
 0x50f   : > { %v6555_v40 = vpop.permute.xlu1 %6554  ;;  %v17026_v36 = vpop.f32.mrb[88].mxu0 }
 0x510   : > { %6224 = vrot.lane.b32.xlu0 %v16131_v9, %s13467_s13  ;;  %6512 = vrot.lane.b32.xlu1 %v21011_v7, %s13468_s14  ;;  %v6615_v53 = vsel %vm2588_vm10, %v6555_v40, %v6557_v34  ;;  %v6614_v19 = vsel %vm2588_vm10, %v16622_v16, %v6555_v40  ;;  %21038 = vst [vmem:[#allocation31_spill] sm:$0xff] %v17026_v36  ;;  %v17029_v16 = vpop.f32.mrb[89].mxu0 }
 0x511   : > { %8387 = vmatprep.subr.bf16.mxu0 %v6615_v53  ;;  %21039 = vst [vmem:[#allocation22_spill] sm:$0xff] %v17029_v16  ;;  %v17032_v3 = vpop.f32.mrb[90].mxu0  ;;  %v18194_v16 = vld [vmem:[%s20695_s7 + $0x248] sm:$0xff] }
 0x512   : > { %v17017_v0 = vpop.permute.xlu0 %6560  ;;  %8388 = vmatpush1.bf16.msra.mxu0 %v6614_v19  ;;  %21040 = vst [vmem:[#allocation30_spill] sm:$0xff] %v17032_v3  ;;  %v17034_v40 = vpop.f32.mrb[91].mxu0 }
 0x513   : > { %v6559_v47 = vpop.permute.xlu1 %6558  ;;  %21041 = vst [vmem:[#allocation42_spill] sm:$0xff] %v17034_v40 }
 0x514   : > { %6514 = vrot.lane.b32.xlu0 %v21012_v30, %s13468_s14  ;;  %6516 = vrot.lane.b32.xlu1 %v21013_v41, %s13468_s14  ;;  %v6617_v50 = vsel %vm2588_vm10, %v6559_v47, %v17017_v0  ;;  %v6616_v6 = vsel %vm2588_vm10, %v6557_v34, %v6559_v47 }
 0x515   : > { %8390 = vmatmul.mubr.bf16.vlgmr.msra.gmra.mrb[108].mxu0 %v16634_v61  ;;  %8513 = vmatprep.subr.bf16.mxu1 %v6617_v50 }
 0x516   : > { %v6851_v25 = vpop.permute.xlu0 %6850  ;;  %8514 = vmatpush1.bf16.msra.mxu1 %v6616_v6  ;;  %8399 = vmatprep.mubr.bf16.mxu0 %v16640_v33 }
 0x517   : > { %v6849_v38 = vpop.permute.xlu1 %6848 }
 0x518   : > { %6518 = vrot.lane.b32.xlu0 %v21034_v2, %s13468_s14  ;;  %6562 = vrot.lane.b32.xlu1 %v21014_v12, %s13468_s14  ;;  %v6935_v34 = vsel %vm2761_vm11, %v6849_v38, %v6851_v25  ;;  %v6934_v53 = vsel %vm2761_vm11, %v16651_v63, %v6849_v38  ;;  %v17043_v19 = vpop.f32.mrb[84].mxu1  ;;  %v17062_v38 = vpop.f32.mrb[92].mxu0 }
 0x519   : > { %21042 = vst [vmem:[#allocation27_spill] sm:$0xff] %v17043_v19  ;;  %8420 = vmatprep.subr.bf16.mxu0 %v6935_v34  ;;  %8516 = vmatmul.mubr.bf16.vlgmr.msra.gmra.mrb[108].mxu1 %v16634_v61  ;;  %v17046_v47 = vpop.f32.mrb[85].mxu1  ;;  %21046 = vst [vmem:[#allocation49_spill] sm:$0xff] %v17062_v38  ;;  %v18205_v19 = vld [vmem:[%s20695_s7 + $0x330] sm:$0xff] }
 0x51a   : > { %21043 = vst [vmem:[#allocation17_spill] sm:$0xff] %v17046_v47  ;;  %v17048_v50 = vpop.permute.xlu0 %6854  ;;  %8421 = vmatpush1.bf16.msra.mxu0 %v6934_v53  ;;  %8525 = vmatprep.mubr.bf16.mxu1 %v16640_v33  ;;  %v17051_v6 = vpop.f32.mrb[86].mxu1 }
 0x51b   : > { %21044 = vst [vmem:[#allocation34_spill] sm:$0xff] %v17051_v6  ;;  %v6853_v3 = vpop.permute.xlu1 %6852  ;;  %v17053_v40 = vpop.f32.mrb[87].mxu1 }
 0x51c   : > { %21045 = vst [vmem:[#allocation26_spill] sm:$0xff] %v17053_v40  ;;  %6564 = vrot.lane.b32.xlu0 %v21015_v24, %s13468_s14  ;;  %6566 = vrot.lane.b32.xlu1 %v21018_v4, %s13468_s14  ;;  %v6937_v61 = vsel %vm2761_vm11, %v6853_v3, %v17048_v50  ;;  %v6936_v63 = vsel %vm2761_vm11, %v6851_v25, %v6853_v3  ;;  %v17065_v33 = vpop.f32.mrb[93].mxu0  ;;  %v18189_v40 = vld [vmem:[%s20695_s7 + $0x240] sm:$0xff] }
 0x51d   : > { %8400 = vmatmul.mubr.bf16.gmra.mrb[112].mxu0 %v16664_v35  ;;  %8546 = vmatprep.subr.bf16.mxu1 %v6937_v61  ;;  %21047 = vst [vmem:[#allocation24_spill] sm:$0xff] %v17065_v33  ;;  %v17068_v53 = vpop.f32.mrb[94].mxu0  ;;  %21110 = vst [vmem:[#allocation97_spill] sm:$0xff] %v18189_v40 }
 0x51e   : > { %v6901_v34 = vpop.permute.xlu0 %6900  ;;  %8547 = vmatpush1.bf16.msra.mxu1 %v6936_v63  ;;  %8409 = vmatprep.mubr.bf16.mxu0 %v16670_v14  ;;  %21048 = vst [vmem:[#allocation18_spill] sm:$0xff] %v17068_v53  ;;  %v17070_v36 = vpop.f32.mrb[95].mxu0 }
 0x51f   : > { %v6899_v6 = vpop.permute.xlu1 %6898  ;;  %21049 = vst [vmem:[#allocation21_spill] sm:$0xff] %v17070_v36 }
 0x520   : > { %6568 = vrot.lane.b32.xlu0 %v16131_v9, %s13468_s14  ;;  %6856 = vrot.lane.b32.xlu1 %v21011_v7, %s13469_s15  ;;  %v6959_v25 = vsel %vm2761_vm11, %v6899_v6, %v6901_v34  ;;  %v6958_v3 = vsel %vm2761_vm11, %v16681_v21, %v6899_v6  ;;  %v17079_v61 = vpop.f32.mrb[88].mxu1 }
 0x521   : > { %21050 = vst [vmem:[#allocation20_spill] sm:$0xff] %v17079_v61  ;;  %8422 = vmatprep.subr.bf16.mxu0 %v6959_v25  ;;  %8526 = vmatmul.mubr.bf16.gmra.mrb[112].mxu1 %v16664_v35  ;;  %v17082_v63 = vpop.f32.mrb[89].mxu1  ;;  %v18166_v61 = vld [vmem:[%s20695_s7 + $0x2c8] sm:$0xff] }
 0x522   : > { %21051 = vst [vmem:[#allocation16_spill] sm:$0xff] %v17082_v63  ;;  %v17084_v53 = vpop.permute.xlu0 %6904  ;;  %8423 = vmatpush1.bf16.msra.mxu0 %v6958_v3  ;;  %8535 = vmatprep.mubr.bf16.mxu1 %v16670_v14  ;;  %v17087_v36 = vpop.f32.mrb[90].mxu1  ;;  %v18226_v63 = vld [vmem:[%s20695_s7 + $0x2d8] sm:$0xff] }
 0x523   : > { %21052 = vst [vmem:[#allocation52_spill] sm:$0xff] %v17087_v36  ;;  %v6903_v38 = vpop.permute.xlu1 %6902  ;;  %v17089_v33 = vpop.f32.mrb[91].mxu1 }
 0x524   : > { %21053 = vst [vmem:[#allocation8_spill] sm:$0xff] %v17089_v33  ;;  %6858 = vrot.lane.b32.xlu0 %v21012_v30, %s13469_s15  ;;  %6860 = vrot.lane.b32.xlu1 %v21013_v41, %s13469_s15  ;;  %v6961_v35 = vsel %vm2761_vm11, %v6903_v38, %v17084_v53  ;;  %v6960_v21 = vsel %vm2761_vm11, %v6901_v34, %v6903_v38  ;;  %v13471_v33 = vmov 2  }
 0x525   : > { %8410 = vmatmul.mubr.bf16.gmra.mrb[116].mxu0 %v16694_v37  ;;  %8548 = vmatprep.subr.bf16.mxu1 %v6961_v35 }
 0x526   : > { %v4355_v14 = vpop.permute.xlu0 %4354  ;;  %8549 = vmatpush1.bf16.msra.mxu1 %v6960_v21  ;;  %8452 = vmatprep.mubr.bf16.mxu0 %v20953_v43 }
 0x527   : > { %v4353_v6 = vpop.permute.xlu1 %4352  ;;  %13397 = vset.pattern.permute.xlu1 %v13471_v33  ;;  %13398 = vset.pattern.permute.xlu0 %v13471_v33 }
 0x528   : > { %6862 = vrot.lane.b32.xlu0 %v21034_v2, %s13469_s15  ;;  %6906 = vrot.lane.b32.xlu1 %v21014_v12, %s13469_s15  ;;  %v4435_v25 = vsel %vm1502_vm4, %v4353_v6, %v4355_v14  ;;  %v17105_v3 = vpop.f32.mrb[92].mxu1 }
 0x529   : > { %21054 = vst [vmem:[#allocation33_spill] sm:$0xff] %v17105_v3  ;;  %8536 = vmatmul.mubr.bf16.gmra.mrb[116].mxu1 %v16694_v37  ;;  %8609 = vmatprep.subr.bf16.mxu0 %v4435_v25  ;;  %v17108_v38 = vpop.f32.mrb[93].mxu1  ;;  %v4434_v25 = vsel %vm1502_vm4, %v16704_v39, %v4353_v6 }
 0x52a   : > { %21055 = vst [vmem:[#allocation36_spill] sm:$0xff] %v17108_v38  ;;  %v17110_v34 = vpop.permute.xlu0 %4358  ;;  %8578 = vmatprep.mubr.bf16.mxu1 %v20953_v43  ;;  %v17113_v35 = vpop.f32.mrb[94].mxu1  ;;  %v18148_v38 = vld [vmem:[%s20695_s7 + $0x328] sm:$0xff] }
 0x52b   : > { %21056 = vst [vmem:[#allocation35_spill] sm:$0xff] %v17113_v35  ;;  %v4357_v21 = vpop.permute.xlu1 %4356  ;;  %v17115_v36 = vpop.f32.mrb[95].mxu1 }
 0x52c   : > { %21057 = vst [vmem:[#allocation53_spill] sm:$0xff] %v17115_v36  ;;  %6908 = vrot.lane.b32.xlu0 %v21015_v24, %s13469_s15  ;;  %6910 = vrot.lane.b32.xlu1 %v21018_v4, %s13469_s15  ;;  %v4437_v37 = vsel %vm1502_vm4, %v4357_v21, %v17110_v34  ;;  %v4436_v39 = vsel %vm1502_vm4, %v4355_v14, %v4357_v21 }
 0x52d   : > { %11884 = vmatmul.mubr.msk.bf16.vlgmr.msra.gmra.mrb[108].mxu0 %vm7591_vm0, %v16716_v45  ;;  %8735 = vmatprep.subr.bf16.mxu1 %v4437_v37 }
 0x52e   : > { %v4405_v35 = vpop.permute.xlu0 %4404  ;;  %8610 = vmatpush1.bf16.msra.mxu0 %v4434_v25  ;;  %8462 = vmatprep.mubr.bf16.mxu0 %v20953_v43  ;;  %v21058_v25 = vld [vmem:[#allocation50_spill] sm:$0xff] }
 0x52f   : > { %v4403_v33 = vpop.permute.xlu1 %4402 }
 0x530   : > { %6912 = vrot.lane.b32.xlu0 %v16131_v9, %s13469_s15  ;;  %4360 = vrot.lane.b32.xlu1 %v21034_v2, %s13463_s22  ;;  %v4459_v36 = vsel %vm1502_vm4, %v4403_v33, %v4405_v35  ;;  %v4458_v3 = vsel %vm1502_vm4, %v16733_v48, %v4403_v33 }
 0x531   : > { %11887 = vmatmul.mubr.msk.bf16.vlgmr.msra.gmra.mrb[108].mxu1 %vm7591_vm0, %v16716_v45  ;;  %8611 = vmatprep.subr.bf16.mxu0 %v4459_v36 }
 0x532   : > { %v17138_v6 = vpop.permute.xlu0 %4408  ;;  %8736 = vmatpush1.bf16.msra.mxu1 %v4436_v39  ;;  %8612 = vmatpush1.bf16.msra.mxu0 %v4458_v3 }
 0x533   : > { %v4407_v37 = vpop.permute.xlu1 %4406  ;;  %8588 = vmatprep.mubr.bf16.mxu1 %v20953_v43 }
 0x534   : > { %4362 = vrot.lane.b32.xlu0 %v21058_v25, %s13463_s22  ;;  %4364 = vrot.lane.b32.xlu1 %v16104_v26, %s13463_s22  ;;  %v4461_v48 = vsel %vm1502_vm4, %v4407_v37, %v17138_v6  ;;  %v4460_v45 = vsel %vm1502_vm4, %v4405_v35, %v4407_v37 }
 0x535   : > { %8737 = vmatprep.subr.bf16.mxu1 %v4461_v48  ;;  %11885 = vmatmul.mubr.msk.bf16.gmra.mrb[112].mxu0 %vm7591_vm0, %v16748_v62 }
 0x536   : > { %v4699_v36 = vpop.permute.xlu0 %4698  ;;  %8738 = vmatpush1.bf16.msra.mxu1 %v4460_v45  ;;  %8472 = vmatprep.mubr.bf16.mxu0 %v20953_v43 }
 0x537   : > { %v4697_v14 = vpop.permute.xlu1 %4696 }
 0x538   : > { %4366 = vrot.lane.b32.xlu0 %v16111_v54, %s13463_s22  ;;  %4410 = vrot.lane.b32.xlu1 %v16131_v9, %s13463_s22  ;;  %v4779_v3 = vsel %vm1675_vm5, %v4697_v14, %v4699_v36  ;;  %v4778_v35 = vsel %vm1675_vm5, %v16768_v10, %v4697_v14 }
 0x539   : > { %8613 = vmatprep.subr.bf16.mxu0 %v4779_v3  ;;  %11888 = vmatmul.mubr.msk.bf16.gmra.mrb[112].mxu1 %vm7591_vm0, %v16748_v62 }
 0x53a   : > { %v17160_v21 = vpop.permute.xlu0 %4702  ;;  %8614 = vmatpush1.bf16.msra.mxu0 %v4778_v35  ;;  %8598 = vmatprep.mubr.bf16.mxu1 %v20953_v43 }
 0x53b   : > { %v4701_v33 = vpop.permute.xlu1 %4700 }
 0x53c   : > { %4412 = vrot.lane.b32.xlu0 %v16145_v15, %s13463_s22  ;;  %4414 = vrot.lane.b32.xlu1 %v16168_v23, %s13463_s22  ;;  %v4781_v39 = vsel %vm1675_vm5, %v4701_v33, %v17160_v21  ;;  %v4780_v10 = vsel %vm1675_vm5, %v4699_v36, %v4701_v33 }
 0x53d   : > { %8739 = vmatprep.subr.bf16.mxu1 %v4781_v39  ;;  %11886 = vmatmul.mubr.msk.bf16.gmra.mrb[116].mxu0 %vm7591_vm0, %v16783_v52 }
 0x53e   : > { %v4749_v62 = vpop.permute.xlu0 %4748  ;;  %8740 = vmatpush1.bf16.msra.mxu1 %v4780_v10  ;;  %8641 = vmatprep.mubr.bf16.mxu0 %v16792_v56 }
 0x53f   : > { %v4747_v37 = vpop.permute.xlu1 %4746 }
 0x540   : > { %4416 = vrot.lane.b32.xlu0 %v16176_v22, %s13463_s22  ;;  %4704 = vrot.lane.b32.xlu1 %v21034_v2, %s13462_s21  ;;  %v4803_v48 = vsel %vm1675_vm5, %v4747_v37, %v4749_v62  ;;  %v4802_v45 = vsel %vm1675_vm5, %v16814_v32, %v4747_v37 }
 0x541   : > { %8615 = vmatprep.subr.bf16.mxu0 %v4803_v48  ;;  %11889 = vmatmul.mubr.msk.bf16.gmra.mrb[116].mxu1 %vm7591_vm0, %v16783_v52 }
 0x542   : > { %v17182_v36 = vpop.permute.xlu0 %4752  ;;  %8616 = vmatpush1.bf16.msra.mxu0 %v4802_v45  ;;  %8767 = vmatprep.mubr.bf16.mxu1 %v16792_v56 }
 0x543   : > { %v4751_v14 = vpop.permute.xlu1 %4750 }
 0x544   : > { %4706 = vrot.lane.b32.xlu0 %v21058_v25, %s13462_s21  ;;  %4708 = vrot.lane.b32.xlu1 %v16104_v26, %s13462_s21  ;;  %v4805_v3 = vsel %vm1675_vm5, %v4751_v14, %v17182_v36  ;;  %v4804_v32 = vsel %vm1675_vm5, %v4749_v62, %v4751_v14 }
 0x545   : > { %8741 = vmatprep.subr.bf16.mxu1 %v4805_v3 }
 0x546   : > { %v5043_v35 = vpop.permute.xlu0 %5042  ;;  %8742 = vmatpush1.bf16.msra.mxu1 %v4804_v32 }
 0x547   : > { %v5041_v52 = vpop.permute.xlu1 %5040 }
 0x548   : > { %4710 = vrot.lane.b32.xlu0 %v16111_v54, %s13462_s21  ;;  %4754 = vrot.lane.b32.xlu1 %v16131_v9, %s13462_s21  ;;  %v5123_v56 = vsel %vm1848_vm6, %v5041_v52, %v5043_v35  ;;  %v5122_v33 = vsel %vm1848_vm6, %v16843_v60, %v5041_v52 }
 0x549   : > { %8617 = vmatprep.subr.bf16.mxu0 %v5123_v56 }
 0x54a   : > { %v17199_v39 = vpop.permute.xlu0 %5046  ;;  %8618 = vmatpush1.bf16.msra.mxu0 %v5122_v33 }
 0x54b   : > { %v5045_v10 = vpop.permute.xlu1 %5044 }
 0x54c   : > { %4756 = vrot.lane.b32.xlu0 %v16145_v15, %s13462_s21  ;;  %4758 = vrot.lane.b32.xlu1 %v16168_v23, %s13462_s21  ;;  %v5125_v62 = vsel %vm1848_vm6, %v5045_v10, %v17199_v39  ;;  %v5124_v37 = vsel %vm1848_vm6, %v5043_v35, %v5045_v10 }
 0x54d   : > { %8743 = vmatprep.subr.bf16.mxu1 %v5125_v62 }
 0x54e   : > { %v5093_v48 = vpop.permute.xlu0 %5092  ;;  %8744 = vmatpush1.bf16.msra.mxu1 %v5124_v37 }
 0x54f   : > { %v5091_v60 = vpop.permute.xlu1 %5090 }
 0x550   : > { %4760 = vrot.lane.b32.xlu0 %v16176_v22, %s13462_s21  ;;  %5048 = vrot.lane.b32.xlu1 %v21034_v2, %s13465_s24  ;;  %v5147_v45 = vsel %vm1848_vm6, %v5091_v60, %v5093_v48  ;;  %v5146_v14 = vsel %vm1848_vm6, %v16865_v29, %v5091_v60 }
 0x551   : > { %8619 = vmatprep.subr.bf16.mxu0 %v5147_v45 }
 0x552   : > { %v17215_v3 = vpop.permute.xlu0 %5096  ;;  %8620 = vmatpush1.bf16.msra.mxu0 %v5146_v14 }
 0x553   : > { %v5095_v32 = vpop.permute.xlu1 %5094 }
 0x554   : > { %5050 = vrot.lane.b32.xlu0 %v21058_v25, %s13465_s24  ;;  %5052 = vrot.lane.b32.xlu1 %v16104_v26, %s13465_s24  ;;  %v5149_v35 = vsel %vm1848_vm6, %v5095_v32, %v17215_v3  ;;  %v5148_v52 = vsel %vm1848_vm6, %v5093_v48, %v5095_v32 }
 0x555   : > { %8745 = vmatprep.subr.bf16.mxu1 %v5149_v35 }
 0x556   : > { %v5387_v56 = vpop.permute.xlu0 %5386  ;;  %8746 = vmatpush1.bf16.msra.mxu1 %v5148_v52 }
 0x557   : > { %v5385_v29 = vpop.permute.xlu1 %5384 }
 0x558   : > { %5054 = vrot.lane.b32.xlu0 %v16111_v54, %s13465_s24  ;;  %5098 = vrot.lane.b32.xlu1 %v16131_v9, %s13465_s24  ;;  %v5467_v33 = vsel %vm2021_vm7, %v5385_v29, %v5387_v56  ;;  %v5466_v10 = vsel %vm2021_vm7, %v16889_v11, %v5385_v29 }
 0x559   : > { %8621 = vmatprep.subr.bf16.mxu0 %v5467_v33 }
 0x55a   : > { %v17231_v62 = vpop.permute.xlu0 %5390  ;;  %8622 = vmatpush1.bf16.msra.mxu0 %v5466_v10 }
 0x55b   : > { %v5389_v37 = vpop.permute.xlu1 %5388 }
 0x55c   : > { %5100 = vrot.lane.b32.xlu0 %v16145_v15, %s13465_s24  ;;  %5102 = vrot.lane.b32.xlu1 %v16168_v23, %s13465_s24  ;;  %v5469_v48 = vsel %vm2021_vm7, %v5389_v37, %v17231_v62  ;;  %v5468_v60 = vsel %vm2021_vm7, %v5387_v56, %v5389_v37 }
 0x55d   : > { %8747 = vmatprep.subr.bf16.mxu1 %v5469_v48 }
 0x55e   : > { %v5437_v45 = vpop.permute.xlu0 %5436  ;;  %8748 = vmatpush1.bf16.msra.mxu1 %v5468_v60 }
 0x55f   : > { %v5435_v11 = vpop.permute.xlu1 %5434 }
 0x560   : > { %5104 = vrot.lane.b32.xlu0 %v16176_v22, %s13465_s24  ;;  %5392 = vrot.lane.b32.xlu1 %v21034_v2, %s13464_s23  ;;  %v5491_v14 = vsel %vm2021_vm7, %v5435_v11, %v5437_v45  ;;  %v5490_v32 = vsel %vm2021_vm7, %v16905_v49, %v5435_v11 }
 0x561   : > { %8623 = vmatprep.subr.bf16.mxu0 %v5491_v14 }
 0x562   : > { %v17247_v35 = vpop.permute.xlu0 %5440  ;;  %8624 = vmatpush1.bf16.msra.mxu0 %v5490_v32 }
 0x563   : > { %v5439_v52 = vpop.permute.xlu1 %5438  ;;  %8625 = vmatprep.subr.bf16.mxu0 %v21011_v7 }
 0x564   : > { %5394 = vrot.lane.b32.xlu0 %v21058_v25, %s13464_s23  ;;  %5396 = vrot.lane.b32.xlu1 %v16104_v26, %s13464_s23  ;;  %v5493_v56 = vsel %vm2021_vm7, %v5439_v52, %v17247_v35  ;;  %v5492_v29 = vsel %vm2021_vm7, %v5437_v45, %v5439_v52 }
 0x565   : > { %8749 = vmatprep.subr.bf16.mxu1 %v5493_v56 }
 0x566   : > { %v5827_v49 = vpop.permute.xlu0 %5826  ;;  %8626 = vmatpush1.bf16.msra.mxu0 %v21009_v18  ;;  %8750 = vmatpush1.bf16.msra.mxu1 %v5492_v29 }
 0x567   : > { %8751 = vmatprep.subr.bf16.mxu1 %v21013_v41  ;;  %v5825_v33 = vpop.permute.xlu1 %5824  ;;  %8627 = vmatprep.subr.bf16.mxu0 %v21014_v12 }
 0x568   : > { %5398 = vrot.lane.b32.xlu0 %v16111_v54, %s13464_s23  ;;  %5442 = vrot.lane.b32.xlu1 %v16131_v9, %s13464_s23  ;;  %v5907_v18 = vsel %vm2242_vm8, %v5825_v33, %v5827_v49  ;;  %v5906_v12 = vsel %vm2242_vm8, %v16922_v44, %v5825_v33 }
 0x56a   : > { %v17264_v7 = vpop.permute.xlu0 %5830  ;;  %8628 = vmatpush1.bf16.msra.mxu0 %v21010_v1  ;;  %8752 = vmatpush1.bf16.msra.mxu1 %v21012_v30 }
 0x56b   : > { %8753 = vmatprep.subr.bf16.mxu1 %v21018_v4  ;;  %v5829_v41 = vpop.permute.xlu1 %5828  ;;  %8629 = vmatprep.subr.bf16.mxu0 %v5907_v18 }
 0x56c   : > { %5444 = vrot.lane.b32.xlu0 %v16145_v15, %s13464_s23  ;;  %5446 = vrot.lane.b32.xlu1 %v16168_v23, %s13464_s23  ;;  %v5909_v1 = vsel %vm2242_vm8, %v5829_v41, %v17264_v7  ;;  %v5908_v37 = vsel %vm2242_vm8, %v5827_v49, %v5829_v41 }
 0x56e   : > { %v5877_v10 = vpop.permute.xlu0 %5876  ;;  %8630 = vmatpush1.bf16.msra.mxu0 %v5906_v12  ;;  %8754 = vmatpush1.bf16.msra.mxu1 %v21015_v24 }
 0x56f   : > { %8755 = vmatprep.subr.bf16.mxu1 %v5909_v1  ;;  %v5875_v30 = vpop.permute.xlu1 %5874 }
 0x570   : > { %5448 = vrot.lane.b32.xlu0 %v16176_v22, %s13464_s23  ;;  %5832 = vrot.lane.b32.xlu1 %v21058_v25, %s13466_s12  ;;  %v5931_v4 = vsel %vm2242_vm8, %v5875_v30, %v5877_v10  ;;  %v5930_v44 = vsel %vm2242_vm8, %v16945_v57, %v5875_v30 }
 0x571   : > { %8631 = vmatprep.subr.bf16.mxu0 %v5931_v4 }
 0x572   : > { %v17287_v24 = vpop.permute.xlu0 %5880  ;;  %8632 = vmatpush1.bf16.msra.mxu0 %v5930_v44  ;;  %8756 = vmatpush1.bf16.msra.mxu1 %v5908_v37 }
 0x573   : > { %v5879_v48 = vpop.permute.xlu1 %5878 }
 0x574   : > { %5834 = vrot.lane.b32.xlu0 %v16104_v26, %s13466_s12  ;;  %5836 = vrot.lane.b32.xlu1 %v16111_v54, %s13466_s12  ;;  %v5933_v60 = vsel %vm2242_vm8, %v5879_v48, %v17287_v24  ;;  %v5932_v45 = vsel %vm2242_vm8, %v5877_v10, %v5879_v48 }
 0x575   : > { %8757 = vmatprep.subr.bf16.mxu1 %v5933_v60 }
 0x576   : > { %v6171_v57 = vpop.permute.xlu0 %6170  ;;  %8758 = vmatpush1.bf16.msra.mxu1 %v5932_v45 }
 0x577   : > { %v6169_v11 = vpop.permute.xlu1 %6168 }
 0x578   : > { %13388 = vrot.lane.b32.xlu0 %v20953_v43, %s13466_s12  ;;  %5882 = vrot.lane.b32.xlu1 %v16145_v15, %s13466_s12  ;;  %v6251_v14 = vsel %vm2415_vm9, %v6169_v11, %v6171_v57  ;;  %v6250_v32 = vsel %vm2415_vm9, %v16961_v8, %v6169_v11 }
 0x579   : > { %8633 = vmatprep.subr.bf16.mxu0 %v6251_v14 }
 0x57a   : > { %v17303_v52 = vpop.permute.xlu0 %6174  ;;  %8634 = vmatpush1.bf16.msra.mxu0 %v6250_v32 }
 0x57b   : > { %v6173_v56 = vpop.permute.xlu1 %6172 }
 0x57c   : > { %5884 = vrot.lane.b32.xlu0 %v16168_v23, %s13466_s12  ;;  %5886 = vrot.lane.b32.xlu1 %v16176_v22, %s13466_s12  ;;  %v6253_v29 = vsel %vm2415_vm9, %v6173_v56, %v17303_v52  ;;  %v6252_v49 = vsel %vm2415_vm9, %v6171_v57, %v6173_v56 }
 0x57d   : > { %8759 = vmatprep.subr.bf16.mxu1 %v6253_v29 }
 0x57e   : > { %v6221_v33 = vpop.permute.xlu0 %6220  ;;  %8760 = vmatpush1.bf16.msra.mxu1 %v6252_v49 }
 0x57f   : > { %v6219_v8 = vpop.permute.xlu1 %6218 }
 0x580   : > { %6176 = vrot.lane.b32.xlu0 %v21058_v25, %s13467_s13  ;;  %6178 = vrot.lane.b32.xlu1 %v16104_v26, %s13467_s13  ;;  %v6275_v18 = vsel %vm2415_vm9, %v6219_v8, %v6221_v33  ;;  %v6274_v41 = vsel %vm2415_vm9, %v16977_v5, %v6219_v8  ;;  %v17319_v12 = vpop.f32.mrb[96].mxu0 }
 0x581   : > { %21059 = vst [vmem:[#allocation45_spill] sm:$0xff] %v17319_v12  ;;  %8635 = vmatprep.subr.bf16.mxu0 %v6275_v18  ;;  %v17321_v10 = vpop.f32.mrb[97].mxu0  ;;  %v7514_v12 = vld [vmem:[%s20693_s5 + $0x20] sm:$0xff] }
 0x582   : > { %21060 = vst [vmem:[#allocation55_spill] sm:$0xff] %v17321_v10  ;;  %v17323_v1 = vpop.permute.xlu0 %6224  ;;  %8636 = vmatpush1.bf16.msra.mxu0 %v6274_v41  ;;  %v17325_v30 = vpop.f32.mrb[98].mxu0  ;;  %v18143_v10 = vld [vmem:[%s20695_s7 + $0x320] sm:$0xff] }
 0x583   : > { %21061 = vst [vmem:[#allocation56_spill] sm:$0xff] %v17325_v30  ;;  %v6223_v4 = vpop.permute.xlu1 %6222  ;;  %v17327_v44 = vpop.f32.mrb[99].mxu0 }
 0x584   : > { %21062 = vst [vmem:[#allocation57_spill] sm:$0xff] %v17327_v44  ;;  %6180 = vrot.lane.b32.xlu0 %v16111_v54, %s13467_s13  ;;  %13393 = vrot.lane.b32.xlu1 %v20953_v43, %s13467_s13  ;;  %v6277_v5 = vsel %vm2415_vm9, %v6223_v4, %v17323_v1  ;;  %v6276_v37 = vsel %vm2415_vm9, %v6221_v33, %v6223_v4  ;;  %v17336_v48 = vpop.f32.mrb[96].mxu1 }
 0x585   : > { %21063 = vst [vmem:[#allocation46_spill] sm:$0xff] %v17336_v48  ;;  %8761 = vmatprep.subr.bf16.mxu1 %v6277_v5  ;;  %v17338_v60 = vpop.f32.mrb[97].mxu1 }
 0x586   : > { %21064 = vst [vmem:[#allocation15_spill] sm:$0xff] %v17338_v60  ;;  %v6515_v45 = vpop.permute.xlu0 %6514  ;;  %8762 = vmatpush1.bf16.msra.mxu1 %v6276_v37  ;;  %v17340_v57 = vpop.f32.mrb[98].mxu1  ;;  %v18120_v60 = vld [vmem:[%s20695_s7 + $0x3a8] sm:$0xff] }
 0x587   : > { %21065 = vst [vmem:[#allocation32_spill] sm:$0xff] %v17340_v57  ;;  %v6513_v11 = vpop.permute.xlu1 %6512  ;;  %v17342_v14 = vpop.f32.mrb[99].mxu1 }
 0x588   : > { %21066 = vst [vmem:[#allocation37_spill] sm:$0xff] %v17342_v14  ;;  %6226 = vrot.lane.b32.xlu0 %v16145_v15, %s13467_s13  ;;  %6228 = vrot.lane.b32.xlu1 %v16168_v23, %s13467_s13  ;;  %v6595_v32 = vsel %vm2588_vm10, %v6513_v11, %v6515_v45  ;;  %v6594_v56 = vsel %vm2588_vm10, %v16993_v59, %v6513_v11  ;;  %v17351_v29 = vpop.f32.mrb[100].mxu0  ;;  %v7512_v14 = vld [vmem:[%s20693_s5 + $0x10] sm:$0xff] }
 0x589   : > { %21067 = vst [vmem:[#allocation40_spill] sm:$0xff] %v17351_v29  ;;  %8637 = vmatprep.subr.bf16.mxu0 %v6595_v32  ;;  %v17353_v49 = vpop.f32.mrb[101].mxu0  ;;  %v7511_v29 = vld [vmem:[%s20693_s5 + $0x8] sm:$0xff] }
 0x58a   : > { %21068 = vst [vmem:[#allocation47_spill] sm:$0xff] %v17353_v49  ;;  %v17355_v33 = vpop.permute.xlu0 %6518  ;;  %8638 = vmatpush1.bf16.msra.mxu0 %v6594_v56  ;;  %v17357_v8 = vpop.f32.mrb[102].mxu0 }
 0x58b   : > { %21069 = vst [vmem:[#allocation38_spill] sm:$0xff] %v17357_v8  ;;  %v6517_v18 = vpop.permute.xlu1 %6516  ;;  %v17359_v41 = vpop.f32.mrb[103].mxu0 }
 0x58c   : > { %21070 = vst [vmem:[#allocation39_spill] sm:$0xff] %v17359_v41  ;;  %6230 = vrot.lane.b32.xlu0 %v16176_v22, %s13467_s13  ;;  %6520 = vrot.lane.b32.xlu1 %v21058_v25, %s13468_s14  ;;  %v6597_v59 = vsel %vm2588_vm10, %v6517_v18, %v17355_v33  ;;  %v6596_v4 = vsel %vm2588_vm10, %v6515_v45, %v6517_v18  ;;  %v17368_v5 = vpop.f32.mrb[100].mxu1 }
 0x58d   : > { %21071 = vst [vmem:[#allocation41_spill] sm:$0xff] %v17368_v5  ;;  %8763 = vmatprep.subr.bf16.mxu1 %v6597_v59  ;;  %v17370_v37 = vpop.f32.mrb[101].mxu1 }
 0x58e   : > { %21072 = vst [vmem:[#allocation7_spill] sm:$0xff] %v17370_v37  ;;  %v6565_v11 = vpop.permute.xlu0 %6564  ;;  %8764 = vmatpush1.bf16.msra.mxu1 %v6596_v4  ;;  %v17372_v32 = vpop.f32.mrb[102].mxu1 }
 0x58f   : > { %21073 = vst [vmem:[#allocation19_spill] sm:$0xff] %v17372_v32  ;;  %v6563_v56 = vpop.permute.xlu1 %6562  ;;  %v17374_v8 = vpop.f32.mrb[103].mxu1 }
 0x590   : > { %21074 = vst [vmem:[#allocation48_spill] sm:$0xff] %v17374_v8  ;;  %6522 = vrot.lane.b32.xlu0 %v16104_v26, %s13468_s14  ;;  %6524 = vrot.lane.b32.xlu1 %v16111_v54, %s13468_s14  ;;  %v6619_v45 = vsel %vm2588_vm10, %v6563_v56, %v6565_v11  ;;  %v6618_v18 = vsel %vm2588_vm10, %v17017_v0, %v6563_v56  ;;  %v17383_v59 = vpop.f32.mrb[104].mxu0 }
 0x591   : > { %21075 = vst [vmem:[#allocation50_spill] sm:$0xff] %v17383_v59  ;;  %8639 = vmatprep.subr.bf16.mxu0 %v6619_v45  ;;  %v17385_v4 = vpop.f32.mrb[105].mxu0  ;;  %v17413_v59 = vld [vmem:[%s20692_s4 + $0x1c] ss:$12 sps:$4 sm:$0xff]  }
 0x592   : > { %21076 = vst [vmem:[#allocation63_spill] sm:$0xff] %v17385_v4  ;;  %v17387_v32 = vpop.permute.xlu0 %6568  ;;  %8640 = vmatpush1.bf16.msra.mxu0 %v6618_v18  ;;  %v17389_v8 = vpop.f32.mrb[106].mxu0  ;;  %v17405_v18 = vld [vmem:[%s20692_s4] ss:$12 sps:$4 sm:$0xff]  }
 0x593   : > { %21077 = vst [vmem:[#allocation64_spill] sm:$0xff] %v17389_v8  ;;  %v6567_v5 = vpop.permute.xlu1 %6566  ;;  %v17391_v37 = vpop.f32.mrb[107].mxu0 }
 0x594   : > { %21078 = vst [vmem:[#allocation65_spill] sm:$0xff] %v17391_v37  ;;  %6526 = vrot.lane.b32.xlu0 %v20953_v43, %s13468_s14  ;;  %6570 = vrot.lane.b32.xlu1 %v16145_v15, %s13468_s14  ;;  %v6621_v0 = vsel %vm2588_vm10, %v6567_v5, %v17387_v32  ;;  %v6620_v56 = vsel %vm2588_vm10, %v6565_v11, %v6567_v5  ;;  %v17400_v45 = vpop.f32.mrb[104].mxu1 }
 0x595   : > { %21079 = vst [vmem:[#allocation66_spill] sm:$0xff] %v17400_v45  ;;  %8642 = vmatmul.mubr.bf16.vlgmr.msra.gmra.mrb[120].mxu0 %v17405_v18  ;;  %8765 = vmatprep.subr.bf16.mxu1 %v6621_v0  ;;  %v17408_v8 = vpop.f32.mrb[105].mxu1 }
 0x596   : > { %21080 = vst [vmem:[#allocation67_spill] sm:$0xff] %v17408_v8  ;;  %v6859_v37 = vpop.permute.xlu0 %6858  ;;  %8766 = vmatpush1.bf16.msra.mxu1 %v6620_v56  ;;  %8651 = vmatprep.mubr.bf16.mxu0 %v17413_v59  ;;  %v17416_v5 = vpop.f32.mrb[106].mxu1 }
 0x597   : > { %21081 = vst [vmem:[#allocation68_spill] sm:$0xff] %v17416_v5  ;;  %v6857_v11 = vpop.permute.xlu1 %6856  ;;  %v17418_v45 = vpop.f32.mrb[107].mxu1 }
 0x598   : > { %21082 = vst [vmem:[#allocation69_spill] sm:$0xff] %v17418_v45  ;;  %6572 = vrot.lane.b32.xlu0 %v16168_v23, %s13468_s14  ;;  %6574 = vrot.lane.b32.xlu1 %v16176_v22, %s13468_s14  ;;  %v6939_v0 = vsel %vm2761_vm11, %v6857_v11, %v6859_v37  ;;  %v6938_v56 = vsel %vm2761_vm11, %v17048_v50, %v6857_v11  ;;  %v17441_v11 = vld [vmem:[%s20692_s4 + $0x18] ss:$12 sps:$4 sm:$0xff]  }
 0x599   : > { %8672 = vmatprep.subr.bf16.mxu0 %v6939_v0  ;;  %8768 = vmatmul.mubr.bf16.vlgmr.msra.gmra.mrb[120].mxu1 %v17405_v18 }
 0x59a   : > { %v17428_v8 = vpop.permute.xlu0 %6862  ;;  %8673 = vmatpush1.bf16.msra.mxu0 %v6938_v56  ;;  %8777 = vmatprep.mubr.bf16.mxu1 %v17413_v59  ;;  %v17447_v56 = vld [vmem:[%s20692_s4 + $0x34] ss:$12 sps:$4 sm:$0xff]  }
 0x59b   : > { %v6861_v5 = vpop.permute.xlu1 %6860 }
 0x59c   : > { %6576 = vrot.lane.b32.xlu0 %v20953_v43, %s13468_s14  ;;  %6864 = vrot.lane.b32.xlu1 %v21058_v25, %s13469_s15  ;;  %v6941_v45 = vsel %vm2761_vm11, %v6861_v5, %v17428_v8  ;;  %v6940_v50 = vsel %vm2761_vm11, %v6859_v37, %v6861_v5 }
 0x59d   : > { %8652 = vmatmul.mubr.bf16.gmra.mrb[124].mxu0 %v17441_v11  ;;  %8798 = vmatprep.subr.bf16.mxu1 %v6941_v45 }
 0x59e   : > { %v6909_v0 = vpop.permute.xlu0 %6908  ;;  %8799 = vmatpush1.bf16.msra.mxu1 %v6940_v50  ;;  %8661 = vmatprep.mubr.bf16.mxu0 %v17447_v56 }
 0x59f   : > { %v6907_v4 = vpop.permute.xlu1 %6906 }
 0x5a0   : > { %6866 = vrot.lane.b32.xlu0 %v16104_v26, %s13469_s15  ;;  %6868 = vrot.lane.b32.xlu1 %v16111_v54, %s13469_s15  ;;  %v6963_v37 = vsel %vm2761_vm11, %v6907_v4, %v6909_v0  ;;  %v6962_v45 = vsel %vm2761_vm11, %v17084_v53, %v6907_v4  ;;  %v17471_v4 = vld [vmem:[%s20692_s4 + $0x30] ss:$12 sps:$4 sm:$0xff]  }
 0x5a1   : > { %8674 = vmatprep.subr.bf16.mxu0 %v6963_v37  ;;  %8778 = vmatmul.mubr.bf16.gmra.mrb[124].mxu1 %v17441_v11 }
 0x5a2   : > { %v17458_v5 = vpop.permute.xlu0 %6912  ;;  %8675 = vmatpush1.bf16.msra.mxu0 %v6962_v45  ;;  %8787 = vmatprep.mubr.bf16.mxu1 %v17447_v56 }
 0x5a3   : > { %v6911_v50 = vpop.permute.xlu1 %6910 }
 0x5a4   : > { %6870 = vrot.lane.b32.xlu0 %v20953_v43, %s13469_s15  ;;  %6914 = vrot.lane.b32.xlu1 %v16145_v15, %s13469_s15  ;;  %v6965_v41 = vsel %vm2761_vm11, %v6911_v50, %v17458_v5  ;;  %v6964_v53 = vsel %vm2761_vm11, %v6909_v0, %v6911_v50  ;;  %v7510_v50 = vld [vmem:[%s20693_s5] sm:$0xff] }
 0x5a5   : > { %8662 = vmatmul.mubr.bf16.gmra.mrb[128].mxu0 %v17471_v4  ;;  %8800 = vmatprep.subr.bf16.mxu1 %v6965_v41 }
 0x5a6   : > { %v4363_v37 = vpop.permute.xlu0 %4362  ;;  %8801 = vmatpush1.bf16.msra.mxu1 %v6964_v53  ;;  %8704 = vmatprep.mubr.bf16.mxu0 %v20953_v43 }
 0x5a7   : > { %v4361_v45 = vpop.permute.xlu1 %4360 }
 0x5a8   : > { %6916 = vrot.lane.b32.xlu0 %v16168_v23, %s13469_s15  ;;  %6918 = vrot.lane.b32.xlu1 %v16176_v22, %s13469_s15  ;;  %v4439_v0 = vsel %vm1502_vm4, %v4361_v45, %v4363_v37 }
 0x5a9   : > { %8788 = vmatmul.mubr.bf16.gmra.mrb[128].mxu1 %v17471_v4  ;;  %8861 = vmatprep.subr.bf16.mxu0 %v4439_v0  ;;  %v17497_v0 = vld [vmem:[%s20692_s4 + $0x8] ss:$12 sps:$4 sm:$0xff]  }
 0x5aa   : > { %v4367_v41 = vpop.permute.xlu0 %4366  ;;  %8830 = vmatprep.mubr.bf16.mxu1 %v20953_v43 }
 0x5ab   : > { %v4365_v53 = vpop.permute.xlu1 %4364 }
 0x5ac   : > { %6920 = vrot.lane.b32.xlu0 %v20953_v43, %s13469_s15  ;;  %7518 = vperm.xlu1 %13397, %v7510_v50   ;;  %v4441_v57 = vsel %vm1502_vm4, %v4365_v53, %v4367_v41  ;;  %v4438_v50 = vsel %vm1502_vm4, %v17110_v34, %v4361_v45  ;;  %v4440_v44 = vsel %vm1502_vm4, %v4363_v37, %v4365_v53  ;;  %v7513_v34 = vld [vmem:[%s20693_s5 + $0x18] sm:$0xff]  ;;  %s347_s15 = scalar_lea.vmem %s20697_s9, %s11791_s20 }
 0x5ad   : > { %11890 = vmatmul.mubr.msk.bf16.vlgmr.msra.gmra.mrb[120].mxu0 %vm7591_vm0, %v17497_v0  ;;  %8987 = vmatprep.subr.bf16.mxu1 %v4441_v57 }
 0x5ae   : > { %v4413_v41 = vpop.permute.xlu0 %4412  ;;  %8862 = vmatpush1.bf16.msra.mxu0 %v4438_v50  ;;  %8714 = vmatprep.mubr.bf16.mxu0 %v20953_v43 }
 0x5af   : > { %v4411_v49 = vpop.permute.xlu1 %4410 }
 0x5b0   : > { %7523 = vperm.xlu0 %13398, %v7511_v29   ;;  %7528 = vperm.xlu1 %13397, %v7512_v14   ;;  %v4462_v48 = vsel %vm1502_vm4, %v17138_v6, %v4411_v49  ;;  %v4463_v30 = vsel %vm1502_vm4, %v4411_v49, %v4413_v41  ;;  %v7515_v49 = vld [vmem:[%s20693_s5 + $0x28] sm:$0xff] }
 0x5b1   : > { %11893 = vmatmul.mubr.msk.bf16.vlgmr.msra.gmra.mrb[120].mxu1 %vm7591_vm0, %v17497_v0  ;;  %8863 = vmatprep.subr.bf16.mxu0 %v4463_v30  ;;  %v17525_v30 = vld [vmem:[%s20692_s4 + $0x20] ss:$12 sps:$4 sm:$0xff]  }
 0x5b2   : > { %v4417_v57 = vpop.permute.xlu0 %4416  ;;  %8988 = vmatpush1.bf16.msra.mxu1 %v4440_v44  ;;  %8864 = vmatpush1.bf16.msra.mxu0 %v4462_v48 }
 0x5b3   : > { %v4415_v6 = vpop.permute.xlu1 %4414  ;;  %8840 = vmatprep.mubr.bf16.mxu1 %v20953_v43 }
 0x5b4   : > { %7538 = vperm.xlu0 %13398, %v7514_v12   ;;  %7533 = vperm.xlu1 %13397, %v7513_v34   ;;  %v4464_v14 = vsel %vm1502_vm4, %v4413_v41, %v4415_v6  ;;  %v4465_v29 = vsel %vm1502_vm4, %v4415_v6, %v4417_v57  ;;  %v17541_v34 = vld [vmem:[%s20692_s4 + $0x38] ss:$12 sps:$4 sm:$0xff]  }
 0x5b5   : > { %11891 = vmatmul.mubr.msk.bf16.gmra.mrb[124].mxu0 %vm7591_vm0, %v17525_v30  ;;  %8989 = vmatprep.subr.bf16.mxu1 %v4465_v29  ;;  %v13452_v57 = vld [vmem:[%s20692_s4 + $0x4] ss:$12 sps:$4 sm:$0xff]  }
 0x5b6   : > { %v4707_v44 = vpop.permute.xlu0 %4706  ;;  %8990 = vmatpush1.bf16.msra.mxu1 %v4464_v14  ;;  %8724 = vmatprep.mubr.bf16.mxu0 %v20953_v43 }
 0x5b7   : > { %v4705_v12 = vpop.permute.xlu1 %4704 }
 0x5b8   : > { %7543 = vperm.xlu1 %13397, %v7515_v49   ;;  %v4782_v48 = vsel %vm1675_vm5, %v17160_v21, %v4705_v12  ;;  %v4783_v37 = vsel %vm1675_vm5, %v4705_v12, %v4707_v44 }
 0x5b9   : > { %11894 = vmatmul.mubr.msk.bf16.gmra.mrb[124].mxu1 %vm7591_vm0, %v17525_v30  ;;  %8865 = vmatprep.subr.bf16.mxu0 %v4783_v37 }
 0x5ba   : > { %v4711_v45 = vpop.permute.xlu0 %4710  ;;  %8866 = vmatpush1.bf16.msra.mxu0 %v4782_v48  ;;  %8850 = vmatprep.mubr.bf16.mxu1 %v20953_v43 }
 0x5bb   : > { %v4709_v53 = vpop.permute.xlu1 %4708 }
 0x5bc   : > { %v4784_v50 = vsel %vm1675_vm5, %v4707_v44, %v4709_v53  ;;  %v4785_v41 = vsel %vm1675_vm5, %v4709_v53, %v4711_v45 }
 0x5bd   : > { %11892 = vmatmul.mubr.msk.bf16.gmra.mrb[128].mxu0 %vm7591_vm0, %v17541_v34  ;;  %8991 = vmatprep.subr.bf16.mxu1 %v4785_v41 }
 0x5be   : > { %v4757_v21 = vpop.permute.xlu0 %4756  ;;  %8992 = vmatpush1.bf16.msra.mxu1 %v4784_v50  ;;  %8893 = vmatprep.mubr.bf16.mxu0 %v13452_v57 }
 0x5bf   : > { %v4755_v6 = vpop.permute.xlu1 %4754 }
 0x5c0   : > { %v4806_v14 = vsel %vm1675_vm5, %v17182_v36, %v4755_v6  ;;  %v4807_v29 = vsel %vm1675_vm5, %v4755_v6, %v4757_v21 }
 0x5c1   : > { %11895 = vmatmul.mubr.msk.bf16.gmra.mrb[128].mxu1 %vm7591_vm0, %v17541_v34  ;;  %8867 = vmatprep.subr.bf16.mxu0 %v4807_v29 }
 0x5c2   : > { %v4761_v49 = vpop.permute.xlu0 %4760  ;;  %8868 = vmatpush1.bf16.msra.mxu0 %v4806_v14  ;;  %9019 = vmatprep.mubr.bf16.mxu1 %v13452_v57 }
 0x5c3   : > { %v4759_v44 = vpop.permute.xlu1 %4758 }
 0x5c4   : > { %v4808_v12 = vsel %vm1675_vm5, %v4757_v21, %v4759_v44  ;;  %v4809_v48 = vsel %vm1675_vm5, %v4759_v44, %v4761_v49 }
 0x5c5   : > { %8993 = vmatprep.subr.bf16.mxu1 %v4809_v48 }
 0x5c6   : > { %v5051_v37 = vpop.permute.xlu0 %5050  ;;  %8994 = vmatpush1.bf16.msra.mxu1 %v4808_v12 }
 0x5c7   : > { %v5049_v45 = vpop.permute.xlu1 %5048 }
 0x5c8   : > { %v5126_v36 = vsel %vm1848_vm6, %v17199_v39, %v5049_v45  ;;  %v5127_v53 = vsel %vm1848_vm6, %v5049_v45, %v5051_v37 }
 0x5c9   : > { %8869 = vmatprep.subr.bf16.mxu0 %v5127_v53 }
 0x5ca   : > { %v5055_v50 = vpop.permute.xlu0 %5054  ;;  %8870 = vmatpush1.bf16.msra.mxu0 %v5126_v36 }
 0x5cb   : > { %v5053_v41 = vpop.permute.xlu1 %5052 }
 0x5cc   : > { %v5128_v57 = vsel %vm1848_vm6, %v5051_v37, %v5053_v41  ;;  %v5129_v6 = vsel %vm1848_vm6, %v5053_v41, %v5055_v50 }
 0x5cd   : > { %8995 = vmatprep.subr.bf16.mxu1 %v5129_v6 }
 0x5ce   : > { %v5101_v21 = vpop.permute.xlu0 %5100  ;;  %8996 = vmatpush1.bf16.msra.mxu1 %v5128_v57 }
 0x5cf   : > { %v5099_v14 = vpop.permute.xlu1 %5098 }
 0x5d0   : > { %v5150_v29 = vsel %vm1848_vm6, %v17215_v3, %v5099_v14  ;;  %v5151_v49 = vsel %vm1848_vm6, %v5099_v14, %v5101_v21 }
 0x5d1   : > { %8871 = vmatprep.subr.bf16.mxu0 %v5151_v49 }
 0x5d2   : > { %v5105_v39 = vpop.permute.xlu0 %5104  ;;  %8872 = vmatpush1.bf16.msra.mxu0 %v5150_v29 }
 0x5d3   : > { %v5103_v44 = vpop.permute.xlu1 %5102 }
 0x5d4   : > { %v5152_v12 = vsel %vm1848_vm6, %v5101_v21, %v5103_v44  ;;  %v5153_v48 = vsel %vm1848_vm6, %v5103_v44, %v5105_v39 }
 0x5d5   : > { %8997 = vmatprep.subr.bf16.mxu1 %v5153_v48 }
 0x5d6   : > { %v5395_v37 = vpop.permute.xlu0 %5394  ;;  %8998 = vmatpush1.bf16.msra.mxu1 %v5152_v12 }
 0x5d7   : > { %v5393_v45 = vpop.permute.xlu1 %5392 }
 0x5d8   : > { %v5470_v36 = vsel %vm2021_vm7, %v17231_v62, %v5393_v45  ;;  %v5471_v53 = vsel %vm2021_vm7, %v5393_v45, %v5395_v37 }
 0x5d9   : > { %8873 = vmatprep.subr.bf16.mxu0 %v5471_v53 }
 0x5da   : > { %v5399_v3 = vpop.permute.xlu0 %5398  ;;  %8874 = vmatpush1.bf16.msra.mxu0 %v5470_v36 }
 0x5db   : > { %v5397_v50 = vpop.permute.xlu1 %5396 }
 0x5dc   : > { %v5472_v41 = vsel %vm2021_vm7, %v5395_v37, %v5397_v50  ;;  %v5473_v57 = vsel %vm2021_vm7, %v5397_v50, %v5399_v3 }
 0x5dd   : > { %8999 = vmatprep.subr.bf16.mxu1 %v5473_v57 }
 0x5de   : > { %v5445_v6 = vpop.permute.xlu0 %5444  ;;  %9000 = vmatpush1.bf16.msra.mxu1 %v5472_v41 }
 0x5df   : > { %v5443_v21 = vpop.permute.xlu1 %5442 }
 0x5e0   : > { %v5494_v14 = vsel %vm2021_vm7, %v17247_v35, %v5443_v21  ;;  %v5495_v29 = vsel %vm2021_vm7, %v5443_v21, %v5445_v6 }
 0x5e1   : > { %8875 = vmatprep.subr.bf16.mxu0 %v5495_v29 }
 0x5e2   : > { %v5449_v62 = vpop.permute.xlu0 %5448  ;;  %8876 = vmatpush1.bf16.msra.mxu0 %v5494_v14 }
 0x5e3   : > { %v5447_v49 = vpop.permute.xlu1 %5446  ;;  %8877 = vmatprep.subr.bf16.mxu0 %v21058_v25 }
 0x5e4   : > { %v5496_v39 = vsel %vm2021_vm7, %v5445_v6, %v5447_v49  ;;  %v5497_v44 = vsel %vm2021_vm7, %v5447_v49, %v5449_v62 }
 0x5e5   : > { %9001 = vmatprep.subr.bf16.mxu1 %v5497_v44 }
 0x5e6   : > { %v5835_v12 = vpop.permute.xlu0 %5834  ;;  %8878 = vmatpush1.bf16.msra.mxu0 %v21034_v2  ;;  %9002 = vmatpush1.bf16.msra.mxu1 %v5496_v39 }
 0x5e7   : > { %9003 = vmatprep.subr.bf16.mxu1 %v16111_v54  ;;  %v5833_v35 = vpop.permute.xlu1 %5832  ;;  %8879 = vmatprep.subr.bf16.mxu0 %v16145_v15 }
 0x5e8   : > { %v5911_v25 = vsel %vm2242_vm8, %v5833_v35, %v5835_v12  ;;  %v5910_v2 = vsel %vm2242_vm8, %v17264_v7, %v5833_v35 }
 0x5ea   : > { %v13389_v48 = vpop.permute.xlu0 %13388  ;;  %8880 = vmatpush1.bf16.msra.mxu0 %v16131_v9  ;;  %9004 = vmatpush1.bf16.msra.mxu1 %v16104_v26 }
 0x5eb   : > { %v13390_v37 = vunpack.i.l.bf16 %v13389_v48  ;;  %9005 = vmatprep.subr.bf16.mxu1 %v16176_v22  ;;  %v5837_v45 = vpop.permute.xlu1 %5836  ;;  %8881 = vmatprep.subr.bf16.mxu0 %v5911_v25  ;;  %v13391_v53 = vunpack.i.h.bf16 %v13389_v48 }
 0x5ec   : > { %v5912_v22 = vsel %vm2242_vm8, %v5835_v12, %v5837_v45 }
 0x5ed   : > { %v5913_v54 = vsel %vm2242_vm8, %v5837_v45, %v13390_v37 }
 0x5ee   : > { %v5885_v36 = vpop.permute.xlu0 %5884  ;;  %8882 = vmatpush1.bf16.msra.mxu0 %v5910_v2  ;;  %9006 = vmatpush1.bf16.msra.mxu1 %v16168_v23 }
 0x5ef   : > { %9007 = vmatprep.subr.bf16.mxu1 %v5913_v54  ;;  %v5883_v9 = vpop.permute.xlu1 %5882 }
 0x5f0   : > { %v5934_v26 = vsel %vm2242_vm8, %v17287_v24, %v5883_v9  ;;  %v5935_v15 = vsel %vm2242_vm8, %v5883_v9, %v5885_v36 }
 0x5f1   : > { %8883 = vmatprep.subr.bf16.mxu0 %v5935_v15 }
 0x5f2   : > { %v6177_v3 = vpop.permute.xlu0 %6176  ;;  %8884 = vmatpush1.bf16.msra.mxu0 %v5934_v26  ;;  %9008 = vmatpush1.bf16.msra.mxu1 %v5912_v22 }
 0x5f3   : > { %v5887_v7 = vpop.permute.xlu1 %5886  ;;  %v6254_v6 = vsel %vm2415_vm9, %v17303_v52, %v6177_v3 }
 0x5f4   : > { %v5936_v50 = vsel %vm2242_vm8, %v5885_v36, %v5887_v7  ;;  %v5937_v23 = vsel %vm2242_vm8, %v5887_v7, %v13391_v53 }
 0x5f5   : > { %9009 = vmatprep.subr.bf16.mxu1 %v5937_v23 }
 0x5f6   : > { %v6181_v41 = vpop.permute.xlu0 %6180  ;;  %9010 = vmatpush1.bf16.msra.mxu1 %v5936_v50 }
 0x5f7   : > { %v6179_v57 = vpop.permute.xlu1 %6178 }
 0x5f8   : > { %v6255_v24 = vsel %vm2415_vm9, %v6177_v3, %v6179_v57  ;;  %v6256_v44 = vsel %vm2415_vm9, %v6179_v57, %v6181_v41 }
 0x5f9   : > { %8885 = vmatprep.subr.bf16.mxu0 %v6255_v24 }
 0x5fa   : > { %v6227_v21 = vpop.permute.xlu0 %6226  ;;  %8886 = vmatpush1.bf16.msra.mxu0 %v6254_v6 }
 0x5fb   : > { %v13394_v14 = vpop.permute.xlu1 %13393  ;;  %v6278_v52 = vsel %vm2415_vm9, %v17323_v1, %v6227_v21 }
 0x5fc   : > { %v13396_v29 = vunpack.i.h.bf16 %v13394_v14  ;;  %v13395_v62 = vunpack.i.l.bf16 %v13394_v14 }
 0x5fe   : > { %v6231_v49 = vpop.permute.xlu0 %6230  ;;  %v6257_v39 = vsel %vm2415_vm9, %v6181_v41, %v13395_v62 }
 0x5ff   : > { %v6229_v12 = vpop.permute.xlu1 %6228  ;;  %9011 = vmatprep.subr.bf16.mxu1 %v6257_v39  ;;  %v6281_v48 = vsel %vm2415_vm9, %v6231_v49, %v13396_v29 }
 0x600   : > { %9012 = vmatpush1.bf16.msra.mxu1 %v6256_v44  ;;  %v6279_v35 = vsel %vm2415_vm9, %v6227_v21, %v6229_v12  ;;  %v17600_v25 = vpop.f32.mrb[108].mxu0  ;;  %v6280_v36 = vsel %vm2415_vm9, %v6229_v12, %v6231_v49 }
 0x601   : > { %21083 = vst [vmem:[#allocation70_spill] sm:$0xff] %v17600_v25  ;;  %8887 = vmatprep.subr.bf16.mxu0 %v6279_v35  ;;  %9013 = vmatprep.subr.bf16.mxu1 %v6281_v48  ;;  %v17604_v37 = vpop.f32.mrb[109].mxu0 }
 0x602   : > { %21084 = vst [vmem:[#allocation71_spill] sm:$0xff] %v17604_v37  ;;  %v6523_v45 = vpop.permute.xlu0 %6522  ;;  %8888 = vmatpush1.bf16.msra.mxu0 %v6278_v52  ;;  %v17606_v2 = vpop.f32.mrb[110].mxu0  ;;  %v18048_v37 = vld [vmem:[%s20695_s7 + $0x390] sm:$0xff] }
 0x603   : > { %21085 = vst [vmem:[#allocation72_spill] sm:$0xff] %v17606_v2  ;;  %v6521_v54 = vpop.permute.xlu1 %6520  ;;  %v17609_v9 = vpop.f32.mrb[111].mxu0  ;;  %v18000_v2 = vld [vmem:[%s20695_s7 + $0x388] sm:$0xff] }
 0x604   : > { %21086 = vst [vmem:[#allocation73_spill] sm:$0xff] %v17609_v9  ;;  %v6598_v26 = vsel %vm2588_vm10, %v17355_v33, %v6521_v54  ;;  %9014 = vmatpush1.bf16.msra.mxu1 %v6280_v36  ;;  %v6599_v15 = vsel %vm2588_vm10, %v6521_v54, %v6523_v45  ;;  %v17614_v1 = vpop.f32.mrb[108].mxu1  ;;  %v17995_v9 = vld [vmem:[%s20695_s7 + $0x380] sm:$0xff] }
 0x605   : > { %21087 = vst [vmem:[#allocation74_spill] sm:$0xff] %v17614_v1  ;;  %8889 = vmatprep.subr.bf16.mxu0 %v6599_v15  ;;  %v17616_v22 = vpop.f32.mrb[109].mxu1 }
 0x606   : > { %21088 = vst [vmem:[#allocation75_spill] sm:$0xff] %v17616_v22  ;;  %v6527_v53 = vpop.permute.xlu0 %6526  ;;  %8890 = vmatpush1.bf16.msra.mxu0 %v6598_v26  ;;  %v17618_v3 = vpop.f32.mrb[110].mxu1  ;;  %v18011_v22 = vld [vmem:[%s20695_s7 + $0x210] sm:$0xff] }
 0x607   : > { %21089 = vst [vmem:[#allocation76_spill] sm:$0xff] %v17618_v3  ;;  %v6525_v7 = vpop.permute.xlu1 %6524  ;;  %v17620_v50 = vpop.f32.mrb[111].mxu1  ;;  %v17990_v3 = vld [vmem:[%s20695_s7 + $0x298] sm:$0xff] }
 0x608   : > { %21090 = vst [vmem:[#allocation77_spill] sm:$0xff] %v17620_v50  ;;  %v6600_v23 = vsel %vm2588_vm10, %v6523_v45, %v6525_v7  ;;  %v6601_v41 = vsel %vm2588_vm10, %v6525_v7, %v6527_v53  ;;  %v17624_v33 = vpop.f32.mrb[112].mxu0  ;;  %v17985_v50 = vld [vmem:[%s20695_s7 + $0x290] sm:$0xff] }
 0x609   : > { %21091 = vst [vmem:[#allocation78_spill] sm:$0xff] %v17624_v33  ;;  %9015 = vmatprep.subr.bf16.mxu1 %v6601_v41  ;;  %v17626_v57 = vpop.f32.mrb[113].mxu0 }
 0x60a   : > { %21092 = vst [vmem:[#allocation79_spill] sm:$0xff] %v17626_v57  ;;  %v6573_v24 = vpop.permute.xlu0 %6572  ;;  %9016 = vmatpush1.bf16.msra.mxu1 %v6600_v23  ;;  %v17628_v6 = vpop.f32.mrb[114].mxu0  ;;  %v17976_v57 = vld [vmem:[%s20695_s7 + $0x208] sm:$0xff] }
 0x60b   : > { %21093 = vst [vmem:[#allocation80_spill] sm:$0xff] %v17628_v6  ;;  %v6571_v21 = vpop.permute.xlu1 %6570  ;;  %v17630_v14 = vpop.f32.mrb[115].mxu0  ;;  %v17951_v6 = vld [vmem:[%s20695_s7 + $0x280] sm:$0xff] }
 0x60c   : > { %21094 = vst [vmem:[#allocation81_spill] sm:$0xff] %v17630_v14  ;;  %v6622_v29 = vsel %vm2588_vm10, %v17387_v32, %v6571_v21  ;;  %v6623_v62 = vsel %vm2588_vm10, %v6571_v21, %v6573_v24  ;;  %v17635_v49 = vpop.f32.mrb[112].mxu1  ;;  %v17946_v14 = vld [vmem:[%s20695_s7 + $0x1f8] sm:$0xff] }
 0x60d   : > { %21095 = vst [vmem:[#allocation82_spill] sm:$0xff] %v17635_v49  ;;  %8891 = vmatprep.subr.bf16.mxu0 %v6623_v62  ;;  %v17637_v39 = vpop.f32.mrb[113].mxu1  ;;  %v17971_v49 = vld [vmem:[%s20695_s7 + $0x200] sm:$0xff] }
 0x60e   : > { %21096 = vst [vmem:[#allocation83_spill] sm:$0xff] %v17637_v39  ;;  %v6577_v44 = vpop.permute.xlu0 %6576  ;;  %8892 = vmatpush1.bf16.msra.mxu0 %v6622_v29  ;;  %v17639_v12 = vpop.f32.mrb[114].mxu1  ;;  %v17941_v39 = vld [vmem:[%s20695_s7 + $0x1f0] sm:$0xff] }
 0x60f   : > { %21097 = vst [vmem:[#allocation84_spill] sm:$0xff] %v17639_v12  ;;  %v6575_v35 = vpop.permute.xlu1 %6574  ;;  %v17641_v48 = vpop.f32.mrb[115].mxu1  ;;  %v21115_v40 = vpack.c.bf16 %v17946_v14, %v17941_v39 }
 0x610   : > { %21098 = vst [vmem:[#allocation85_spill] sm:$0xff] %v17641_v48  ;;  %v6624_v52 = vsel %vm2588_vm10, %v6573_v24, %v6575_v35  ;;  %v6625_v45 = vsel %vm2588_vm10, %v6575_v35, %v6577_v44  ;;  %v17645_v36 = vpop.f32.mrb[116].mxu0  ;;  %v17933_v48 = vld [vmem:[%s20695_s7 + $0x168] sm:$0xff] }
 0x611   : > { %21099 = vst [vmem:[#allocation86_spill] sm:$0xff] %v17645_v36  ;;  %8894 = vmatmul.mubr.bf16.vlgmr.msra.gmra.mrb[132].mxu0 %v17405_v18  ;;  %9017 = vmatprep.subr.bf16.mxu1 %v6625_v45  ;;  %v17648_v32 = vpop.f32.mrb[117].mxu0  ;;  %v17908_v36 = vld [vmem:[%s20695_s7 + $0x1e0] sm:$0xff] }
 0x612   : > { %21100 = vst [vmem:[#allocation87_spill] sm:$0xff] %v17648_v32  ;;  %v6867_v54 = vpop.permute.xlu0 %6866  ;;  %9018 = vmatpush1.bf16.msra.mxu1 %v6624_v52  ;;  %8903 = vmatprep.mubr.bf16.mxu0 %v17413_v59  ;;  %v17651_v26 = vpop.f32.mrb[118].mxu0  ;;  %v9561_v52 = vld [vmem:[%s20695_s7 + $0x80] sm:$0xff]  ;;  %v17871_v32 = vld [vmem:[%s20695_s7 + $0x1d8] sm:$0xff] }
 0x613   : > { %21101 = vst [vmem:[#allocation88_spill] sm:$0xff] %v17651_v26  ;;  %v6865_v15 = vpop.permute.xlu1 %6864  ;;  %v17653_v53 = vpop.f32.mrb[119].mxu0  ;;  %v17866_v26 = vld [vmem:[%s20695_s7 + $0x1d0] sm:$0xff] }
 0x614   : > { %21102 = vst [vmem:[#allocation89_spill] sm:$0xff] %v17653_v53  ;;  %v6942_v7 = vsel %vm2761_vm11, %v17428_v8, %v6865_v15  ;;  %v6943_v23 = vsel %vm2761_vm11, %v6865_v15, %v6867_v54  ;;  %v17658_v41 = vpop.f32.mrb[116].mxu1 }
 0x615   : > { %21103 = vst [vmem:[#allocation90_spill] sm:$0xff] %v17658_v41  ;;  %8924 = vmatprep.subr.bf16.mxu0 %v6943_v23  ;;  %9020 = vmatmul.mubr.bf16.vlgmr.msra.gmra.mrb[132].mxu1 %v17405_v18  ;;  %v17661_v24 = vpop.f32.mrb[117].mxu1  ;;  %v9562_v18 = vld [vmem:[%s20695_s7 + $0x88] sm:$0xff]  ;;  %v9593_v23 = vld [vmem:[%s20695_s7 + $0x180] sm:$0xff] }
 0x616   : > { %21104 = vst [vmem:[#allocation91_spill] sm:$0xff] %v17661_v24  ;;  %v6871_v21 = vpop.permute.xlu0 %6870  ;;  %8925 = vmatpush1.bf16.msra.mxu0 %v6942_v7  ;;  %9029 = vmatprep.mubr.bf16.mxu1 %v17413_v59  ;;  %v17664_v29 = vpop.f32.mrb[118].mxu1  ;;  %v12633_v15 = vpack.c.bf16 %v9562_v18, %v9561_v52  ;;  %v9563_v18 = vld [vmem:[%s20695_s7 + $0x90] sm:$0xff] }
 0x617   : > { %21105 = vst [vmem:[#allocation92_spill] sm:$0xff] %v17664_v29  ;;  %v6869_v62 = vpop.permute.xlu1 %6868  ;;  %v17666_v44 = vpop.f32.mrb[119].mxu1 }
 0x618   : > { %21106 = vst [vmem:[#allocation93_spill] sm:$0xff] %v17666_v44  ;;  %v6944_v8 = vsel %vm2761_vm11, %v6867_v54, %v6869_v62  ;;  %v6945_v35 = vsel %vm2761_vm11, %v6869_v62, %v6871_v21  ;;  %v9594_v21 = vld [vmem:[%s20695_s7 + $0x188] sm:$0xff]  ;;  %v9579_v44 = vld [vmem:[%s20695_s7 + $0x110] sm:$0xff] }
 0x619   : > { %8904 = vmatmul.mubr.bf16.gmra.mrb[136].mxu0 %v17441_v11  ;;  %9050 = vmatprep.subr.bf16.mxu1 %v6945_v35 }
 0x61a   : > { %v6917_v59 = vpop.permute.xlu0 %6916  ;;  %9051 = vmatpush1.bf16.msra.mxu1 %v6944_v8  ;;  %8913 = vmatprep.mubr.bf16.mxu0 %v17447_v56 }
 0x61b   : > { %v6915_v45 = vpop.permute.xlu1 %6914 }
 0x61c   : > { %v6966_v54 = vsel %vm2761_vm11, %v17458_v5, %v6915_v45  ;;  %v6967_v7 = vsel %vm2761_vm11, %v6915_v45, %v6917_v59  ;;  %v12665_v5 = vpack.c.bf16 %v9594_v21, %v9593_v23  ;;  %v9577_v23 = vld [vmem:[%s20695_s7 + $0x100] sm:$0xff] }
 0x61d   : > { %8926 = vmatprep.subr.bf16.mxu0 %v6967_v7  ;;  %9030 = vmatmul.mubr.bf16.gmra.mrb[136].mxu1 %v17441_v11  ;;  %v9545_v11 = vld [vmem:[%s20695_s7] sm:$0xff] }
 0x61e   : > { %8927 = vmatpush1.bf16.msra.mxu0 %v6966_v54  ;;  %v6921_v62 = vpop.permute.xlu0 %6920  ;;  %9039 = vmatprep.mubr.bf16.mxu1 %v17447_v56  ;;  %v9546_v56 = vld [vmem:[%s20695_s7 + $0x8] sm:$0xff]  ;;  %v9548_v54 = vld [vmem:[%s20695_s7 + $0x18] sm:$0xff]  ;;  %v9565_v21 = vld [vmem:[%s20695_s7 + $0xa0] sm:$0xff] }
 0x61f   : > { %v6919_v8 = vpop.permute.xlu1 %6918  ;;  %12634 = vmatprep.subr.bf16.mxu0 %v12633_v15  ;;  %v12635_v45 = vpack.c.bf16 %v9546_v56, %v9545_v11  ;;  %v9547_v15 = vld [vmem:[%s20695_s7 + $0x10] sm:$0xff]  ;;  %v9549_v11 = vld [vmem:[%s20695_s7 + $0x20] sm:$0xff]  ;;  %v9550_v56 = vld [vmem:[%s20695_s7 + $0x28] sm:$0xff] }
 0x620   : > { %v6968_v35 = vsel %vm2761_vm11, %v6917_v59, %v6919_v8  ;;  %v6969_v52 = vsel %vm2761_vm11, %v6919_v8, %v6921_v62  ;;  %v9564_v59 = vld [vmem:[%s20695_s7 + $0x98] sm:$0xff]  ;;  %v9566_v62 = vld [vmem:[%s20695_s7 + $0xa8] sm:$0xff]  ;;  %v9595_v8 = vld [vmem:[%s20695_s7 + $0x190] sm:$0xff] }
 0x621   : > { %8914 = vmatmul.mubr.bf16.gmra.mrb[140].mxu0 %v17471_v4  ;;  %9052 = vmatprep.subr.bf16.mxu1 %v6969_v52  ;;  %v12637_v7 = vpack.c.bf16 %v9564_v59, %v9563_v18  ;;  %v12641_v18 = vpack.c.bf16 %v9566_v62, %v9565_v21  ;;  %v9551_v62 = vld [vmem:[%s20695_s7 + $0x30] sm:$0xff] }
 0x622   : > { %9053 = vmatpush1.bf16.msra.mxu1 %v6968_v35  ;;  %8956 = vmatprep.mubr.bf16.mxu0 %v20953_v43  ;;  %v12639_v35 = vpack.c.bf16 %v9548_v54, %v9547_v15  ;;  %v9567_v15 = vld [vmem:[%s20695_s7 + $0xb0] sm:$0xff]  ;;  %v9568_v54 = vld [vmem:[%s20695_s7 + $0xb8] sm:$0xff] }
 0x623   : > { %12666 = vmatprep.subr.bf16.mxu1 %v12665_v5  ;;  %v9596_v5 = vld [vmem:[%s20695_s7 + $0x198] sm:$0xff]  ;;  %v12645_v29 = vpack.c.bf16 %v9568_v54, %v9567_v15  ;;  %v9554_v15 = vld [vmem:[%s20695_s7 + $0x48] sm:$0xff]  ;;  %v9583_v54 = vld [vmem:[%s20695_s7 + $0x130] sm:$0xff] }
 0x624   : > { %v12669_v59 = vpack.c.bf16 %v9596_v5, %v9595_v8  ;;  %v9552_v8 = vld [vmem:[%s20695_s7 + $0x38] sm:$0xff] }
 0x625   : > { %9040 = vmatmul.mubr.bf16.gmra.mrb[140].mxu1 %v17471_v4  ;;  %v9578_v4 = vld [vmem:[%s20695_s7 + $0x108] sm:$0xff] }
 0x626   : > { %9082 = vmatprep.mubr.bf16.mxu1 %v20953_v43  ;;  %v12667_v52 = vpack.c.bf16 %v9578_v4, %v9577_v23  ;;  %v9598_v23 = vld [vmem:[%s20695_s7 + $0x1a8] sm:$0xff]  ;;  %v12643_v4 = vpack.c.bf16 %v9550_v56, %v9549_v11  ;;  %v9599_v11 = vld [vmem:[%s20695_s7 + $0x1b0] sm:$0xff]  ;;  %v9600_v56 = vld [vmem:[%s20695_s7 + $0x1b8] sm:$0xff] }
 0x629   : > { %11896 = vmatmul.mubr.msk.bf16.vlgmr.msra.gmra.mrb[132].mxu0 %vm7591_vm0, %v17497_v0 }
 0x62a   : > { %12636 = vmatpush3.bf16.msra.mxu0 %v12635_v45  ;;  %8966 = vmatprep.mubr.bf16.mxu0 %v20953_v43  ;;  %v9580_v45 = vld [vmem:[%s20695_s7 + $0x118] sm:$0xff] }
 0x62b   : > { %12638 = vmatprep.subr.bf16.mxu0 %v12637_v7  ;;  %v9597_v7 = vld [vmem:[%s20695_s7 + $0x1a0] sm:$0xff]  ;;  %v12671_v21 = vpack.c.bf16 %v9580_v45, %v9579_v44  ;;  %v17766_v5 = vpop.permute.xlu1 %7518  ;;  %v9582_v44 = vld [vmem:[%s20695_s7 + $0x128] sm:$0xff] }
 0x62c   : > { %v12673_v24 = vpack.c.bf16 %v9598_v23, %v9597_v7  ;;  %v9584_v7 = vld [vmem:[%s20695_s7 + $0x138] sm:$0xff]  ;;  %v13050_v23 = vadd.f32 %v16753_v13, %v17766_v5  ;;  %v17824_v13 = vld [vmem:[%s20695_s7 + $0x1c8] sm:$0xff]  ;;  %v17861_v41 = vadd.f32 %v16795_v51, %v17766_v5 }
 0x62d   : > { %11899 = vmatmul.mubr.msk.bf16.vlgmr.msra.gmra.mrb[132].mxu1 %vm7591_vm0, %v17497_v0  ;;  %v9581_v0 = vld [vmem:[%s20695_s7 + $0x120] sm:$0xff]  ;;  %v17881_v51 = vld [vmem:[%s20695_s7 + $0x68] sm:$0xff] }
 0x62e   : > { %12640 = vmatpush3.bf16.msra.mxu0 %v12639_v35  ;;  %12668 = vmatpush3.bf16.msra.mxu1 %v12667_v52  ;;  %v9569_v35 = vld [vmem:[%s20695_s7 + $0xc0] sm:$0xff]  ;;  %v9570_v52 = vld [vmem:[%s20695_s7 + $0xc8] sm:$0xff]  ;;  %v12675_v45 = vpack.c.bf16 %v9582_v44, %v9581_v0  ;;  %v9258_v53 = vmul.f32 0.2, %v13050_v23  ;;  %vm9114_vm4 = vcmp.ge.f32.partialorder %v13050_v23, 0.0  ;;  %vm9116_vm5 = vcmp.ge.f32.partialorder %v17861_v41, 0.0 }
 0x62f   : > { %12642 = vmatprep.subr.bf16.mxu0 %v12641_v18  ;;  %12670 = vmatprep.subr.bf16.mxu1 %v12669_v59  ;;  %v17792_v18 = vld [vmem:[%s20695_s7 + $0x40] sm:$0xff]  ;;  %v12647_v59 = vpack.c.bf16 %v9552_v8, %v9551_v62  ;;  %v17808_v62 = vld [vmem:[%s20695_s7 + $0xd0] sm:$0xff]  ;;  %v17813_v8 = vld [vmem:[%s20695_s7 + $0xd8] sm:$0xff]  ;;  %v9260_v1 = vmul.f32 0.2, %v17861_v41 }
 0x630   : > { %9092 = vmatprep.mubr.bf16.mxu1 %v20953_v43  ;;  %v17818_v0 = vld [vmem:[%s20695_s7 + $0x1c0] sm:$0xff] }
 0x631   : > { %11897 = vmatmul.mubr.msk.bf16.gmra.mrb[136].mxu0 %vm7591_vm0, %v17525_v30  ;;  %v17841_v44 = vld [vmem:[%s20695_s7 + $0x140] sm:$0xff]  ;;  %v12681_v12 = vpack.c.bf16 %v17824_v13, %v17818_v0  ;;  %v17961_v0 = vld [vmem:[%s20695_s7 + $0x170] sm:$0xff]  ;;  %v17966_v13 = vld [vmem:[%s20695_s7 + $0x178] sm:$0xff] }
 0x632   : > { %12644 = vmatpush3.bf16.msra.mxu0 %v12643_v4  ;;  %12672 = vmatpush3.bf16.msra.mxu1 %v12671_v21  ;;  %v12649_v4 = vpack.c.bf16 %v9570_v52, %v9569_v35  ;;  %v12677_v21 = vpack.c.bf16 %v9600_v56, %v9599_v11  ;;  %v17846_v35 = vld [vmem:[%s20695_s7 + $0x148] sm:$0xff]  ;;  %v17851_v52 = vld [vmem:[%s20695_s7 + $0xe0] sm:$0xff]  ;;  %v12679_v56 = vpack.c.bf16 %v9584_v7, %v9583_v54  ;;  %v17898_v54 = vld [vmem:[%s20695_s7 + $0xf0] sm:$0xff] }
 0x633   : > { %12646 = vmatprep.subr.bf16.mxu0 %v12645_v29  ;;  %12674 = vmatprep.subr.bf16.mxu1 %v12673_v24  ;;  %v17829_v24 = vld [vmem:[%s20695_s7 + $0x50] sm:$0xff]  ;;  %v17834_v29 = vld [vmem:[%s20695_s7 + $0x58] sm:$0xff]  ;;  %v17856_v11 = vld [vmem:[%s20695_s7 + $0xe8] sm:$0xff] }
 0x634   : > { %8976 = vmatprep.mubr.bf16.mxu0 %v20953_v43  ;;  %v17903_v7 = vld [vmem:[%s20695_s7 + $0xf8] sm:$0xff]  ;;  %v12655_v33 = vpack.c.bf16 %v17834_v29, %v17829_v24  ;;  %v9402_v24 = vsel %vm9114_vm4, %v13050_v23, %v9258_v53  ;;  %v12683_v29 = vpack.c.bf16 %v17846_v35, %v17841_v44  ;;  %v12657_v25 = vpack.c.bf16 %v17856_v11, %v17851_v52  ;;  %v18021_v53 = vld [vmem:[%s20695_s7 + $0x300] sm:$0xff]  ;;  %v18026_v23 = vld [vmem:[%s20695_s7 + $0x308] sm:$0xff] }
 0x635   : > { %11900 = vmatmul.mubr.msk.bf16.gmra.mrb[136].mxu1 %vm7591_vm0, %v17525_v30  ;;  %v12651_v30 = vpack.c.bf16 %v9554_v15, %v17792_v18  ;;  %v17876_v18 = vld [vmem:[%s20695_s7 + $0x60] sm:$0xff]  ;;  %v12653_v15 = vpack.c.bf16 %v17813_v8, %v17808_v62  ;;  %v17923_v62 = vld [vmem:[%s20695_s7 + $0x78] sm:$0xff]  ;;  %v18036_v35 = vld [vmem:[%s20695_s7 + $0x2a8] sm:$0xff]  ;;  %v12685_v52 = vpack.c.bf16 %v17871_v32, %v17866_v26  ;;  %v12661_v26 = vpack.c.bf16 %v17903_v7, %v17898_v54  ;;  %v18083_v54 = vpop.permute.xlu0 %7523 }
 0x636   : > { %12648 = vmatpush3.bf16.msra.mxu0 %v12647_v59  ;;  %12676 = vmatpush3.bf16.msra.mxu1 %v12675_v45  ;;  %v17886_v59 = vld [vmem:[%s20695_s7 + $0x150] sm:$0xff]  ;;  %v17891_v45 = vld [vmem:[%s20695_s7 + $0x158] sm:$0xff]  ;;  %v17928_v8 = vld [vmem:[%s20695_s7 + $0x160] sm:$0xff]  ;;  %v12659_v11 = vpack.c.bf16 %v17881_v51, %v17876_v18  ;;  %v13052_v7 = vadd.f32 %v16764_v17, %v18083_v54  ;;  %v13051_v17 = vadd.f32 %v16755_v20, %v18083_v54 }
 0x637   : > { %12650 = vmatprep.subr.bf16.mxu0 %v12649_v4  ;;  %12678 = vmatprep.subr.bf16.mxu1 %v12677_v21  ;;  %v17913_v4 = vld [vmem:[%s20695_s7 + $0x1e8] sm:$0xff]  ;;  %v17918_v21 = vld [vmem:[%s20695_s7 + $0x70] sm:$0xff]  ;;  %v18031_v44 = vld [vmem:[%s20695_s7 + $0x2a0] sm:$0xff]  ;;  %v13061_v20 = vadd.f32 %v16787_v28, %v17766_v5 }
 0x638   : > { %9102 = vmatprep.mubr.bf16.mxu1 %v20953_v43  ;;  %v17956_v43 = vld [vmem:[%s20695_s7 + $0x288] sm:$0xff]  ;;  %v18058_v32 = vld [vmem:[%s20695_s7 + $0x220] sm:$0xff]  ;;  %v12689_v18 = vpack.c.bf16 %v17913_v4, %v17908_v36  ;;  %v18081_v36 = vld [vmem:[%s20695_s7 + $0x318] sm:$0xff]  ;;  %vm9138_vm7 = vcmp.ge.f32.partialorder %v13052_v7, 0.0  ;;  %vm9137_vm8 = vcmp.ge.f32.partialorder %v13051_v17, 0.0 }
 0x639   : > { %11898 = vmatmul.mubr.msk.bf16.gmra.mrb[140].mxu0 %vm7591_vm0, %v17541_v34  ;;  %v18098_v51 = vld [vmem:[%s20695_s7 + $0x2b0] sm:$0xff]  ;;  %v18108_v4 = vld [vmem:[%s20695_s7 + $0x3a0] sm:$0xff]  ;;  %v21112_v28 = vld [vmem:[#allocation25_spill] sm:$0xff]  ;;  %v21116_v47 = vpack.c.bf16 %v17956_v43, %v17951_v6  ;;  %vm9115_vm9 = vcmp.ge.f32.partialorder %v13061_v20, 0.0 }
 0x63a   : > { %12652 = vmatpush3.bf16.msra.mxu0 %v12651_v30  ;;  %12680 = vmatpush3.bf16.msra.mxu1 %v12679_v56  ;;  %v18016_v30 = vld [vmem:[%s20695_s7 + $0x218] sm:$0xff]  ;;  %v12687_v56 = vpack.c.bf16 %v17891_v45, %v17886_v59  ;;  %v18071_v45 = vld [vmem:[%s20695_s7 + $0x228] sm:$0xff]  ;;  %v9404_v59 = vsel %vm9116_vm5, %v17861_v41, %v9260_v1  ;;  %v18132_v41 = vpop.permute.xlu1 %7528  ;;  %v13064_v58 = vadd.f32 %v21112_v28, %v18083_v54  ;;  %v9259_v28 = vmul.f32 0.2, %v13061_v20  ;;  %v21120_v6 = vld [vmem:[#allocation14_spill] sm:$0xff] }
 0x63b   : > { %9993 = vmatprep.mubr.f32.mxu0 %v9402_v24  ;;  %12654 = vmatprep.subr.bf16.mxu0 %v12653_v15  ;;  %v18053_v15 = vld [vmem:[%s20695_s7 + $0x398] sm:$0xff]  ;;  %v13066_v43 = vadd.f32 %v21120_v6, %v18132_v41 }
 0x63c   : > { %12682 = vmatprep.subr.bf16.mxu1 %v12681_v12  ;;  %v18076_v12 = vld [vmem:[%s20695_s7 + $0x310] sm:$0xff]  ;;  %v18130_v1 = vld [vmem:[%s20695_s7 + $0x238] sm:$0xff]  ;;  %v9284_v14 = vmul.f32 0.2, %v13064_v58  ;;  %vm9140_vm11 = vcmp.ge.f32.partialorder %v13064_v58, 0.0 }
 0x63d   : > { %11901 = vmatmul.mubr.msk.bf16.gmra.mrb[140].mxu1 %vm7591_vm0, %v17541_v34  ;;  %v18103_v34 = vld [vmem:[%s20695_s7 + $0x2b8] sm:$0xff]  ;;  %vm9164_vm14 = vcmp.ge.f32.partialorder %v13066_v43, 0.0 }
 0x63e   : > { %12656 = vmatpush3.bf16.msra.mxu0 %v12655_v33  ;;  %12684 = vmatpush3.bf16.msra.mxu1 %v12683_v29  ;;  %v18125_v33 = vld [vmem:[%s20695_s7 + $0x230] sm:$0xff]  ;;  %v21111_v24 = vld [vmem:[#allocation23_spill] sm:$0xff]  ;;  %v18232_v42 = vpop.permute.xlu1 %7533 }
 0x63f   : > { %10088 = vmatprep.mubr.f32.mxu1 %v9404_v59  ;;  %12658 = vmatprep.subr.bf16.mxu0 %v12657_v25  ;;  %v18153_v25 = vld [vmem:[%s20695_s7 + $0x2c0] sm:$0xff]  ;;  %v13049_v59 = vadd.f32 %v16743_v46, %v17766_v5  ;;  %v18176_v46 = vld [vmem:[%s20695_s7 + $0x3b8] sm:$0xff]  ;;  %v13054_v29 = vadd.f32 %v21111_v24, %v18132_v41  ;;  %v18221_v24 = vld [vmem:[%s20695_s7 + $0x2d0] sm:$0xff] }
 0x640   : > { %21107 = vst [vmem:[#allocation94_spill] sm:$0xff] %v18153_v25  ;;  %12686 = vmatprep.subr.bf16.mxu1 %v12685_v52  ;;  %v18171_v52 = vld [vmem:[%s20695_s7 + $0x3b0] sm:$0xff]  ;;  %21109 = vst [vmem:[#allocation96_spill] sm:$0xff] %v18176_v46  ;;  %v21114_v46 = vpack.c.bf16 %v17933_v48, %v17928_v8 }
 0x641   : > { %21108 = vst [vmem:[#allocation95_spill] sm:$0xff] %v18171_v52  ;;  %vm9113_vm6 = vcmp.ge.f32.partialorder %v13049_v59, 0.0  ;;  %v21113_v52 = vpack.c.bf16 %v17923_v62, %v17918_v21  ;;  %v9306_v25 = vmul.f32 0.2, %v13054_v29  ;;  %vm9162_vm10 = vcmp.ge.f32.partialorder %v13054_v29, 0.0  ;;  %v21117_v21 = vld [vmem:[#allocation43_spill] sm:$0xff] }
 0x642   : > { %12660 = vmatpush3.bf16.msra.mxu0 %v12659_v11  ;;  %12688 = vmatpush3.bf16.msra.mxu1 %v12687_v56  ;;  %v9281_v56 = vmul.f32 0.2, %v13051_v17  ;;  %v13053_v48 = vadd.f32 %v21117_v21, %v18132_v41  ;;  %v21118_v62 = vld [vmem:[#allocation44_spill] sm:$0xff]  ;;  %v21121_v21 = vld [vmem:[#allocation10_spill] sm:$0xff] }
 0x643   : > { %12662 = vmatprep.subr.bf16.mxu0 %v12661_v26  ;;  %12690 = vmatprep.subr.bf16.mxu1 %v12689_v18  ;;  %v9257_v26 = vmul.f32 0.2, %v13049_v59  ;;  %v9282_v18 = vmul.f32 0.2, %v13052_v7  ;;  %v13063_v8 = vadd.f32 %v21118_v62, %v18083_v54  ;;  %v13055_v62 = vadd.f32 %v21121_v21, %v18232_v42 }
 0x644   : > { %vm9161_vm0 = vcmp.ge.f32.partialorder %v13053_v48, 0.0  ;;  %v21132_v21 = vpack.c.bf16 %v18026_v23, %v18021_v53 }
 0x645   : > { %v9426_v11 = vsel %vm9138_vm7, %v13052_v7, %v9282_v18  ;;  %v9403_v7 = vsel %vm9115_vm9, %v13061_v20, %v9259_v28  ;;  %v21123_v18 = vld [vmem:[#allocation5_spill] sm:$0xff]  ;;  %vm9139_vm12 = vcmp.ge.f32.partialorder %v13063_v8, 0.0  ;;  %v18280_v20 = vpop.permute.xlu1 %7543  ;;  %v21128_v28 = vld [vmem:[#allocation54_spill] sm:$0xff]  ;;  %vm9185_vm15 = vcmp.ge.f32.partialorder %v13055_v62, 0.0 }
 0x646   : > { %12664 = vmatpush3.bf16.msra.mxu0 %v21113_v52  ;;  %12692 = vmatpush3.bf16.msra.mxu1 %v21114_v46  ;;  %v18254_v52 = vpop.permute.xlu0 %7538  ;;  %v9401_v46 = vsel %vm9113_vm6, %v13049_v59, %v9257_v26  ;;  %v21122_v59 = vpack.c.bf16 %v17966_v13, %v17961_v0  ;;  %v9450_v26 = vsel %vm9162_vm10, %v13054_v29, %v9306_v25  ;;  %v21126_v0 = vld [vmem:[#allocation59_spill] sm:$0xff] }
 0x647   : > { %12694 = vmatprep.subr.bf16.mxu1 %v21115_v40  ;;  %12698 = vmatprep.subr.bf16.mxu0 %v21116_v47  ;;  %v21119_v40 = vld [vmem:[#allocation9_spill] sm:$0xff]  ;;  %v9425_v47 = vsel %vm9137_vm8, %v13051_v17, %v9281_v56  ;;  %v21124_v17 = vpack.c.bf16 %v17976_v57, %v17971_v49  ;;  %v21125_v56 = vpack.c.bf16 %v18000_v2, %v17995_v9  ;;  %v9283_v57 = vmul.f32 0.2, %v13063_v8 }
 0x648   : > { %v13056_v39 = vadd.f32 %v21119_v40, %v18232_v42  ;;  %v13058_v13 = vadd.f32 %v21126_v0, %v18254_v52  ;;  %v21127_v29 = vpack.c.bf16 %v17990_v3, %v17985_v50  ;;  %v9428_v25 = vsel %vm9140_vm11, %v13064_v58, %v9284_v14  ;;  %v21129_v3 = vld [vmem:[#allocation11_spill] sm:$0xff]  ;;  %v21130_v58 = vld [vmem:[#allocation29_spill] sm:$0xff] }
 0x649   : > { %9994 = vmatmul.mubr.f32.vlgmr.msra.gmra.mrb[144].mxu0 %v9401_v46  ;;  %v13065_v46 = vadd.f32 %v21123_v18, %v18132_v41  ;;  %v9308_v2 = vmul.f32 0.2, %v13066_v43  ;;  %v9329_v9 = vmul.f32 0.2, %v13055_v62  ;;  %v13068_v40 = vadd.f32 %v21128_v28, %v18232_v42 }
 0x64a   : > { %9998 = vmatprep.mubr.f32.mxu0 %v9426_v11  ;;  %12696 = vmatpush3.bf16.msra.mxu1 %v21122_v59  ;;  %v9305_v11 = vmul.f32 0.2, %v13053_v48  ;;  %vm9186_vm13 = vcmp.ge.f32.partialorder %v13056_v39, 0.0  ;;  %v9330_v49 = vmul.f32 0.2, %v13056_v39  ;;  %v13057_v50 = vadd.f32 %v21129_v3, %v18254_v52  ;;  %v18397_v3 = vld [vmem:[%s20695_s7 + $0x3d8] sm:$0xff] }
 0x64b   : > { %12700 = vmatpush3.bf16.msra.mxu0 %v21124_v17  ;;  %12730 = vmatprep.subr.bf16.mxu1 %v21125_v56  ;;  %v9307_v6 = vmul.f32 0.2, %v13065_v46  ;;  %v13067_v14 = vadd.f32 %v21130_v58, %v18232_v42  ;;  %vm9163_vm1 = vcmp.ge.f32.partialorder %v13065_v46, 0.0  ;;  %v9354_v59 = vmul.f32 0.2, %v13058_v13  ;;  %v18407_v58 = vld [vmem:[%s20695_s7 + $0x268] sm:$0xff] }
 0x64c   : > { %12702 = vmatprep.subr.bf16.mxu0 %v21127_v29  ;;  %v13070_v18 = vadd.f32 %v16876_v27, %v18254_v52  ;;  %v9449_v17 = vsel %vm9161_vm0, %v13053_v48, %v9305_v11  ;;  %v9427_v56 = vsel %vm9139_vm12, %v13063_v8, %v9283_v57  ;;  %v9474_v53 = vsel %vm9186_vm13, %v13056_v39, %v9330_v49  ;;  %v18327_v8 = vld [vmem:[%s20695_s7 + $0x250] sm:$0xff]  ;;  %v18332_v39 = vld [vmem:[%s20695_s7 + $0x258] sm:$0xff]  ;;  %v18372_v49 = vld [vmem:[%s20695_s7 + $0x348] sm:$0xff] }
 0x64d   : > { %9999 = vmatmul.mubr.f32.gmra.mrb[146].mxu0 %v9425_v47  ;;  %10089 = vmatmul.mubr.f32.vlgmr.msra.gmra.mrb[144].mxu1 %v9403_v7  ;;  %v21131_v47 = vpack.c.bf16 %v18016_v30, %v18011_v22  ;;  %v21133_v7 = vld [vmem:[#allocation58_spill] sm:$0xff]  ;;  %v21134_v22 = vpack.c.bf16 %v18036_v35, %v18031_v44  ;;  %v21135_v30 = vpack.c.bf16 %v18053_v15, %v18048_v37  ;;  %vm9210_vm2 = vcmp.ge.f32.partialorder %v13058_v13, 0.0  ;;  %v18316_v44 = vld [vmem:[%s20695_s7 + $0x3c0] sm:$0xff]  ;;  %v18321_v37 = vld [vmem:[%s20695_s7 + $0x3c8] sm:$0xff] }
 0x64e   : > { %10003 = vmatprep.mubr.f32.mxu0 %v9450_v26  ;;  %10093 = vmatprep.mubr.f32.mxu1 %v9428_v25  ;;  %v13060_v26 = vadd.f32 %v21133_v7, %v18280_v20  ;;  %v9452_v23 = vsel %vm9164_vm14, %v13066_v43, %v9308_v2  ;;  %v9473_v27 = vsel %vm9185_vm15, %v13055_v62, %v9329_v9  ;;  %vm9188_vm3 = vcmp.ge.f32.partialorder %v13068_v40, 0.0  ;;  %v18377_v2 = vld [vmem:[%s20695_s7 + $0x2e0] sm:$0xff] }
 0x64f   : > { %12704 = vmatpush3.bf16.msra.mxu0 %v21131_v47  ;;  %12732 = vmatpush3.bf16.msra.mxu1 %v21132_v21  ;;  %v9332_v48 = vmul.f32 0.2, %v13068_v40  ;;  %v9451_v35 = vsel %vm9163_vm1, %v13065_v46, %v9307_v6  ;;  %vm9209_vm4 = vcmp.ge.f32.partialorder %v13057_v50, 0.0  ;;  %v9353_v15 = vmul.f32 0.2, %v13057_v50  ;;  %v18392_v6 = vld [vmem:[%s20695_s7 + $0x3d0] sm:$0xff] }
 0x650   : > { %12706 = vmatprep.subr.bf16.mxu0 %v21134_v22  ;;  %12734 = vmatprep.subr.bf16.mxu1 %v21135_v30  ;;  %vm9187_vm5 = vcmp.ge.f32.partialorder %v13067_v14, 0.0  ;;  %v21136_v43 = vpack.c.bf16 %v18071_v45, %v18058_v32  ;;  %v21137_v62 = vpack.c.bf16 %v18081_v36, %v18076_v12  ;;  %v9498_v46 = vsel %vm9210_vm2, %v13058_v13, %v9354_v59  ;;  %v21140_v32 = vld [vmem:[#allocation51_spill] sm:$0xff]  ;;  %v21141_v12 = vld [vmem:[#allocation28_spill] sm:$0xff] }
 0x651   : > { %10004 = vmatmul.mubr.f32.gmra.mrb[148].mxu0 %v9449_v17  ;;  %10094 = vmatmul.mubr.f32.gmra.mrb[146].mxu1 %v9427_v56  ;;  %v9331_v11 = vmul.f32 0.2, %v13067_v14  ;;  %v9378_v0 = vmul.f32 0.2, %v13060_v26  ;;  %v9356_v29 = vmul.f32 0.2, %v13070_v18  ;;  %v21138_v25 = vpack.c.bf16 %v18103_v34, %v18098_v51 }
 0x652   : > { %10008 = vmatprep.mubr.f32.mxu0 %v9474_v53  ;;  %10098 = vmatprep.mubr.f32.mxu1 %v9452_v23  ;;  %v21139_v57 = vpack.c.bf16 %v18120_v60, %v18108_v4  ;;  %vm9234_vm6 = vcmp.ge.f32.partialorder %v13060_v26, 0.0  ;;  %vm9212_vm7 = vcmp.ge.f32.partialorder %v13070_v18, 0.0  ;;  %v18349_v45 = vadd.f32 %v21140_v32, %v18280_v20  ;;  %v21142_v51 = vld [vmem:[#allocation61_spill] sm:$0xff]  ;;  %v18367_v4 = vld [vmem:[%s20695_s7 + $0x340] sm:$0xff]  ;;  %v18421_v56 = vld [vmem:[%s20695_s7 + $0x350] sm:$0xff] }
 0x653   : > { %12708 = vmatpush3.bf16.msra.mxu0 %v21136_v43  ;;  %12736 = vmatpush3.bf16.msra.mxu1 %v21137_v62  ;;  %v18353_v36 = vadd.f32 %v21141_v12, %v18254_v52  ;;  %v9476_v13 = vsel %vm9188_vm3, %v13068_v40, %v9332_v48  ;;  %v18358_v34 = vadd.f32 %v21142_v51, %v18280_v20  ;;  %v21150_v53 = vld [vmem:[#allocation60_spill] sm:$0xff]  ;;  %v18471_v43 = vld [vmem:[%s20695_s7 + $0x270] sm:$0xff]  ;;  %v18476_v62 = vld [vmem:[%s20695_s7 + $0x278] sm:$0xff] }
 0x654   : > { %12710 = vmatprep.subr.bf16.mxu0 %v21138_v25  ;;  %12738 = vmatprep.subr.bf16.mxu1 %v21139_v57  ;;  %v18362_v60 = vadd.f32 %v17004_v31, %v17766_v5  ;;  %v18382_v31 = vld [vmem:[%s20695_s7 + $0x2e8] sm:$0xff]  ;;  %v9497_v9 = vsel %vm9209_vm4, %v13057_v50, %v9353_v15  ;;  %v12745_v28 = vpack.c.bf16 %v18321_v37, %v18316_v44  ;;  %v18402_v50 = vld [vmem:[%s20695_s7 + $0x260] sm:$0xff]  ;;  %vm9233_vm8 = vcmp.ge.f32.partialorder %v18349_v45, 0.0  ;;  %v18497_v25 = vld [vmem:[%s20695_s7 + $0x3f0] sm:$0xff] }
 0x655   : > { %10009 = vmatmul.mubr.f32.gmra.mrb[150].mxu0 %v9473_v27  ;;  %10099 = vmatmul.mubr.f32.gmra.mrb[148].mxu1 %v9451_v35  ;;  %v12719_v40 = vpack.c.bf16 %v18332_v39, %v18327_v8  ;;  %v21143_v47 = vpack.c.bf16 %v18130_v1, %v18125_v33  ;;  %v21144_v21 = vpack.c.bf16 %v18148_v38, %v18143_v10  ;;  %v18426_v33 = vld [vmem:[%s20695_s7 + $0x358] sm:$0xff]  ;;  %v18431_v38 = vld [vmem:[%s20695_s7 + $0x2f0] sm:$0xff]  ;;  %v9377_v22 = vmul.f32 0.2, %v18349_v45  ;;  %v21151_v44 = vld [vmem:[#allocation17_spill] sm:$0xff] }
 0x656   : > { %10013 = vmatprep.mubr.f32.mxu0 %v9498_v46  ;;  %10103 = vmatprep.mubr.f32.mxu1 %v9476_v13  ;;  %v9475_v59 = vsel %vm9187_vm5, %v13067_v14, %v9331_v11  ;;  %v9522_v7 = vsel %vm9234_vm6, %v13060_v26, %v9378_v0  ;;  %v9500_v17 = vsel %vm9212_vm7, %v13070_v18, %v9356_v29  ;;  %v21145_v10 = vld [vmem:[#allocation94_spill] sm:$0xff]  ;;  %v21147_v14 = vld [vmem:[#allocation96_spill] sm:$0xff]  ;;  %v21148_v26 = vld [vmem:[#allocation95_spill] sm:$0xff]  ;;  %v9355_v30 = vmul.f32 0.2, %v18353_v36 }
 0x657   : > { %12712 = vmatpush3.bf16.msra.mxu0 %v21143_v47  ;;  %12740 = vmatpush3.bf16.msra.mxu1 %v21144_v21  ;;  %v21146_v1 = vpack.c.bf16 %v18166_v61, %v21145_v10  ;;  %v21149_v18 = vpack.c.bf16 %v21147_v14, %v21148_v26  ;;  %v18444_v23 = vadd.f32 %v21150_v53, %v18280_v20  ;;  %v18449_v27 = vld [vmem:[%s20695_s7 + $0x2f8] sm:$0xff]  ;;  %vm9211_vm9 = vcmp.ge.f32.partialorder %v18353_v36, 0.0  ;;  %v18461_v35 = vld [vmem:[%s20695_s7 + $0x3e0] sm:$0xff]  ;;  %v18466_v15 = vld [vmem:[%s20695_s7 + $0x3e8] sm:$0xff] }
 0x658   : > { %v9380_v61 = vmul.f32 0.2, %v18358_v34  ;;  %v9262_v48 = vmul.f32 0.2, %v18362_v60  ;;  %v18456_v37 = vadd.f32 %v21151_v44, %v17766_v5  ;;  %v18481_v46 = vld [vmem:[%s20695_s7 + $0x360] sm:$0xff]  ;;  %v18486_v11 = vld [vmem:[%s20695_s7 + $0x368] sm:$0xff]  ;;  %v12747_v0 = vpack.c.bf16 %v18372_v49, %v18367_v4 }
 0x659   : > { %12714 = vmatprep.subr.bf16.mxu0 %v21146_v1  ;;  %12742 = vmatprep.subr.bf16.mxu1 %v21149_v18  ;;  %vm9236_vm10 = vcmp.ge.f32.partialorder %v18358_v34, 0.0  ;;  %vm9118_vm11 = vcmp.ge.f32.partialorder %v18362_v60, 0.0  ;;  %v12721_v29 = vpack.c.bf16 %v18382_v31, %v18377_v2  ;;  %v18502_v57 = vld [vmem:[%s20695_s7 + $0x3f8] sm:$0xff]  ;;  %v18507_v32 = vld [vmem:[%s20695_s7 + $0x480] sm:$0xff]  ;;  %v18512_v12 = vld [vmem:[%s20695_s7 + $0x488] sm:$0xff]  ;;  %v21154_v2 = vpack.c.bf16 %v18210_v55, %v18205_v19 }
 0x65a   : > { %10014 = vmatmul.mubr.f32.gmra.mrb[152].mxu0 %v9497_v9  ;;  %10104 = vmatmul.mubr.f32.gmra.mrb[150].mxu1 %v9475_v59  ;;  %v18517_v13 = vld [vmem:[%s20695_s7 + $0x370] sm:$0xff]  ;;  %v18522_v51 = vld [vmem:[%s20695_s7 + $0x378] sm:$0xff]  ;;  %v21152_v4 = vld [vmem:[#allocation97_spill] sm:$0xff]  ;;  %v12749_v31 = vpack.c.bf16 %v18397_v3, %v18392_v6  ;;  %v12723_v9 = vpack.c.bf16 %v18407_v58, %v18402_v50  ;;  %v12751_v47 = vpack.c.bf16 %v18426_v33, %v18421_v56  ;;  %vm9235_vm0 = vcmp.ge.f32.partialorder %v18444_v23, 0.0 }
 0x65b   : > { %10018 = vmatprep.mubr.f32.mxu0 %v9522_v7  ;;  %10108 = vmatprep.mubr.f32.mxu1 %v9500_v17  ;;  %v21153_v49 = vpack.c.bf16 %v18194_v16, %v21152_v4  ;;  %v18539_v21 = vld [vmem:[%s20695_s7 + $0x400] sm:$0xff]  ;;  %v18544_v16 = vld [vmem:[%s20695_s7 + $0x408] sm:$0xff]  ;;  %v18549_v55 = vld [vmem:[%s20695_s7 + $0x490] sm:$0xff]  ;;  %v9521_v6 = vsel %vm9233_vm8, %v18349_v45, %v9377_v22  ;;  %v9499_v3 = vsel %vm9211_vm9, %v18353_v36, %v9355_v30  ;;  %v9379_v7 = vmul.f32 0.2, %v18444_v23 }
 0x65c   : > { %12744 = vmatpush3.bf16.msra.mxu1 %v21154_v2  ;;  %v18554_v19 = vld [vmem:[%s20695_s7 + $0x498] sm:$0xff]  ;;  %v21155_v59 = vpack.c.bf16 %v18226_v63, %v18221_v24  ;;  %v12725_v17 = vpack.c.bf16 %v18449_v27, %v18431_v38  ;;  %v18571_v10 = vld [vmem:[%s20695_s7 + $0x580] sm:$0xff]  ;;  %v18576_v45 = vld [vmem:[%s20695_s7 + $0x588] sm:$0xff]  ;;  %v9524_v36 = vsel %vm9236_vm10, %v18358_v34, %v9380_v61  ;;  %v9264_v38 = vmul.f32 0.2, %v18456_v37 }
 0x65d   : > { %12716 = vmatpush3.bf16.msra.mxu0 %v21153_v49  ;;  %12746 = vmatprep.subr.bf16.mxu1 %v12745_v28  ;;  %v18581_v63 = vld [vmem:[%s20695_s7 + $0x410] sm:$0xff]  ;;  %v18586_v24 = vld [vmem:[%s20695_s7 + $0x418] sm:$0xff]  ;;  %v9406_v28 = vsel %vm9118_vm11, %v18362_v60, %v9262_v48  ;;  %v18599_v1 = vld [vmem:[%s20695_s7 + $0x500] sm:$0xff]  ;;  %vm9120_vm12 = vcmp.ge.f32.partialorder %v18456_v37, 0.0  ;;  %v12753_v60 = vpack.c.bf16 %v18466_v15, %v18461_v35  ;;  %v12727_v26 = vpack.c.bf16 %v18476_v62, %v18471_v43 }
 0x65e   : > { %12718 = vmatprep.subr.bf16.mxu0 %v21155_v59  ;;  %10019 = vmatmul.mubr.f32.gmra.mrb[154].mxu0 %v9521_v6  ;;  %v18604_v14 = vld [vmem:[%s20695_s7 + $0x508] sm:$0xff]  ;;  %v18609_v34 = vld [vmem:[%s20695_s7 + $0x4a0] sm:$0xff]  ;;  %v12755_v18 = vpack.c.bf16 %v18486_v11, %v18481_v46  ;;  %v18626_v30 = vld [vmem:[%s20695_s7 + $0x590] sm:$0xff]  ;;  %v12757_v27 = vpack.c.bf16 %v18502_v57, %v18497_v25  ;;  %v12761_v61 = vpack.c.bf16 %v18512_v12, %v18507_v32 }
 0x65f   : > { %10109 = vmatmul.mubr.f32.gmra.mrb[152].mxu1 %v9499_v3  ;;  %10183 = vmatprep.mubr.f32.mxu0 %v9406_v28  ;;  %v18621_v22 = vld [vmem:[%s20695_s7 + $0x4a8] sm:$0xff]  ;;  %v18631_v53 = vld [vmem:[%s20695_s7 + $0x598] sm:$0xff]  ;;  %v12759_v48 = vpack.c.bf16 %v18522_v51, %v18517_v13  ;;  %v18645_v44 = vld [vmem:[%s20695_s7 + $0x420] sm:$0xff]  ;;  %v12763_v35 = vpack.c.bf16 %v18544_v16, %v18539_v21  ;;  %v9408_v46 = vsel %vm9120_vm12, %v18456_v37, %v9264_v38 }
 0x660   : > { %10113 = vmatprep.mubr.f32.mxu1 %v9524_v36  ;;  %12748 = vmatpush3.bf16.msra.mxu1 %v12747_v0  ;;  %v18650_v8 = vld [vmem:[%s20695_s7 + $0x428] sm:$0xff]  ;;  %v18655_v39 = vld [vmem:[%s20695_s7 + $0x510] sm:$0xff]  ;;  %v18667_v43 = vld [vmem:[%s20695_s7 + $0x518] sm:$0xff] }
 0x661   : > { %12720 = vmatpush3.bf16.msra.mxu0 %v12719_v40  ;;  %v9523_v40 = vsel %vm9235_vm0, %v18444_v23, %v9379_v7  ;;  %12750 = vmatprep.subr.bf16.mxu1 %v12749_v31  ;;  %v18672_v62 = vld [vmem:[%s20695_s7 + $0x4b0] sm:$0xff]  ;;  %v18677_v23 = vld [vmem:[%s20695_s7 + $0x4b8] sm:$0xff]  ;;  %v18691_v57 = vld [vmem:[%s20695_s7 + $0x5a0] sm:$0xff] }
 0x662   : > { %12722 = vmatprep.subr.bf16.mxu0 %v12721_v29  ;;  %v21156_v11 = vld [vmem:[#allocation62_spill] sm:$0xff]  ;;  %v12793_v29 = vpack.c.bf16 %v18576_v45, %v18571_v10  ;;  %v18696_v32 = vld [vmem:[%s20695_s7 + $0x5a8] sm:$0xff]  ;;  %v21157_v12 = vld [vmem:[#allocation4_spill] sm:$0xff] }
 0x663   : > { %10114 = vmatmul.mubr.f32.gmra.mrb[154].mxu1 %v9523_v40  ;;  %v13073_v0 = vadd.f32 %v21156_v11, %v17766_v5  ;;  %v18701_v37 = vld [vmem:[%s20695_s7 + $0x430] sm:$0xff]  ;;  %v13076_v4 = vadd.f32 %v21157_v12, %v18083_v54  ;;  %v18714_v6 = vld [vmem:[%s20695_s7 + $0x438] sm:$0xff]  ;;  %v18719_v3 = vld [vmem:[%s20695_s7 + $0x520] sm:$0xff] }
 0x664   : > { %10278 = vmatprep.mubr.f32.mxu1 %v9408_v46  ;;  %v18724_v59 = vld [vmem:[%s20695_s7 + $0x528] sm:$0xff]  ;;  %12752 = vmatpush3.bf16.msra.mxu1 %v12751_v47  ;;  %v21158_v7 = vld [vmem:[#allocation6_spill] sm:$0xff]  ;;  %v18741_v40 = vld [vmem:[%s20695_s7 + $0x4c0] sm:$0xff] }
 0x665   : > { %12724 = vmatpush3.bf16.msra.mxu0 %v12723_v9  ;;  %v13075_v36 = vadd.f32 %v21158_v7, %v18083_v54  ;;  %12754 = vmatprep.subr.bf16.mxu1 %v12753_v60  ;;  %v21159_v50 = vld [vmem:[#allocation27_spill] sm:$0xff]  ;;  %v21160_v56 = vld [vmem:[#allocation22_spill] sm:$0xff]  ;;  %v18752_v47 = vld [vmem:[%s20695_s7 + $0x4c8] sm:$0xff]  ;;  %v9261_v60 = vmul.f32 0.2, %v13073_v0  ;;  %vm9117_vm13 = vcmp.ge.f32.partialorder %v13073_v0, 0.0 }
 0x666   : > { %12726 = vmatprep.subr.bf16.mxu0 %v12725_v17  ;;  %v13085_v58 = vadd.f32 %v21159_v50, %v17766_v5  ;;  %v13078_v33 = vadd.f32 %v21160_v56, %v18132_v41  ;;  %v18757_v46 = vld [vmem:[%s20695_s7 + $0x5b0] sm:$0xff]  ;;  %v18762_v17 = vld [vmem:[%s20695_s7 + $0x5b8] sm:$0xff]  ;;  %v9286_v50 = vmul.f32 0.2, %v13076_v4  ;;  %vm9142_vm14 = vcmp.ge.f32.partialorder %v13076_v4, 0.0  ;;  %v21169_v21 = vld [vmem:[#allocation24_spill] sm:$0xff] }
 0x667   : > { %v21161_v56 = vld [vmem:[#allocation26_spill] sm:$0xff]  ;;  %v21162_v38 = vld [vmem:[#allocation31_spill] sm:$0xff]  ;;  %vm9141_vm15 = vcmp.ge.f32.partialorder %v13075_v36, 0.0  ;;  %v12805_v12 = vpack.c.bf16 %v18762_v17, %v18757_v46  ;;  %v9285_v7 = vmul.f32 0.2, %v13075_v36  ;;  %v13082_v16 = vadd.f32 %v21169_v21, %v18254_v52 }
 0x668   : > { %v13088_v9 = vadd.f32 %v21161_v56, %v18083_v54  ;;  %v13077_v28 = vadd.f32 %v21162_v38, %v18132_v41  ;;  %12756 = vmatpush3.bf16.msra.mxu1 %v12755_v18  ;;  %v9263_v31 = vmul.f32 0.2, %v13085_v58  ;;  %v9310_v2 = vmul.f32 0.2, %v13078_v33  ;;  %v21163_v56 = vld [vmem:[#allocation34_spill] sm:$0xff] }
 0x669   : > { %12728 = vmatpush3.bf16.msra.mxu0 %v12727_v26  ;;  %12758 = vmatprep.subr.bf16.mxu1 %v12757_v27  ;;  %v13087_v49 = vadd.f32 %v21163_v56, %v18083_v54  ;;  %v9405_v38 = vsel %vm9117_vm13, %v13073_v0, %v9261_v60  ;;  %vm9119_vm1 = vcmp.ge.f32.partialorder %v13085_v58, 0.0  ;;  %vm9166_vm2 = vcmp.ge.f32.partialorder %v13078_v33, 0.0  ;;  %v21164_v26 = vld [vmem:[#allocation42_spill] sm:$0xff]  ;;  %v21165_v27 = vld [vmem:[#allocation16_spill] sm:$0xff] }
 0x66a   : > { %12762 = vmatprep.subr.bf16.mxu0 %v12761_v61  ;;  %v13080_v18 = vadd.f32 %v21164_v26, %v18232_v42  ;;  %v9430_v11 = vsel %vm9142_vm14, %v13076_v4, %v9286_v50  ;;  %v9288_v25 = vmul.f32 0.2, %v13088_v9  ;;  %v9309_v15 = vmul.f32 0.2, %v13077_v28  ;;  %v21166_v0 = vld [vmem:[#allocation30_spill] sm:$0xff]  ;;  %v21167_v56 = vld [vmem:[#allocation20_spill] sm:$0xff] }
 0x66b   : > { %v13090_v61 = vadd.f32 %v21165_v27, %v18132_v41  ;;  %vm9144_vm3 = vcmp.ge.f32.partialorder %v13088_v9, 0.0  ;;  %vm9165_vm4 = vcmp.ge.f32.partialorder %v13077_v28, 0.0  ;;  %v13079_v60 = vadd.f32 %v21166_v0, %v18232_v42 }
 0x66c   : > { %10184 = vmatmul.mubr.f32.vlgmr.msra.gmra.mrb[156].mxu0 %v9405_v38  ;;  %12760 = vmatpush3.bf16.msra.mxu1 %v12759_v48  ;;  %v13089_v26 = vadd.f32 %v21167_v56, %v18132_v41  ;;  %v9429_v4 = vsel %vm9141_vm15, %v13075_v36, %v9285_v7  ;;  %v9454_v13 = vsel %vm9166_vm2, %v13078_v33, %v9310_v2  ;;  %v9287_v51 = vmul.f32 0.2, %v13087_v49  ;;  %v21171_v2 = vld [vmem:[#allocation49_spill] sm:$0xff] }
 0x66d   : > { %10188 = vmatprep.mubr.f32.mxu0 %v9430_v11  ;;  %12764 = vmatpush3.bf16.msra.mxu0 %v12763_v35  ;;  %v9407_v11 = vsel %vm9119_vm1, %v13085_v58, %v9263_v31  ;;  %v21168_v48 = vpack.c.bf16 %v18554_v19, %v18549_v55  ;;  %vm9143_vm5 = vcmp.ge.f32.partialorder %v13087_v49, 0.0  ;;  %v9334_v50 = vmul.f32 0.2, %v13080_v18  ;;  %v21170_v35 = vld [vmem:[#allocation8_spill] sm:$0xff]  ;;  %v21177_v38 = vld [vmem:[#allocation21_spill] sm:$0xff] }
 0x66e   : > { %12794 = vmatprep.subr.bf16.mxu1 %v12793_v29  ;;  %v13092_v36 = vadd.f32 %v21170_v35, %v18232_v42  ;;  %v9432_v10 = vsel %vm9144_vm3, %v13088_v9, %v9288_v25  ;;  %v9453_v45 = vsel %vm9165_vm4, %v13077_v28, %v9309_v15  ;;  %vm9190_vm6 = vcmp.ge.f32.partialorder %v13080_v18, 0.0  ;;  %v21174_v28 = vld [vmem:[#allocation52_spill] sm:$0xff]  ;;  %v18891_v35 = vld [vmem:[%s20695_s7 + $0x5c8] sm:$0xff] }
 0x66f   : > { %12766 = vmatprep.subr.bf16.mxu0 %v21168_v48  ;;  %10279 = vmatmul.mubr.f32.vlgmr.msra.gmra.mrb[156].mxu1 %v9407_v11  ;;  %v9312_v29 = vmul.f32 0.2, %v13090_v61  ;;  %vm9168_vm7 = vcmp.ge.f32.partialorder %v13090_v61, 0.0  ;;  %v9333_v55 = vmul.f32 0.2, %v13079_v60  ;;  %v18812_v31 = vadd.f32 %v21171_v2, %v18254_v52  ;;  %v18826_v9 = vld [vmem:[%s20695_s7 + $0x440] sm:$0xff] }
 0x670   : > { %10189 = vmatmul.mubr.f32.gmra.mrb[158].mxu0 %v9429_v4  ;;  %10283 = vmatprep.mubr.f32.mxu1 %v9432_v10  ;;  %v9311_v19 = vmul.f32 0.2, %v13089_v26  ;;  %v21172_v58 = vpack.c.bf16 %v18586_v24, %v18581_v63  ;;  %v21173_v25 = vpack.c.bf16 %v18604_v14, %v18599_v1  ;;  %v9431_v15 = vsel %vm9143_vm5, %v13087_v49, %v9287_v51  ;;  %v18831_v63 = vld [vmem:[%s20695_s7 + $0x448] sm:$0xff]  ;;  %v18865_v4 = vld [vmem:[%s20695_s7 + $0x4d0] sm:$0xff]  ;;  %v18870_v11 = vld [vmem:[%s20695_s7 + $0x4d8] sm:$0xff] }
 0x671   : > { %10193 = vmatprep.mubr.f32.mxu0 %v9454_v13  ;;  %vm9189_vm8 = vcmp.ge.f32.partialorder %v13079_v60, 0.0  ;;  %vm9167_vm9 = vcmp.ge.f32.partialorder %v13089_v26, 0.0  ;;  %v13091_v33 = vadd.f32 %v21174_v28, %v18232_v42  ;;  %v21175_v24 = vpack.c.bf16 %v18621_v22, %v18609_v34  ;;  %v21178_v34 = vld [vmem:[#allocation36_spill] sm:$0xff] }
 0x672   : > { %12768 = vmatpush3.bf16.msra.mxu0 %v21172_v58  ;;  %12796 = vmatpush3.bf16.msra.mxu1 %v21173_v25  ;;  %v21176_v1 = vpack.c.bf16 %v18631_v53, %v18626_v30  ;;  %v9478_v14 = vsel %vm9190_vm6, %v13080_v18, %v9334_v50  ;;  %v9358_v49 = vmul.f32 0.2, %v13082_v16  ;;  %v9336_v7 = vmul.f32 0.2, %v13092_v36  ;;  %v18850_v30 = vld [vmem:[%s20695_s7 + $0x530] sm:$0xff]  ;;  %v18855_v53 = vld [vmem:[%s20695_s7 + $0x538] sm:$0xff] }
 0x673   : > { %12770 = vmatprep.subr.bf16.mxu0 %v21175_v24  ;;  %v13084_v27 = vadd.f32 %v21177_v38, %v18280_v20  ;;  %10284 = vmatmul.mubr.f32.gmra.mrb[158].mxu1 %v9431_v15  ;;  %v9456_v0 = vsel %vm9168_vm7, %v13090_v61, %v9312_v29  ;;  %vm9214_vm10 = vcmp.ge.f32.partialorder %v13082_v16, 0.0  ;;  %vm9192_vm11 = vcmp.ge.f32.partialorder %v13092_v36, 0.0  ;;  %v21181_v50 = vld [vmem:[#allocation18_spill] sm:$0xff]  ;;  %v18939_v15 = vld [vmem:[%s20695_s7 + $0x548] sm:$0xff]  ;;  %v18944_v28 = vld [vmem:[%s20695_s7 + $0x4e0] sm:$0xff] }
 0x674   : > { %12798 = vmatprep.subr.bf16.mxu1 %v21176_v1  ;;  %10194 = vmatmul.mubr.f32.gmra.mrb[160].mxu0 %v9453_v45  ;;  %v18845_v22 = vadd.f32 %v21178_v34, %v18254_v52  ;;  %v9477_v18 = vsel %vm9189_vm8, %v13079_v60, %v9333_v55  ;;  %v9455_v61 = vsel %vm9167_vm9, %v13089_v26, %v9311_v19  ;;  %vm9213_vm0 = vcmp.ge.f32.partialorder %v18812_v31, 0.0  ;;  %v18875_v60 = vld [vmem:[%s20695_s7 + $0x5c0] sm:$0xff]  ;;  %v21184_v45 = vld [vmem:[#allocation33_spill] sm:$0xff] }
 0x675   : > { %10198 = vmatprep.mubr.f32.mxu0 %v9478_v14  ;;  %10288 = vmatprep.mubr.f32.mxu1 %v9456_v0  ;;  %v12779_v56 = vpack.c.bf16 %v18831_v63, %v18826_v9  ;;  %v21179_v26 = vpack.c.bf16 %v18650_v8, %v18645_v44  ;;  %v21180_v13 = vpack.c.bf16 %v18667_v43, %v18655_v39  ;;  %v9357_v51 = vmul.f32 0.2, %v18812_v31  ;;  %v18927_v19 = vld [vmem:[%s20695_s7 + $0x540] sm:$0xff]  ;;  %v18949_v24 = vld [vmem:[%s20695_s7 + $0x4e8] sm:$0xff]  ;;  %v18966_v0 = vld [vmem:[%s20695_s7 + $0x5d0] sm:$0xff] }
 0x676   : > { %vm9191_vm12 = vcmp.ge.f32.partialorder %v13091_v33, 0.0  ;;  %v9335_v48 = vmul.f32 0.2, %v13091_v33  ;;  %v18886_v21 = vadd.f32 %v21181_v50, %v18280_v20  ;;  %v21182_v44 = vpack.c.bf16 %v18677_v23, %v18672_v62  ;;  %v21185_v62 = vld [vmem:[#allocation53_spill] sm:$0xff]  ;;  %v19064_v50 = vld [vmem:[%s20695_s7 + $0x5f0] sm:$0xff]  ;;  %v19098_v63 = vld [vmem:[%s20695_s7 + $0x578] sm:$0xff] }
 0x677   : > { %12772 = vmatpush3.bf16.msra.mxu0 %v21179_v26  ;;  %12800 = vmatpush3.bf16.msra.mxu1 %v21180_v13  ;;  %v21183_v8 = vpack.c.bf16 %v18696_v32, %v18691_v57  ;;  %v9502_v39 = vsel %vm9214_vm10, %v13082_v16, %v9358_v49  ;;  %v9480_v43 = vsel %vm9192_vm11, %v13092_v36, %v9336_v7  ;;  %v9382_v10 = vmul.f32 0.2, %v13084_v27  ;;  %v18913_v57 = vld [vmem:[%s20695_s7 + $0x450] sm:$0xff]  ;;  %v18918_v32 = vld [vmem:[%s20695_s7 + $0x458] sm:$0xff] }
 0x678   : > { %12774 = vmatprep.subr.bf16.mxu0 %v21182_v44  ;;  %v18903_v29 = vadd.f32 %v21184_v45, %v18254_v52  ;;  %10199 = vmatmul.mubr.f32.gmra.mrb[162].mxu0 %v9477_v18  ;;  %vm9238_vm13 = vcmp.ge.f32.partialorder %v13084_v27, 0.0  ;;  %v9360_v55 = vmul.f32 0.2, %v18845_v22  ;;  %v18908_v23 = vadd.f32 %v21185_v62, %v18280_v20  ;;  %v21186_v16 = vld [vmem:[#allocation55_spill] sm:$0xff]  ;;  %v19018_v18 = vld [vmem:[%s20695_s7 + $0x4f0] sm:$0xff]  ;;  %v19074_v44 = vld [vmem:[%s20695_s7 + $0x680] sm:$0xff] }
 0x679   : > { %12802 = vmatprep.subr.bf16.mxu1 %v21183_v8  ;;  %10289 = vmatmul.mubr.f32.gmra.mrb[160].mxu1 %v9455_v61  ;;  %v18922_v36 = vadd.f32 %v21186_v16, %v17766_v5  ;;  %vm9216_vm14 = vcmp.ge.f32.partialorder %v18845_v22, 0.0  ;;  %v12807_v2 = vpack.c.bf16 %v18855_v53, %v18850_v30  ;;  %v12781_v58 = vpack.c.bf16 %v18870_v11, %v18865_v4  ;;  %v18994_v30 = vld [vmem:[%s20695_s7 + $0x468] sm:$0xff]  ;;  %v19023_v61 = vld [vmem:[%s20695_s7 + $0x4f8] sm:$0xff]  ;;  %v19038_v11 = vld [vmem:[%s20695_s7 + $0x470] sm:$0xff] }
 0x67a   : > { %10203 = vmatprep.mubr.f32.mxu0 %v9502_v39  ;;  %10293 = vmatprep.mubr.f32.mxu1 %v9480_v43  ;;  %v12809_v25 = vpack.c.bf16 %v18891_v35, %v18875_v60  ;;  %v21187_v1 = vpack.c.bf16 %v18714_v6, %v18701_v37  ;;  %v21188_v14 = vpack.c.bf16 %v18724_v59, %v18719_v3  ;;  %vm9237_vm15 = vcmp.ge.f32.partialorder %v18886_v21, 0.0  ;;  %v18971_v37 = vld [vmem:[%s20695_s7 + $0x5d8] sm:$0xff]  ;;  %v18976_v6 = vld [vmem:[%s20695_s7 + $0x460] sm:$0xff]  ;;  %v19033_v4 = vld [vmem:[%s20695_s7 + $0x5e8] sm:$0xff] }
 0x67b   : > { %v9501_v49 = vsel %vm9213_vm0, %v18812_v31, %v9357_v51  ;;  %v9479_v7 = vsel %vm9191_vm12, %v13091_v33, %v9335_v48  ;;  %v9381_v38 = vmul.f32 0.2, %v18886_v21  ;;  %v21189_v3 = vpack.c.bf16 %v18752_v47, %v18741_v40  ;;  %v21190_v33 = vld [vmem:[#allocation35_spill] sm:$0xff]  ;;  %v18999_v40 = vld [vmem:[%s20695_s7 + $0x550] sm:$0xff]  ;;  %v19054_v51 = vld [vmem:[%s20695_s7 + $0x560] sm:$0xff] }
 0x67c   : > { %12776 = vmatpush3.bf16.msra.mxu0 %v21187_v1  ;;  %12804 = vmatpush3.bf16.msra.mxu1 %v21188_v14  ;;  %v9526_v59 = vsel %vm9238_vm13, %v13084_v27, %v9382_v10  ;;  %vm9215_vm1 = vcmp.ge.f32.partialorder %v18903_v29, 0.0  ;;  %v9359_v31 = vmul.f32 0.2, %v18903_v29  ;;  %v18989_v34 = vadd.f32 %v21190_v33, %v18280_v20  ;;  %v19004_v47 = vld [vmem:[%s20695_s7 + $0x558] sm:$0xff]  ;;  %v19059_v48 = vld [vmem:[%s20695_s7 + $0x568] sm:$0xff]  ;;  %v19093_v9 = vld [vmem:[%s20695_s7 + $0x570] sm:$0xff] }
 0x67d   : > { %12778 = vmatprep.subr.bf16.mxu0 %v21189_v3  ;;  %12806 = vmatprep.subr.bf16.mxu1 %v12805_v12  ;;  %v9504_v46 = vsel %vm9216_vm14, %v18845_v22, %v9360_v55  ;;  %v9384_v17 = vmul.f32 0.2, %v18908_v23  ;;  %v9266_v12 = vmul.f32 0.2, %v18922_v36  ;;  %v21191_v27 = vld [vmem:[#allocation15_spill] sm:$0xff]  ;;  %v19028_v22 = vld [vmem:[%s20695_s7 + $0x5e0] sm:$0xff]  ;;  %v12783_v26 = vpack.c.bf16 %v18918_v32, %v18913_v57 }
 0x67e   : > { %10204 = vmatmul.mubr.f32.gmra.mrb[164].mxu0 %v9501_v49  ;;  %10294 = vmatmul.mubr.f32.gmra.mrb[162].mxu1 %v9479_v7  ;;  %v19013_v53 = vadd.f32 %v21191_v27, %v17766_v5  ;;  %v19043_v60 = vld [vmem:[%s20695_s7 + $0x478] sm:$0xff]  ;;  %vm9240_vm2 = vcmp.ge.f32.partialorder %v18908_v23, 0.0  ;;  %vm9122_vm3 = vcmp.ge.f32.partialorder %v18922_v36, 0.0  ;;  %v12811_v13 = vpack.c.bf16 %v18939_v15, %v18927_v19  ;;  %v19088_v10 = vld [vmem:[%s20695_s7 + $0x688] sm:$0xff]  ;;  %v19112_v57 = vld [vmem:[%s20695_s7 + $0x600] sm:$0xff] }
 0x67f   : > { %10208 = vmatprep.mubr.f32.mxu0 %v9526_v59  ;;  %10298 = vmatprep.mubr.f32.mxu1 %v9504_v46  ;;  %v19069_v35 = vld [vmem:[%s20695_s7 + $0x5f8] sm:$0xff]  ;;  %v12785_v8 = vpack.c.bf16 %v18949_v24, %v18944_v28  ;;  %v12813_v39 = vpack.c.bf16 %v18971_v37, %v18966_v0  ;;  %v12787_v43 = vpack.c.bf16 %v18994_v30, %v18976_v6  ;;  %v9383_v55 = vmul.f32 0.2, %v18989_v34  ;;  %v19132_v16 = vld [vmem:[%s20695_s7 + $0x780] sm:$0xff]  ;;  %v19137_v19 = vld [vmem:[%s20695_s7 + $0x788] sm:$0xff] }
 0x680   : > { %12780 = vmatpush3.bf16.msra.mxu0 %v12779_v56  ;;  %12808 = vmatpush3.bf16.msra.mxu1 %v12807_v2  ;;  %v9525_v56 = vsel %vm9237_vm15, %v18886_v21, %v9381_v38  ;;  %v9503_v45 = vsel %vm9215_vm1, %v18903_v29, %v9359_v31  ;;  %v12815_v62 = vpack.c.bf16 %v19004_v47, %v18999_v40  ;;  %v19117_v21 = vld [vmem:[%s20695_s7 + $0x608] sm:$0xff]  ;;  %v19122_v29 = vld [vmem:[%s20695_s7 + $0x690] sm:$0xff]  ;;  %v19127_v32 = vld [vmem:[%s20695_s7 + $0x698] sm:$0xff]  ;;  %vm9239_vm4 = vcmp.ge.f32.partialorder %v18989_v34, 0.0  ;;  %v19189_v0 = vpop.f32.mrb[120].mxu0 }
 0x681   : > { %12782 = vmatprep.subr.bf16.mxu0 %v12781_v58  ;;  %12810 = vmatprep.subr.bf16.mxu1 %v12809_v25  ;;  %v9528_v2 = vsel %vm9240_vm2, %v18908_v23, %v9384_v17  ;;  %v9410_v58 = vsel %vm9122_vm3, %v18922_v36, %v9266_v12  ;;  %v9268_v25 = vmul.f32 0.2, %v19013_v53  ;;  %v19150_v15 = vld [vmem:[%s20695_s7 + $0x610] sm:$0xff]  ;;  %v19155_v28 = vld [vmem:[%s20695_s7 + $0x618] sm:$0xff]  ;;  %v19160_v23 = vld [vmem:[%s20695_s7 + $0x700] sm:$0xff]  ;;  %vm9124_vm5 = vcmp.ge.f32.partialorder %v19013_v53, 0.0 }
 0x682   : > { %10209 = vmatmul.mubr.f32.gmra.mrb[166].mxu0 %v9525_v56  ;;  %10299 = vmatmul.mubr.f32.gmra.mrb[164].mxu1 %v9503_v45  ;;  %v19165_v36 = vld [vmem:[%s20695_s7 + $0x708] sm:$0xff]  ;;  %v12789_v24 = vpack.c.bf16 %v19023_v61, %v19018_v18  ;;  %v12817_v1 = vpack.c.bf16 %v19033_v4, %v19028_v22  ;;  %v19177_v49 = vld [vmem:[%s20695_s7 + $0x6a0] sm:$0xff]  ;;  %v19187_v38 = vld [vmem:[%s20695_s7 + $0x790] sm:$0xff]  ;;  %21192 = vst [vmem:[#allocation23_spill] sm:$0xff] %v19189_v0  ;;  %v19215_v46 = vpop.f32.mrb[121].mxu0 }
 0x683   : > { %10303 = vmatprep.mubr.f32.mxu1 %v9528_v2  ;;  %10373 = vmatprep.mubr.f32.mxu0 %v9410_v58  ;;  %v19182_v7 = vld [vmem:[%s20695_s7 + $0x6a8] sm:$0xff]  ;;  %v12819_v37 = vpack.c.bf16 %v19059_v48, %v19054_v51  ;;  %v19200_v31 = vld [vmem:[%s20695_s7 + $0x798] sm:$0xff]  ;;  %v19205_v33 = vld [vmem:[%s20695_s7 + $0x620] sm:$0xff]  ;;  %v9527_v47 = vsel %vm9239_vm4, %v18989_v34, %v9383_v55  ;;  %v9412_v22 = vsel %vm9124_vm5, %v19013_v53, %v9268_v25  ;;  %v19239_v4 = vpop.f32.mrb[122].mxu0 }
 0x684   : > { %12784 = vmatpush3.bf16.msra.mxu0 %v12783_v26  ;;  %12812 = vmatpush3.bf16.msra.mxu1 %v12811_v13  ;;  %v19210_v40 = vld [vmem:[%s20695_s7 + $0x628] sm:$0xff]  ;;  %v19224_v18 = vld [vmem:[%s20695_s7 + $0x710] sm:$0xff]  ;;  %v19229_v61 = vld [vmem:[%s20695_s7 + $0x718] sm:$0xff]  ;;  %21194 = vst [vmem:[#allocation25_spill] sm:$0xff] %v19239_v4 }
 0x685   : > { %12786 = vmatprep.subr.bf16.mxu0 %v12785_v8  ;;  %12814 = vmatprep.subr.bf16.mxu1 %v12813_v39  ;;  %v21193_v17 = vld [vmem:[#allocation45_spill] sm:$0xff]  ;;  %v19234_v34 = vld [vmem:[%s20695_s7 + $0x6b0] sm:$0xff]  ;;  %v19250_v48 = vld [vmem:[%s20695_s7 + $0x6b8] sm:$0xff]  ;;  %v19262_v39 = vpop.f32.mrb[123].mxu0 }
 0x686   : > { %v13097_v12 = vadd.f32 %v21193_v17, %v17766_v5  ;;  %10304 = vmatmul.mubr.f32.gmra.mrb[166].mxu1 %v9527_v47  ;;  %v19255_v53 = vld [vmem:[%s20695_s7 + $0x7a0] sm:$0xff]  ;;  %v19260_v8 = vld [vmem:[%s20695_s7 + $0x7a8] sm:$0xff]  ;;  %21195 = vst [vmem:[#allocation43_spill] sm:$0xff] %v19262_v39  ;;  %v19275_v25 = vld [vmem:[%s20695_s7 + $0x630] sm:$0xff] }
 0x687   : > { %10468 = vmatprep.mubr.f32.mxu1 %v9412_v22  ;;  %v21196_v56 = vld [vmem:[#allocation57_spill] sm:$0xff]  ;;  %v19280_v47 = vld [vmem:[%s20695_s7 + $0x638] sm:$0xff]  ;;  %v19285_v17 = vld [vmem:[%s20695_s7 + $0x720] sm:$0xff]  ;;  %v19290_v22 = vpop.f32.mrb[120].mxu1 }
 0x688   : > { %v13100_v45 = vadd.f32 %v21196_v56, %v18083_v54  ;;  %12788 = vmatpush3.bf16.msra.mxu0 %v12787_v43  ;;  %12816 = vmatpush3.bf16.msra.mxu1 %v12815_v62  ;;  %21197 = vst [vmem:[#allocation44_spill] sm:$0xff] %v19290_v22  ;;  %v21198_v56 = vld [vmem:[#allocation56_spill] sm:$0xff]  ;;  %v19301_v13 = vld [vmem:[%s20695_s7 + $0x728] sm:$0xff]  ;;  %v19313_v43 = vpop.f32.mrb[121].mxu1  ;;  %v9265_v62 = vmul.f32 0.2, %v13097_v12 }
 0x689   : > { %v13099_v58 = vadd.f32 %v21198_v56, %v18083_v54  ;;  %v19306_v6 = vld [vmem:[%s20695_s7 + $0x6c0] sm:$0xff]  ;;  %v19311_v30 = vld [vmem:[%s20695_s7 + $0x6c8] sm:$0xff]  ;;  %12790 = vmatprep.subr.bf16.mxu0 %v12789_v24  ;;  %12818 = vmatprep.subr.bf16.mxu1 %v12817_v1  ;;  %v21199_v56 = vld [vmem:[#allocation46_spill] sm:$0xff]  ;;  %v19331_v1 = vpop.f32.mrb[122].mxu1  ;;  %vm9121_vm6 = vcmp.ge.f32.partialorder %v13097_v12, 0.0 }
 0x68a   : > { %v13109_v55 = vadd.f32 %v21199_v56, %v17766_v5  ;;  %v19324_v26 = vld [vmem:[%s20695_s7 + $0x7b0] sm:$0xff]  ;;  %v19329_v24 = vld [vmem:[%s20695_s7 + $0x7b8] sm:$0xff]  ;;  %21200 = vst [vmem:[#allocation9_spill] sm:$0xff] %v19331_v1  ;;  %v21202_v2 = vld [vmem:[#allocation37_spill] sm:$0xff]  ;;  %v19339_v3 = vpop.f32.mrb[123].mxu1  ;;  %vm9146_vm7 = vcmp.ge.f32.partialorder %v13100_v45, 0.0  ;;  %v9409_v1 = vsel %vm9121_vm6, %v13097_v12, %v9265_v62 }
 0x68b   : > { %v21201_v56 = vld [vmem:[#allocation47_spill] sm:$0xff]  ;;  %v13112_v59 = vadd.f32 %v21202_v2, %v18083_v54  ;;  %21203 = vst [vmem:[#allocation14_spill] sm:$0xff] %v19339_v3  ;;  %v9290_v14 = vmul.f32 0.2, %v13100_v45  ;;  %v19350_v2 = vpop.f32.mrb[124].mxu0  ;;  %v21206_v3 = vld [vmem:[#allocation40_spill] sm:$0xff] }
 0x68c   : > { %v13102_v27 = vadd.f32 %v21201_v56, %v18132_v41  ;;  %v21204_v56 = vpack.c.bf16 %v19043_v60, %v19038_v11  ;;  %12820 = vmatpush3.bf16.msra.mxu1 %v12819_v37  ;;  %21205 = vst [vmem:[#allocation10_spill] sm:$0xff] %v19350_v2  ;;  %v9289_v51 = vmul.f32 0.2, %v13099_v58  ;;  %v13101_v22 = vadd.f32 %v21206_v3, %v18132_v41  ;;  %v19359_v4 = vld [vmem:[%s20695_s7 + $0x640] sm:$0xff]  ;;  %v19368_v37 = vpop.f32.mrb[125].mxu0  ;;  %v19389_v0 = vpop.f32.mrb[124].mxu1 }
 0x68d   : > { %v21207_v11 = vpack.c.bf16 %v19069_v35, %v19064_v50  ;;  %v21208_v60 = vpack.c.bf16 %v19088_v10, %v19074_v44  ;;  %21209 = vst [vmem:[#allocation5_spill] sm:$0xff] %v19368_v37  ;;  %vm9145_vm8 = vcmp.ge.f32.partialorder %v13099_v58, 0.0  ;;  %vm9123_vm9 = vcmp.ge.f32.partialorder %v13109_v55, 0.0  ;;  %v19375_v39 = vpop.f32.mrb[126].mxu0  ;;  %v21211_v50 = vld [vmem:[#allocation32_spill] sm:$0xff]  ;;  %v21212_v44 = vld [vmem:[#allocation39_spill] sm:$0xff] }
 0x68e   : > { %12792 = vmatpush3.bf16.msra.mxu0 %v21204_v56  ;;  %v9267_v3 = vmul.f32 0.2, %v13109_v55  ;;  %v19373_v56 = vld [vmem:[%s20695_s7 + $0x648] sm:$0xff]  ;;  %21210 = vst [vmem:[#allocation59_spill] sm:$0xff] %v19375_v39  ;;  %v9314_v12 = vmul.f32 0.2, %v13102_v27  ;;  %v13111_v35 = vadd.f32 %v21211_v50, %v18083_v54  ;;  %v13104_v10 = vadd.f32 %v21212_v44, %v18232_v42 }
 0x68f   : > { %12822 = vmatprep.subr.bf16.mxu1 %v21207_v11  ;;  %12826 = vmatprep.subr.bf16.mxu0 %v21208_v60  ;;  %v9292_v62 = vmul.f32 0.2, %v13112_v59  ;;  %v9434_v11 = vsel %vm9146_vm7, %v13100_v45, %v9290_v14  ;;  %v19382_v60 = vpop.f32.mrb[127].mxu0  ;;  %vm9170_vm10 = vcmp.ge.f32.partialorder %v13102_v27, 0.0  ;;  %vm9148_vm11 = vcmp.ge.f32.partialorder %v13112_v59, 0.0  ;;  %v21214_v37 = vld [vmem:[#allocation7_spill] sm:$0xff] }
 0x690   : > { %21213 = vst [vmem:[#allocation54_spill] sm:$0xff] %v19382_v60  ;;  %v13114_v2 = vadd.f32 %v21214_v37, %v18132_v41  ;;  %v21215_v39 = vpack.c.bf16 %v19098_v63, %v19093_v9  ;;  %v9433_v50 = vsel %vm9145_vm8, %v13099_v58, %v9289_v51  ;;  %v9313_v44 = vmul.f32 0.2, %v13101_v22  ;;  %v19403_v63 = vpop.f32.mrb[125].mxu1  ;;  %v21219_v51 = vld [vmem:[#allocation41_spill] sm:$0xff]  ;;  %v21220_v58 = vld [vmem:[#allocation63_spill] sm:$0xff] }
 0x691   : > { %10374 = vmatmul.mubr.f32.vlgmr.msra.gmra.mrb[168].mxu0 %v9409_v1  ;;  %v21216_v1 = vld [vmem:[#allocation38_spill] sm:$0xff]  ;;  %v12843_v45 = vpack.c.bf16 %v19373_v56, %v19359_v4  ;;  %v21217_v60 = vpack.c.bf16 %v19117_v21, %v19112_v57  ;;  %v9411_v37 = vsel %vm9123_vm9, %v13109_v55, %v9267_v3  ;;  %v21218_v9 = vpack.c.bf16 %v19137_v19, %v19132_v16  ;;  %v19414_v55 = vpop.f32.mrb[126].mxu1 }
 0x692   : > { %10378 = vmatprep.mubr.f32.mxu0 %v9434_v11  ;;  %12824 = vmatpush3.bf16.msra.mxu1 %v21215_v39  ;;  %v13103_v14 = vadd.f32 %v21216_v1, %v18232_v42  ;;  %vm9169_vm0 = vcmp.ge.f32.partialorder %v13101_v22, 0.0  ;;  %v13113_v39 = vadd.f32 %v21219_v51, %v18132_v41  ;;  %v13106_v11 = vadd.f32 %v21220_v58, %v18254_v52  ;;  %v19416_v3 = vpop.f32.mrb[127].mxu1  ;;  %v9779_v4 = vld [vmem:[%s20695_s7 + $0x750] sm:$0xff] }
 0x693   : > { %12828 = vmatpush3.bf16.msra.mxu0 %v21217_v60  ;;  %12858 = vmatprep.subr.bf16.mxu1 %v21218_v9  ;;  %v21221_v1 = vpack.c.bf16 %v19127_v32, %v19122_v29  ;;  %v9458_v57 = vsel %vm9170_vm10, %v13102_v27, %v9314_v12  ;;  %v9436_v21 = vsel %vm9148_vm11, %v13112_v59, %v9292_v62  ;;  %v9291_v16 = vmul.f32 0.2, %v13111_v35  ;;  %v21222_v9 = vld [vmem:[#allocation48_spill] sm:$0xff]  ;;  %v19420_v29 = vpop.f32.mrb[128].mxu0  ;;  %v19426_v27 = vld [vmem:[%s20695_s7 + $0x730] sm:$0xff] }
 0x694   : > { %v9338_v19 = vmul.f32 0.2, %v13104_v10  ;;  %vm9147_vm12 = vcmp.ge.f32.partialorder %v13111_v35, 0.0  ;;  %vm9194_vm13 = vcmp.ge.f32.partialorder %v13104_v10, 0.0  ;;  %v9316_v60 = vmul.f32 0.2, %v13114_v2 }
 0x695   : > { %12830 = vmatprep.subr.bf16.mxu0 %v21221_v1  ;;  %10379 = vmatmul.mubr.f32.gmra.mrb[170].mxu0 %v9433_v50  ;;  %v13116_v51 = vadd.f32 %v21222_v9, %v18232_v42  ;;  %v9457_v32 = vsel %vm9169_vm0, %v13101_v22, %v9313_v44  ;;  %vm9172_vm14 = vcmp.ge.f32.partialorder %v13114_v2, 0.0  ;;  %vm9193_vm15 = vcmp.ge.f32.partialorder %v13103_v14, 0.0  ;;  %v19434_v50 = vpop.f32.mrb[129].mxu0  ;;  %v21225_v44 = vld [vmem:[#allocation50_spill] sm:$0xff]  ;;  %v21226_v1 = vld [vmem:[#allocation19_spill] sm:$0xff] }
 0x696   : > { %10469 = vmatmul.mubr.f32.vlgmr.msra.gmra.mrb[168].mxu1 %v9411_v37  ;;  %10383 = vmatprep.mubr.f32.mxu0 %v9458_v57  ;;  %v9337_v59 = vmul.f32 0.2, %v13103_v14  ;;  %v21223_v12 = vpack.c.bf16 %v19155_v28, %v19150_v15  ;;  %v21224_v62 = vpack.c.bf16 %v19165_v36, %v19160_v23  ;;  %v9315_v37 = vmul.f32 0.2, %v13113_v39  ;;  %v19453_v9 = vpop.f32.mrb[130].mxu0 }
 0x697   : > { %10473 = vmatprep.mubr.f32.mxu1 %v9436_v21  ;;  %v9362_v22 = vmul.f32 0.2, %v13106_v11  ;;  %v13105_v58 = vadd.f32 %v21225_v44, %v18254_v52  ;;  %v13115_v57 = vadd.f32 %v21226_v1, %v18232_v42  ;;  %v19443_v21 = vld [vmem:[%s20695_s7 + $0x738] sm:$0xff]  ;;  %v9435_v15 = vsel %vm9147_vm12, %v13111_v35, %v9291_v16  ;;  %v19484_v1 = vld [vmem:[%s20695_s7 + $0x7c0] sm:$0xff] }
 0x698   : > { %12832 = vmatpush3.bf16.msra.mxu0 %v21223_v12  ;;  %12860 = vmatpush3.bf16.msra.mxu1 %v21224_v62  ;;  %v21227_v28 = vpack.c.bf16 %v19182_v7, %v19177_v49  ;;  %v21228_v23 = vpack.c.bf16 %v19200_v31, %v19187_v38  ;;  %v9482_v36 = vsel %vm9194_vm13, %v13104_v10, %v9338_v19  ;;  %vm9171_vm1 = vcmp.ge.f32.partialorder %v13113_v39, 0.0  ;;  %v19456_v62 = vpop.f32.mrb[131].mxu0  ;;  %v21229_v49 = vld [vmem:[#allocation65_spill] sm:$0xff]  ;;  %v21230_v16 = vld [vmem:[#allocation67_spill] sm:$0xff]  ;;  %v19466_v19 = vpop.f32.mrb[128].mxu1 }
 0x699   : > { %vm9218_vm2 = vcmp.ge.f32.partialorder %v13106_v11, 0.0  ;;  %10384 = vmatmul.mubr.f32.gmra.mrb[172].mxu0 %v9457_v32  ;;  %v9460_v12 = vsel %vm9172_vm14, %v13114_v2, %v9316_v60  ;;  %v9340_v35 = vmul.f32 0.2, %v13116_v51  ;;  %v13108_v7 = vadd.f32 %v21229_v49, %v18280_v20  ;;  %v21231_v31 = vld [vmem:[#allocation71_spill] sm:$0xff]  ;;  %v19474_v60 = vld [vmem:[%s20695_s7 + $0x6d0] sm:$0xff]  ;;  %v19499_v49 = vld [vmem:[%s20695_s7 + $0x7c8] sm:$0xff] }
 0x69a   : > { %12834 = vmatprep.subr.bf16.mxu0 %v21227_v28  ;;  %12862 = vmatprep.subr.bf16.mxu1 %v21228_v23  ;;  %v13118_v38 = vadd.f32 %v21230_v16, %v18254_v52  ;;  %v19464_v10 = vadd.f32 %v21231_v31, %v17766_v5  ;;  %v9481_v32 = vsel %vm9193_vm15, %v13103_v14, %v9337_v59  ;;  %vm9196_vm3 = vcmp.ge.f32.partialorder %v13116_v51, 0.0  ;;  %v19479_v44 = vld [vmem:[%s20695_s7 + $0x6d8] sm:$0xff]  ;;  %v19493_v28 = vpop.f32.mrb[129].mxu1 }
 0x69b   : > { %10474 = vmatmul.mubr.f32.gmra.mrb[170].mxu1 %v9435_v15  ;;  %10388 = vmatprep.mubr.f32.mxu0 %v9482_v36  ;;  %v12871_v2 = vpack.c.bf16 %v19443_v21, %v19426_v27  ;;  %v21232_v14 = vpack.c.bf16 %v19210_v40, %v19205_v33  ;;  %v21233_v59 = vpack.c.bf16 %v19229_v61, %v19224_v18  ;;  %v9361_v36 = vmul.f32 0.2, %v13105_v58  ;;  %v19507_v18 = vpop.f32.mrb[130].mxu1  ;;  %v21237_v61 = vld [vmem:[#allocation64_spill] sm:$0xff] }
 0x69c   : > { %10478 = vmatprep.mubr.f32.mxu1 %v9460_v12  ;;  %v9459_v15 = vsel %vm9171_vm1, %v13113_v39, %v9315_v37  ;;  %v9506_v23 = vsel %vm9218_vm2, %v13106_v11, %v9362_v22  ;;  %v9339_v12 = vmul.f32 0.2, %v13115_v57  ;;  %v21234_v33 = vpack.c.bf16 %v19250_v48, %v19234_v34  ;;  %21236 = vst [vmem:[#allocation11_spill] sm:$0xff] %v19507_v18  ;;  %v21238_v11 = vld [vmem:[#allocation66_spill] sm:$0xff]  ;;  %v19514_v34 = vpop.f32.mrb[131].mxu1 }
 0x69d   : > { %12836 = vmatpush3.bf16.msra.mxu0 %v21232_v14  ;;  %12864 = vmatpush3.bf16.msra.mxu1 %v21233_v59  ;;  %v21235_v40 = vpack.c.bf16 %v19260_v8, %v19255_v53  ;;  %vm9217_vm4 = vcmp.ge.f32.partialorder %v13105_v58, 0.0  ;;  %vm9195_vm5 = vcmp.ge.f32.partialorder %v13115_v57, 0.0  ;;  %v13107_v39 = vadd.f32 %v21237_v61, %v18280_v20  ;;  %v21239_v53 = vld [vmem:[#allocation69_spill] sm:$0xff]  ;;  %v21240_v59 = vld [vmem:[#allocation75_spill] sm:$0xff] }
 0x69e   : > { %12838 = vmatprep.subr.bf16.mxu0 %v21234_v33  ;;  %v13117_v37 = vadd.f32 %v21238_v11, %v18254_v52  ;;  %10389 = vmatmul.mubr.f32.gmra.mrb[174].mxu0 %v9481_v32  ;;  %v9484_v22 = vsel %vm9196_vm3, %v13116_v51, %v9340_v35  ;;  %v9386_v48 = vmul.f32 0.2, %v13108_v7  ;;  %v9364_v16 = vmul.f32 0.2, %v13118_v38  ;;  %v19525_v51 = vld [vmem:[%s20695_s7 + $0x650] sm:$0xff]  ;;  %v19530_v35 = vld [vmem:[%s20695_s7 + $0x658] sm:$0xff] }
 0x69f   : > { %12866 = vmatprep.subr.bf16.mxu1 %v21235_v40  ;;  %10479 = vmatmul.mubr.f32.gmra.mrb[172].mxu1 %v9459_v15  ;;  %v13120_v8 = vadd.f32 %v21239_v53, %v18280_v20  ;;  %vm9242_vm6 = vcmp.ge.f32.partialorder %v13108_v7, 0.0  ;;  %vm9220_vm7 = vcmp.ge.f32.partialorder %v13118_v38, 0.0  ;;  %v12845_v31 = vpack.c.bf16 %v19479_v44, %v19474_v60  ;;  %v9778_v33 = vld [vmem:[%s20695_s7 + $0x748] sm:$0xff]  ;;  %v9767_v53 = vld [vmem:[%s20695_s7 + $0x6f0] sm:$0xff] }
 0x6a0   : > { %10393 = vmatprep.mubr.f32.mxu0 %v9506_v23  ;;  %10483 = vmatprep.mubr.f32.mxu1 %v9484_v22  ;;  %v12873_v32 = vpack.c.bf16 %v19499_v49, %v19484_v1  ;;  %v9270_v14 = vmul.f32 0.2, %v19464_v10  ;;  %v19535_v15 = vadd.f32 %v21240_v59, %v17766_v5  ;;  %v21241_v60 = vpack.c.bf16 %v19280_v47, %v19275_v25  ;;  %v9777_v49 = vld [vmem:[%s20695_s7 + $0x740] sm:$0xff]  ;;  %v21247_v59 = vld [vmem:[#allocation74_spill] sm:$0xff] }
 0x6a1   : > { %v21242_v44 = vpack.c.bf16 %v19301_v13, %v19285_v17  ;;  %v9505_v1 = vsel %vm9217_vm4, %v13105_v58, %v9361_v36  ;;  %v9483_v23 = vsel %vm9195_vm5, %v13115_v57, %v9339_v12  ;;  %v19554_v25 = vld [vmem:[%s20695_s7 + $0x6e0] sm:$0xff]  ;;  %v21243_v13 = vpack.c.bf16 %v19311_v30, %v19306_v6  ;;  %v9766_v12 = vld [vmem:[%s20695_s7 + $0x6e8] sm:$0xff] }
 0x6a2   : > { %12840 = vmatpush3.bf16.msra.mxu0 %v21241_v60  ;;  %v21244_v47 = vpack.c.bf16 %v19329_v24, %v19324_v26  ;;  %vm9241_vm8 = vcmp.ge.f32.partialorder %v13107_v39, 0.0  ;;  %v9385_v17 = vmul.f32 0.2, %v13107_v39  ;;  %v9363_v58 = vmul.f32 0.2, %v13117_v37  ;;  %v21245_v57 = vld [vmem:[#allocation68_spill] sm:$0xff] }
 0x6a3   : > { %12868 = vmatpush3.bf16.msra.mxu1 %v21242_v44  ;;  %12842 = vmatprep.subr.bf16.mxu0 %v21243_v13  ;;  %v13119_v36 = vadd.f32 %v21245_v57, %v18280_v20  ;;  %v9530_v40 = vsel %vm9242_vm6, %v13108_v7, %v9386_v48  ;;  %v9508_v6 = vsel %vm9220_vm7, %v13118_v38, %v9364_v16  ;;  %vm9219_vm9 = vcmp.ge.f32.partialorder %v13117_v37, 0.0  ;;  %v9795_v26 = vld [vmem:[%s20695_s7 + $0x7d0] sm:$0xff]  ;;  %v9796_v24 = vld [vmem:[%s20695_s7 + $0x7d8] sm:$0xff]  ;;  %v9749_v48 = vld [vmem:[%s20695_s7 + $0x660] sm:$0xff] }
 0x6a4   : > { %12870 = vmatprep.subr.bf16.mxu1 %v21244_v47  ;;  %10394 = vmatmul.mubr.f32.gmra.mrb[176].mxu0 %v9505_v1  ;;  %v9388_v30 = vmul.f32 0.2, %v13120_v8  ;;  %vm9244_vm10 = vcmp.ge.f32.partialorder %v13120_v8, 0.0  ;;  %v12847_v61 = vpack.c.bf16 %v19530_v35, %v19525_v51  ;;  %vm9126_vm11 = vcmp.ge.f32.partialorder %v19464_v10, 0.0  ;;  %v21246_v7 = vld [vmem:[#allocation70_spill] sm:$0xff]  ;;  %v9750_v16 = vld [vmem:[%s20695_s7 + $0x668] sm:$0xff] }
 0x6a5   : > { %10484 = vmatmul.mubr.f32.gmra.mrb[174].mxu1 %v9483_v23  ;;  %10398 = vmatprep.mubr.f32.mxu0 %v9530_v40  ;;  %v13121_v38 = vadd.f32 %v21246_v7, %v17766_v5  ;;  %v12875_v11 = vpack.c.bf16 %v9778_v33, %v9777_v49  ;;  %v12849_v22 = vpack.c.bf16 %v9766_v12, %v19554_v25  ;;  %v9387_v27 = vmul.f32 0.2, %v13119_v36  ;;  %v9768_v51 = vld [vmem:[%s20695_s7 + $0x6f8] sm:$0xff]  ;;  %v9798_v35 = vld [vmem:[%s20695_s7 + $0x7e8] sm:$0xff]  ;;  %v21248_v1 = vld [vmem:[#allocation72_spill] sm:$0xff] }
 0x6a6   : > { %10488 = vmatprep.mubr.f32.mxu1 %v9508_v6  ;;  %12844 = vmatpush3.bf16.msra.mxu0 %v12843_v45  ;;  %v9529_v56 = vsel %vm9241_vm8, %v13107_v39, %v9385_v17  ;;  %v9507_v45 = vsel %vm9219_vm9, %v13117_v37, %v9363_v58  ;;  %v12877_v21 = vpack.c.bf16 %v9796_v24, %v9795_v26  ;;  %v9272_v39 = vmul.f32 0.2, %v19535_v15  ;;  %v9781_v25 = vld [vmem:[%s20695_s7 + $0x760] sm:$0xff]  ;;  %v9782_v13 = vld [vmem:[%s20695_s7 + $0x768] sm:$0xff]  ;;  %v9799_v12 = vld [vmem:[%s20695_s7 + $0x7f0] sm:$0xff] }
 0x6a7   : > { %12872 = vmatpush3.bf16.msra.mxu1 %v12871_v2  ;;  %12846 = vmatprep.subr.bf16.mxu0 %v12845_v31  ;;  %v9780_v2 = vld [vmem:[%s20695_s7 + $0x758] sm:$0xff]  ;;  %v9532_v37 = vsel %vm9244_vm10, %v13120_v8, %v9388_v30  ;;  %v9414_v31 = vsel %vm9126_vm11, %v19464_v10, %v9270_v14  ;;  %vm9243_vm0 = vcmp.ge.f32.partialorder %v13119_v36, 0.0  ;;  %v19620_v60 = vadd.f32 %v21247_v59, %v17766_v5  ;;  %v9751_v10 = vld [vmem:[%s20695_s7 + $0x670] sm:$0xff]  ;;  %v21249_v47 = vld [vmem:[#allocation73_spill] sm:$0xff] }
 0x6a8   : > { %12874 = vmatprep.subr.bf16.mxu1 %v12873_v32  ;;  %10399 = vmatmul.mubr.f32.gmra.mrb[178].mxu0 %v9529_v56  ;;  %v9797_v32 = vld [vmem:[%s20695_s7 + $0x7e0] sm:$0xff]  ;;  %v12851_v8 = vpack.c.bf16 %v9750_v16, %v9749_v48  ;;  %vm9128_vm12 = vcmp.ge.f32.partialorder %v19535_v15, 0.0  ;;  %v9752_v14 = vld [vmem:[%s20695_s7 + $0x678] sm:$0xff]  ;;  %v9269_v44 = vmul.f32 0.2, %v13121_v38  ;;  %v19631_v23 = vadd.f32 %v21248_v1, %v18083_v54  ;;  %v21251_v7 = vld [vmem:[#allocation77_spill] sm:$0xff] }
 0x6a9   : > { %10489 = vmatmul.mubr.f32.gmra.mrb[176].mxu1 %v9507_v45  ;;  %10563 = vmatprep.mubr.f32.mxu0 %v9414_v31  ;;  %v12879_v49 = vpack.c.bf16 %v9780_v2, %v9779_v4  ;;  %v12853_v33 = vpack.c.bf16 %v9768_v51, %v9767_v53  ;;  %vm9125_vm13 = vcmp.ge.f32.partialorder %v13121_v38, 0.0  ;;  %v19641_v17 = vadd.f32 %v21249_v47, %v18083_v54  ;;  %v21250_v40 = vld [vmem:[#allocation76_spill] sm:$0xff]  ;;  %v21253_v45 = vld [vmem:[#allocation79_spill] sm:$0xff]  ;;  %v21254_v2 = vld [vmem:[#allocation82_spill] sm:$0xff] }
 0x6aa   : > { %10493 = vmatprep.mubr.f32.mxu1 %v9532_v37  ;;  %12848 = vmatpush3.bf16.msra.mxu0 %v12847_v61  ;;  %v9531_v58 = vsel %vm9243_vm0, %v13119_v36, %v9387_v27  ;;  %v12881_v57 = vpack.c.bf16 %v9798_v35, %v9797_v32  ;;  %v19649_v6 = vadd.f32 %v21250_v40, %v18083_v54  ;;  %v9800_v36 = vld [vmem:[%s20695_s7 + $0x7f8] sm:$0xff]  ;;  %v9817_v24 = vld [vmem:[%s20695_s7 + $0x880] sm:$0xff]  ;;  %v9818_v61 = vld [vmem:[%s20695_s7 + $0x888] sm:$0xff]  ;;  %vm9127_vm14 = vcmp.ge.f32.partialorder %v19620_v60, 0.0 }
 0x6ab   : > { %12876 = vmatpush3.bf16.msra.mxu1 %v12875_v11  ;;  %12850 = vmatprep.subr.bf16.mxu0 %v12849_v22  ;;  %v9416_v30 = vsel %vm9128_vm12, %v19535_v15, %v9272_v39  ;;  %v12855_v26 = vpack.c.bf16 %v9752_v14, %v9751_v10  ;;  %v19666_v11 = vadd.f32 %v21251_v7, %v18083_v54  ;;  %v21252_v15 = vld [vmem:[#allocation78_spill] sm:$0xff]  ;;  %v19674_v4 = vmul.f32 0.2, %v19631_v23  ;;  %v9784_v37 = vld [vmem:[%s20695_s7 + $0x778] sm:$0xff]  ;;  %v9801_v31 = vld [vmem:[%s20695_s7 + $0x800] sm:$0xff] }
 0x6ac   : > { %12878 = vmatprep.subr.bf16.mxu1 %v12877_v21  ;;  %v19670_v22 = vadd.f32 %v21252_v15, %v18132_v41  ;;  %v12883_v48 = vpack.c.bf16 %v9782_v13, %v9781_v25  ;;  %v9413_v16 = vsel %vm9125_vm13, %v13121_v38, %v9269_v44  ;;  %v9271_v56 = vmul.f32 0.2, %v19620_v60  ;;  %v9783_v39 = vld [vmem:[%s20695_s7 + $0x770] sm:$0xff]  ;;  %v21255_v35 = vld [vmem:[#allocation80_spill] sm:$0xff]  ;;  %v21257_v14 = vld [vmem:[#allocation83_spill] sm:$0xff] }
 0x6ad   : > { %10494 = vmatmul.mubr.f32.gmra.mrb[178].mxu1 %v9531_v58  ;;  %v19679_v27 = vadd.f32 %v21253_v45, %v18132_v41  ;;  %v9294_v21 = vmul.f32 0.2, %v19641_v17  ;;  %v19684_v53 = vadd.f32 %v21254_v2, %v18132_v41  ;;  %v12885_v38 = vpack.c.bf16 %v9800_v36, %v9799_v12  ;;  %v9802_v1 = vld [vmem:[%s20695_s7 + $0x808] sm:$0xff]  ;;  %v21258_v47 = vld [vmem:[#allocation84_spill] sm:$0xff]  ;;  %v9819_v40 = vld [vmem:[%s20695_s7 + $0x890] sm:$0xff] }
 0x6ae   : > { %10658 = vmatprep.mubr.f32.mxu1 %v9416_v30  ;;  %12852 = vmatpush3.bf16.msra.mxu0 %v12851_v8  ;;  %v12889_v51 = vpack.c.bf16 %v9818_v61, %v9817_v24  ;;  %v19696_v32 = vmul.f32 0.2, %v19649_v6  ;;  %v19700_v59 = vadd.f32 %v21255_v35, %v18232_v42  ;;  %v21256_v8 = vld [vmem:[#allocation81_spill] sm:$0xff]  ;;  %v19708_v44 = vadd.f32 %v21257_v14, %v18132_v41  ;;  %v9820_v30 = vld [vmem:[%s20695_s7 + $0x898] sm:$0xff]  ;;  %v9803_v7 = vld [vmem:[%s20695_s7 + $0x810] sm:$0xff] }
 0x6af   : > { %12880 = vmatpush3.bf16.msra.mxu1 %v12879_v49  ;;  %12854 = vmatprep.subr.bf16.mxu0 %v12853_v33  ;;  %v19704_v10 = vadd.f32 %v21256_v8, %v18232_v42  ;;  %v9849_v49 = vld [vmem:[%s20695_s7 + $0x980] sm:$0xff]  ;;  %v9850_v33 = vld [vmem:[%s20695_s7 + $0x988] sm:$0xff]  ;;  %v9296_v25 = vmul.f32 0.2, %v19666_v11  ;;  %v19721_v13 = vmul.f32 0.2, %v19670_v22  ;;  %v19725_v58 = vadd.f32 %v21258_v47, %v18232_v42 }
 0x6b0   : > { %12882 = vmatprep.subr.bf16.mxu1 %v12881_v57  ;;  %v21259_v57 = vld [vmem:[#allocation85_spill] sm:$0xff]  ;;  %v9415_v36 = vsel %vm9127_vm14, %v19620_v60, %v9271_v56  ;;  %v9318_v24 = vmul.f32 0.2, %v19679_v27  ;;  %vm9150_vm15 = vcmp.ge.f32.partialorder %v19641_v17, 0.0  ;;  %v12887_v61 = vpack.c.bf16 %v9784_v37, %v9783_v39  ;;  %v9804_v15 = vld [vmem:[%s20695_s7 + $0x818] sm:$0xff]  ;;  %v9833_v45 = vld [vmem:[%s20695_s7 + $0x900] sm:$0xff] }
 0x6b1   : > { %v19729_v12 = vadd.f32 %v21259_v57, %v18232_v42  ;;  %v9834_v60 = vld [vmem:[%s20695_s7 + $0x908] sm:$0xff]  ;;  %v12891_v2 = vpack.c.bf16 %v9802_v1, %v9801_v31  ;;  %v12921_v39 = vpack.c.bf16 %v9850_v33, %v9849_v49  ;;  %v9821_v37 = vld [vmem:[%s20695_s7 + $0x8a0] sm:$0xff]  ;;  %v9851_v8 = vld [vmem:[%s20695_s7 + $0x990] sm:$0xff]  ;;  %v19771_v14 = vmul.f32 0.2, %v19700_v59 }
 0x6b2   : > { %12856 = vmatpush3.bf16.msra.mxu0 %v12855_v26  ;;  %v19755_v26 = vmul.f32 0.2, %v19684_v53  ;;  %v9822_v35 = vld [vmem:[%s20695_s7 + $0x8a8] sm:$0xff]  ;;  %v12893_v31 = vpack.c.bf16 %v9820_v30, %v9819_v40  ;;  %v19780_v1 = vmul.f32 0.2, %v19725_v58  ;;  %v9438_v33 = vsel %vm9150_vm15, %v19641_v17, %v9294_v21  ;;  %v9852_v47 = vld [vmem:[%s20695_s7 + $0x998] sm:$0xff] }
 0x6b3   : > { %12884 = vmatpush3.bf16.msra.mxu1 %v12883_v48  ;;  %v21260_v48 = vld [vmem:[#allocation86_spill] sm:$0xff]  ;;  %12890 = vmatprep.subr.bf16.mxu0 %v12889_v51  ;;  %v19777_v51 = vmul.f32 0.2, %v19708_v44  ;;  %v19783_v49 = vmul.f32 0.2, %v19729_v12  ;;  %vm9149_vm1 = vcmp.ge.f32.partialorder %v19631_v23, 0.0  ;;  %v12923_v18 = vpack.c.bf16 %v9834_v60, %v9833_v45 }
 0x6b4   : > { %v19759_v56 = vadd.f32 %v21260_v48, %v18254_v52  ;;  %12886 = vmatprep.subr.bf16.mxu1 %v12885_v38  ;;  %v19774_v38 = vmul.f32 0.2, %v19704_v10  ;;  %v21261_v57 = vld [vmem:[#allocation87_spill] sm:$0xff]  ;;  %v21262_v30 = vld [vmem:[#allocation88_spill] sm:$0xff]  ;;  %vm9174_vm2 = vcmp.ge.f32.partialorder %v19679_v27, 0.0  ;;  %vm9152_vm3 = vcmp.ge.f32.partialorder %v19666_v11, 0.0 }
 0x6b5   : > { %10564 = vmatmul.mubr.f32.vlgmr.msra.gmra.mrb[180].mxu0 %v9413_v16  ;;  %v19794_v40 = vadd.f32 %v21261_v57, %v18254_v52  ;;  %v19798_v48 = vadd.f32 %v21262_v30, %v18280_v20  ;;  %v21263_v16 = vld [vmem:[#allocation90_spill] sm:$0xff]  ;;  %v12895_v57 = vpack.c.bf16 %v9804_v15, %v9803_v7  ;;  %v9437_v30 = vsel %vm9149_vm1, %v19631_v23, %v19674_v4  ;;  %v9836_v15 = vld [vmem:[%s20695_s7 + $0x918] sm:$0xff]  ;;  %v21264_v60 = vld [vmem:[#allocation89_spill] sm:$0xff] }
 0x6b6   : > { %10568 = vmatprep.mubr.f32.mxu0 %v9438_v33  ;;  %v19803_v17 = vmul.f32 0.2, %v19759_v56  ;;  %v19807_v21 = vadd.f32 %v21263_v16, %v18254_v52  ;;  %12892 = vmatpush3.bf16.msra.mxu0 %v12891_v2  ;;  %v9805_v33 = vld [vmem:[%s20695_s7 + $0x820] sm:$0xff]  ;;  %vm9173_vm4 = vcmp.ge.f32.partialorder %v19670_v22, 0.0  ;;  %v12897_v2 = vpack.c.bf16 %v9822_v35, %v9821_v37  ;;  %v9835_v7 = vld [vmem:[%s20695_s7 + $0x910] sm:$0xff]  ;;  %v9824_v35 = vld [vmem:[%s20695_s7 + $0x8b8] sm:$0xff] }
 0x6b7   : > { %12888 = vmatpush3.bf16.msra.mxu1 %v12887_v61  ;;  %v9806_v61 = vld [vmem:[%s20695_s7 + $0x828] sm:$0xff]  ;;  %12894 = vmatprep.subr.bf16.mxu0 %v12893_v31  ;;  %v9823_v45 = vld [vmem:[%s20695_s7 + $0x8b0] sm:$0xff]  ;;  %v19831_v23 = vadd.f32 %v21264_v60, %v18280_v20  ;;  %v9462_v4 = vsel %vm9174_vm2, %v19679_v27, %v9318_v24  ;;  %v9440_v37 = vsel %vm9152_vm3, %v19666_v11, %v9296_v25  ;;  %vm9151_vm5 = vcmp.ge.f32.partialorder %v19649_v6, 0.0  ;;  %v21265_v27 = vld [vmem:[#allocation91_spill] sm:$0xff] }
 0x6b8   : > { %12922 = vmatprep.subr.bf16.mxu1 %v12921_v39  ;;  %v12925_v39 = vpack.c.bf16 %v9852_v47, %v9851_v8  ;;  %v9853_v8 = vld [vmem:[%s20695_s7 + $0x9a0] sm:$0xff]  ;;  %v19851_v24 = vadd.f32 %v21265_v27, %v18254_v52  ;;  %vm9198_vm6 = vcmp.ge.f32.partialorder %v19704_v10, 0.0  ;;  %vm9176_vm7 = vcmp.ge.f32.partialorder %v19708_v44, 0.0  ;;  %v9807_v60 = vld [vmem:[%s20695_s7 + $0x830] sm:$0xff] }
 0x6b9   : > { %10569 = vmatmul.mubr.f32.gmra.mrb[182].mxu0 %v9437_v30  ;;  %v21266_v11 = vld [vmem:[#allocation92_spill] sm:$0xff]  ;;  %v9366_v31 = vmul.f32 0.2, %v19794_v40  ;;  %v9461_v47 = vsel %vm9173_vm4, %v19670_v22, %v19721_v13  ;;  %v12899_v16 = vpack.c.bf16 %v9806_v61, %v9805_v33  ;;  %v12927_v30 = vpack.c.bf16 %v9836_v15, %v9835_v7  ;;  %v9838_v33 = vld [vmem:[%s20695_s7 + $0x928] sm:$0xff]  ;;  %v9855_v15 = vld [vmem:[%s20695_s7 + $0x9b0] sm:$0xff] }
 0x6ba   : > { %10659 = vmatmul.mubr.f32.vlgmr.msra.gmra.mrb[180].mxu1 %v9415_v36  ;;  %v9854_v36 = vld [vmem:[%s20695_s7 + $0x9a8] sm:$0xff]  ;;  %v19855_v25 = vadd.f32 %v21266_v11, %v18280_v20  ;;  %10573 = vmatprep.mubr.f32.mxu0 %v9462_v4  ;;  %v9808_v4 = vld [vmem:[%s20695_s7 + $0x838] sm:$0xff]  ;;  %vm9197_vm8 = vcmp.ge.f32.partialorder %v19700_v59, 0.0  ;;  %v12901_v22 = vpack.c.bf16 %v9824_v35, %v9823_v45  ;;  %v9825_v61 = vld [vmem:[%s20695_s7 + $0x8c0] sm:$0xff]  ;;  %vm9175_vm9 = vcmp.ge.f32.partialorder %v19684_v53, 0.0 }
 0x6bb   : > { %10663 = vmatprep.mubr.f32.mxu1 %v9440_v37  ;;  %12896 = vmatpush3.bf16.msra.mxu0 %v12895_v57  ;;  %v12929_v13 = vpack.c.bf16 %v9854_v36, %v9853_v8  ;;  %v9837_v57 = vld [vmem:[%s20695_s7 + $0x920] sm:$0xff]  ;;  %v9826_v7 = vld [vmem:[%s20695_s7 + $0x8c8] sm:$0xff]  ;;  %v9856_v45 = vld [vmem:[%s20695_s7 + $0x9b8] sm:$0xff]  ;;  %vm9222_vm10 = vcmp.ge.f32.partialorder %v19794_v40, 0.0  ;;  %vm9200_vm11 = vcmp.ge.f32.partialorder %v19729_v12, 0.0  ;;  %v12903_v37 = vpack.c.bf16 %v9808_v4, %v9807_v60 }
 0x6bc   : > { %12924 = vmatpush3.bf16.msra.mxu1 %v12923_v18  ;;  %v9439_v18 = vsel %vm9151_vm5, %v19649_v6, %v19696_v32  ;;  %12898 = vmatprep.subr.bf16.mxu0 %v12897_v2  ;;  %v21267_v6 = vld [vmem:[#allocation93_spill] sm:$0xff]  ;;  %v9486_v2 = vsel %vm9198_vm6, %v19704_v10, %v19774_v38  ;;  %v19907_v10 = vmul.f32 0.2, %v19798_v48  ;;  %v9390_v38 = vmul.f32 0.2, %v19831_v23  ;;  %v9839_v27 = vld [vmem:[%s20695_s7 + $0x930] sm:$0xff] }
 0x6bd   : > { %12926 = vmatprep.subr.bf16.mxu1 %v12925_v39  ;;  %v19886_v32 = vadd.f32 %v21267_v6, %v18280_v20  ;;  %10574 = vmatmul.mubr.f32.gmra.mrb[184].mxu0 %v9461_v47  ;;  %v9464_v39 = vsel %vm9176_vm7, %v19708_v44, %v19777_v51  ;;  %v19911_v44 = vadd.f32 %v19215_v46, %v17766_v5  ;;  %v9809_v46 = vld [vmem:[%s20695_s7 + $0x840] sm:$0xff]  ;;  %v9810_v8 = vld [vmem:[%s20695_s7 + $0x848] sm:$0xff]  ;;  %vm9221_vm0 = vcmp.ge.f32.partialorder %v19759_v56, 0.0  ;;  %v9840_v11 = vld [vmem:[%s20695_s7 + $0x938] sm:$0xff] }
 0x6be   : > { %10664 = vmatmul.mubr.f32.gmra.mrb[182].mxu1 %v9439_v18  ;;  %10578 = vmatprep.mubr.f32.mxu0 %v9486_v2  ;;  %v9485_v51 = vsel %vm9197_vm8, %v19700_v59, %v19771_v14  ;;  %v12931_v35 = vpack.c.bf16 %v9838_v33, %v9837_v57  ;;  %v9463_v36 = vsel %vm9175_vm9, %v19684_v53, %v19755_v26  ;;  %v9827_v47 = vld [vmem:[%s20695_s7 + $0x8d0] sm:$0xff]  ;;  %v9368_v53 = vmul.f32 0.2, %v19851_v24  ;;  %v9857_v60 = vld [vmem:[%s20695_s7 + $0x9c0] sm:$0xff]  ;;  %v9858_v4 = vld [vmem:[%s20695_s7 + $0x9c8] sm:$0xff] }
 0x6bf   : > { %10668 = vmatprep.mubr.f32.mxu1 %v9464_v39  ;;  %12900 = vmatpush3.bf16.msra.mxu0 %v12899_v16  ;;  %v12905_v59 = vpack.c.bf16 %v9826_v7, %v9825_v61  ;;  %v12933_v14 = vpack.c.bf16 %v9856_v45, %v9855_v15  ;;  %v9510_v26 = vsel %vm9222_vm10, %v19794_v40, %v9366_v31  ;;  %vm9199_vm12 = vcmp.ge.f32.partialorder %v19725_v58, 0.0  ;;  %v9812_v57 = vld [vmem:[%s20695_s7 + $0x858] sm:$0xff]  ;;  %v9841_v61 = vld [vmem:[%s20695_s7 + $0x940] sm:$0xff]  ;;  %v9842_v6 = vld [vmem:[%s20695_s7 + $0x948] sm:$0xff] }
 0x6c0   : > { %12928 = vmatpush3.bf16.msra.mxu1 %v12927_v30  ;;  %12902 = vmatprep.subr.bf16.mxu0 %v12901_v22  ;;  %v9488_v16 = vsel %vm9200_vm11, %v19729_v12, %v19783_v49  ;;  %v9828_v30 = vld [vmem:[%s20695_s7 + $0x8d8] sm:$0xff]  ;;  %v9367_v40 = vmul.f32 0.2, %v19807_v21  ;;  %v9392_v31 = vmul.f32 0.2, %v19886_v32  ;;  %vm9246_vm13 = vcmp.ge.f32.partialorder %v19831_v23, 0.0 }
 0x6c1   : > { %12930 = vmatprep.subr.bf16.mxu1 %v12929_v13  ;;  %10579 = vmatmul.mubr.f32.gmra.mrb[186].mxu0 %v9485_v51  ;;  %vm9224_vm14 = vcmp.ge.f32.partialorder %v19851_v24, 0.0  ;;  %v9274_v12 = vmul.f32 0.2, %v19911_v44  ;;  %v9509_v49 = vsel %vm9221_vm0, %v19759_v56, %v19803_v17  ;;  %v12907_v18 = vpack.c.bf16 %v9810_v8, %v9809_v46  ;;  %v9811_v13 = vld [vmem:[%s20695_s7 + $0x850] sm:$0xff]  ;;  %v9829_v2 = vld [vmem:[%s20695_s7 + $0x8e0] sm:$0xff]  ;;  %v9830_v7 = vld [vmem:[%s20695_s7 + $0x8e8] sm:$0xff] }
 0x6c2   : > { %10669 = vmatmul.mubr.f32.gmra.mrb[184].mxu1 %v9463_v36  ;;  %10583 = vmatprep.mubr.f32.mxu0 %v9510_v26  ;;  %v12935_v22 = vpack.c.bf16 %v9840_v11, %v9839_v27  ;;  %v9487_v33 = vsel %vm9199_vm12, %v19725_v58, %v19780_v1  ;;  %vm9245_vm15 = vcmp.ge.f32.partialorder %v19798_v48, 0.0  ;;  %v12909_v56 = vpack.c.bf16 %v9828_v30, %v9827_v47  ;;  %v9860_v15 = vld [vmem:[%s20695_s7 + $0x9d8] sm:$0xff]  ;;  %v9862_v26 = vld [vmem:[%s20695_s7 + $0x9e8] sm:$0xff] }
 0x6c3   : > { %10673 = vmatprep.mubr.f32.mxu1 %v9488_v16  ;;  %12904 = vmatpush3.bf16.msra.mxu0 %v12903_v37  ;;  %v12937_v17 = vpack.c.bf16 %v9858_v4, %v9857_v60  ;;  %v19989_v58 = vadd.f32 %v19313_v43, %v17766_v5  ;;  %v9534_v1 = vsel %vm9246_vm13, %v19831_v23, %v9390_v38  ;;  %vm9223_vm1 = vcmp.ge.f32.partialorder %v19807_v21, 0.0  ;;  %v9859_v43 = vld [vmem:[%s20695_s7 + $0x9d0] sm:$0xff]  ;;  %v21268_v23 = vld [vmem:[#allocation23_spill] sm:$0xff]  ;;  %v9813_v37 = vld [vmem:[%s20695_s7 + $0x860] sm:$0xff] }
 0x6c4   : > { %12932 = vmatpush3.bf16.msra.mxu1 %v12931_v35  ;;  %12906 = vmatprep.subr.bf16.mxu0 %v12905_v59  ;;  %v9512_v39 = vsel %vm9224_vm14, %v19851_v24, %v9368_v53  ;;  %v13145_v45 = vadd.f32 %v21268_v23, %v17766_v5  ;;  %vm9248_vm2 = vcmp.ge.f32.partialorder %v19886_v32, 0.0  ;;  %vm9130_vm3 = vcmp.ge.f32.partialorder %v19911_v44, 0.0  ;;  %v9814_v35 = vld [vmem:[%s20695_s7 + $0x868] sm:$0xff]  ;;  %v9844_v59 = vld [vmem:[%s20695_s7 + $0x958] sm:$0xff]  ;;  %v9861_v53 = vld [vmem:[%s20695_s7 + $0x9e0] sm:$0xff] }
 0x6c5   : > { %12934 = vmatprep.subr.bf16.mxu1 %v12933_v14  ;;  %10584 = vmatmul.mubr.f32.gmra.mrb[188].mxu0 %v9509_v49  ;;  %v9533_v24 = vsel %vm9245_vm15, %v19798_v48, %v19907_v10  ;;  %v12911_v38 = vpack.c.bf16 %v9812_v57, %v9811_v13  ;;  %v12939_v51 = vpack.c.bf16 %v9842_v6, %v9841_v61  ;;  %v9391_v46 = vmul.f32 0.2, %v19855_v25  ;;  %v9843_v10 = vld [vmem:[%s20695_s7 + $0x950] sm:$0xff]  ;;  %v9832_v47 = vld [vmem:[%s20695_s7 + $0x8f8] sm:$0xff]  ;;  %v9845_v13 = vld [vmem:[%s20695_s7 + $0x960] sm:$0xff] }
 0x6c6   : > { %10674 = vmatmul.mubr.f32.gmra.mrb[186].mxu1 %v9487_v33  ;;  %10588 = vmatprep.mubr.f32.mxu0 %v9534_v1  ;;  %v9511_v8 = vsel %vm9223_vm1, %v19807_v21, %v9367_v40  ;;  %v12913_v36 = vpack.c.bf16 %v9830_v7, %v9829_v2  ;;  %v12941_v48 = vpack.c.bf16 %v9860_v15, %v9859_v43  ;;  %v9831_v14 = vld [vmem:[%s20695_s7 + $0x8f0] sm:$0xff]  ;;  %v9276_v27 = vmul.f32 0.2, %v19989_v58  ;;  %v9846_v57 = vld [vmem:[%s20695_s7 + $0x968] sm:$0xff]  ;;  %v9864_v61 = vld [vmem:[%s20695_s7 + $0x9f8] sm:$0xff] }
 0x6c7   : > { %10678 = vmatprep.mubr.f32.mxu1 %v9512_v39  ;;  %12908 = vmatpush3.bf16.msra.mxu0 %v12907_v18  ;;  %v9536_v21 = vsel %vm9248_vm2, %v19886_v32, %v9392_v31  ;;  %v9418_v11 = vsel %vm9130_vm3, %v19911_v44, %v9274_v12  ;;  %vm9247_vm4 = vcmp.ge.f32.partialorder %v19855_v25, 0.0  ;;  %v9273_v16 = vmul.f32 0.2, %v13145_v45  ;;  %v21269_v32 = vld [vmem:[#allocation44_spill] sm:$0xff]  ;;  %v21270_v44 = vld [vmem:[#allocation25_spill] sm:$0xff]  ;;  %v9815_v31 = vld [vmem:[%s20695_s7 + $0x870] sm:$0xff] }
 0x6c8   : > { %12936 = vmatpush3.bf16.msra.mxu1 %v12935_v22  ;;  %12910 = vmatprep.subr.bf16.mxu0 %v12909_v56  ;;  %v13157_v30 = vadd.f32 %v21269_v32, %v17766_v5  ;;  %vm9132_vm5 = vcmp.ge.f32.partialorder %v19989_v58, 0.0  ;;  %vm9129_vm6 = vcmp.ge.f32.partialorder %v13145_v45, 0.0  ;;  %v20056_v60 = vadd.f32 %v21270_v44, %v18083_v54  ;;  %v9816_v12 = vld [vmem:[%s20695_s7 + $0x878] sm:$0xff]  ;;  %v9863_v33 = vld [vmem:[%s20695_s7 + $0x9f0] sm:$0xff]  ;;  %v9881_v6 = vld [vmem:[%s20695_s7 + $0xa80] sm:$0xff] }
 0x6c9   : > { %12938 = vmatprep.subr.bf16.mxu1 %v12937_v17  ;;  %10589 = vmatmul.mubr.f32.gmra.mrb[190].mxu0 %v9533_v24  ;;  %v12915_v4 = vpack.c.bf16 %v9814_v35, %v9813_v37  ;;  %v12943_v40 = vpack.c.bf16 %v9844_v59, %v9843_v10  ;;  %v9535_v49 = vsel %vm9247_vm4, %v19855_v25, %v9391_v46  ;;  %v21271_v56 = vld [vmem:[#allocation43_spill] sm:$0xff]  ;;  %v9882_v2 = vld [vmem:[%s20695_s7 + $0xa88] sm:$0xff]  ;;  %v9847_v35 = vld [vmem:[%s20695_s7 + $0x970] sm:$0xff] }
 0x6ca   : > { %10679 = vmatmul.mubr.f32.gmra.mrb[188].mxu1 %v9511_v8  ;;  %10753 = vmatprep.mubr.f32.mxu0 %v9418_v11  ;;  %v12917_v18 = vpack.c.bf16 %v9832_v47, %v9831_v14  ;;  %v12945_v22 = vpack.c.bf16 %v9862_v26, %v9861_v53  ;;  %v20078_v17 = vadd.f32 %v21271_v56, %v18083_v54  ;;  %v9275_v39 = vmul.f32 0.2, %v13157_v30  ;;  %v21272_v7 = vld [vmem:[#allocation9_spill] sm:$0xff]  ;;  %v9848_v46 = vld [vmem:[%s20695_s7 + $0x978] sm:$0xff]  ;;  %v9913_v53 = vld [vmem:[%s20695_s7 + $0xb80] sm:$0xff] }
 0x6cb   : > { %10683 = vmatprep.mubr.f32.mxu1 %v9536_v21  ;;  %12912 = vmatpush3.bf16.msra.mxu0 %v12911_v38  ;;  %v9420_v25 = vsel %vm9132_vm5, %v19989_v58, %v9276_v27  ;;  %v9417_v1 = vsel %vm9129_vm6, %v13145_v45, %v9273_v16  ;;  %v20095_v43 = vadd.f32 %v21272_v7, %v18083_v54  ;;  %vm9131_vm7 = vcmp.ge.f32.partialorder %v13157_v30, 0.0  ;;  %v21273_v58 = vld [vmem:[#allocation14_spill] sm:$0xff]  ;;  %v21275_v10 = vld [vmem:[#allocation5_spill] sm:$0xff]  ;;  %v21276_v14 = vld [vmem:[#allocation59_spill] sm:$0xff] }
 0x6cc   : > { %12940 = vmatpush3.bf16.msra.mxu1 %v12939_v51  ;;  %12914 = vmatprep.subr.bf16.mxu0 %v12913_v36  ;;  %v20099_v15 = vadd.f32 %v21273_v58, %v18083_v54  ;;  %v12919_v23 = vpack.c.bf16 %v9816_v12, %v9815_v31  ;;  %v12947_v24 = vpack.c.bf16 %v9846_v57, %v9845_v13  ;;  %v20102_v38 = vmul.f32 0.2, %v20056_v60  ;;  %v21274_v45 = vld [vmem:[#allocation10_spill] sm:$0xff]  ;;  %v9865_v36 = vld [vmem:[%s20695_s7 + $0xa00] sm:$0xff]  ;;  %v9866_v47 = vld [vmem:[%s20695_s7 + $0xa08] sm:$0xff] }
 0x6cd   : > { %12942 = vmatprep.subr.bf16.mxu1 %v12941_v48  ;;  %v20106_v51 = vadd.f32 %v21274_v45, %v18132_v41  ;;  %v12949_v37 = vpack.c.bf16 %v9864_v61, %v9863_v33  ;;  %v12953_v8 = vpack.c.bf16 %v9882_v2, %v9881_v6  ;;  %v9298_v48 = vmul.f32 0.2, %v20078_v17  ;;  %v21277_v21 = vld [vmem:[#allocation54_spill] sm:$0xff]  ;;  %v9914_v26 = vld [vmem:[%s20695_s7 + $0xb88] sm:$0xff]  ;;  %v9884_v31 = vld [vmem:[%s20695_s7 + $0xa98] sm:$0xff] }
 0x6ce   : > { %10684 = vmatmul.mubr.f32.gmra.mrb[190].mxu1 %v9535_v49  ;;  %v20120_v59 = vadd.f32 %v21275_v10, %v18132_v41  ;;  %v20124_v27 = vadd.f32 %v21276_v14, %v18232_v42  ;;  %v20128_v11 = vadd.f32 %v21277_v21, %v18232_v42  ;;  %v9419_v16 = vsel %vm9131_vm7, %v13157_v30, %v9275_v39  ;;  %v9868_v49 = vld [vmem:[%s20695_s7 + $0xa18] sm:$0xff]  ;;  %v9885_v56 = vld [vmem:[%s20695_s7 + $0xaa0] sm:$0xff]  ;;  %v9915_v61 = vld [vmem:[%s20695_s7 + $0xb90] sm:$0xff] }
 0x6cf   : > { %10848 = vmatprep.mubr.f32.mxu1 %v9420_v25  ;;  %12916 = vmatpush3.bf16.msra.mxu0 %v12915_v4  ;;  %v20141_v32 = vmul.f32 0.2, %v20095_v43  ;;  %v20145_v44 = vadd.f32 %v19389_v0, %v18132_v41  ;;  %v20149_v4 = vadd.f32 %v19403_v63, %v18132_v41  ;;  %v9300_v30 = vmul.f32 0.2, %v20099_v15  ;;  %v20166_v63 = vld [vmem:[%s20695_s7 + $0xa10] sm:$0xff]  ;;  %v9886_v25 = vld [vmem:[%s20695_s7 + $0xaa8] sm:$0xff] }
 0x6d0   : > { %12944 = vmatpush3.bf16.msra.mxu1 %v12943_v40  ;;  %12918 = vmatprep.subr.bf16.mxu0 %v12917_v18  ;;  %v9883_v40 = vld [vmem:[%s20695_s7 + $0xa90] sm:$0xff]  ;;  %v20160_v12 = vadd.f32 %v19414_v55, %v18232_v42  ;;  %vm9154_vm8 = vcmp.ge.f32.partialorder %v20078_v17, 0.0  ;;  %v12951_v0 = vpack.c.bf16 %v9848_v46, %v9847_v35  ;;  %v9897_v18 = vld [vmem:[%s20695_s7 + $0xb00] sm:$0xff]  ;;  %v9898_v55 = vld [vmem:[%s20695_s7 + $0xb08] sm:$0xff]  ;;  %v20180_v13 = vadd.f32 %v19416_v3, %v18232_v42 }
 0x6d1   : > { %12946 = vmatprep.subr.bf16.mxu1 %v12945_v22  ;;  %v9321_v22 = vmul.f32 0.2, %v20106_v51  ;;  %v12955_v57 = vpack.c.bf16 %v9866_v47, %v9865_v36  ;;  %v12985_v33 = vpack.c.bf16 %v9914_v26, %v9913_v53  ;;  %v9322_v6 = vmul.f32 0.2, %v20120_v59  ;;  %v9899_v10 = vld [vmem:[%s20695_s7 + $0xb10] sm:$0xff]  ;;  %v9900_v14 = vld [vmem:[%s20695_s7 + $0xb18] sm:$0xff] }
 0x6d2   : > { %v20193_v3 = vmul.f32 0.2, %v20124_v27  ;;  %v20196_v2 = vmul.f32 0.2, %v20128_v11  ;;  %v12957_v39 = vpack.c.bf16 %v9884_v31, %v9883_v40  ;;  %v20199_v7 = vmul.f32 0.2, %v20145_v44 }
 0x6d3   : > { %12920 = vmatpush3.bf16.msra.mxu0 %v12919_v23  ;;  %v20202_v58 = vmul.f32 0.2, %v20149_v4  ;;  %v9442_v23 = vsel %vm9154_vm8, %v20078_v17, %v9298_v48  ;;  %vm9153_vm9 = vcmp.ge.f32.partialorder %v20056_v60, 0.0  ;;  %v20212_v45 = vmul.f32 0.2, %v20160_v12  ;;  %v9887_v21 = vld [vmem:[%s20695_s7 + $0xab0] sm:$0xff] }
 0x6d4   : > { %12948 = vmatpush3.bf16.msra.mxu1 %v12947_v24  ;;  %12954 = vmatprep.subr.bf16.mxu0 %v12953_v8  ;;  %v9916_v24 = vld [vmem:[%s20695_s7 + $0xb98] sm:$0xff]  ;;  %vm9178_vm10 = vcmp.ge.f32.partialorder %v20120_v59, 0.0  ;;  %vm9156_vm11 = vcmp.ge.f32.partialorder %v20099_v15, 0.0  ;;  %v20221_v17 = vmul.f32 0.2, %v20180_v13  ;;  %v12959_v35 = vpack.c.bf16 %v9868_v49, %v20166_v63  ;;  %v9870_v8 = vld [vmem:[%s20695_s7 + $0xa28] sm:$0xff] }
 0x6d5   : > { %12950 = vmatprep.subr.bf16.mxu1 %v12949_v37  ;;  %v20216_v37 = vadd.f32 %v19420_v29, %v18254_v52  ;;  %v12987_v46 = vpack.c.bf16 %v9898_v55, %v9897_v18  ;;  %v9869_v29 = vld [vmem:[%s20695_s7 + $0xa20] sm:$0xff]  ;;  %v9441_v36 = vsel %vm9153_vm9, %v20056_v60, %v20102_v38  ;;  %vm9177_vm0 = vcmp.ge.f32.partialorder %v20106_v51, 0.0  ;;  %v9888_v53 = vld [vmem:[%s20695_s7 + $0xab8] sm:$0xff]  ;;  %v9918_v26 = vld [vmem:[%s20695_s7 + $0xba8] sm:$0xff] }
 0x6d6   : > { %10754 = vmatmul.mubr.f32.vlgmr.msra.gmra.mrb[192].mxu0 %v9417_v1  ;;  %v20225_v1 = vadd.f32 %v19434_v50, %v18254_v52  ;;  %v12961_v50 = vpack.c.bf16 %v9886_v25, %v9885_v56  ;;  %v12989_v48 = vpack.c.bf16 %v9916_v24, %v9915_v61  ;;  %v20250_v60 = vadd.f32 %v19453_v9, %v18280_v20  ;;  %v9917_v9 = vld [vmem:[%s20695_s7 + $0xba0] sm:$0xff]  ;;  %v9902_v18 = vld [vmem:[%s20695_s7 + $0xb28] sm:$0xff]  ;;  %v9920_v56 = vld [vmem:[%s20695_s7 + $0xbb8] sm:$0xff] }
 0x6d7   : > { %10758 = vmatprep.mubr.f32.mxu0 %v9442_v23  ;;  %12956 = vmatpush3.bf16.msra.mxu0 %v12955_v57  ;;  %v9466_v38 = vsel %vm9178_vm10, %v20120_v59, %v9322_v6  ;;  %v9444_v47 = vsel %vm9156_vm11, %v20099_v15, %v9300_v30  ;;  %vm9155_vm12 = vcmp.ge.f32.partialorder %v20095_v43, 0.0  ;;  %v20270_v59 = vadd.f32 %v19456_v62, %v18280_v20  ;;  %v9872_v30 = vld [vmem:[%s20695_s7 + $0xa38] sm:$0xff]  ;;  %v9901_v49 = vld [vmem:[%s20695_s7 + $0xb20] sm:$0xff]  ;;  %v9890_v57 = vld [vmem:[%s20695_s7 + $0xac8] sm:$0xff] }
 0x6d8   : > { %12952 = vmatpush3.bf16.msra.mxu1 %v12951_v0  ;;  %12958 = vmatprep.subr.bf16.mxu0 %v12957_v39  ;;  %v20274_v15 = vadd.f32 %v19493_v28, %v18254_v52  ;;  %vm9202_vm13 = vcmp.ge.f32.partialorder %v20128_v11, 0.0  ;;  %vm9180_vm14 = vcmp.ge.f32.partialorder %v20149_v4, 0.0  ;;  %v9465_v40 = vsel %vm9177_vm0, %v20106_v51, %v9321_v22  ;;  %v9871_v28 = vld [vmem:[%s20695_s7 + $0xa30] sm:$0xff]  ;;  %v9889_v55 = vld [vmem:[%s20695_s7 + $0xac0] sm:$0xff]  ;;  %v9874_v39 = vld [vmem:[%s20695_s7 + $0xa48] sm:$0xff] }
 0x6d9   : > { %12986 = vmatprep.subr.bf16.mxu1 %v12985_v33  ;;  %v12963_v62 = vpack.c.bf16 %v9870_v8, %v9869_v29  ;;  %v12991_v31 = vpack.c.bf16 %v9900_v14, %v9899_v10  ;;  %v9443_v0 = vsel %vm9155_vm12, %v20095_v43, %v20141_v32  ;;  %vm9201_vm15 = vcmp.ge.f32.partialorder %v20124_v27, 0.0  ;;  %v9919_v33 = vld [vmem:[%s20695_s7 + $0xbb0] sm:$0xff]  ;;  %v9904_v24 = vld [vmem:[%s20695_s7 + $0xb38] sm:$0xff]  ;;  %v9922_v8 = vld [vmem:[%s20695_s7 + $0xbc8] sm:$0xff] }
 0x6da   : > { %10759 = vmatmul.mubr.f32.gmra.mrb[194].mxu0 %v9441_v36  ;;  %v12965_v51 = vpack.c.bf16 %v9888_v53, %v9887_v21  ;;  %v12993_v63 = vpack.c.bf16 %v9918_v26, %v9917_v9  ;;  %v9370_v43 = vmul.f32 0.2, %v20225_v1  ;;  %v9490_v32 = vsel %vm9202_vm13, %v20128_v11, %v20196_v2  ;;  %v9903_v23 = vld [vmem:[%s20695_s7 + $0xb30] sm:$0xff]  ;;  %v9892_v29 = vld [vmem:[%s20695_s7 + $0xad8] sm:$0xff]  ;;  %v9905_v53 = vld [vmem:[%s20695_s7 + $0xb40] sm:$0xff] }
 0x6db   : > { %10849 = vmatmul.mubr.f32.vlgmr.msra.gmra.mrb[192].mxu1 %v9419_v16  ;;  %10763 = vmatprep.mubr.f32.mxu0 %v9466_v38  ;;  %v20279_v16 = vmul.f32 0.2, %v20216_v37  ;;  %v9468_v22 = vsel %vm9180_vm14, %v20149_v4, %v20202_v58  ;;  %vm9179_vm1 = vcmp.ge.f32.partialorder %v20145_v44, 0.0  ;;  %v9394_v11 = vmul.f32 0.2, %v20270_v59  ;;  %v21278_v36 = vld [vmem:[#allocation11_spill] sm:$0xff] }
 0x6dc   : > { %10853 = vmatprep.mubr.f32.mxu1 %v9444_v47  ;;  %12960 = vmatpush3.bf16.msra.mxu0 %v12959_v35  ;;  %v20326_v25 = vadd.f32 %v19466_v19, %v18254_v52  ;;  %vm9226_vm2 = vcmp.ge.f32.partialorder %v20225_v1, 0.0  ;;  %vm9204_vm3 = vcmp.ge.f32.partialorder %v20180_v13, 0.0  ;;  %v9372_v4 = vmul.f32 0.2, %v20274_v15  ;;  %v9873_v19 = vld [vmem:[%s20695_s7 + $0xa40] sm:$0xff]  ;;  %v9891_v35 = vld [vmem:[%s20695_s7 + $0xad0] sm:$0xff] }
 0x6dd   : > { %12988 = vmatpush3.bf16.msra.mxu1 %v12987_v46  ;;  %12962 = vmatprep.subr.bf16.mxu0 %v12961_v50  ;;  %v9489_v61 = vsel %vm9201_vm15, %v20124_v27, %v20193_v3  ;;  %v12967_v6 = vpack.c.bf16 %v9872_v30, %v9871_v28  ;;  %v12995_v2 = vpack.c.bf16 %v9902_v18, %v9901_v49  ;;  %vm9225_vm4 = vcmp.ge.f32.partialorder %v20216_v37, 0.0  ;;  %v9875_v14 = vld [vmem:[%s20695_s7 + $0xa50] sm:$0xff]  ;;  %v9876_v21 = vld [vmem:[%s20695_s7 + $0xa58] sm:$0xff]  ;;  %v9906_v9 = vld [vmem:[%s20695_s7 + $0xb48] sm:$0xff] }
 0x6de   : > { %12990 = vmatprep.subr.bf16.mxu1 %v12989_v48  ;;  %10764 = vmatmul.mubr.f32.gmra.mrb[196].mxu0 %v9465_v40  ;;  %v9467_v58 = vsel %vm9179_vm1, %v20145_v44, %v20199_v7  ;;  %v12969_v27 = vpack.c.bf16 %v9890_v57, %v9889_v55  ;;  %v12997_v3 = vpack.c.bf16 %v9920_v56, %v9919_v33  ;;  %vm9203_vm5 = vcmp.ge.f32.partialorder %v20160_v12, 0.0  ;;  %v9893_v26 = vld [vmem:[%s20695_s7 + $0xae0] sm:$0xff]  ;;  %v9894_v40 = vld [vmem:[%s20695_s7 + $0xae8] sm:$0xff]  ;;  %v9907_v18 = vld [vmem:[%s20695_s7 + $0xb50] sm:$0xff] }
 0x6df   : > { %10854 = vmatmul.mubr.f32.gmra.mrb[194].mxu1 %v9443_v0  ;;  %10768 = vmatprep.mubr.f32.mxu0 %v9490_v32  ;;  %v20357_v44 = vadd.f32 %v19514_v34, %v18280_v20  ;;  %v9514_v7 = vsel %vm9226_vm2, %v20225_v1, %v9370_v43  ;;  %v9492_v46 = vsel %vm9204_vm3, %v20180_v13, %v20221_v17  ;;  %v9921_v34 = vld [vmem:[%s20695_s7 + $0xbc0] sm:$0xff]  ;;  %v9393_v1 = vmul.f32 0.2, %v20250_v60  ;;  %v9878_v0 = vld [vmem:[%s20695_s7 + $0xa68] sm:$0xff]  ;;  %v9908_v55 = vld [vmem:[%s20695_s7 + $0xb58] sm:$0xff] }
 0x6e0   : > { %10858 = vmatprep.mubr.f32.mxu1 %v9468_v22  ;;  %12964 = vmatpush3.bf16.msra.mxu0 %v12963_v62  ;;  %v20379_v50 = vadd.f32 %v21278_v36, %v18280_v20  ;;  %vm9250_vm6 = vcmp.ge.f32.partialorder %v20270_v59, 0.0  ;;  %vm9228_vm7 = vcmp.ge.f32.partialorder %v20274_v15, 0.0  ;;  %v9371_v13 = vmul.f32 0.2, %v20326_v25  ;;  %v9923_v62 = vld [vmem:[%s20695_s7 + $0xbd0] sm:$0xff]  ;;  %v9877_v30 = vld [vmem:[%s20695_s7 + $0xa60] sm:$0xff] }
 0x6e1   : > { %12992 = vmatpush3.bf16.msra.mxu1 %v12991_v31  ;;  %12966 = vmatprep.subr.bf16.mxu0 %v12965_v51  ;;  %v9513_v17 = vsel %vm9225_vm4, %v20216_v37, %v20279_v16  ;;  %v12971_v48 = vpack.c.bf16 %v9874_v39, %v9873_v19  ;;  %v12999_v10 = vpack.c.bf16 %v9904_v24, %v9903_v23  ;;  %vm9249_vm8 = vcmp.ge.f32.partialorder %v20250_v60, 0.0  ;;  %v9924_v31 = vld [vmem:[%s20695_s7 + $0xbd8] sm:$0xff]  ;;  %v9895_v43 = vld [vmem:[%s20695_s7 + $0xaf0] sm:$0xff]  ;;  %v9925_v57 = vld [vmem:[%s20695_s7 + $0xbe0] sm:$0xff] }
 0x6e2   : > { %12994 = vmatprep.subr.bf16.mxu1 %v12993_v63  ;;  %10769 = vmatmul.mubr.f32.gmra.mrb[198].mxu0 %v9489_v61  ;;  %v9491_v38 = vsel %vm9203_vm5, %v20160_v12, %v20212_v45  ;;  %v12973_v37 = vpack.c.bf16 %v9892_v29, %v9891_v35  ;;  %v13001_v47 = vpack.c.bf16 %v9922_v8, %v9921_v34  ;;  %v9396_v12 = vmul.f32 0.2, %v20357_v44  ;;  %v9896_v22 = vld [vmem:[%s20695_s7 + $0xaf8] sm:$0xff]  ;;  %v9926_v33 = vld [vmem:[%s20695_s7 + $0xbe8] sm:$0xff]  ;;  %v9909_v19 = vld [vmem:[%s20695_s7 + $0xb60] sm:$0xff] }
 0x6e3   : > { %10859 = vmatmul.mubr.f32.gmra.mrb[196].mxu1 %v9467_v58  ;;  %10773 = vmatprep.mubr.f32.mxu0 %v9514_v7  ;;  %v9538_v45 = vsel %vm9250_vm6, %v20270_v59, %v9394_v11  ;;  %v9516_v16 = vsel %vm9228_vm7, %v20274_v15, %v9372_v4  ;;  %vm9227_vm9 = vcmp.ge.f32.partialorder %v20326_v25, 0.0  ;;  %vm9252_vm10 = vcmp.ge.f32.partialorder %v20357_v44, 0.0  ;;  %v9910_v39 = vld [vmem:[%s20695_s7 + $0xb68] sm:$0xff]  ;;  %v9927_v58 = vld [vmem:[%s20695_s7 + $0xbf0] sm:$0xff] }
 0x6e4   : > { %10863 = vmatprep.mubr.f32.mxu1 %v9492_v46  ;;  %12968 = vmatpush3.bf16.msra.mxu0 %v12967_v6  ;;  %v9537_v59 = vsel %vm9249_vm8, %v20250_v60, %v9393_v1  ;;  %v12975_v15 = vpack.c.bf16 %v9876_v21, %v9875_v14  ;;  %v13003_v28 = vpack.c.bf16 %v9906_v9, %v9905_v53  ;;  %v9395_v51 = vmul.f32 0.2, %v20379_v50  ;;  %v9911_v35 = vld [vmem:[%s20695_s7 + $0xb70] sm:$0xff] }
 0x6e5   : > { %12996 = vmatpush3.bf16.msra.mxu1 %v12995_v2  ;;  %12970 = vmatprep.subr.bf16.mxu0 %v12969_v27  ;;  %v9515_v63 = vsel %vm9227_vm9, %v20326_v25, %v9371_v13  ;;  %v12977_v49 = vpack.c.bf16 %v9894_v40, %v9893_v26  ;;  %v13005_v60 = vpack.c.bf16 %v9924_v31, %v9923_v62  ;;  %vm9251_vm11 = vcmp.ge.f32.partialorder %v20379_v50, 0.0  ;;  %v9879_v25 = vld [vmem:[%s20695_s7 + $0xa70] sm:$0xff]  ;;  %v9880_v2 = vld [vmem:[%s20695_s7 + $0xa78] sm:$0xff] }
 0x6e6   : > { %12998 = vmatprep.subr.bf16.mxu1 %v12997_v3  ;;  %10774 = vmatmul.mubr.f32.gmra.mrb[200].mxu0 %v9513_v17  ;;  %v9540_v32 = vsel %vm9252_vm10, %v20357_v44, %v9396_v12  ;;  %v12979_v56 = vpack.c.bf16 %v9878_v0, %v9877_v30  ;;  %v13007_v11 = vpack.c.bf16 %v9908_v55, %v9907_v18  ;;  %v9928_v27 = vld [vmem:[%s20695_s7 + $0xbf8] sm:$0xff] }
 0x6e7   : > { %10864 = vmatmul.mubr.f32.gmra.mrb[198].mxu1 %v9491_v38  ;;  %10778 = vmatprep.mubr.f32.mxu0 %v9538_v45  ;;  %v9539_v4 = vsel %vm9251_vm11, %v20379_v50, %v9395_v51  ;;  %v12981_v61 = vpack.c.bf16 %v9896_v22, %v9895_v43  ;;  %v13009_v6 = vpack.c.bf16 %v9926_v33, %v9925_v57  ;;  %v9912_v44 = vld [vmem:[%s20695_s7 + $0xb78] sm:$0xff] }
 0x6e8   : > { %10868 = vmatprep.mubr.f32.mxu1 %v9516_v16  ;;  %12972 = vmatpush3.bf16.msra.mxu0 %v12971_v48  ;;  %v12983_v3 = vpack.c.bf16 %v9880_v2, %v9879_v25  ;;  %v13011_v23 = vpack.c.bf16 %v9910_v39, %v9909_v19  ;;  %v13013_v24 = vpack.c.bf16 %v9928_v27, %v9927_v58 }
 0x6e9   : > { %13000 = vmatpush3.bf16.msra.mxu1 %v12999_v10  ;;  %12974 = vmatprep.subr.bf16.mxu0 %v12973_v37  ;;  %v13015_v7 = vpack.c.bf16 %v9912_v44, %v9911_v35 }
 0x6ea   : > { %13002 = vmatprep.subr.bf16.mxu1 %v13001_v47  ;;  %10779 = vmatmul.mubr.f32.gmra.mrb[202].mxu0 %v9537_v59 }
 0x6eb   : > { %10869 = vmatmul.mubr.f32.gmra.mrb[200].mxu1 %v9515_v63 }
 0x6ec   : > { %10873 = vmatprep.mubr.f32.mxu1 %v9540_v32  ;;  %12976 = vmatpush3.bf16.msra.mxu0 %v12975_v15 }
 0x6ed   : > { %13004 = vmatpush3.bf16.msra.mxu1 %v13003_v28  ;;  %12978 = vmatprep.subr.bf16.mxu0 %v12977_v49 }
 0x6ee   : > { %13006 = vmatprep.subr.bf16.mxu1 %v13005_v60 }
 0x6ef   : > { %10874 = vmatmul.mubr.f32.gmra.mrb[202].mxu1 %v9539_v4 }
 0x6f0   : > { %12980 = vmatpush3.bf16.msra.mxu0 %v12979_v56 }
 0x6f1   : > { %13008 = vmatpush3.bf16.msra.mxu1 %v13007_v11  ;;  %12982 = vmatprep.subr.bf16.mxu0 %v12981_v61 }
 0x6f2   : > { %13010 = vmatprep.subr.bf16.mxu1 %v13009_v6 }
 0x6f4   : > { %12984 = vmatpush3.bf16.msra.mxu0 %v12983_v3 }
 0x6f5   : > { %13012 = vmatpush3.bf16.msra.mxu1 %v13011_v23 }
 0x6f6   : > { %13014 = vmatprep.subr.bf16.mxu1 %v13013_v24 }
 0x6f9   : > { %13016 = vmatpush3.bf16.msra.mxu1 %v13015_v7 }
 0x6fc   : > { %v8958_v46 = vpop.f32.mrb[132].mxu0 }
 0x6fd   : > { %v13169_v29 = vadd.f32 %v8958_v46, %v17766_v5  ;;  %v8960_v34 = vpop.f32.mrb[133].mxu0 }
 0x6fe   : > { %v13170_v8 = vadd.f32 %v8960_v34, %v17766_v5  ;;  %v8962_v1 = vpop.f32.mrb[134].mxu0 }
 0x6ff   : > { %v9277_v36 = vmul.f32 0.2, %v13169_v29  ;;  %v13171_v50 = vadd.f32 %v8962_v1, %v18083_v54  ;;  %v8964_v13 = vpop.f32.mrb[135].mxu0  ;;  %vm9133_vm0 = vcmp.ge.f32.partialorder %v13169_v29, 0.0 }
 0x700   : > { %v9278_v17 = vmul.f32 0.2, %v13170_v8  ;;  %v13172_v48 = vadd.f32 %v8964_v13, %v18083_v54  ;;  %v9084_v10 = vpop.f32.mrb[132].mxu1  ;;  %vm9134_vm12 = vcmp.ge.f32.partialorder %v13170_v8, 0.0 }
 0x701   : > { %v9301_v14 = vmul.f32 0.2, %v13171_v50  ;;  %v13181_v21 = vadd.f32 %v9084_v10, %v17766_v5  ;;  %v9086_v38 = vpop.f32.mrb[133].mxu1  ;;  %vm9157_vm13 = vcmp.ge.f32.partialorder %v13171_v50, 0.0  ;;  %v9421_v26 = vsel %vm9133_vm0, %v13169_v29, %v9277_v36 }
 0x702   : > { %v9302_v37 = vmul.f32 0.2, %v13172_v48  ;;  %v13182_v47 = vadd.f32 %v9086_v38, %v17766_v5  ;;  %v9088_v53 = vpop.f32.mrb[134].mxu1  ;;  %v9422_v9 = vsel %vm9134_vm12, %v13170_v8, %v9278_v17  ;;  %vm9158_vm14 = vcmp.ge.f32.partialorder %v13172_v48, 0.0 }
 0x703   : > { %vm9135_vm15 = vcmp.ge.f32.partialorder %v13181_v21, 0.0  ;;  %v9279_v12 = vmul.f32 0.2, %v13181_v21  ;;  %v13183_v45 = vadd.f32 %v9088_v53, %v18083_v54  ;;  %v9090_v16 = vpop.f32.mrb[135].mxu1  ;;  %10943 = vmatprep.mubr.f32.mxu0 %v9422_v9  ;;  %v9445_v30 = vsel %vm9157_vm13, %v13171_v50, %v9301_v14 }
 0x704   : > { %v9280_v40 = vmul.f32 0.2, %v13182_v47  ;;  %v13184_v62 = vadd.f32 %v9090_v16, %v18083_v54  ;;  %v8968_v31 = vpop.f32.mrb[136].mxu0  ;;  %10944 = vmatmul.mubr.f32.vlgmr.msra.gmra.mrb[204].mxu0 %v9421_v26  ;;  %v9446_v59 = vsel %vm9158_vm14, %v13172_v48, %v9302_v37  ;;  %vm9136_vm1 = vcmp.ge.f32.partialorder %v13182_v47, 0.0 }
 0x705   : > { %v9303_v15 = vmul.f32 0.2, %v13183_v45  ;;  %v13173_v5 = vadd.f32 %v8968_v31, %v18132_v41  ;;  %v8970_v28 = vpop.f32.mrb[137].mxu0  ;;  %10948 = vmatprep.mubr.f32.mxu0 %v9446_v59  ;;  %vm9159_vm2 = vcmp.ge.f32.partialorder %v13183_v45, 0.0  ;;  %v9423_v54 = vsel %vm9135_vm15, %v13181_v21, %v9279_v12 }
 0x706   : > { %v9304_v0 = vmul.f32 0.2, %v13184_v62  ;;  %v13174_v51 = vadd.f32 %v8970_v28, %v18132_v41  ;;  %v8972_v63 = vpop.f32.mrb[138].mxu0  ;;  %v9424_v49 = vsel %vm9136_vm1, %v13182_v47, %v9280_v40  ;;  %vm9160_vm3 = vcmp.ge.f32.partialorder %v13184_v62, 0.0 }
 0x707   : > { %v9325_v60 = vmul.f32 0.2, %v13173_v5  ;;  %v13175_v18 = vadd.f32 %v8972_v63, %v18232_v42  ;;  %v8974_v55 = vpop.f32.mrb[139].mxu0  ;;  %11038 = vmatprep.mubr.f32.mxu1 %v9424_v49  ;;  %vm9181_vm4 = vcmp.ge.f32.partialorder %v13173_v5, 0.0  ;;  %v9447_v25 = vsel %vm9159_vm2, %v13183_v45, %v9303_v15 }
 0x708   : > { %v9326_v43 = vmul.f32 0.2, %v13174_v51  ;;  %v13176_v32 = vadd.f32 %v8974_v55, %v18232_v42  ;;  %v9094_v22 = vpop.f32.mrb[136].mxu1  ;;  %10949 = vmatmul.mubr.f32.gmra.mrb[206].mxu0 %v9445_v30  ;;  %11039 = vmatmul.mubr.f32.vlgmr.msra.gmra.mrb[204].mxu1 %v9423_v54  ;;  %v9448_v57 = vsel %vm9160_vm3, %v13184_v62, %v9304_v0  ;;  %vm9182_vm5 = vcmp.ge.f32.partialorder %v13174_v51, 0.0 }
 0x709   : > { %v9349_v33 = vmul.f32 0.2, %v13175_v18  ;;  %v13185_v56 = vadd.f32 %v9094_v22, %v18132_v41  ;;  %v9096_v11 = vpop.f32.mrb[137].mxu1  ;;  %11043 = vmatprep.mubr.f32.mxu1 %v9448_v57  ;;  %vm9205_vm6 = vcmp.ge.f32.partialorder %v13175_v18, 0.0  ;;  %v9469_v27 = vsel %vm9181_vm4, %v13173_v5, %v9325_v60 }
 0x70a   : > { %v9350_v4 = vmul.f32 0.2, %v13176_v32  ;;  %v13186_v61 = vadd.f32 %v9096_v11, %v18132_v41  ;;  %v9098_v6 = vpop.f32.mrb[138].mxu1  ;;  %v9470_v2 = vsel %vm9182_vm5, %v13174_v51, %v9326_v43  ;;  %vm9206_vm7 = vcmp.ge.f32.partialorder %v13176_v32, 0.0 }
 0x70b   : > { %v9327_v19 = vmul.f32 0.2, %v13185_v56  ;;  %v13187_v39 = vadd.f32 %v9098_v6, %v18232_v42  ;;  %v9100_v58 = vpop.f32.mrb[139].mxu1  ;;  %10953 = vmatprep.mubr.f32.mxu0 %v9470_v2  ;;  %vm9183_vm8 = vcmp.ge.f32.partialorder %v13185_v56, 0.0  ;;  %v9493_v46 = vsel %vm9205_vm6, %v13175_v18, %v9349_v33 }
 0x70c   : > { %v9328_v3 = vmul.f32 0.2, %v13186_v61  ;;  %v13188_v23 = vadd.f32 %v9100_v58, %v18232_v42  ;;  %v8978_v24 = vpop.f32.mrb[140].mxu0  ;;  %10954 = vmatmul.mubr.f32.gmra.mrb[208].mxu0 %v9469_v27  ;;  %11044 = vmatmul.mubr.f32.gmra.mrb[206].mxu1 %v9447_v25  ;;  %v9494_v35 = vsel %vm9206_vm7, %v13176_v32, %v9350_v4  ;;  %vm9184_vm9 = vcmp.ge.f32.partialorder %v13186_v61, 0.0 }
 0x70d   : > { %v9351_v41 = vmul.f32 0.2, %v13187_v39  ;;  %v13177_v44 = vadd.f32 %v8978_v24, %v18254_v52  ;;  %v8980_v7 = vpop.f32.mrb[141].mxu0  ;;  %10958 = vmatprep.mubr.f32.mxu0 %v9494_v35  ;;  %vm9207_vm10 = vcmp.ge.f32.partialorder %v13187_v39, 0.0  ;;  %v9471_v13 = vsel %vm9183_vm8, %v13185_v56, %v9327_v19 }
 0x70e   : > { %v9352_v29 = vmul.f32 0.2, %v13188_v23  ;;  %v13178_v34 = vadd.f32 %v8980_v7, %v18254_v52  ;;  %v8982_v8 = vpop.f32.mrb[142].mxu0  ;;  %v9472_v1 = vsel %vm9184_vm9, %v13186_v61, %v9328_v3  ;;  %vm9208_vm11 = vcmp.ge.f32.partialorder %v13188_v23, 0.0 }
 0x70f   : > { %v9373_v42 = vmul.f32 0.2, %v13177_v44  ;;  %v13179_v36 = vadd.f32 %v8982_v8, %v18280_v20  ;;  %v8984_v50 = vpop.f32.mrb[143].mxu0  ;;  %11048 = vmatprep.mubr.f32.mxu1 %v9472_v1  ;;  %vm9229_vm0 = vcmp.ge.f32.partialorder %v13177_v44, 0.0  ;;  %v9495_v53 = vsel %vm9207_vm10, %v13187_v39, %v9351_v41 }
 0x710   : > { %v9374_v17 = vmul.f32 0.2, %v13178_v34  ;;  %v13180_v48 = vadd.f32 %v8984_v50, %v18280_v20  ;;  %v9104_v10 = vpop.f32.mrb[140].mxu1  ;;  %10959 = vmatmul.mubr.f32.gmra.mrb[210].mxu0 %v9493_v46  ;;  %11049 = vmatmul.mubr.f32.gmra.mrb[208].mxu1 %v9471_v13  ;;  %v9496_v14 = vsel %vm9208_vm11, %v13188_v23, %v9352_v29  ;;  %vm9230_vm12 = vcmp.ge.f32.partialorder %v13178_v34, 0.0 }
 0x711   : > { %v9397_v21 = vmul.f32 0.2, %v13179_v36  ;;  %v13189_v38 = vadd.f32 %v9104_v10, %v18254_v52  ;;  %v9106_v37 = vpop.f32.mrb[141].mxu1  ;;  %11053 = vmatprep.mubr.f32.mxu1 %v9496_v14  ;;  %v9517_v47 = vsel %vm9229_vm0, %v13177_v44, %v9373_v42  ;;  %vm9253_vm14 = vcmp.ge.f32.partialorder %v13179_v36, 0.0 }
 0x712   : > { %v9398_v9 = vmul.f32 0.2, %v13180_v48  ;;  %v13190_v26 = vadd.f32 %v9106_v37, %v18254_v52  ;;  %v9108_v12 = vpop.f32.mrb[142].mxu1  ;;  %v9518_v45 = vsel %vm9230_vm12, %v13178_v34, %v9374_v17  ;;  %vm9254_vm13 = vcmp.ge.f32.partialorder %v13180_v48, 0.0 }
 0x713   : > { %v9375_v16 = vmul.f32 0.2, %v13189_v38  ;;  %v13191_v40 = vadd.f32 %v9108_v12, %v18280_v20  ;;  %v9110_v62 = vpop.f32.mrb[143].mxu1  ;;  %10963 = vmatprep.mubr.f32.mxu0 %v9518_v45  ;;  %vm9231_vm15 = vcmp.ge.f32.partialorder %v13189_v38, 0.0  ;;  %v9541_v30 = vsel %vm9253_vm14, %v13179_v36, %v9397_v21 }
 0x714   : > { %v9376_v31 = vmul.f32 0.2, %v13190_v26  ;;  %v13192_v59 = vadd.f32 %v9110_v62, %v18280_v20  ;;  %10964 = vmatmul.mubr.f32.gmra.mrb[212].mxu0 %v9517_v47  ;;  %11054 = vmatmul.mubr.f32.gmra.mrb[210].mxu1 %v9495_v53  ;;  %v9542_v15 = vsel %vm9254_vm13, %v13180_v48, %v9398_v9  ;;  %vm9232_vm1 = vcmp.ge.f32.partialorder %v13190_v26, 0.0 }
 0x715   : > { %10968 = vmatprep.mubr.f32.mxu0 %v9542_v15  ;;  %v9399_v28 = vmul.f32 0.2, %v13191_v40  ;;  %v9519_v0 = vsel %vm9231_vm15, %v13189_v38, %v9375_v16  ;;  %vm9255_vm3 = vcmp.ge.f32.partialorder %v13191_v40, 0.0  ;;  %vm13473_vm4 = vmmov 0  }
 0x716   : > { %v9400_v5 = vmul.f32 0.2, %v13192_v59  ;;  %v9520_v52 = vsel %vm9232_vm1, %v13190_v26, %v9376_v31  ;;  %vm9256_vm2 = vcmp.ge.f32.partialorder %v13192_v59, 0.0  ;;  %vm11109_vm5 = vcmask 392192  }
 0x717   : > { %11058 = vmatprep.mubr.f32.mxu1 %v9520_v52  ;;  %v9543_v63 = vsel %vm9255_vm3, %v13191_v40, %v9399_v28  ;;  %vm11308_vm6 = vcmask 326656   ;;  %vm11439_vm13 = vcmask 1045504   ;;  %vm13478_vm1 = vmmov 1  }
 0x718   : > { %10969 = vmatmul.mubr.f32.gmra.mrb[214].mxu0 %v9541_v30  ;;  %11059 = vmatmul.mubr.f32.gmra.mrb[212].mxu1 %v9519_v0  ;;  %v9544_v51 = vsel %vm9256_vm2, %v13192_v59, %v9400_v5  ;;  %vm13039_vm2 = vmpackc.low %vm11439_vm13, %vm13478_vm1  ;;  %vm11432_vm3 = vcmask 244736   ;;  %vm11717_vm13 = vcmask 62464  }
 0x719   : > { %11063 = vmatprep.mubr.f32.mxu1 %v9544_v51 }
 0x71c   : > { %v11954_v49 = vpop.f32.mrb[144].mxu0  ;;  %11064 = vmatmul.mubr.f32.gmra.mrb[214].mxu1 %v9543_v63 }
 0x71d   : > { %v11955_v20 = vpop.f32.mrb[145].mxu0 }
 0x71e   : > { %v11956_v54 = vadd.f32 %v11955_v20, %v11954_v49 }
 0x720   : > { %v11957_v60 = vpop.f32.mrb[146].mxu0  ;;  %v12004_v18 = vpop.f32.mrb[144].mxu1 }
 0x721   : > { %v11958_v55 = vpop.f32.mrb[147].mxu0  ;;  %v12005_v43 = vpop.f32.mrb[145].mxu1 }
 0x722   : > { %v11959_v32 = vadd.f32 %v11958_v55, %v11957_v60  ;;  %v12006_v22 = vadd.f32 %v12005_v43, %v12004_v18 }
 0x724   : > { %v10091_v57 = vadd.f32 %v12006_v22, %v11956_v54  ;;  %v11960_v33 = vpop.f32.mrb[148].mxu0  ;;  %v12007_v56 = vpop.f32.mrb[146].mxu1 }
 0x725   : > { %v11961_v11 = vpop.f32.mrb[149].mxu0  ;;  %v12008_v25 = vpop.f32.mrb[147].mxu1 }
 0x726   : > { %v11962_v4 = vadd.f32 %v11961_v11, %v11960_v33  ;;  %v12009_v61 = vadd.f32 %v12008_v25, %v12007_v56 }
 0x728   : > { %v10096_v6 = vadd.f32 %v12009_v61, %v11959_v32  ;;  %v11963_v2 = vpop.f32.mrb[150].mxu0  ;;  %v12010_v19 = vpop.f32.mrb[148].mxu1 }
 0x729   : > { %v11964_v39 = vpop.f32.mrb[151].mxu0  ;;  %v12011_v58 = vpop.f32.mrb[149].mxu1 }
 0x72a   : > { %v11965_v27 = vadd.f32 %v11964_v39, %v11963_v2  ;;  %v12012_v3 = vadd.f32 %v12011_v58, %v12010_v19 }
 0x72c   : > { %v10101_v23 = vadd.f32 %v12012_v3, %v11962_v4 }
 0x72d   : > { %v11966_v24 = vpop.f32.mrb[152].mxu0  ;;  %v12013_v35 = vpop.f32.mrb[150].mxu1 }
 0x72e   : > { %v11967_v41 = vpop.f32.mrb[153].mxu0  ;;  %v12014_v44 = vpop.f32.mrb[151].mxu1 }
 0x72f   : > { %v11968_v7 = vadd.f32 %v11967_v41, %v11966_v24  ;;  %v12015_v46 = vadd.f32 %v12014_v44, %v12013_v35 }
 0x731   : > { %v10106_v29 = vadd.f32 %v12015_v46, %v11965_v27  ;;  %v11969_v34 = vpop.f32.mrb[154].mxu0 }
 0x732   : > { %v12016_v8 = vpop.f32.mrb[152].mxu1  ;;  %v11970_v1 = vpop.f32.mrb[155].mxu0 }
 0x733   : > { %v12017_v42 = vpop.f32.mrb[153].mxu1  ;;  %v11971_v36 = vadd.f32 %v11970_v1, %v11969_v34 }
 0x734   : > { %v12018_v50 = vadd.f32 %v12017_v42, %v12016_v8 }
 0x736   : > { %v10111_v13 = vadd.f32 %v12018_v50, %v11968_v7  ;;  %v12019_v17 = vpop.f32.mrb[154].mxu1 }
 0x737   : > { %v12020_v48 = vpop.f32.mrb[155].mxu1 }
 0x738   : > { %v12021_v10 = vadd.f32 %v12020_v48, %v12019_v17 }
 0x73a   : > { %v10116_v14 = vadd.f32 %v12021_v10, %v11971_v36 }
 0x73f   : > { %v12054_v21 = vpop.f32.mrb[156].mxu0 }
 0x740   : > { %v12055_v38 = vpop.f32.mrb[157].mxu0 }
 0x741   : > { %v12056_v37 = vadd.f32 %v12055_v38, %v12054_v21 }
 0x742   : > { %v12104_v9 = vpop.f32.mrb[156].mxu1 }
 0x743   : > { %v10186_v47 = vadd.f32 %v12056_v37, %v10091_v57  ;;  %v12057_v53 = vpop.f32.mrb[158].mxu0  ;;  %v12105_v12 = vpop.f32.mrb[157].mxu1  ;;  %v13472_v37 = vmov 0.0|0.0  }
 0x744   : > { %v12058_v26 = vpop.f32.mrb[159].mxu0  ;;  %v12106_v16 = vadd.f32 %v12105_v12, %v12104_v9  ;;  %13017 = vmatprep.subr.bf16.mxu0 %v13472_v37 }
 0x745   : > { %v12059_v45 = vadd.f32 %v12058_v26, %v12057_v53 }
 0x746   : > { %v10281_v62 = vadd.f32 %v12106_v16, %v10186_v47  ;;  %v12107_v59 = vpop.f32.mrb[158].mxu1 }
 0x747   : > { %v10191_v40 = vadd.f32 %v12059_v45, %v10096_v6  ;;  %v12060_v31 = vpop.f32.mrb[160].mxu0  ;;  %v12108_v5 = vpop.f32.mrb[159].mxu1 }
 0x748   : > { %v12061_v15 = vpop.f32.mrb[161].mxu0  ;;  %v12109_v28 = vadd.f32 %v12108_v5, %v12107_v59 }
 0x749   : > { %v12062_v52 = vadd.f32 %v12061_v15, %v12060_v31 }
 0x74a   : > { %v10286_v0 = vadd.f32 %v12109_v28, %v10191_v40 }
 0x74b   : > { %v10196_v30 = vadd.f32 %v12062_v52, %v10101_v23  ;;  %v12063_v51 = vpop.f32.mrb[162].mxu0 }
 0x74c   : > { %v12110_v63 = vpop.f32.mrb[160].mxu1  ;;  %v12064_v49 = vpop.f32.mrb[163].mxu0 }
 0x74d   : > { %v12111_v20 = vpop.f32.mrb[161].mxu1  ;;  %v12065_v54 = vadd.f32 %v12064_v49, %v12063_v51 }
 0x74e   : > { %v12112_v60 = vadd.f32 %v12111_v20, %v12110_v63 }
 0x74f   : > { %v10201_v18 = vadd.f32 %v12065_v54, %v10106_v29 }
 0x750   : > { %v10291_v55 = vadd.f32 %v12112_v60, %v10196_v30 }
 0x751   : > { %v12066_v43 = vpop.f32.mrb[164].mxu0  ;;  %v12113_v32 = vpop.f32.mrb[162].mxu1 }
 0x752   : > { %v12067_v22 = vpop.f32.mrb[165].mxu0  ;;  %v12114_v57 = vpop.f32.mrb[163].mxu1 }
 0x753   : > { %v12068_v33 = vadd.f32 %v12067_v22, %v12066_v43  ;;  %v12115_v56 = vadd.f32 %v12114_v57, %v12113_v32 }
 0x755   : > { %v10206_v11 = vadd.f32 %v12068_v33, %v10111_v13  ;;  %v10296_v25 = vadd.f32 %v12115_v56, %v10201_v18  ;;  %v12069_v4 = vpop.f32.mrb[166].mxu0  ;;  %v12116_v61 = vpop.f32.mrb[164].mxu1  ;;  %v13474_v33 = vmov 0.0  }
 0x756   : > { %v12070_v6 = vpop.f32.mrb[167].mxu0  ;;  %v12117_v2 = vpop.f32.mrb[165].mxu1  ;;  %12569 = vmatprep.mubr.msk.f32.mxu0 %vm13473_vm4, %v13474_v33 }
 0x757   : > { %v12071_v19 = vadd.f32 %v12070_v6, %v12069_v4  ;;  %v12118_v39 = vadd.f32 %v12117_v2, %v12116_v61 }
 0x759   : > { %v10211_v58 = vadd.f32 %v12071_v19, %v10116_v14  ;;  %v10301_v27 = vadd.f32 %v12118_v39, %v10206_v11  ;;  %v12119_v3 = vpop.f32.mrb[166].mxu1 }
 0x75a   : > { %v12120_v23 = vpop.f32.mrb[167].mxu1 }
 0x75b   : > { %v12121_v24 = vadd.f32 %v12120_v23, %v12119_v3 }
 0x75d   : > { %v10306_v35 = vadd.f32 %v12121_v24, %v10211_v58 }
 0x764   : > { %v12154_v41 = vpop.f32.mrb[168].mxu0 }
 0x765   : > { %v12155_v44 = vpop.f32.mrb[169].mxu0 }
 0x766   : > { %v12156_v7 = vadd.f32 %v12155_v44, %v12154_v41 }
 0x768   : > { %v10376_v46 = vadd.f32 %v12156_v7, %v10281_v62  ;;  %v12157_v29 = vpop.f32.mrb[170].mxu0 }
 0x769   : > { %v12204_v34 = vpop.f32.mrb[168].mxu1  ;;  %v12158_v8 = vpop.f32.mrb[171].mxu0 }
 0x76a   : > { %v12205_v1 = vpop.f32.mrb[169].mxu1  ;;  %v12159_v42 = vadd.f32 %v12158_v8, %v12157_v29 }
 0x76b   : > { %v12206_v36 = vadd.f32 %v12205_v1, %v12204_v34 }
 0x76c   : > { %v10381_v50 = vadd.f32 %v12159_v42, %v10286_v0  ;;  %v12160_v17 = vpop.f32.mrb[172].mxu0  ;;  %v20525_v42 = vld [vmem:[%s20696_s8] sm:$0xff] }
 0x76d   : > { %v10471_v13 = vadd.f32 %v12206_v36, %v10376_v46  ;;  %v12161_v10 = vpop.f32.mrb[173].mxu0  ;;  %v20530_v36 = vld [vmem:[%s20696_s8 + $0x8] sm:$0xff] }
 0x76e   : > { %v12207_v48 = vpop.f32.mrb[170].mxu1  ;;  %v12162_v21 = vadd.f32 %v12161_v10, %v12160_v17 }
 0x76f   : > { %v12208_v14 = vpop.f32.mrb[171].mxu1 }
 0x770   : > { %v12209_v38 = vadd.f32 %v12208_v14, %v12207_v48  ;;  %v10386_v47 = vadd.f32 %v12162_v21, %v10291_v55 }
 0x771   : > { %v12163_v9 = vpop.f32.mrb[174].mxu0 }
 0x772   : > { %v10476_v53 = vadd.f32 %v12209_v38, %v10381_v50  ;;  %v12210_v26 = vpop.f32.mrb[172].mxu1  ;;  %v12164_v12 = vpop.f32.mrb[175].mxu0  ;;  %v13475_v50 = vmov 40  }
 0x773   : > { %v12211_v45 = vpop.f32.mrb[173].mxu1  ;;  %v12165_v16 = vadd.f32 %v12164_v12, %v12163_v9  ;;  %13400 = vset.pattern.permute.xlu1 %v13475_v50  ;;  %13399 = vset.pattern.permute.xlu0 %v13475_v50 }
 0x774   : > { %v12212_v40 = vadd.f32 %v12211_v45, %v12210_v26  ;;  %11082 = vperm.xlu1 %13400, %v20530_v36   ;;  %11077 = vperm.xlu0 %13399, %v20525_v42   ;;  %v13476_v26 = vmov 41  }
 0x775   : > { %v10391_v62 = vadd.f32 %v12165_v16, %v10296_v25 }
 0x776   : > { %v10481_v31 = vadd.f32 %v12212_v40, %v10386_v47 }
 0x777   : > { %v12166_v59 = vpop.f32.mrb[176].mxu0 }
 0x778   : > { %v12213_v15 = vpop.f32.mrb[174].mxu1  ;;  %v12167_v5 = vpop.f32.mrb[177].mxu0  ;;  %13401 = vset.pattern.permute.xlu1 %v13476_v26  ;;  %13402 = vset.pattern.permute.xlu0 %v13476_v26 }
 0x779   : > { %v12214_v52 = vpop.f32.mrb[175].mxu1  ;;  %v12168_v28 = vadd.f32 %v12167_v5, %v12166_v59  ;;  %11211 = vperm.xlu1 %13401, %v20525_v42   ;;  %11215 = vperm.xlu0 %13402, %v20530_v36   ;;  %v20543_v5 = vld [vmem:[%s20696_s8 + $0x10] sm:$0xff] }
 0x77a   : > { %v12215_v30 = vadd.f32 %v12214_v52, %v12213_v15 }
 0x77b   : > { %v10396_v0 = vadd.f32 %v12168_v28, %v10301_v27  ;;  %v12169_v63 = vpop.f32.mrb[178].mxu0 }
 0x77c   : > { %v10486_v51 = vadd.f32 %v12215_v30, %v10391_v62  ;;  %v12216_v49 = vpop.f32.mrb[176].mxu1  ;;  %v12170_v20 = vpop.f32.mrb[179].mxu0 }
 0x77d   : > { %v12217_v54 = vpop.f32.mrb[177].mxu1  ;;  %v12171_v60 = vadd.f32 %v12170_v20, %v12169_v63  ;;  %13403 = vset.pattern.permute.xlu1 %v13475_v50  ;;  %11219 = vperm.xlu0 %13402, %v20543_v5   ;;  %v20551_v20 = vld [vmem:[%s20696_s8 + $0x18] sm:$0xff] }
 0x77e   : > { %v12218_v18 = vadd.f32 %v12217_v54, %v12216_v49  ;;  %11087 = vperm.xlu1 %13403, %v20543_v5   ;;  %v13477_v54 = vmov 48  }
 0x77f   : > { %v10401_v55 = vadd.f32 %v12171_v60, %v10306_v35 }
 0x780   : > { %v10491_v43 = vadd.f32 %v12218_v18, %v10396_v0  ;;  %v12219_v32 = vpop.f32.mrb[178].mxu1 }
 0x781   : > { %v12220_v22 = vpop.f32.mrb[179].mxu1  ;;  %13405 = vset.pattern.permute.xlu0 %v13477_v54 }
 0x782   : > { %v12221_v57 = vadd.f32 %v12220_v22, %v12219_v32  ;;  %11092 = vperm.xlu1 %13403, %v20551_v20   ;;  %11245 = vperm.xlu0 %13405, %v20525_v42   ;;  %v20560_v32 = vld [vmem:[%s20696_s8 + $0x20] sm:$0xff] }
 0x784   : > { %v10496_v56 = vadd.f32 %v12221_v57, %v10401_v55 }
 0x786   : > { %13404 = vset.pattern.permute.xlu1 %v13476_v26  ;;  %11253 = vperm.xlu0 %13405, %v20543_v5  }
 0x787   : > { %11223 = vperm.xlu1 %13404, %v20551_v20  }
 0x788   : > { %v12254_v11 = vpop.f32.mrb[180].mxu0 }
 0x789   : > { %v12255_v25 = vpop.f32.mrb[181].mxu0 }
 0x78a   : > { %v12256_v4 = vadd.f32 %v12255_v25, %v12254_v11  ;;  %13409 = vset.pattern.permute.xlu0 %v13476_v26 }
 0x78b   : > { %13406 = vset.pattern.permute.xlu1 %v13477_v54  ;;  %11227 = vperm.xlu0 %13409, %v20560_v32  }
 0x78c   : > { %v10566_v61 = vadd.f32 %v12256_v4, %v10471_v13  ;;  %v12257_v6 = vpop.f32.mrb[182].mxu0  ;;  %11249 = vperm.xlu1 %13406, %v20530_v36  }
 0x78d   : > { %v12304_v2 = vpop.f32.mrb[180].mxu1  ;;  %v12258_v19 = vpop.f32.mrb[183].mxu0 }
 0x78e   : > { %v12305_v39 = vpop.f32.mrb[181].mxu1  ;;  %v12259_v58 = vadd.f32 %v12258_v19, %v12257_v6 }
 0x78f   : > { %v12306_v27 = vadd.f32 %v12305_v39, %v12304_v2  ;;  %13410 = vset.pattern.permute.xlu0 %v13477_v54 }
 0x790   : > { %v10571_v3 = vadd.f32 %v12259_v58, %v10476_v53  ;;  %v12260_v24 = vpop.f32.mrb[184].mxu0  ;;  %13407 = vset.pattern.permute.xlu1 %v13475_v50 }
 0x791   : > { %v20518_v23 = vadd.f32 %v12306_v27, %v10566_v61  ;;  %v12307_v35 = vpop.f32.mrb[182].mxu1  ;;  %v12261_v41 = vpop.f32.mrb[185].mxu0  ;;  %11097 = vperm.xlu1 %13407, %v20560_v32  }
 0x792   : > { %v12308_v44 = vpop.f32.mrb[183].mxu1  ;;  %v12262_v7 = vadd.f32 %v12261_v41, %v12260_v24 }
 0x793   : > { %v12309_v46 = vadd.f32 %v12308_v44, %v12307_v35 }
 0x794   : > { %v10576_v29 = vadd.f32 %v12262_v7, %v10481_v31  ;;  %v12263_v8 = vpop.f32.mrb[186].mxu0 }
 0x795   : > { %v20520_v34 = vadd.f32 %v12309_v46, %v10571_v3  ;;  %v12310_v1 = vpop.f32.mrb[184].mxu1  ;;  %v12264_v13 = vpop.f32.mrb[187].mxu0  ;;  %13408 = vset.pattern.permute.xlu1 %v13477_v54 }
 0x796   : > { %v12311_v17 = vpop.f32.mrb[185].mxu1  ;;  %v12265_v48 = vadd.f32 %v12264_v13, %v12263_v8  ;;  %11257 = vperm.xlu1 %13408, %v20551_v20  }
 0x797   : > { %v12312_v10 = vadd.f32 %v12311_v17, %v12310_v1 }
 0x798   : > { %v10581_v14 = vadd.f32 %v12265_v48, %v10486_v51  ;;  %v12266_v38 = vpop.f32.mrb[188].mxu0 }
 0x799   : > { %v20536_v21 = vadd.f32 %v12312_v10, %v10576_v29  ;;  %v12313_v47 = vpop.f32.mrb[186].mxu1  ;;  %v12267_v53 = vpop.f32.mrb[189].mxu0 }
 0x79a   : > { %v12314_v9 = vpop.f32.mrb[187].mxu1  ;;  %v12268_v12 = vadd.f32 %v12267_v53, %v12266_v38  ;;  %11261 = vperm.xlu1 %13408, %v20560_v32  }
 0x79b   : > { %v12315_v45 = vadd.f32 %v12314_v9, %v12313_v47 }
 0x79c   : > { %v10586_v16 = vadd.f32 %v12268_v12, %v10491_v43  ;;  %v12269_v62 = vpop.f32.mrb[190].mxu0 }
 0x79d   : > { %v10676_v40 = vadd.f32 %v12315_v45, %v10581_v14  ;;  %v12316_v31 = vpop.f32.mrb[188].mxu1  ;;  %v12270_v59 = vpop.f32.mrb[191].mxu0 }
 0x79e   : > { %v12317_v15 = vpop.f32.mrb[189].mxu1  ;;  %v12271_v52 = vadd.f32 %v12270_v59, %v12269_v62 }
 0x79f   : > { %v12318_v28 = vadd.f32 %v12317_v15, %v12316_v31 }
 0x7a0   : > { %v10591_v30 = vadd.f32 %v12271_v52, %v10496_v56 }
 0x7a1   : > { %v10681_v0 = vadd.f32 %v12318_v28, %v10586_v16  ;;  %v12319_v51 = vpop.f32.mrb[190].mxu1  ;;  %v20586_v28 = vld [vmem:[%s20696_s8 + $0x40] sm:$0x3f] }
 0x7a2   : > { %v12320_v63 = vpop.f32.mrb[191].mxu1 }
 0x7a3   : > { %v12321_v49 = vadd.f32 %v12320_v63, %v12319_v51  ;;  %v20598_v51 = vld [vmem:[%s20696_s8 + $0x60] sm:$0xff]  ;;  %v20604_v63 = vld [vmem:[%s20696_s8 + $0x70] sm:$0x3f] }
 0x7a5   : > { %v10686_v60 = vadd.f32 %v12321_v49, %v10591_v30 }
 0x7a9   : > { %v12354_v18 = vpop.f32.mrb[192].mxu0 }
 0x7aa   : > { %v12355_v55 = vpop.f32.mrb[193].mxu0 }
 0x7ab   : > { %v12356_v43 = vadd.f32 %v12355_v55, %v12354_v18 }
 0x7ad   : > { %v10756_v22 = vadd.f32 %v12356_v43, %v20518_v23  ;;  %v12357_v57 = vpop.f32.mrb[194].mxu0 }
 0x7ae   : > { %v12404_v56 = vpop.f32.mrb[192].mxu1  ;;  %v12358_v11 = vpop.f32.mrb[195].mxu0 }
 0x7af   : > { %v12405_v25 = vpop.f32.mrb[193].mxu1  ;;  %v12359_v4 = vadd.f32 %v12358_v11, %v12357_v57 }
 0x7b0   : > { %v12406_v61 = vadd.f32 %v12405_v25, %v12404_v56 }
 0x7b1   : > { %v10761_v6 = vadd.f32 %v12359_v4, %v20520_v34  ;;  %v12360_v19 = vpop.f32.mrb[196].mxu0 }
 0x7b2   : > { %v10851_v2 = vadd.f32 %v12406_v61, %v10756_v22  ;;  %v12407_v39 = vpop.f32.mrb[194].mxu1  ;;  %v12361_v58 = vpop.f32.mrb[197].mxu0 }
 0x7b3   : > { %v12408_v27 = vpop.f32.mrb[195].mxu1  ;;  %v12362_v3 = vadd.f32 %v12361_v58, %v12360_v19 }
 0x7b4   : > { %v12409_v23 = vadd.f32 %v12408_v27, %v12407_v39 }
 0x7b5   : > { %v10766_v24 = vadd.f32 %v12362_v3, %v20536_v21  ;;  %v12363_v41 = vpop.f32.mrb[198].mxu0  ;;  %v20574_v21 = vld [vmem:[%s20696_s8 + $0x28] sm:$0xff] }
 0x7b6   : > { %v10856_v35 = vadd.f32 %v12409_v23, %v10761_v6  ;;  %v12410_v44 = vpop.f32.mrb[196].mxu1  ;;  %v12364_v7 = vpop.f32.mrb[199].mxu0  ;;  %11290 = vperm.xlu1 %13408, %v20574_v21   ;;  %12594 = vmatprep.mubr.msk.f32.mxu1 %vm11308_vm6, %v20574_v21 }
 0x7b7   : > { %v12411_v46 = vpop.f32.mrb[197].mxu1  ;;  %v12365_v29 = vadd.f32 %v12364_v7, %v12363_v41 }
 0x7b8   : > { %v12412_v34 = vadd.f32 %v12411_v46, %v12410_v44 }
 0x7b9   : > { %v10771_v8 = vadd.f32 %v12365_v29, %v10676_v40  ;;  %v12366_v50 = vpop.f32.mrb[200].mxu0  ;;  %v20580_v40 = vld [vmem:[%s20696_s8 + $0x38] sm:$0xff] }
 0x7ba   : > { %v10861_v1 = vadd.f32 %v12412_v34, %v10766_v24  ;;  %v12413_v13 = vpop.f32.mrb[198].mxu1  ;;  %v12367_v17 = vpop.f32.mrb[201].mxu0  ;;  %11300 = vperm.xlu1 %13408, %v20580_v40  }
 0x7bb   : > { %v12414_v48 = vpop.f32.mrb[199].mxu1  ;;  %v12368_v10 = vadd.f32 %v12367_v17, %v12366_v50 }
 0x7bc   : > { %v12415_v14 = vadd.f32 %v12414_v48, %v12413_v13 }
 0x7bd   : > { %v10776_v38 = vadd.f32 %v12368_v10, %v10681_v0  ;;  %v12369_v53 = vpop.f32.mrb[202].mxu0  ;;  %v20592_v0 = vld [vmem:[%s20696_s8 + $0x50] sm:$0xff] }
 0x7be   : > { %v10866_v47 = vadd.f32 %v12415_v14, %v10771_v8  ;;  %v12416_v9 = vpop.f32.mrb[200].mxu1  ;;  %v12370_v26 = vpop.f32.mrb[203].mxu0  ;;  %11305 = vperm.xlu1 %13408, %v20586_v28  }
 0x7bf   : > { %v12417_v12 = vpop.f32.mrb[201].mxu1  ;;  %v12371_v45 = vadd.f32 %v12370_v26, %v12369_v53 }
 0x7c0   : > { %v12418_v16 = vadd.f32 %v12417_v12, %v12416_v9 }
 0x7c1   : > { %v10781_v62 = vadd.f32 %v12371_v45, %v10686_v60 }
 0x7c2   : > { %v10871_v31 = vadd.f32 %v12418_v16, %v10776_v38  ;;  %v12419_v59 = vpop.f32.mrb[202].mxu1  ;;  %11424 = vperm.xlu1 %13408, %v20592_v0  }
 0x7c3   : > { %v12420_v15 = vpop.f32.mrb[203].mxu1 }
 0x7c4   : > { %v12421_v52 = vadd.f32 %v12420_v15, %v12419_v59 }
 0x7c6   : > { %v10876_v30 = vadd.f32 %v12421_v52, %v10781_v62  ;;  %11536 = vperm.xlu1 %13408, %v20598_v51  }
 0x7ca   : > { %11637 = vperm.xlu1 %13408, %v20604_v63  }
 0x7d7   : > { %v12454_v49 = vpop.f32.mrb[204].mxu0 }
 0x7d8   : > { %v12455_v54 = vpop.f32.mrb[205].mxu0 }
 0x7d9   : > { %v12456_v60 = vadd.f32 %v12455_v54, %v12454_v49 }
 0x7db   : > { %v10946_v18 = vadd.f32 %v12456_v60, %v10851_v2  ;;  %v12457_v55 = vpop.f32.mrb[206].mxu0  ;;  %v12504_v43 = vpop.f32.mrb[204].mxu1 }
 0x7dc   : > { %v12458_v22 = vpop.f32.mrb[207].mxu0  ;;  %v12505_v57 = vpop.f32.mrb[205].mxu1 }
 0x7dd   : > { %v12459_v56 = vadd.f32 %v12458_v22, %v12457_v55  ;;  %v12506_v11 = vadd.f32 %v12505_v57, %v12504_v43  ;;  %v11069_v55 = vld [vmem:[%s343_s19] sm:$0x3] }
 0x7de   : > { %v21279_v57 = vld [vmem:[#allocation12_spill] sm:$0xff] }
 0x7df   : > { %v10951_v25 = vadd.f32 %v12459_v56, %v10856_v35  ;;  %v11041_v4 = vadd.f32 %v12506_v11, %v10946_v18  ;;  %v12460_v61 = vpop.f32.mrb[208].mxu0  ;;  %v12507_v6 = vpop.f32.mrb[206].mxu1  ;;  %v11103_v56 = vrot.slane %v11069_v55, %v21279_v57  ;;  %v21280_v11 = vld [vmem:[#allocation13_spill] sm:$0xff] }
 0x7e0   : > { %v12461_v19 = vpop.f32.mrb[209].mxu0  ;;  %v12508_v39 = vpop.f32.mrb[207].mxu1 }
 0x7e1   : > { %v12462_v58 = vadd.f32 %v12461_v19, %v12460_v61  ;;  %v12509_v27 = vadd.f32 %v12508_v39, %v12507_v6 }
 0x7e3   : > { %v10956_v3 = vadd.f32 %v12462_v58, %v10861_v1  ;;  %v11046_v23 = vadd.f32 %v12509_v27, %v10951_v25  ;;  %v12463_v24 = vpop.f32.mrb[210].mxu0  ;;  %v12510_v41 = vpop.f32.mrb[208].mxu1  ;;  %v11233_v25 = vrot.slane %v11069_v55, %v21280_v11 }
 0x7e4   : > { %v12464_v44 = vpop.f32.mrb[211].mxu0  ;;  %v12511_v2 = vpop.f32.mrb[209].mxu1 }
 0x7e5   : > { %v13018_v7 = vpack.c.bf16 %v11046_v23, %v11041_v4  ;;  %v12465_v46 = vadd.f32 %v12464_v44, %v12463_v24  ;;  %v12512_v29 = vadd.f32 %v12511_v2, %v12510_v41 }
 0x7e7   : > { %v10961_v34 = vadd.f32 %v12465_v46, %v10866_v47  ;;  %v11051_v8 = vadd.f32 %v12512_v29, %v10956_v3  ;;  %v12466_v50 = vpop.f32.mrb[212].mxu0  ;;  %v12513_v35 = vpop.f32.mrb[210].mxu1  ;;  %13019 = vmatpush3.bf16.msra.mxu0 %v13018_v7 }
 0x7e8   : > { %v12467_v13 = vpop.f32.mrb[213].mxu0  ;;  %v12514_v17 = vpop.f32.mrb[211].mxu1  ;;  %13020 = vmatprep.subr.bf16.mxu0 %v13472_v37 }
 0x7e9   : > { %v12468_v48 = vadd.f32 %v12467_v13, %v12466_v50  ;;  %v12515_v10 = vadd.f32 %v12514_v17, %v12513_v35 }
 0x7eb   : > { %v10966_v1 = vadd.f32 %v12468_v48, %v10871_v31  ;;  %v11056_v14 = vadd.f32 %v12515_v10, %v10961_v34  ;;  %v12469_v38 = vpop.f32.mrb[214].mxu0  ;;  %v12516_v53 = vpop.f32.mrb[212].mxu1 }
 0x7ec   : > { %v12470_v9 = vpop.f32.mrb[215].mxu0  ;;  %v12517_v26 = vpop.f32.mrb[213].mxu1 }
 0x7ed   : > { %v13021_v12 = vpack.c.bf16 %v11056_v14, %v11051_v8  ;;  %v12471_v45 = vadd.f32 %v12470_v9, %v12469_v38  ;;  %v12518_v16 = vadd.f32 %v12517_v26, %v12516_v53 }
 0x7ef   : > { %v10971_v47 = vadd.f32 %v12471_v45, %v10876_v30  ;;  %v11061_v62 = vadd.f32 %v12518_v16, %v10966_v1  ;;  %v12519_v59 = vpop.f32.mrb[214].mxu1  ;;  %13022 = vmatpush3.bf16.msra.mxu0 %v13021_v12 }
 0x7f0   : > { %v12520_v15 = vpop.f32.mrb[215].mxu1  ;;  %13023 = vmatprep.subr.bf16.mxu0 %v13472_v37 }
 0x7f1   : > { %v12521_v52 = vadd.f32 %v12520_v15, %v12519_v59 }
 0x7f3   : > { %v11066_v49 = vadd.f32 %v12521_v52, %v10971_v47  ;;  %v11078_v30 = vpop.permute.xlu0 %11077 }
 0x7f4   : > { %v11104_v4 = vmul.f32 %v11103_v56, %v11078_v30 }
 0x7f5   : > { %v13024_v54 = vpack.c.bf16 %v11066_v49, %v11061_v62 }
 0x7f7   : > { %13025 = vmatpush3.bf16.msra.mxu0 %v13024_v54 }
 0x7f8   : > { %v11216_v18 = vpop.permute.xlu0 %11215 }
 0x7f9   : > { %v11235_v41 = vmul.f32 %v11233_v25, %v11216_v18 }
 0x7fa   : > { %12570 = vmatmul.mubr.msk.f32.vlgmr.msra.gmra.mrb[216].mxu0 %vm11109_vm5, %v20525_v42  ;;  %v20625_v42 = vld [vmem:[%s20696_s8 + $0x30] sm:$0xff] }
 0x7fb   : > { %12572 = vmatprep.mubr.msk.f32.mxu0 %vm13473_vm4, %v13474_v33  ;;  %11295 = vperm.xlu0 %13410, %v20625_v42  }
 0x7fc   : > { %v11220_v22 = vpop.permute.xlu0 %11219 }
 0x7fd   : > { %v11236_v35 = vmul.f32 %v11233_v25, %v11220_v22 }
 0x7fe   : > { %12573 = vmatmul.mubr.msk.f32.gmra.mrb[218].mxu0 %vm11109_vm5, %v20530_v36  ;;  %v20633_v36 = vld [vmem:[%s20696_s8 + $0x48] sm:$0xff] }
 0x7ff   : > { %12575 = vmatprep.mubr.msk.f32.mxu0 %vm13473_vm4, %v13474_v33  ;;  %11419 = vperm.xlu0 %13410, %v20633_v36  }
 0x801   : > { %v11246_v27 = vpop.permute.xlu0 %11245 }
 0x802   : > { %12576 = vmatmul.mubr.msk.f32.gmra.mrb[220].mxu0 %vm11109_vm5, %v20543_v5  ;;  %v20639_v5 = vld [vmem:[%s20696_s8 + $0x58] sm:$0xf] }
 0x803   : > { %12578 = vmatprep.mubr.msk.f32.mxu0 %vm13473_vm4, %v13474_v33  ;;  %11429 = vperm.xlu0 %13410, %v20639_v5  }
 0x805   : > { %v11254_v50 = vpop.permute.xlu0 %11253 }
 0x806   : > { %12579 = vmatmul.mubr.msk.f32.gmra.mrb[222].mxu0 %vm11109_vm5, %v20551_v20  ;;  %v20645_v20 = vld [vmem:[%s20696_s8 + $0x68] sm:$0x3] }
 0x807   : > { %12581 = vmatprep.mubr.msk.f32.mxu0 %vm13473_vm4, %v13474_v33  ;;  %11541 = vperm.xlu0 %13410, %v20645_v20  }
 0x80a   : > { %12582 = vmatmul.mubr.msk.f32.gmra.mrb[224].mxu0 %vm11109_vm5, %v20560_v32  ;;  %v11083_v32 = vpop.permute.xlu1 %11082  ;;  %v11228_v26 = vpop.permute.xlu0 %11227  ;;  %vm11544_vm5 = vcmask 162816  }
 0x80b   : > { %v11105_v3 = vmul.f32 %v11103_v56, %v11083_v32  ;;  %v11238_v54 = vmul.f32 %v11233_v25, %v11228_v26  ;;  %12623 = vmatprep.mubr.msk.f32.mxu0 %vm11544_vm5, %v20598_v51 }
 0x80e   : > { %v11212_v21 = vpop.permute.xlu1 %11211 }
 0x80f   : > { %v11234_v6 = vmul.f32 %v11233_v25, %v11212_v21 }
 0x812   : > { %v11088_v31 = vpop.permute.xlu1 %11087 }
 0x813   : > { %v11106_v46 = vmul.f32 %v11103_v56, %v11088_v31 }
 0x816   : > { %v11093_v60 = vpop.permute.xlu1 %11092 }
 0x817   : > { %v11107_v1 = vmul.f32 %v11103_v56, %v11093_v60 }
 0x81a   : > { %v11224_v43 = vpop.permute.xlu1 %11223 }
 0x81b   : > { %v11237_v53 = vmul.f32 %v11233_v25, %v11224_v43 }
 0x81e   : > { %v11250_v19 = vpop.permute.xlu1 %11249 }
 0x822   : > { %v11098_v29 = vpop.permute.xlu1 %11097 }
 0x823   : > { %v11108_v52 = vmul.f32 %v11103_v56, %v11098_v29 }
 0x826   : > { %v11258_v59 = vpop.permute.xlu1 %11257 }
 0x82a   : > { %v11262_v43 = vpop.permute.xlu1 %11261 }
 0x8cd   : > { %v11186_v61 = vpop.f32.mrb[216].mxu0 }
 0x8ce   : > { %v11187_v39 = vadd.f32 %v11186_v61, %v11104_v4  ;;  %v12571_v58 = vpop.f32.mrb[217].mxu0  ;;  %v11291_v61 = vpop.permute.xlu1 %11290 }
 0x8d0   : > { %v11239_v23 = vadd.f32 %v11234_v6, %v11187_v39 }
 0x8d1   : > { %v11191_v24 = vpop.f32.mrb[218].mxu0 }
 0x8d2   : > { %v11264_v44 = vadd.f32 %v11246_v27, %v11239_v23  ;;  %v11192_v2 = vadd.f32 %v11191_v24, %v11105_v3  ;;  %v12574_v7 = vpop.f32.mrb[219].mxu0  ;;  %v11301_v6 = vpop.permute.xlu1 %11300 }
 0x8d4   : > { %v11240_v34 = vadd.f32 %v11235_v41, %v11192_v2  ;;  %v11274_v13 = vmul.f32 0.2, %v11264_v44  ;;  %vm11269_vm7 = vcmp.ge.f32.partialorder %v11264_v44, 0.0 }
 0x8d5   : > { %v11196_v8 = vpop.f32.mrb[220].mxu0 }
 0x8d6   : > { %v11265_v17 = vadd.f32 %v11250_v19, %v11240_v34  ;;  %v11197_v48 = vadd.f32 %v11196_v8, %v11106_v46  ;;  %v12577_v10 = vpop.f32.mrb[221].mxu0  ;;  %v11279_v47 = vsel %vm11269_vm7, %v11264_v44, %v11274_v13  ;;  %v11296_v19 = vpop.permute.xlu0 %11295 }
 0x8d7   : > { %v11306_v23 = vpop.permute.xlu1 %11305 }
 0x8d8   : > { %v11275_v14 = vmul.f32 0.2, %v11265_v17  ;;  %v11241_v38 = vadd.f32 %v11236_v35, %v11197_v48  ;;  %vm11270_vm8 = vcmp.ge.f32.partialorder %v11265_v17, 0.0 }
 0x8d9   : > { %v11201_v9 = vpop.f32.mrb[222].mxu0 }
 0x8da   : > { %v11266_v12 = vadd.f32 %v11254_v50, %v11241_v38  ;;  %v11202_v45 = vadd.f32 %v11201_v9, %v11107_v1  ;;  %v12580_v16 = vpop.f32.mrb[223].mxu0  ;;  %v11280_v62 = vsel %vm11270_vm8, %v11265_v17, %v11275_v14  ;;  %vm11549_vm8 = vcmask 1043456  }
 0x8db   : > { %v13026_v15 = vpack.c.bf16 %v11280_v62, %v11279_v47  ;;  %v11425_v48 = vpop.permute.xlu1 %11424 }
 0x8dc   : > { %v11242_v49 = vadd.f32 %v11237_v53, %v11202_v45  ;;  %v11276_v21 = vmul.f32 0.2, %v11266_v12  ;;  %vm11271_vm9 = vcmp.ge.f32.partialorder %v11266_v12, 0.0 }
 0x8dd   : > { %v11206_v32 = vpop.f32.mrb[224].mxu0  ;;  %13027 = vmatprep.subr.bf16.mxu1 %v13026_v15 }
 0x8de   : > { %v11267_v31 = vadd.f32 %v11258_v59, %v11242_v49  ;;  %v11207_v30 = vadd.f32 %v11206_v32, %v11108_v52  ;;  %13029 = vmatpush3.bf16.msra.mxu1 %v13026_v15  ;;  %v12583_v60 = vpop.f32.mrb[225].mxu0  ;;  %v11281_v57 = vsel %vm11271_vm9, %v11266_v12, %v11276_v21 }
 0x8df   : > { %v11537_v59 = vpop.permute.xlu1 %11536 }
 0x8e0   : > { %v11277_v18 = vmul.f32 0.2, %v11267_v31  ;;  %v11243_v55 = vadd.f32 %v11238_v54, %v11207_v30  ;;  %vm11272_vm10 = vcmp.ge.f32.partialorder %v11267_v31, 0.0 }
 0x8e2   : > { %v11268_v22 = vadd.f32 %v11262_v43, %v11243_v55  ;;  %v11282_v11 = vsel %vm11272_vm10, %v11267_v31, %v11277_v18  ;;  %vm11643_vm10 = vcmask 1041408  }
 0x8e3   : > { %v13030_v4 = vpack.c.bf16 %v11282_v11, %v11281_v57 }
 0x8e4   : > { %vm11273_vm11 = vcmp.ge.f32.partialorder %v11268_v22, 0.0  ;;  %v11278_v56 = vmul.f32 0.2, %v11268_v22 }
 0x8e5   : > { %13031 = vmatprep.subr.bf16.mxu1 %v13030_v4 }
 0x8e6   : > { %13033 = vmatpush3.bf16.msra.mxu1 %v13030_v4  ;;  %v11283_v25 = vsel %vm11273_vm11, %v11268_v22, %v11278_v56 }
 0x8e7   : > { %12592 = vmatprep.subr.mxu1 %v11283_v25 }
 0x8ea   : > { %12593 = vmatpush3.msra.mxu1 %v11283_v25 }
 0x8eb   : > { %12595 = vmatmul.mubr.msk.f32.vlgmr.msra.gmra.mrb[216].mxu1 %vm11308_vm6, %v20625_v42  ;;  %13034 = vmatprep.subr.bf16.mxu1 %v13472_v37 }
 0x8ec   : > { %12597 = vmatprep.mubr.msk.f32.mxu1 %vm11308_vm6, %v20580_v40 }
 0x8ef   : > { %12598 = vmatmul.mubr.msk.f32.gmra.mrb[218].mxu1 %vm11308_vm6, %v20586_v28 }
 0x8f0   : > { %12608 = vmatprep.mubr.msk.f32.mxu1 %vm13473_vm4, %v13474_v33 }
 0x9be   : > { %v12596_v39 = vpop.f32.mrb[216].mxu1 }
 0x9bf   : > { %v11389_v58 = vadd.f32 %v12596_v39, %v11296_v19  ;;  %v11383_v27 = vpop.f32.mrb[217].mxu1 }
 0x9c0   : > { %v11384_v3 = vadd.f32 %v11383_v27, %v11291_v61 }
 0x9c1   : > { %vm11403_vm0 = vcmp.ge.f32.partialorder %v11389_v58, 0.0  ;;  %v11407_v42 = vmul.f32 0.2, %v11389_v58 }
 0x9c2   : > { %vm11402_vm12 = vcmp.ge.f32.partialorder %v11384_v3, 0.0  ;;  %v11406_v24 = vmul.f32 0.2, %v11384_v3  ;;  %v12599_v41 = vpop.f32.mrb[218].mxu1 }
 0x9c3   : > { %v11411_v40 = vsel %vm11403_vm0, %v11389_v58, %v11407_v42  ;;  %v11399_v44 = vadd.f32 %v12599_v41, %v11306_v23  ;;  %v11393_v2 = vpop.f32.mrb[219].mxu1  ;;  %vm13047_vm0 = vmpackc.low %vm11643_vm10, %vm13478_vm1 }
 0x9c4   : > { %v11410_v28 = vsel %vm11402_vm12, %v11384_v3, %v11406_v24  ;;  %v11394_v7 = vadd.f32 %v11393_v2, %v11301_v6  ;;  %vm11640_vm12 = vcmask 80896  }
 0x9c5   : > { %v13035_v46 = vpack.c.bf16 %v11411_v40, %v11410_v28  ;;  %vm11405_vm14 = vcmp.ge.f32.partialorder %v11399_v44, 0.0  ;;  %v11409_v29 = vmul.f32 0.2, %v11399_v44 }
 0x9c6   : > { %vm11404_vm15 = vcmp.ge.f32.partialorder %v11394_v7, 0.0  ;;  %v11408_v34 = vmul.f32 0.2, %v11394_v7 }
 0x9c7   : > { %v11413_v8 = vsel %vm11405_vm14, %v11399_v44, %v11409_v29  ;;  %13036 = vmatpush3.bf16.msra.mxu1 %v13035_v46 }
 0x9c8   : > { %v11412_v50 = vsel %vm11404_vm15, %v11394_v7, %v11408_v34  ;;  %13037 = vmatprep.subr.bf16.mxu1 %v13472_v37 }
 0x9c9   : > { %v13038_v35 = vpack.c.bf16 %v11413_v8, %v11412_v50 }
 0x9cb   : > { %13040 = vmatpush3.bf16.msk.msra.mxu1 %vm13039_vm2, %v13038_v35 }
 0x9cc   : > { %13045 = vmatprep.subr.bf16.mxu1 %v13472_v37  ;;  %v11420_v37 = vpop.permute.xlu0 %11419 }
 0x9ce   : > { %12609 = vmatmul.mubr.msk.f32.vlgmr.msra.gmra.mrb[220].mxu1 %vm11432_vm3, %v20633_v36 }
 0x9cf   : > { %12611 = vmatprep.mubr.msk.f32.mxu1 %vm13473_vm4, %v13474_v33 }
 0x9d2   : > { %12612 = vmatmul.mubr.msk.f32.gmra.mrb[222].mxu1 %vm11432_vm3, %v20592_v0 }
 0x9d3   : > { %12614 = vmatprep.mubr.msk.f32.mxu1 %vm13473_vm4, %v13474_v33 }
 0x9d6   : > { %12615 = vmatmul.mubr.msk.f32.gmra.mrb[224].mxu1 %vm11432_vm3, %v20639_v5  ;;  %v11430_v5 = vpop.permute.xlu0 %11429 }
 0x9d7   : > { %12630 = vmatprep.mubr.msk.f32.mxu1 %vm13473_vm4, %v13474_v33 }
 0x9da   : > { %v11542_v47 = vpop.permute.xlu0 %11541 }
 0xaa1   : > { %v11509_v13 = vpop.f32.mrb[220].mxu1 }
 0xaa2   : > { %v11510_v36 = vadd.f32 %v11509_v13, %v11420_v37  ;;  %v12610_v17 = vpop.f32.mrb[221].mxu1 }
 0xaa4   : > { %v11526_v1 = vmul.f32 0.2, %v11510_v36  ;;  %vm11523_vm6 = vcmp.ge.f32.partialorder %v11510_v36, 0.0 }
 0xaa5   : > { %v11514_v10 = vpop.f32.mrb[222].mxu1 }
 0xaa6   : > { %v11515_v0 = vadd.f32 %v11514_v10, %v11425_v48  ;;  %v12613_v14 = vpop.f32.mrb[223].mxu1  ;;  %v11529_v33 = vsel %vm11523_vm6, %v11510_v36, %v11526_v1 }
 0xaa8   : > { %vm11524_vm7 = vcmp.ge.f32.partialorder %v11515_v0, 0.0  ;;  %v11527_v38 = vmul.f32 0.2, %v11515_v0 }
 0xaa9   : > { %v11519_v53 = vpop.f32.mrb[224].mxu1 }
 0xaaa   : > { %v11520_v9 = vadd.f32 %v11519_v53, %v11430_v5  ;;  %v11530_v26 = vsel %vm11524_vm7, %v11515_v0, %v11527_v38  ;;  %v12616_v12 = vpop.f32.mrb[225].mxu1 }
 0xaab   : > { %v13041_v45 = vpack.c.bf16 %v11530_v26, %v11529_v33 }
 0xaac   : > { %vm11525_vm4 = vcmp.ge.f32.partialorder %v11520_v9, 0.0  ;;  %v11528_v51 = vmul.f32 0.2, %v11520_v9 }
 0xaad   : > { %13042 = vmatprep.subr.bf16.mxu0 %v13041_v45 }
 0xaae   : > { %13044 = vmatpush3.bf16.msra.mxu0 %v13041_v45  ;;  %v11531_v16 = vsel %vm11525_vm4, %v11520_v9, %v11528_v51 }
 0xaaf   : > { %12621 = vmatprep.subr.msk.mxu0 %vm11549_vm8, %v11531_v16 }
 0xab2   : > { %12622 = vmatpush3.msk.msra.mxu0 %vm11549_vm8, %v11531_v16 }
 0xab3   : > { %12624 = vmatmul.mubr.msk.f32.vlgmr.msra.gmra.mrb[226].mxu0 %vm11544_vm5, %v20645_v20  ;;  %v11638_v20 = vpop.permute.xlu1 %11637 }
 0xb86   : > { %v12625_v62 = vpop.f32.mrb[226].mxu0 }
 0xb87   : > { %v11625_v15 = vadd.f32 %v12625_v62, %v11542_v47  ;;  %v11619_v52 = vpop.f32.mrb[227].mxu0 }
 0xb88   : > { %v11620_v49 = vadd.f32 %v11619_v52, %v11537_v59 }
 0xb89   : > { %vm11629_vm9 = vcmp.ge.f32.partialorder %v11625_v15, 0.0  ;;  %v11631_v54 = vmul.f32 0.2, %v11625_v15 }
 0xb8a   : > { %vm11628_vm11 = vcmp.ge.f32.partialorder %v11620_v49, 0.0  ;;  %v11630_v32 = vmul.f32 0.2, %v11620_v49 }
 0xb8b   : > { %v11633_v21 = vsel %vm11629_vm9, %v11625_v15, %v11631_v54 }
 0xb8c   : > { %v11632_v31 = vsel %vm11628_vm11, %v11620_v49, %v11630_v32 }
 0xb8d   : > { %v13046_v30 = vpack.c.bf16 %v11633_v21, %v11632_v31 }
 0xb8f   : > { %13048 = vmatpush3.bf16.msk.msra.mxu1 %vm13047_vm0, %v13046_v30 }
 0xb92   : > { %12631 = vmatmul.mubr.msk.f32.vlgmr.msra.gmra.mrb[226].mxu1 %vm11640_vm12, %v20604_v63 }
 0xc65   : > { %v11713_v60 = vpop.f32.mrb[226].mxu1 }
 0xc66   : > { %v11714_v18 = vadd.f32 %v11713_v60, %v11638_v20  ;;  %v12632_v55 = vpop.f32.mrb[227].mxu1 }
 0xc68   : > { %11718 = vst.msk [vmem:[%s347_s15] sm:$0x3f] %vm11717_vm13, %v11714_v18 }
 0xc69 PF: > { %s19_s30 = sadd.s32 1, %s13459_s30  }
 0xc6a   : > { %p16_p4 = scmp.ge.s32.totalorder %s19_s30, 4  }
 0xc6c   :  { %18 = sbr.rel (!%p16_p4) target bundleno = 1 (0x1), region = 89 }

</bundles_post_ra>
